<compile_context>
chip_gen: v5e
topology: v5e:2x2
jax: 0.10.0
libtpu: 0.0.40
codegen_flags: <defaults>
</compile_context>

<pallas_src>
import functools
import math

import jax
import jax.numpy as jnp
from jax.experimental import pallas as pl
from jax.experimental.pallas import tpu as pltpu

NHEAD = 4
# MXU operand dtype (accumulation stays f32).  bf16 is MXU-native on v5e/v6e/v7x.
MXU_DTYPE = jnp.bfloat16


# --------------------------- in-kernel helpers ------------------------------


def _mm(a, b):
    # [M, K] @ [K, N] -> [M, N], f32 accumulation on the MXU.
    return jnp.dot(a.astype(MXU_DTYPE), b.astype(MXU_DTYPE),
                   preferred_element_type=jnp.float32)


def _mm_nt(a, b):
    # [M, K] x [N, K]^T -> [M, N] without an explicit in-kernel transpose.
    return jax.lax.dot_general(
        a.astype(MXU_DTYPE), b.astype(MXU_DTYPE),
        dimension_numbers=(((1,), (1,)), ((), ())),
        preferred_element_type=jnp.float32)


def _linear(x, pr, act=None):
    # pr: {"w": ref-view [K, N], "b": ref-view [1, N]}
    y = _mm(x, pr["w"][...]) + pr["b"][...]
    if act == "relu":
        y = jnp.maximum(y, 0.0)
    return y


def _layernorm(x, pr):
    # Residual adds are done by the caller as `_layernorm(x + res, pr)` so the
    # add is fused into this (VPU) computation.  All math in f32.
    mu = jnp.mean(x, axis=-1, keepdims=True)
    var = jnp.mean(jnp.square(x - mu), axis=-1, keepdims=True)
    return (x - mu) * jax.lax.rsqrt(var + 1e-5) * pr["g"][...] + pr["b"][...]


def _mha_core(q, k, v, bias, dh, scale):
    # q: [Lq, D], k/v: [Lk, D], bias: [1, Lk] additive key-padding bias or None.
    # Static loop over heads; softmax in f32.
    # Scale q once ([Lq, D]) instead of scaling every per-head score tile.
    q = q * scale
    outs = []
    for h in range(NHEAD):
        sl = slice(h * dh, (h + 1) * dh)
        s = _mm_nt(q[:, sl], k[:, sl])                       # [Lq, Lk]
        if bias is not None:
            s = s + bias
        s = s - jnp.max(s, axis=-1, keepdims=True)
        p = jnp.exp(s)
        p = p * pl.reciprocal(jnp.sum(p, axis=-1, keepdims=True), approx=True)
        outs.append(_mm(p, v[:, sl]))                        # [Lq, dh]
    return jnp.concatenate(outs, axis=-1)                    # [Lq, D]


def _self_attn_block(x_qk_in, x_v_in, pa, bias, dh, scale):
    # Q and K share the same input (x + pos), so their projections are fused
    # into a single [D, 2D] matmul; V is projected from x (no pos), DETR-style.
    qk = _mm(x_qk_in, pa["w_qk"][...]) + pa["b_qk"][...]
    d = x_v_in.shape[-1]
    q, k = qk[:, :d], qk[:, d:]
    v = _mm(x_v_in, pa["w_v"][...]) + pa["b_v"][...]
    ctx = _mha_core(q, k, v, bias, dh, scale)
    return _mm(ctx, pa["w_o"][...]) + pa["b_o"][...]


def _cross_attn_block(q_in, k_in, v_in, pa, bias, dh, scale):
    q = _mm(q_in, pa["w_q"][...]) + pa["b_q"][...]
    k = _mm(k_in, pa["w_k"][...]) + pa["b_k"][...]
    v = _mm(v_in, pa["w_v"][...]) + pa["b_v"][...]
    ctx = _mha_core(q, k, v, bias, dh, scale)
    return _mm(ctx, pa["w_o"][...]) + pa["b_o"][...]


def _encoder_layer(src, pos, bias, lp, dh, scale):
    a = _self_attn_block(src + pos, src, lp["self_attn"], bias, dh, scale)
    src = _layernorm(src + a, lp["norm1"])
    f = _linear(_linear(src, lp["lin1"], act="relu"), lp["lin2"])
    return _layernorm(src + f, lp["norm2"])


def _decoder_layer(tgt, memory, mem_k_in, qpos, mem_bias, lp, dh, scale):
    a = _self_attn_block(tgt + qpos, tgt, lp["self_attn"], None, dh, scale)
    tgt = _layernorm(tgt + a, lp["norm1"])
    a = _cross_attn_block(tgt + qpos, mem_k_in, memory, lp["cross_attn"],
                          mem_bias, dh, scale)
    tgt = _layernorm(tgt + a, lp["norm2"])
    f = _linear(_linear(tgt, lp["lin1"], act="relu"), lp["lin2"])
    return _layernorm(tgt + f, lp["norm3"])


# ------------------------------ fused kernel --------------------------------


def _make_fused_kernel(treedef, leaf_locator, n_packs):
    leaf_locator = tuple(leaf_locator)

    def kernel(*refs):
        feat_ref, pos_ref, mask_ref, bbox_ref = refs[:4]
        pack_refs = refs[4:4 + n_packs]
        coord_ref, class_ref = refs[4 + n_packs:]

        # Rebuild the original parameter pytree as zero-cost Ref views into the
        # packed VMEM-resident weight blocks.  Loads still happen lazily at the
        # point of use inside the compute helpers (no vreg-pressure blowup).
        leaves = [pack_refs[g].at[j] for (g, j) in leaf_locator]
        p = jax.tree_util.tree_unflatten(treedef, leaves)

        feat = feat_ref[0]                 # [L, Cin]
        pos = pos_ref[0]                   # [L, D]
        bias = mask_ref[0] * (-1e9)        # [1, L] additive key-padding bias
        bbox = bbox_ref[0]                 # [1, 4]  (x, y, w, h)

        qpos = p["query_embed"][...]       # [Q, D]
        num_q, d_model = qpos.shape
        dh = d_model // NHEAD
        scale = 1.0 / math.sqrt(dh)

        # input_proj: Conv2d(kernel_size=1) == per-token linear over channels.
        src = _linear(feat, p["input_proj"])               # [L, D]

        # Encoder.
        memory = src
        for lp in p["encoder"]:
            memory = _encoder_layer(memory, pos, bias, lp, dh, scale)

        # Decoder (tgt starts at zeros; only the last layer output feeds the
        # heads, equivalent to hs[-1] of DETR's return_intermediate + norm).
        tgt = jnp.zeros((num_q, d_model), jnp.float32)
        mem_k_in = memory + pos
        for lp in p["decoder"]:
            tgt = _decoder_layer(tgt, memory, mem_k_in, qpos, bias, lp,
                                 dh, scale)
        j_embed = _layernorm(tgt, p["dec_norm"])           # [Q, D]

        # coord_predictor MLP + sigmoid + bbox scaling + clamp (all fused).
        h = _linear(j_embed, p["coord"][0], act="relu")
        h = _linear(h, p["coord"][1], act="relu")
        logits = _linear(h, p["coord"][2])                 # [Q, 2]
        c = jax.nn.sigmoid(logits) * 1.25 - 0.625
        x = jnp.clip(c[:, 0:1] * bbox[:, 2:3] + bbox[:, 0:1], 0.0, 1.0)
        y = jnp.clip(c[:, 1:2] * bbox[:, 3:4] + bbox[:, 1:2], 0.0, 1.0)
        coord_ref[0] = jnp.concatenate([x, y], axis=-1)    # [Q, 2]

        # class head computed per batch element; the wrapper selects the last
        # batch element to match the reference `class_predictor(j_embed[-1])`.
        class_ref[0] = _linear(j_embed, p["class"])        # [Q, K+1]

    return kernel


# ---------------------------- DETR_kpts forward -----------------------------


def detr_kpts_forward(params, bboxes, features, pos, mask):
    B, Cin, H, W = features.shape
    L = H * W
    Qn, D = params["query_embed"].shape
    n_cls = params["class"]["w"].shape[1]

    # One-time NCHW -> [B, L, C] layout change (tiny, done once per call) so
    # the kernel sees token-major, lane-dense [L, C] tiles.
    feat = features.transpose(0, 2, 3, 1).reshape(B, L, Cin)
    pos_seq = pos.transpose(0, 2, 3, 1).reshape(B, L, D)
    mask_f = mask.reshape(B, 1, L).astype(jnp.float32)
    bbox3 = bboxes.reshape(B, 1, 4)

    # ---- pack parameters by shape: ~70 tiny arrays -> ~11 stacked arrays ----
    flat_params, treedef = jax.tree_util.tree_flatten(params)
    groups = {}  # shape -> list of leaf positions (insertion-ordered)
    for pos_idx, leaf in enumerate(flat_params):
        groups.setdefault(tuple(leaf.shape), []).append(pos_idx)

    packs = []
    leaf_locator = [None] * len(flat_params)
    for g, (shape, positions) in enumerate(groups.items()):
        packs.append(jnp.stack([flat_params[i] for i in positions], axis=0))
        for j, i in enumerate(positions):
            leaf_locator[i] = (g, j)
    n_packs = len(packs)

    def _const_spec(a):
        # Whole-array block, constant index map -> fetched once, VMEM resident.
        nd = a.ndim
        return pl.BlockSpec(a.shape, lambda b, _nd=nd: (0,) * _nd)

    in_specs = [
        pl.BlockSpec((1, L, Cin), lambda b: (b, 0, 0)),
        pl.BlockSpec((1, L, D), lambda b: (b, 0, 0)),
        pl.BlockSpec((1, 1, L), lambda b: (b, 0, 0)),
        pl.BlockSpec((1, 1, 4), lambda b: (b, 0, 0)),
    ] + [_const_spec(a) for a in packs]

    out_specs = (
        pl.BlockSpec((1, Qn, 2), lambda b: (b, 0, 0)),
        pl.BlockSpec((1, Qn, n_cls), lambda b: (b, 0, 0)),
    )

    kernel = _make_fused_kernel(treedef, leaf_locator, n_packs)
    coord, cls_all = pl.pallas_call(
        kernel,
        out_shape=(
            jax.ShapeDtypeStruct((B, Qn, 2), jnp.float32),
            jax.ShapeDtypeStruct((B, Qn, n_cls), jnp.float32),
        ),
        grid=(B,),
        in_specs=in_specs,
        out_specs=out_specs,
        compiler_params=pltpu.CompilerParams(
            dimension_semantics=("parallel",)),   # both v7x TCs do one batch each
    )(feat, pos_seq, mask_f, bbox3, *packs)

    j_coord = coord              # [B, Q, 2]
    j_class = cls_all[-1]        # class_predictor(j_embed[-1]) — last batch element
    return j_coord, j_class


# ------------------------------ parameter init -------------------------------


def _ln_params(D):
    return {"g": jnp.ones((1, D), jnp.float32), "b": jnp.zeros((1, D), jnp.float32)}


def _self_attn_params(key, D):
    k1, k2, k3 = jax.random.split(key, 3)
    return {
        "w_qk": 0.02 * jax.random.normal(k1, (D, 2 * D), jnp.float32),
        "b_qk": jnp.zeros((1, 2 * D), jnp.float32),
        "w_v": 0.02 * jax.random.normal(k2, (D, D), jnp.float32),
        "b_v": jnp.zeros((1, D), jnp.float32),
        "w_o": 0.02 * jax.random.normal(k3, (D, D), jnp.float32),
        "b_o": jnp.zeros((1, D), jnp.float32),
    }


def _cross_attn_params(key, D):
    k1, k2, k3, k4 = jax.random.split(key, 4)
    z = jnp.zeros((1, D), jnp.float32)
    return {
        "w_q": 0.02 * jax.random.normal(k1, (D, D), jnp.float32), "b_q": z,
        "w_k": 0.02 * jax.random.normal(k2, (D, D), jnp.float32), "b_k": z,
        "w_v": 0.02 * jax.random.normal(k3, (D, D), jnp.float32), "b_v": z,
        "w_o": 0.02 * jax.random.normal(k4, (D, D), jnp.float32), "b_o": z,
    }


def _ffn_params(key, D, FF):
    k1, k2 = jax.random.split(key)
    return (
        {"w": 0.02 * jax.random.normal(k1, (D, FF), jnp.float32),
         "b": jnp.zeros((1, FF), jnp.float32)},
        {"w": 0.02 * jax.random.normal(k2, (FF, D), jnp.float32),
         "b": jnp.zeros((1, D), jnp.float32)},
    )


def init_params(key, *, input_dim, hidden_dim, num_queries, num_kpts,
                num_enc_layers=1, num_dec_layers=2, ffn_dim=64):
    keys = iter(jax.random.split(key, 64))
    D, FF = hidden_dim, ffn_dim
    params = {
        "query_embed": 0.02 * jax.random.normal(next(keys), (num_queries, D), jnp.float32),
        "input_proj": {
            "w": 0.02 * jax.random.normal(next(keys), (input_dim, D), jnp.float32),
            "b": jnp.zeros((1, D), jnp.float32),
        },
        "encoder": [],
        "decoder": [],
        "dec_norm": _ln_params(D),
        "class": {
            "w": 0.02 * jax.random.normal(next(keys), (D, num_kpts + 1), jnp.float32),
            "b": jnp.zeros((1, num_kpts + 1), jnp.float32),
        },
    }
    for _ in range(num_enc_layers):
        lin1, lin2 = _ffn_params(next(keys), D, FF)
        params["encoder"].append({
            "self_attn": _self_attn_params(next(keys), D),
            "norm1": _ln_params(D), "norm2": _ln_params(D),
            "lin1": lin1, "lin2": lin2,
        })
    for _ in range(num_dec_layers):
        lin1, lin2 = _ffn_params(next(keys), D, FF)
        params["decoder"].append({
            "self_attn": _self_attn_params(next(keys), D),
            "cross_attn": _cross_attn_params(next(keys), D),
            "norm1": _ln_params(D), "norm2": _ln_params(D), "norm3": _ln_params(D),
            "lin1": lin1, "lin2": lin2,
        })
    # coord MLP: hidden -> hidden -> hidden -> 2 (ReLU between hidden layers)
    k1, k2, k3 = jax.random.split(next(keys), 3)
    params["coord"] = [
        {"w": 0.02 * jax.random.normal(k1, (D, D), jnp.float32),
         "b": jnp.zeros((1, D), jnp.float32)},
        {"w": 0.02 * jax.random.normal(k2, (D, D), jnp.float32),
         "b": jnp.zeros((1, D), jnp.float32)},
        {"w": 0.02 * jax.random.normal(k3, (D, 2), jnp.float32),
         "b": jnp.zeros((1, 2), jnp.float32)},
    ]
    return params


# ------------------------------------ main -----------------------------------

if __name__ == "__main__":
    B, Cin, H, W = 2, 4, 8, 8
    D, Qn, KPTS = 32, 8, 4

    root = jax.random.PRNGKey(0)
    k_par, k_feat, k_pos, k_bb = jax.random.split(root, 4)

    params = init_params(k_par, input_dim=Cin, hidden_dim=D,
                         num_queries=Qn, num_kpts=KPTS)

    features = jax.random.normal(k_feat, (B, Cin, H, W), jnp.float32)
    pos = 0.1 * jax.random.normal(k_pos, (B, D, H, W), jnp.float32)
    mask = jnp.zeros((B, H, W), dtype=bool)  # no padded pixels
    bboxes = jax.random.uniform(k_bb, (B, 4), jnp.float32, 0.1, 0.6)  # [x, y, w, h]

    fwd = jax.jit(functools.partial(detr_kpts_forward, params))
    j_coord, j_class = fwd(bboxes, features, pos, mask)
    jax.block_until_ready((j_coord, j_class))

    assert j_coord.shape == (B, Qn, 2)
    assert j_class.shape == (Qn, KPTS + 1)
    assert bool(jnp.all(jnp.isfinite(j_coord))) and bool(jnp.all(jnp.isfinite(j_class)))
    assert bool(jnp.all(j_coord >= 0.0)) and bool(jnp.all(j_coord <= 1.0))
    print("KERNEL_OK")
</pallas_src>

<mosaic_0001>
module attributes {stable_mosaic.version = 11 : i64} {
  func.func @kernel(%arg0: i32, %arg1: memref<1x64x4xf32, #tpu.memory_space<vmem>>, %arg2: memref<1x64x32xf32, #tpu.memory_space<vmem>>, %arg3: memref<1x1x64xf32, #tpu.memory_space<vmem>>, %arg4: memref<1x1x4xf32, #tpu.memory_space<vmem>>, %arg5: memref<1x1x5xf32, #tpu.memory_space<vmem>>, %arg6: memref<1x32x5xf32, #tpu.memory_space<vmem>>, %arg7: memref<38x1x32xf32, #tpu.memory_space<vmem>>, %arg8: memref<16x32x32xf32, #tpu.memory_space<vmem>>, %arg9: memref<1x1x2xf32, #tpu.memory_space<vmem>>, %arg10: memref<1x32x2xf32, #tpu.memory_space<vmem>>, %arg11: memref<6x1x64xf32, #tpu.memory_space<vmem>>, %arg12: memref<6x32x64xf32, #tpu.memory_space<vmem>>, %arg13: memref<3x64x32xf32, #tpu.memory_space<vmem>>, %arg14: memref<1x4x32xf32, #tpu.memory_space<vmem>>, %arg15: memref<1x8x32xf32, #tpu.memory_space<vmem>>, %arg16: memref<1x8x2xf32, #tpu.memory_space<vmem>>, %arg17: memref<1x8x5xf32, #tpu.memory_space<vmem>>) attributes {dimension_semantics = [#tpu.dimension_semantics<parallel>], iteration_bounds = array<i64: 2>, scalar_prefetch = 0 : i64, scratch_operands = 0 : i64, tpu.core_type = #tpu.core_type<tc>, window_params = [{transform_indices = @transform_0, window_bounds = array<i64: 1, 64, 4>}, {transform_indices = @transform_1, window_bounds = array<i64: 1, 64, 32>}, {transform_indices = @transform_2, window_bounds = array<i64: 1, 1, 64>}, {transform_indices = @transform_3, window_bounds = array<i64: 1, 1, 4>}, {pipeline_mode = #tpu.pipeline_mode<synchronous>, transform_indices = @transform_4, window_bounds = array<i64: 1, 1, 5>}, {pipeline_mode = #tpu.pipeline_mode<synchronous>, transform_indices = @transform_5, window_bounds = array<i64: 1, 32, 5>}, {pipeline_mode = #tpu.pipeline_mode<synchronous>, transform_indices = @transform_6, window_bounds = array<i64: 38, 1, 32>}, {pipeline_mode = #tpu.pipeline_mode<synchronous>, transform_indices = @transform_7, window_bounds = array<i64: 16, 32, 32>}, {pipeline_mode = #tpu.pipeline_mode<synchronous>, transform_indices = @transform_8, window_bounds = array<i64: 1, 1, 2>}, {pipeline_mode = #tpu.pipeline_mode<synchronous>, transform_indices = @transform_9, window_bounds = array<i64: 1, 32, 2>}, {pipeline_mode = #tpu.pipeline_mode<synchronous>, transform_indices = @transform_10, window_bounds = array<i64: 6, 1, 64>}, {pipeline_mode = #tpu.pipeline_mode<synchronous>, transform_indices = @transform_11, window_bounds = array<i64: 6, 32, 64>}, {pipeline_mode = #tpu.pipeline_mode<synchronous>, transform_indices = @transform_12, window_bounds = array<i64: 3, 64, 32>}, {pipeline_mode = #tpu.pipeline_mode<synchronous>, transform_indices = @transform_13, window_bounds = array<i64: 1, 4, 32>}, {pipeline_mode = #tpu.pipeline_mode<synchronous>, transform_indices = @transform_14, window_bounds = array<i64: 1, 8, 32>}, {transform_indices = @transform_15, window_bounds = array<i64: 1, 8, 2>}, {transform_indices = @transform_16, window_bounds = array<i64: 1, 8, 5>}]} {
    %c0 = arith.constant 0 : index
    %c0_0 = arith.constant 0 : index
    %c0_1 = arith.constant 0 : index
    %0 = vector.load %arg1[%c0, %c0_0, %c0_1] : memref<1x64x4xf32, #tpu.memory_space<vmem>>, vector<1x64x4xf32>
    %1 = vector.shape_cast %0 : vector<1x64x4xf32> to vector<64x4xf32>
    %c0_2 = arith.constant 0 : index
    %c0_3 = arith.constant 0 : index
    %c0_4 = arith.constant 0 : index
    %2 = vector.load %arg2[%c0_2, %c0_3, %c0_4] : memref<1x64x32xf32, #tpu.memory_space<vmem>>, vector<1x64x32xf32>
    %3 = vector.shape_cast %2 : vector<1x64x32xf32> to vector<64x32xf32>
    %c0_5 = arith.constant 0 : index
    %c0_6 = arith.constant 0 : index
    %c0_7 = arith.constant 0 : index
    %4 = vector.load %arg3[%c0_5, %c0_6, %c0_7] : memref<1x1x64xf32, #tpu.memory_space<vmem>>, vector<1x1x64xf32>
    %5 = vector.shape_cast %4 : vector<1x1x64xf32> to vector<1x64xf32>
    %cst = arith.constant -1.000000e+09 : f32
    %6 = vector.broadcast %cst : f32 to vector<1x64xf32>
    %7 = arith.mulf %5, %6 : vector<1x64xf32>
    %c0_8 = arith.constant 0 : index
    %c0_9 = arith.constant 0 : index
    %c0_10 = arith.constant 0 : index
    %8 = vector.load %arg4[%c0_8, %c0_9, %c0_10] : memref<1x1x4xf32, #tpu.memory_space<vmem>>, vector<1x1x4xf32>
    %9 = vector.shape_cast %8 : vector<1x1x4xf32> to vector<1x4xf32>
    %c0_11 = arith.constant 0 : index
    %c0_12 = arith.constant 0 : index
    %c0_13 = arith.constant 0 : index
    %10 = vector.load %arg15[%c0_11, %c0_12, %c0_13] : memref<1x8x32xf32, #tpu.memory_space<vmem>>, vector<1x8x32xf32>
    %11 = vector.shape_cast %10 : vector<1x8x32xf32> to vector<8x32xf32>
    %c0_14 = arith.constant 0 : index
    %c0_15 = arith.constant 0 : index
    %c0_16 = arith.constant 0 : index
    %12 = vector.load %arg14[%c0_14, %c0_15, %c0_16] : memref<1x4x32xf32, #tpu.memory_space<vmem>>, vector<1x4x32xf32>
    %13 = vector.shape_cast %12 : vector<1x4x32xf32> to vector<4x32xf32>
    %14 = arith.truncf %1 : vector<64x4xf32> to vector<64x4xbf16>
    %15 = arith.truncf %13 : vector<4x32xf32> to vector<4x32xbf16>
    %cst_17 = arith.constant dense<0.000000e+00> : vector<64x32xf32>
    %16 = tpu.matmul %14, %15, %cst_17 {dimension_numbers = #tpu.dot_dimension_numbers<[1], [0], [0], [1], [0, 0, 1, 1], [], []>} : vector<64x4xbf16>, vector<4x32xbf16>, vector<64x32xf32> -> vector<64x32xf32>
    %c37 = arith.constant 37 : index
    %c0_18 = arith.constant 0 : index
    %c0_19 = arith.constant 0 : index
    %17 = vector.load %arg7[%c37, %c0_18, %c0_19] : memref<38x1x32xf32, #tpu.memory_space<vmem>>, vector<1x1x32xf32>
    %18 = vector.shape_cast %17 : vector<1x1x32xf32> to vector<1x32xf32>
    %19 = vector.broadcast %18 : vector<1x32xf32> to vector<64x32xf32>
    %20 = arith.addf %16, %19 : vector<64x32xf32>
    %21 = arith.addf %20, %3 : vector<64x32xf32>
    %c5 = arith.constant 5 : index
    %c0_20 = arith.constant 0 : index
    %c0_21 = arith.constant 0 : index
    %22 = vector.load %arg12[%c5, %c0_20, %c0_21] : memref<6x32x64xf32, #tpu.memory_space<vmem>>, vector<1x32x64xf32>
    %23 = vector.shape_cast %22 : vector<1x32x64xf32> to vector<32x64xf32>
    %24 = arith.truncf %21 : vector<64x32xf32> to vector<64x32xbf16>
    %25 = arith.truncf %23 : vector<32x64xf32> to vector<32x64xbf16>
    %cst_22 = arith.constant dense<0.000000e+00> : vector<64x64xf32>
    %26 = tpu.matmul %24, %25, %cst_22 {dimension_numbers = #tpu.dot_dimension_numbers<[1], [0], [0], [1], [0, 0, 1, 1], [], []>} : vector<64x32xbf16>, vector<32x64xbf16>, vector<64x64xf32> -> vector<64x64xf32>
    %c5_23 = arith.constant 5 : index
    %c0_24 = arith.constant 0 : index
    %c0_25 = arith.constant 0 : index
    %27 = vector.load %arg11[%c5_23, %c0_24, %c0_25] : memref<6x1x64xf32, #tpu.memory_space<vmem>>, vector<1x1x64xf32>
    %28 = vector.shape_cast %27 : vector<1x1x64xf32> to vector<1x64xf32>
    %29 = vector.broadcast %28 : vector<1x64xf32> to vector<64x64xf32>
    %30 = arith.addf %26, %29 : vector<64x64xf32>
    %31 = vector.extract_strided_slice %30 {offsets = [0, 0], sizes = [64, 32], strides = [1, 1]} : vector<64x64xf32> to vector<64x32xf32>
    %32 = vector.extract_strided_slice %30 {offsets = [0, 32], sizes = [64, 32], strides = [1, 1]} : vector<64x64xf32> to vector<64x32xf32>
    %c15 = arith.constant 15 : index
    %c0_26 = arith.constant 0 : index
    %c0_27 = arith.constant 0 : index
    %33 = vector.load %arg8[%c15, %c0_26, %c0_27] : memref<16x32x32xf32, #tpu.memory_space<vmem>>, vector<1x32x32xf32>
    %34 = vector.shape_cast %33 : vector<1x32x32xf32> to vector<32x32xf32>
    %35 = arith.truncf %20 : vector<64x32xf32> to vector<64x32xbf16>
    %36 = arith.truncf %34 : vector<32x32xf32> to vector<32x32xbf16>
    %cst_28 = arith.constant dense<0.000000e+00> : vector<64x32xf32>
    %37 = tpu.matmul %35, %36, %cst_28 {dimension_numbers = #tpu.dot_dimension_numbers<[1], [0], [0], [1], [0, 0, 1, 1], [], []>} : vector<64x32xbf16>, vector<32x32xbf16>, vector<64x32xf32> -> vector<64x32xf32>
    %c36 = arith.constant 36 : index
    %c0_29 = arith.constant 0 : index
    %c0_30 = arith.constant 0 : index
    %38 = vector.load %arg7[%c36, %c0_29, %c0_30] : memref<38x1x32xf32, #tpu.memory_space<vmem>>, vector<1x1x32xf32>
    %39 = vector.shape_cast %38 : vector<1x1x32xf32> to vector<1x32xf32>
    %40 = vector.broadcast %39 : vector<1x32xf32> to vector<64x32xf32>
    %41 = arith.addf %37, %40 : vector<64x32xf32>
    %cst_31 = arith.constant 0.353553385 : f32
    %42 = vector.broadcast %cst_31 : f32 to vector<64x32xf32>
    %43 = arith.mulf %31, %42 : vector<64x32xf32>
    %44 = vector.extract_strided_slice %43 {offsets = [0, 0], sizes = [64, 8], strides = [1, 1]} : vector<64x32xf32> to vector<64x8xf32>
    %45 = vector.extract_strided_slice %32 {offsets = [0, 0], sizes = [64, 8], strides = [1, 1]} : vector<64x32xf32> to vector<64x8xf32>
    %46 = arith.truncf %44 : vector<64x8xf32> to vector<64x8xbf16>
    %47 = arith.truncf %45 : vector<64x8xf32> to vector<64x8xbf16>
    %cst_32 = arith.constant dense<0.000000e+00> : vector<64x64xf32>
    %48 = tpu.matmul %46, %47, %cst_32 {dimension_numbers = #tpu.dot_dimension_numbers<[1], [1], [0], [0], [0, 0, 1, 0], [], []>} : vector<64x8xbf16>, vector<64x8xbf16>, vector<64x64xf32> -> vector<64x64xf32>
    %49 = vector.broadcast %7 : vector<1x64xf32> to vector<64x64xf32>
    %50 = arith.addf %48, %49 : vector<64x64xf32>
    %cst_33 = arith.constant dense<0xFF800000> : vector<64xf32>
    %51 = vector.multi_reduction <maximumf>, %50, %cst_33 [1] : vector<64x64xf32> to vector<64xf32>
    %52 = vector.shape_cast %51 : vector<64xf32> to vector<64x1xf32>
    %53 = vector.broadcast %52 : vector<64x1xf32> to vector<64x64xf32>
    %54 = arith.subf %50, %53 : vector<64x64xf32>
    %55 = math.exp %54 : vector<64x64xf32>
    %cst_34 = arith.constant dense<0.000000e+00> : vector<64xf32>
    %56 = vector.multi_reduction <add>, %55, %cst_34 [1] : vector<64x64xf32> to vector<64xf32>
    %57 = vector.shape_cast %56 : vector<64xf32> to vector<64x1xf32>
    %58 = tpu.reciprocal %57 {approx = true} : vector<64x1xf32> -> vector<64x1xf32>
    %59 = vector.broadcast %58 : vector<64x1xf32> to vector<64x64xf32>
    %60 = arith.mulf %55, %59 : vector<64x64xf32>
    %61 = vector.extract_strided_slice %41 {offsets = [0, 0], sizes = [64, 8], strides = [1, 1]} : vector<64x32xf32> to vector<64x8xf32>
    %62 = arith.truncf %60 : vector<64x64xf32> to vector<64x64xbf16>
    %63 = arith.truncf %61 : vector<64x8xf32> to vector<64x8xbf16>
    %cst_35 = arith.constant dense<0.000000e+00> : vector<64x8xf32>
    %64 = tpu.matmul %62, %63, %cst_35 {dimension_numbers = #tpu.dot_dimension_numbers<[1], [0], [0], [1], [0, 0, 1, 1], [], []>} : vector<64x64xbf16>, vector<64x8xbf16>, vector<64x8xf32> -> vector<64x8xf32>
    %65 = vector.extract_strided_slice %43 {offsets = [0, 8], sizes = [64, 8], strides = [1, 1]} : vector<64x32xf32> to vector<64x8xf32>
    %66 = vector.extract_strided_slice %32 {offsets = [0, 8], sizes = [64, 8], strides = [1, 1]} : vector<64x32xf32> to vector<64x8xf32>
    %67 = arith.truncf %65 : vector<64x8xf32> to vector<64x8xbf16>
    %68 = arith.truncf %66 : vector<64x8xf32> to vector<64x8xbf16>
    %cst_36 = arith.constant dense<0.000000e+00> : vector<64x64xf32>
    %69 = tpu.matmul %67, %68, %cst_36 {dimension_numbers = #tpu.dot_dimension_numbers<[1], [1], [0], [0], [0, 0, 1, 0], [], []>} : vector<64x8xbf16>, vector<64x8xbf16>, vector<64x64xf32> -> vector<64x64xf32>
    %70 = vector.broadcast %7 : vector<1x64xf32> to vector<64x64xf32>
    %71 = arith.addf %69, %70 : vector<64x64xf32>
    %cst_37 = arith.constant dense<0xFF800000> : vector<64xf32>
    %72 = vector.multi_reduction <maximumf>, %71, %cst_37 [1] : vector<64x64xf32> to vector<64xf32>
    %73 = vector.shape_cast %72 : vector<64xf32> to vector<64x1xf32>
    %74 = vector.broadcast %73 : vector<64x1xf32> to vector<64x64xf32>
    %75 = arith.subf %71, %74 : vector<64x64xf32>
    %76 = math.exp %75 : vector<64x64xf32>
    %cst_38 = arith.constant dense<0.000000e+00> : vector<64xf32>
    %77 = vector.multi_reduction <add>, %76, %cst_38 [1] : vector<64x64xf32> to vector<64xf32>
    %78 = vector.shape_cast %77 : vector<64xf32> to vector<64x1xf32>
    %79 = tpu.reciprocal %78 {approx = true} : vector<64x1xf32> -> vector<64x1xf32>
    %80 = vector.broadcast %79 : vector<64x1xf32> to vector<64x64xf32>
    %81 = arith.mulf %76, %80 : vector<64x64xf32>
    %82 = vector.extract_strided_slice %41 {offsets = [0, 8], sizes = [64, 8], strides = [1, 1]} : vector<64x32xf32> to vector<64x8xf32>
    %83 = arith.truncf %81 : vector<64x64xf32> to vector<64x64xbf16>
    %84 = arith.truncf %82 : vector<64x8xf32> to vector<64x8xbf16>
    %cst_39 = arith.constant dense<0.000000e+00> : vector<64x8xf32>
    %85 = tpu.matmul %83, %84, %cst_39 {dimension_numbers = #tpu.dot_dimension_numbers<[1], [0], [0], [1], [0, 0, 1, 1], [], []>} : vector<64x64xbf16>, vector<64x8xbf16>, vector<64x8xf32> -> vector<64x8xf32>
    %86 = vector.extract_strided_slice %43 {offsets = [0, 16], sizes = [64, 8], strides = [1, 1]} : vector<64x32xf32> to vector<64x8xf32>
    %87 = vector.extract_strided_slice %32 {offsets = [0, 16], sizes = [64, 8], strides = [1, 1]} : vector<64x32xf32> to vector<64x8xf32>
    %88 = arith.truncf %86 : vector<64x8xf32> to vector<64x8xbf16>
    %89 = arith.truncf %87 : vector<64x8xf32> to vector<64x8xbf16>
    %cst_40 = arith.constant dense<0.000000e+00> : vector<64x64xf32>
    %90 = tpu.matmul %88, %89, %cst_40 {dimension_numbers = #tpu.dot_dimension_numbers<[1], [1], [0], [0], [0, 0, 1, 0], [], []>} : vector<64x8xbf16>, vector<64x8xbf16>, vector<64x64xf32> -> vector<64x64xf32>
    %91 = vector.broadcast %7 : vector<1x64xf32> to vector<64x64xf32>
    %92 = arith.addf %90, %91 : vector<64x64xf32>
    %cst_41 = arith.constant dense<0xFF800000> : vector<64xf32>
    %93 = vector.multi_reduction <maximumf>, %92, %cst_41 [1] : vector<64x64xf32> to vector<64xf32>
    %94 = vector.shape_cast %93 : vector<64xf32> to vector<64x1xf32>
    %95 = vector.broadcast %94 : vector<64x1xf32> to vector<64x64xf32>
    %96 = arith.subf %92, %95 : vector<64x64xf32>
    %97 = math.exp %96 : vector<64x64xf32>
    %cst_42 = arith.constant dense<0.000000e+00> : vector<64xf32>
    %98 = vector.multi_reduction <add>, %97, %cst_42 [1] : vector<64x64xf32> to vector<64xf32>
    %99 = vector.shape_cast %98 : vector<64xf32> to vector<64x1xf32>
    %100 = tpu.reciprocal %99 {approx = true} : vector<64x1xf32> -> vector<64x1xf32>
    %101 = vector.broadcast %100 : vector<64x1xf32> to vector<64x64xf32>
    %102 = arith.mulf %97, %101 : vector<64x64xf32>
    %103 = vector.extract_strided_slice %41 {offsets = [0, 16], sizes = [64, 8], strides = [1, 1]} : vector<64x32xf32> to vector<64x8xf32>
    %104 = arith.truncf %102 : vector<64x64xf32> to vector<64x64xbf16>
    %105 = arith.truncf %103 : vector<64x8xf32> to vector<64x8xbf16>
    %cst_43 = arith.constant dense<0.000000e+00> : vector<64x8xf32>
    %106 = tpu.matmul %104, %105, %cst_43 {dimension_numbers = #tpu.dot_dimension_numbers<[1], [0], [0], [1], [0, 0, 1, 1], [], []>} : vector<64x64xbf16>, vector<64x8xbf16>, vector<64x8xf32> -> vector<64x8xf32>
    %107 = vector.extract_strided_slice %43 {offsets = [0, 24], sizes = [64, 8], strides = [1, 1]} : vector<64x32xf32> to vector<64x8xf32>
    %108 = vector.extract_strided_slice %32 {offsets = [0, 24], sizes = [64, 8], strides = [1, 1]} : vector<64x32xf32> to vector<64x8xf32>
    %109 = arith.truncf %107 : vector<64x8xf32> to vector<64x8xbf16>
    %110 = arith.truncf %108 : vector<64x8xf32> to vector<64x8xbf16>
    %cst_44 = arith.constant dense<0.000000e+00> : vector<64x64xf32>
    %111 = tpu.matmul %109, %110, %cst_44 {dimension_numbers = #tpu.dot_dimension_numbers<[1], [1], [0], [0], [0, 0, 1, 0], [], []>} : vector<64x8xbf16>, vector<64x8xbf16>, vector<64x64xf32> -> vector<64x64xf32>
    %112 = vector.broadcast %7 : vector<1x64xf32> to vector<64x64xf32>
    %113 = arith.addf %111, %112 : vector<64x64xf32>
    %cst_45 = arith.constant dense<0xFF800000> : vector<64xf32>
    %114 = vector.multi_reduction <maximumf>, %113, %cst_45 [1] : vector<64x64xf32> to vector<64xf32>
    %115 = vector.shape_cast %114 : vector<64xf32> to vector<64x1xf32>
    %116 = vector.broadcast %115 : vector<64x1xf32> to vector<64x64xf32>
    %117 = arith.subf %113, %116 : vector<64x64xf32>
    %118 = math.exp %117 : vector<64x64xf32>
    %cst_46 = arith.constant dense<0.000000e+00> : vector<64xf32>
    %119 = vector.multi_reduction <add>, %118, %cst_46 [1] : vector<64x64xf32> to vector<64xf32>
    %120 = vector.shape_cast %119 : vector<64xf32> to vector<64x1xf32>
    %121 = tpu.reciprocal %120 {approx = true} : vector<64x1xf32> -> vector<64x1xf32>
    %122 = vector.broadcast %121 : vector<64x1xf32> to vector<64x64xf32>
    %123 = arith.mulf %118, %122 : vector<64x64xf32>
    %124 = vector.extract_strided_slice %41 {offsets = [0, 24], sizes = [64, 8], strides = [1, 1]} : vector<64x32xf32> to vector<64x8xf32>
    %125 = arith.truncf %123 : vector<64x64xf32> to vector<64x64xbf16>
    %126 = arith.truncf %124 : vector<64x8xf32> to vector<64x8xbf16>
    %cst_47 = arith.constant dense<0.000000e+00> : vector<64x8xf32>
    %127 = tpu.matmul %125, %126, %cst_47 {dimension_numbers = #tpu.dot_dimension_numbers<[1], [0], [0], [1], [0, 0, 1, 1], [], []>} : vector<64x64xbf16>, vector<64x8xbf16>, vector<64x8xf32> -> vector<64x8xf32>
    %128 = tpu.concatenate %64, %85, %106, %127 in 1 : vector<64x8xf32>, vector<64x8xf32>, vector<64x8xf32>, vector<64x8xf32> -> vector<64x32xf32>
    %c14 = arith.constant 14 : index
    %c0_48 = arith.constant 0 : index
    %c0_49 = arith.constant 0 : index
    %129 = vector.load %arg8[%c14, %c0_48, %c0_49] : memref<16x32x32xf32, #tpu.memory_space<vmem>>, vector<1x32x32xf32>
    %130 = vector.shape_cast %129 : vector<1x32x32xf32> to vector<32x32xf32>
    %131 = arith.truncf %128 : vector<64x32xf32> to vector<64x32xbf16>
    %132 = arith.truncf %130 : vector<32x32xf32> to vector<32x32xbf16>
    %cst_50 = arith.constant dense<0.000000e+00> : vector<64x32xf32>
    %133 = tpu.matmul %131, %132, %cst_50 {dimension_numbers = #tpu.dot_dimension_numbers<[1], [0], [0], [1], [0, 0, 1, 1], [], []>} : vector<64x32xbf16>, vector<32x32xbf16>, vector<64x32xf32> -> vector<64x32xf32>
    %c35 = arith.constant 35 : index
    %c0_51 = arith.constant 0 : index
    %c0_52 = arith.constant 0 : index
    %134 = vector.load %arg7[%c35, %c0_51, %c0_52] : memref<38x1x32xf32, #tpu.memory_space<vmem>>, vector<1x1x32xf32>
    %135 = vector.shape_cast %134 : vector<1x1x32xf32> to vector<1x32xf32>
    %136 = vector.broadcast %135 : vector<1x32xf32> to vector<64x32xf32>
    %137 = arith.addf %133, %136 : vector<64x32xf32>
    %138 = arith.addf %20, %137 : vector<64x32xf32>
    %cst_53 = arith.constant dense<0.000000e+00> : vector<64xf32>
    %139 = vector.multi_reduction <add>, %138, %cst_53 [1] : vector<64x32xf32> to vector<64xf32>
    %140 = vector.shape_cast %139 : vector<64xf32> to vector<64x1xf32>
    %cst_54 = arith.constant 3.200000e+01 : f32
    %141 = vector.broadcast %cst_54 : f32 to vector<64x1xf32>
    %142 = arith.divf %140, %141 : vector<64x1xf32>
    %143 = vector.broadcast %142 : vector<64x1xf32> to vector<64x32xf32>
    %144 = arith.subf %138, %143 : vector<64x32xf32>
    %145 = arith.mulf %144, %144 : vector<64x32xf32>
    %cst_55 = arith.constant dense<0.000000e+00> : vector<64xf32>
    %146 = vector.multi_reduction <add>, %145, %cst_55 [1] : vector<64x32xf32> to vector<64xf32>
    %147 = vector.shape_cast %146 : vector<64xf32> to vector<64x1xf32>
    %cst_56 = arith.constant 3.200000e+01 : f32
    %148 = vector.broadcast %cst_56 : f32 to vector<64x1xf32>
    %149 = arith.divf %147, %148 : vector<64x1xf32>
    %150 = vector.broadcast %142 : vector<64x1xf32> to vector<64x32xf32>
    %151 = arith.subf %138, %150 : vector<64x32xf32>
    %cst_57 = arith.constant 9.99999974E-6 : f32
    %152 = vector.broadcast %cst_57 : f32 to vector<64x1xf32>
    %153 = arith.addf %149, %152 : vector<64x1xf32>
    %154 = math.rsqrt %153 : vector<64x1xf32>
    %155 = vector.broadcast %154 : vector<64x1xf32> to vector<64x32xf32>
    %156 = arith.mulf %151, %155 : vector<64x32xf32>
    %c32 = arith.constant 32 : index
    %c0_58 = arith.constant 0 : index
    %c0_59 = arith.constant 0 : index
    %157 = vector.load %arg7[%c32, %c0_58, %c0_59] : memref<38x1x32xf32, #tpu.memory_space<vmem>>, vector<1x1x32xf32>
    %158 = vector.shape_cast %157 : vector<1x1x32xf32> to vector<1x32xf32>
    %159 = vector.broadcast %158 : vector<1x32xf32> to vector<64x32xf32>
    %160 = arith.mulf %156, %159 : vector<64x32xf32>
    %c31 = arith.constant 31 : index
    %c0_60 = arith.constant 0 : index
    %c0_61 = arith.constant 0 : index
    %161 = vector.load %arg7[%c31, %c0_60, %c0_61] : memref<38x1x32xf32, #tpu.memory_space<vmem>>, vector<1x1x32xf32>
    %162 = vector.shape_cast %161 : vector<1x1x32xf32> to vector<1x32xf32>
    %163 = vector.broadcast %162 : vector<1x32xf32> to vector<64x32xf32>
    %164 = arith.addf %160, %163 : vector<64x32xf32>
    %c4 = arith.constant 4 : index
    %c0_62 = arith.constant 0 : index
    %c0_63 = arith.constant 0 : index
    %165 = vector.load %arg12[%c4, %c0_62, %c0_63] : memref<6x32x64xf32, #tpu.memory_space<vmem>>, vector<1x32x64xf32>
    %166 = vector.shape_cast %165 : vector<1x32x64xf32> to vector<32x64xf32>
    %167 = arith.truncf %164 : vector<64x32xf32> to vector<64x32xbf16>
    %168 = arith.truncf %166 : vector<32x64xf32> to vector<32x64xbf16>
    %cst_64 = arith.constant dense<0.000000e+00> : vector<64x64xf32>
    %169 = tpu.matmul %167, %168, %cst_64 {dimension_numbers = #tpu.dot_dimension_numbers<[1], [0], [0], [1], [0, 0, 1, 1], [], []>} : vector<64x32xbf16>, vector<32x64xbf16>, vector<64x64xf32> -> vector<64x64xf32>
    %c4_65 = arith.constant 4 : index
    %c0_66 = arith.constant 0 : index
    %c0_67 = arith.constant 0 : index
    %170 = vector.load %arg11[%c4_65, %c0_66, %c0_67] : memref<6x1x64xf32, #tpu.memory_space<vmem>>, vector<1x1x64xf32>
    %171 = vector.shape_cast %170 : vector<1x1x64xf32> to vector<1x64xf32>
    %172 = vector.broadcast %171 : vector<1x64xf32> to vector<64x64xf32>
    %173 = arith.addf %169, %172 : vector<64x64xf32>
    %cst_68 = arith.constant 0.000000e+00 : f32
    %174 = vector.broadcast %cst_68 : f32 to vector<64x64xf32>
    %175 = arith.maximumf %173, %174 : vector<64x64xf32>
    %c2 = arith.constant 2 : index
    %c0_69 = arith.constant 0 : index
    %c0_70 = arith.constant 0 : index
    %176 = vector.load %arg13[%c2, %c0_69, %c0_70] : memref<3x64x32xf32, #tpu.memory_space<vmem>>, vector<1x64x32xf32>
    %177 = vector.shape_cast %176 : vector<1x64x32xf32> to vector<64x32xf32>
    %178 = arith.truncf %175 : vector<64x64xf32> to vector<64x64xbf16>
    %179 = arith.truncf %177 : vector<64x32xf32> to vector<64x32xbf16>
    %cst_71 = arith.constant dense<0.000000e+00> : vector<64x32xf32>
    %180 = tpu.matmul %178, %179, %cst_71 {dimension_numbers = #tpu.dot_dimension_numbers<[1], [0], [0], [1], [0, 0, 1, 1], [], []>} : vector<64x64xbf16>, vector<64x32xbf16>, vector<64x32xf32> -> vector<64x32xf32>
    %c30 = arith.constant 30 : index
    %c0_72 = arith.constant 0 : index
    %c0_73 = arith.constant 0 : index
    %181 = vector.load %arg7[%c30, %c0_72, %c0_73] : memref<38x1x32xf32, #tpu.memory_space<vmem>>, vector<1x1x32xf32>
    %182 = vector.shape_cast %181 : vector<1x1x32xf32> to vector<1x32xf32>
    %183 = vector.broadcast %182 : vector<1x32xf32> to vector<64x32xf32>
    %184 = arith.addf %180, %183 : vector<64x32xf32>
    %185 = arith.addf %164, %184 : vector<64x32xf32>
    %cst_74 = arith.constant dense<0.000000e+00> : vector<64xf32>
    %186 = vector.multi_reduction <add>, %185, %cst_74 [1] : vector<64x32xf32> to vector<64xf32>
    %187 = vector.shape_cast %186 : vector<64xf32> to vector<64x1xf32>
    %cst_75 = arith.constant 3.200000e+01 : f32
    %188 = vector.broadcast %cst_75 : f32 to vector<64x1xf32>
    %189 = arith.divf %187, %188 : vector<64x1xf32>
    %190 = vector.broadcast %189 : vector<64x1xf32> to vector<64x32xf32>
    %191 = arith.subf %185, %190 : vector<64x32xf32>
    %192 = arith.mulf %191, %191 : vector<64x32xf32>
    %cst_76 = arith.constant dense<0.000000e+00> : vector<64xf32>
    %193 = vector.multi_reduction <add>, %192, %cst_76 [1] : vector<64x32xf32> to vector<64xf32>
    %194 = vector.shape_cast %193 : vector<64xf32> to vector<64x1xf32>
    %cst_77 = arith.constant 3.200000e+01 : f32
    %195 = vector.broadcast %cst_77 : f32 to vector<64x1xf32>
    %196 = arith.divf %194, %195 : vector<64x1xf32>
    %197 = vector.broadcast %189 : vector<64x1xf32> to vector<64x32xf32>
    %198 = arith.subf %185, %197 : vector<64x32xf32>
    %cst_78 = arith.constant 9.99999974E-6 : f32
    %199 = vector.broadcast %cst_78 : f32 to vector<64x1xf32>
    %200 = arith.addf %196, %199 : vector<64x1xf32>
    %201 = math.rsqrt %200 : vector<64x1xf32>
    %202 = vector.broadcast %201 : vector<64x1xf32> to vector<64x32xf32>
    %203 = arith.mulf %198, %202 : vector<64x32xf32>
    %c34 = arith.constant 34 : index
    %c0_79 = arith.constant 0 : index
    %c0_80 = arith.constant 0 : index
    %204 = vector.load %arg7[%c34, %c0_79, %c0_80] : memref<38x1x32xf32, #tpu.memory_space<vmem>>, vector<1x1x32xf32>
    %205 = vector.shape_cast %204 : vector<1x1x32xf32> to vector<1x32xf32>
    %206 = vector.broadcast %205 : vector<1x32xf32> to vector<64x32xf32>
    %207 = arith.mulf %203, %206 : vector<64x32xf32>
    %c33 = arith.constant 33 : index
    %c0_81 = arith.constant 0 : index
    %c0_82 = arith.constant 0 : index
    %208 = vector.load %arg7[%c33, %c0_81, %c0_82] : memref<38x1x32xf32, #tpu.memory_space<vmem>>, vector<1x1x32xf32>
    %209 = vector.shape_cast %208 : vector<1x1x32xf32> to vector<1x32xf32>
    %210 = vector.broadcast %209 : vector<1x32xf32> to vector<64x32xf32>
    %211 = arith.addf %207, %210 : vector<64x32xf32>
    %cst_83 = arith.constant 0.000000e+00 : f32
    %212 = vector.broadcast %cst_83 : f32 to vector<8x32xf32>
    %213 = arith.addf %211, %3 : vector<64x32xf32>
    %214 = arith.addf %212, %11 : vector<8x32xf32>
    %c1 = arith.constant 1 : index
    %c0_84 = arith.constant 0 : index
    %c0_85 = arith.constant 0 : index
    %215 = vector.load %arg12[%c1, %c0_84, %c0_85] : memref<6x32x64xf32, #tpu.memory_space<vmem>>, vector<1x32x64xf32>
    %216 = vector.shape_cast %215 : vector<1x32x64xf32> to vector<32x64xf32>
    %217 = arith.truncf %214 : vector<8x32xf32> to vector<8x32xbf16>
    %218 = arith.truncf %216 : vector<32x64xf32> to vector<32x64xbf16>
    %cst_86 = arith.constant dense<0.000000e+00> : vector<8x64xf32>
    %219 = tpu.matmul %217, %218, %cst_86 {dimension_numbers = #tpu.dot_dimension_numbers<[1], [0], [0], [1], [0, 0, 1, 1], [], []>} : vector<8x32xbf16>, vector<32x64xbf16>, vector<8x64xf32> -> vector<8x64xf32>
    %c1_87 = arith.constant 1 : index
    %c0_88 = arith.constant 0 : index
    %c0_89 = arith.constant 0 : index
    %220 = vector.load %arg11[%c1_87, %c0_88, %c0_89] : memref<6x1x64xf32, #tpu.memory_space<vmem>>, vector<1x1x64xf32>
    %221 = vector.shape_cast %220 : vector<1x1x64xf32> to vector<1x64xf32>
    %222 = vector.broadcast %221 : vector<1x64xf32> to vector<8x64xf32>
    %223 = arith.addf %219, %222 : vector<8x64xf32>
    %224 = vector.extract_strided_slice %223 {offsets = [0, 0], sizes = [8, 32], strides = [1, 1]} : vector<8x64xf32> to vector<8x32xf32>
    %225 = vector.extract_strided_slice %223 {offsets = [0, 32], sizes = [8, 32], strides = [1, 1]} : vector<8x64xf32> to vector<8x32xf32>
    %c7 = arith.constant 7 : index
    %c0_90 = arith.constant 0 : index
    %c0_91 = arith.constant 0 : index
    %226 = vector.load %arg8[%c7, %c0_90, %c0_91] : memref<16x32x32xf32, #tpu.memory_space<vmem>>, vector<1x32x32xf32>
    %227 = vector.shape_cast %226 : vector<1x32x32xf32> to vector<32x32xf32>
    %228 = arith.truncf %212 : vector<8x32xf32> to vector<8x32xbf16>
    %229 = arith.truncf %227 : vector<32x32xf32> to vector<32x32xbf16>
    %cst_92 = arith.constant dense<0.000000e+00> : vector<8x32xf32>
    %230 = tpu.matmul %228, %229, %cst_92 {dimension_numbers = #tpu.dot_dimension_numbers<[1], [0], [0], [1], [0, 0, 1, 1], [], []>} : vector<8x32xbf16>, vector<32x32xbf16>, vector<8x32xf32> -> vector<8x32xf32>
    %c16 = arith.constant 16 : index
    %c0_93 = arith.constant 0 : index
    %c0_94 = arith.constant 0 : index
    %231 = vector.load %arg7[%c16, %c0_93, %c0_94] : memref<38x1x32xf32, #tpu.memory_space<vmem>>, vector<1x1x32xf32>
    %232 = vector.shape_cast %231 : vector<1x1x32xf32> to vector<1x32xf32>
    %233 = vector.broadcast %232 : vector<1x32xf32> to vector<8x32xf32>
    %234 = arith.addf %230, %233 : vector<8x32xf32>
    %cst_95 = arith.constant 0.353553385 : f32
    %235 = vector.broadcast %cst_95 : f32 to vector<8x32xf32>
    %236 = arith.mulf %224, %235 : vector<8x32xf32>
    %237 = vector.extract_strided_slice %236 {offsets = [0, 0], sizes = [8, 8], strides = [1, 1]} : vector<8x32xf32> to vector<8x8xf32>
    %238 = vector.extract_strided_slice %225 {offsets = [0, 0], sizes = [8, 8], strides = [1, 1]} : vector<8x32xf32> to vector<8x8xf32>
    %239 = arith.truncf %237 : vector<8x8xf32> to vector<8x8xbf16>
    %240 = arith.truncf %238 : vector<8x8xf32> to vector<8x8xbf16>
    %cst_96 = arith.constant dense<0.000000e+00> : vector<8x8xf32>
    %241 = tpu.matmul %239, %240, %cst_96 {dimension_numbers = #tpu.dot_dimension_numbers<[1], [1], [0], [0], [0, 0, 1, 0], [], []>} : vector<8x8xbf16>, vector<8x8xbf16>, vector<8x8xf32> -> vector<8x8xf32>
    %cst_97 = arith.constant dense<0xFF800000> : vector<8xf32>
    %242 = vector.multi_reduction <maximumf>, %241, %cst_97 [1] : vector<8x8xf32> to vector<8xf32>
    %243 = vector.shape_cast %242 : vector<8xf32> to vector<8x1xf32>
    %244 = vector.broadcast %243 : vector<8x1xf32> to vector<8x8xf32>
    %245 = arith.subf %241, %244 : vector<8x8xf32>
    %246 = math.exp %245 : vector<8x8xf32>
    %cst_98 = arith.constant dense<0.000000e+00> : vector<8xf32>
    %247 = vector.multi_reduction <add>, %246, %cst_98 [1] : vector<8x8xf32> to vector<8xf32>
    %248 = vector.shape_cast %247 : vector<8xf32> to vector<8x1xf32>
    %249 = tpu.reciprocal %248 {approx = true} : vector<8x1xf32> -> vector<8x1xf32>
    %250 = vector.broadcast %249 : vector<8x1xf32> to vector<8x8xf32>
    %251 = arith.mulf %246, %250 : vector<8x8xf32>
    %252 = vector.extract_strided_slice %234 {offsets = [0, 0], sizes = [8, 8], strides = [1, 1]} : vector<8x32xf32> to vector<8x8xf32>
    %253 = arith.truncf %251 : vector<8x8xf32> to vector<8x8xbf16>
    %254 = arith.truncf %252 : vector<8x8xf32> to vector<8x8xbf16>
    %cst_99 = arith.constant dense<0.000000e+00> : vector<8x8xf32>
    %255 = tpu.matmul %253, %254, %cst_99 {dimension_numbers = #tpu.dot_dimension_numbers<[1], [0], [0], [1], [0, 0, 1, 1], [], []>} : vector<8x8xbf16>, vector<8x8xbf16>, vector<8x8xf32> -> vector<8x8xf32>
    %256 = vector.extract_strided_slice %236 {offsets = [0, 8], sizes = [8, 8], strides = [1, 1]} : vector<8x32xf32> to vector<8x8xf32>
    %257 = vector.extract_strided_slice %225 {offsets = [0, 8], sizes = [8, 8], strides = [1, 1]} : vector<8x32xf32> to vector<8x8xf32>
    %258 = arith.truncf %256 : vector<8x8xf32> to vector<8x8xbf16>
    %259 = arith.truncf %257 : vector<8x8xf32> to vector<8x8xbf16>
    %cst_100 = arith.constant dense<0.000000e+00> : vector<8x8xf32>
    %260 = tpu.matmul %258, %259, %cst_100 {dimension_numbers = #tpu.dot_dimension_numbers<[1], [1], [0], [0], [0, 0, 1, 0], [], []>} : vector<8x8xbf16>, vector<8x8xbf16>, vector<8x8xf32> -> vector<8x8xf32>
    %cst_101 = arith.constant dense<0xFF800000> : vector<8xf32>
    %261 = vector.multi_reduction <maximumf>, %260, %cst_101 [1] : vector<8x8xf32> to vector<8xf32>
    %262 = vector.shape_cast %261 : vector<8xf32> to vector<8x1xf32>
    %263 = vector.broadcast %262 : vector<8x1xf32> to vector<8x8xf32>
    %264 = arith.subf %260, %263 : vector<8x8xf32>
    %265 = math.exp %264 : vector<8x8xf32>
    %cst_102 = arith.constant dense<0.000000e+00> : vector<8xf32>
    %266 = vector.multi_reduction <add>, %265, %cst_102 [1] : vector<8x8xf32> to vector<8xf32>
    %267 = vector.shape_cast %266 : vector<8xf32> to vector<8x1xf32>
    %268 = tpu.reciprocal %267 {approx = true} : vector<8x1xf32> -> vector<8x1xf32>
    %269 = vector.broadcast %268 : vector<8x1xf32> to vector<8x8xf32>
    %270 = arith.mulf %265, %269 : vector<8x8xf32>
    %271 = vector.extract_strided_slice %234 {offsets = [0, 8], sizes = [8, 8], strides = [1, 1]} : vector<8x32xf32> to vector<8x8xf32>
    %272 = arith.truncf %270 : vector<8x8xf32> to vector<8x8xbf16>
    %273 = arith.truncf %271 : vector<8x8xf32> to vector<8x8xbf16>
    %cst_103 = arith.constant dense<0.000000e+00> : vector<8x8xf32>
    %274 = tpu.matmul %272, %273, %cst_103 {dimension_numbers = #tpu.dot_dimension_numbers<[1], [0], [0], [1], [0, 0, 1, 1], [], []>} : vector<8x8xbf16>, vector<8x8xbf16>, vector<8x8xf32> -> vector<8x8xf32>
    %275 = vector.extract_strided_slice %236 {offsets = [0, 16], sizes = [8, 8], strides = [1, 1]} : vector<8x32xf32> to vector<8x8xf32>
    %276 = vector.extract_strided_slice %225 {offsets = [0, 16], sizes = [8, 8], strides = [1, 1]} : vector<8x32xf32> to vector<8x8xf32>
    %277 = arith.truncf %275 : vector<8x8xf32> to vector<8x8xbf16>
    %278 = arith.truncf %276 : vector<8x8xf32> to vector<8x8xbf16>
    %cst_104 = arith.constant dense<0.000000e+00> : vector<8x8xf32>
    %279 = tpu.matmul %277, %278, %cst_104 {dimension_numbers = #tpu.dot_dimension_numbers<[1], [1], [0], [0], [0, 0, 1, 0], [], []>} : vector<8x8xbf16>, vector<8x8xbf16>, vector<8x8xf32> -> vector<8x8xf32>
    %cst_105 = arith.constant dense<0xFF800000> : vector<8xf32>
    %280 = vector.multi_reduction <maximumf>, %279, %cst_105 [1] : vector<8x8xf32> to vector<8xf32>
    %281 = vector.shape_cast %280 : vector<8xf32> to vector<8x1xf32>
    %282 = vector.broadcast %281 : vector<8x1xf32> to vector<8x8xf32>
    %283 = arith.subf %279, %282 : vector<8x8xf32>
    %284 = math.exp %283 : vector<8x8xf32>
    %cst_106 = arith.constant dense<0.000000e+00> : vector<8xf32>
    %285 = vector.multi_reduction <add>, %284, %cst_106 [1] : vector<8x8xf32> to vector<8xf32>
    %286 = vector.shape_cast %285 : vector<8xf32> to vector<8x1xf32>
    %287 = tpu.reciprocal %286 {approx = true} : vector<8x1xf32> -> vector<8x1xf32>
    %288 = vector.broadcast %287 : vector<8x1xf32> to vector<8x8xf32>
    %289 = arith.mulf %284, %288 : vector<8x8xf32>
    %290 = vector.extract_strided_slice %234 {offsets = [0, 16], sizes = [8, 8], strides = [1, 1]} : vector<8x32xf32> to vector<8x8xf32>
    %291 = arith.truncf %289 : vector<8x8xf32> to vector<8x8xbf16>
    %292 = arith.truncf %290 : vector<8x8xf32> to vector<8x8xbf16>
    %cst_107 = arith.constant dense<0.000000e+00> : vector<8x8xf32>
    %293 = tpu.matmul %291, %292, %cst_107 {dimension_numbers = #tpu.dot_dimension_numbers<[1], [0], [0], [1], [0, 0, 1, 1], [], []>} : vector<8x8xbf16>, vector<8x8xbf16>, vector<8x8xf32> -> vector<8x8xf32>
    %294 = vector.extract_strided_slice %236 {offsets = [0, 24], sizes = [8, 8], strides = [1, 1]} : vector<8x32xf32> to vector<8x8xf32>
    %295 = vector.extract_strided_slice %225 {offsets = [0, 24], sizes = [8, 8], strides = [1, 1]} : vector<8x32xf32> to vector<8x8xf32>
    %296 = arith.truncf %294 : vector<8x8xf32> to vector<8x8xbf16>
    %297 = arith.truncf %295 : vector<8x8xf32> to vector<8x8xbf16>
    %cst_108 = arith.constant dense<0.000000e+00> : vector<8x8xf32>
    %298 = tpu.matmul %296, %297, %cst_108 {dimension_numbers = #tpu.dot_dimension_numbers<[1], [1], [0], [0], [0, 0, 1, 0], [], []>} : vector<8x8xbf16>, vector<8x8xbf16>, vector<8x8xf32> -> vector<8x8xf32>
    %cst_109 = arith.constant dense<0xFF800000> : vector<8xf32>
    %299 = vector.multi_reduction <maximumf>, %298, %cst_109 [1] : vector<8x8xf32> to vector<8xf32>
    %300 = vector.shape_cast %299 : vector<8xf32> to vector<8x1xf32>
    %301 = vector.broadcast %300 : vector<8x1xf32> to vector<8x8xf32>
    %302 = arith.subf %298, %301 : vector<8x8xf32>
    %303 = math.exp %302 : vector<8x8xf32>
    %cst_110 = arith.constant dense<0.000000e+00> : vector<8xf32>
    %304 = vector.multi_reduction <add>, %303, %cst_110 [1] : vector<8x8xf32> to vector<8xf32>
    %305 = vector.shape_cast %304 : vector<8xf32> to vector<8x1xf32>
    %306 = tpu.reciprocal %305 {approx = true} : vector<8x1xf32> -> vector<8x1xf32>
    %307 = vector.broadcast %306 : vector<8x1xf32> to vector<8x8xf32>
    %308 = arith.mulf %303, %307 : vector<8x8xf32>
    %309 = vector.extract_strided_slice %234 {offsets = [0, 24], sizes = [8, 8], strides = [1, 1]} : vector<8x32xf32> to vector<8x8xf32>
    %310 = arith.truncf %308 : vector<8x8xf32> to vector<8x8xbf16>
    %311 = arith.truncf %309 : vector<8x8xf32> to vector<8x8xbf16>
    %cst_111 = arith.constant dense<0.000000e+00> : vector<8x8xf32>
    %312 = tpu.matmul %310, %311, %cst_111 {dimension_numbers = #tpu.dot_dimension_numbers<[1], [0], [0], [1], [0, 0, 1, 1], [], []>} : vector<8x8xbf16>, vector<8x8xbf16>, vector<8x8xf32> -> vector<8x8xf32>
    %313 = tpu.concatenate %255, %274, %293, %312 in 1 : vector<8x8xf32>, vector<8x8xf32>, vector<8x8xf32>, vector<8x8xf32> -> vector<8x32xf32>
    %c6 = arith.constant 6 : index
    %c0_112 = arith.constant 0 : index
    %c0_113 = arith.constant 0 : index
    %314 = vector.load %arg8[%c6, %c0_112, %c0_113] : memref<16x32x32xf32, #tpu.memory_space<vmem>>, vector<1x32x32xf32>
    %315 = vector.shape_cast %314 : vector<1x32x32xf32> to vector<32x32xf32>
    %316 = arith.truncf %313 : vector<8x32xf32> to vector<8x32xbf16>
    %317 = arith.truncf %315 : vector<32x32xf32> to vector<32x32xbf16>
    %cst_114 = arith.constant dense<0.000000e+00> : vector<8x32xf32>
    %318 = tpu.matmul %316, %317, %cst_114 {dimension_numbers = #tpu.dot_dimension_numbers<[1], [0], [0], [1], [0, 0, 1, 1], [], []>} : vector<8x32xbf16>, vector<32x32xbf16>, vector<8x32xf32> -> vector<8x32xf32>
    %c15_115 = arith.constant 15 : index
    %c0_116 = arith.constant 0 : index
    %c0_117 = arith.constant 0 : index
    %319 = vector.load %arg7[%c15_115, %c0_116, %c0_117] : memref<38x1x32xf32, #tpu.memory_space<vmem>>, vector<1x1x32xf32>
    %320 = vector.shape_cast %319 : vector<1x1x32xf32> to vector<1x32xf32>
    %321 = vector.broadcast %320 : vector<1x32xf32> to vector<8x32xf32>
    %322 = arith.addf %318, %321 : vector<8x32xf32>
    %323 = arith.addf %212, %322 : vector<8x32xf32>
    %cst_118 = arith.constant dense<0.000000e+00> : vector<8xf32>
    %324 = vector.multi_reduction <add>, %323, %cst_118 [1] : vector<8x32xf32> to vector<8xf32>
    %325 = vector.shape_cast %324 : vector<8xf32> to vector<8x1xf32>
    %cst_119 = arith.constant 3.200000e+01 : f32
    %326 = vector.broadcast %cst_119 : f32 to vector<8x1xf32>
    %327 = arith.divf %325, %326 : vector<8x1xf32>
    %328 = vector.broadcast %327 : vector<8x1xf32> to vector<8x32xf32>
    %329 = arith.subf %323, %328 : vector<8x32xf32>
    %330 = arith.mulf %329, %329 : vector<8x32xf32>
    %cst_120 = arith.constant dense<0.000000e+00> : vector<8xf32>
    %331 = vector.multi_reduction <add>, %330, %cst_120 [1] : vector<8x32xf32> to vector<8xf32>
    %332 = vector.shape_cast %331 : vector<8xf32> to vector<8x1xf32>
    %cst_121 = arith.constant 3.200000e+01 : f32
    %333 = vector.broadcast %cst_121 : f32 to vector<8x1xf32>
    %334 = arith.divf %332, %333 : vector<8x1xf32>
    %335 = vector.broadcast %327 : vector<8x1xf32> to vector<8x32xf32>
    %336 = arith.subf %323, %335 : vector<8x32xf32>
    %cst_122 = arith.constant 9.99999974E-6 : f32
    %337 = vector.broadcast %cst_122 : f32 to vector<8x1xf32>
    %338 = arith.addf %334, %337 : vector<8x1xf32>
    %339 = math.rsqrt %338 : vector<8x1xf32>
    %340 = vector.broadcast %339 : vector<8x1xf32> to vector<8x32xf32>
    %341 = arith.mulf %336, %340 : vector<8x32xf32>
    %c10 = arith.constant 10 : index
    %c0_123 = arith.constant 0 : index
    %c0_124 = arith.constant 0 : index
    %342 = vector.load %arg7[%c10, %c0_123, %c0_124] : memref<38x1x32xf32, #tpu.memory_space<vmem>>, vector<1x1x32xf32>
    %343 = vector.shape_cast %342 : vector<1x1x32xf32> to vector<1x32xf32>
    %344 = vector.broadcast %343 : vector<1x32xf32> to vector<8x32xf32>
    %345 = arith.mulf %341, %344 : vector<8x32xf32>
    %c9 = arith.constant 9 : index
    %c0_125 = arith.constant 0 : index
    %c0_126 = arith.constant 0 : index
    %346 = vector.load %arg7[%c9, %c0_125, %c0_126] : memref<38x1x32xf32, #tpu.memory_space<vmem>>, vector<1x1x32xf32>
    %347 = vector.shape_cast %346 : vector<1x1x32xf32> to vector<1x32xf32>
    %348 = vector.broadcast %347 : vector<1x32xf32> to vector<8x32xf32>
    %349 = arith.addf %345, %348 : vector<8x32xf32>
    %350 = arith.addf %349, %11 : vector<8x32xf32>
    %c4_127 = arith.constant 4 : index
    %c0_128 = arith.constant 0 : index
    %c0_129 = arith.constant 0 : index
    %351 = vector.load %arg8[%c4_127, %c0_128, %c0_129] : memref<16x32x32xf32, #tpu.memory_space<vmem>>, vector<1x32x32xf32>
    %352 = vector.shape_cast %351 : vector<1x32x32xf32> to vector<32x32xf32>
    %353 = arith.truncf %350 : vector<8x32xf32> to vector<8x32xbf16>
    %354 = arith.truncf %352 : vector<32x32xf32> to vector<32x32xbf16>
    %cst_130 = arith.constant dense<0.000000e+00> : vector<8x32xf32>
    %355 = tpu.matmul %353, %354, %cst_130 {dimension_numbers = #tpu.dot_dimension_numbers<[1], [0], [0], [1], [0, 0, 1, 1], [], []>} : vector<8x32xbf16>, vector<32x32xbf16>, vector<8x32xf32> -> vector<8x32xf32>
    %c6_131 = arith.constant 6 : index
    %c0_132 = arith.constant 0 : index
    %c0_133 = arith.constant 0 : index
    %356 = vector.load %arg7[%c6_131, %c0_132, %c0_133] : memref<38x1x32xf32, #tpu.memory_space<vmem>>, vector<1x1x32xf32>
    %357 = vector.shape_cast %356 : vector<1x1x32xf32> to vector<1x32xf32>
    %358 = vector.broadcast %357 : vector<1x32xf32> to vector<8x32xf32>
    %359 = arith.addf %355, %358 : vector<8x32xf32>
    %c2_134 = arith.constant 2 : index
    %c0_135 = arith.constant 0 : index
    %c0_136 = arith.constant 0 : index
    %360 = vector.load %arg8[%c2_134, %c0_135, %c0_136] : memref<16x32x32xf32, #tpu.memory_space<vmem>>, vector<1x32x32xf32>
    %361 = vector.shape_cast %360 : vector<1x32x32xf32> to vector<32x32xf32>
    %362 = arith.truncf %213 : vector<64x32xf32> to vector<64x32xbf16>
    %363 = arith.truncf %361 : vector<32x32xf32> to vector<32x32xbf16>
    %cst_137 = arith.constant dense<0.000000e+00> : vector<64x32xf32>
    %364 = tpu.matmul %362, %363, %cst_137 {dimension_numbers = #tpu.dot_dimension_numbers<[1], [0], [0], [1], [0, 0, 1, 1], [], []>} : vector<64x32xbf16>, vector<32x32xbf16>, vector<64x32xf32> -> vector<64x32xf32>
    %c4_138 = arith.constant 4 : index
    %c0_139 = arith.constant 0 : index
    %c0_140 = arith.constant 0 : index
    %365 = vector.load %arg7[%c4_138, %c0_139, %c0_140] : memref<38x1x32xf32, #tpu.memory_space<vmem>>, vector<1x1x32xf32>
    %366 = vector.shape_cast %365 : vector<1x1x32xf32> to vector<1x32xf32>
    %367 = vector.broadcast %366 : vector<1x32xf32> to vector<64x32xf32>
    %368 = arith.addf %364, %367 : vector<64x32xf32>
    %c5_141 = arith.constant 5 : index
    %c0_142 = arith.constant 0 : index
    %c0_143 = arith.constant 0 : index
    %369 = vector.load %arg8[%c5_141, %c0_142, %c0_143] : memref<16x32x32xf32, #tpu.memory_space<vmem>>, vector<1x32x32xf32>
    %370 = vector.shape_cast %369 : vector<1x32x32xf32> to vector<32x32xf32>
    %371 = arith.truncf %211 : vector<64x32xf32> to vector<64x32xbf16>
    %372 = arith.truncf %370 : vector<32x32xf32> to vector<32x32xbf16>
    %cst_144 = arith.constant dense<0.000000e+00> : vector<64x32xf32>
    %373 = tpu.matmul %371, %372, %cst_144 {dimension_numbers = #tpu.dot_dimension_numbers<[1], [0], [0], [1], [0, 0, 1, 1], [], []>} : vector<64x32xbf16>, vector<32x32xbf16>, vector<64x32xf32> -> vector<64x32xf32>
    %c7_145 = arith.constant 7 : index
    %c0_146 = arith.constant 0 : index
    %c0_147 = arith.constant 0 : index
    %374 = vector.load %arg7[%c7_145, %c0_146, %c0_147] : memref<38x1x32xf32, #tpu.memory_space<vmem>>, vector<1x1x32xf32>
    %375 = vector.shape_cast %374 : vector<1x1x32xf32> to vector<1x32xf32>
    %376 = vector.broadcast %375 : vector<1x32xf32> to vector<64x32xf32>
    %377 = arith.addf %373, %376 : vector<64x32xf32>
    %cst_148 = arith.constant 0.353553385 : f32
    %378 = vector.broadcast %cst_148 : f32 to vector<8x32xf32>
    %379 = arith.mulf %359, %378 : vector<8x32xf32>
    %380 = vector.extract_strided_slice %379 {offsets = [0, 0], sizes = [8, 8], strides = [1, 1]} : vector<8x32xf32> to vector<8x8xf32>
    %381 = vector.extract_strided_slice %368 {offsets = [0, 0], sizes = [64, 8], strides = [1, 1]} : vector<64x32xf32> to vector<64x8xf32>
    %382 = arith.truncf %380 : vector<8x8xf32> to vector<8x8xbf16>
    %383 = arith.truncf %381 : vector<64x8xf32> to vector<64x8xbf16>
    %cst_149 = arith.constant dense<0.000000e+00> : vector<8x64xf32>
    %384 = tpu.matmul %382, %383, %cst_149 {dimension_numbers = #tpu.dot_dimension_numbers<[1], [1], [0], [0], [0, 0, 1, 0], [], []>} : vector<8x8xbf16>, vector<64x8xbf16>, vector<8x64xf32> -> vector<8x64xf32>
    %385 = vector.broadcast %7 : vector<1x64xf32> to vector<8x64xf32>
    %386 = arith.addf %384, %385 : vector<8x64xf32>
    %cst_150 = arith.constant dense<0xFF800000> : vector<8xf32>
    %387 = vector.multi_reduction <maximumf>, %386, %cst_150 [1] : vector<8x64xf32> to vector<8xf32>
    %388 = vector.shape_cast %387 : vector<8xf32> to vector<8x1xf32>
    %389 = vector.broadcast %388 : vector<8x1xf32> to vector<8x64xf32>
    %390 = arith.subf %386, %389 : vector<8x64xf32>
    %391 = math.exp %390 : vector<8x64xf32>
    %cst_151 = arith.constant dense<0.000000e+00> : vector<8xf32>
    %392 = vector.multi_reduction <add>, %391, %cst_151 [1] : vector<8x64xf32> to vector<8xf32>
    %393 = vector.shape_cast %392 : vector<8xf32> to vector<8x1xf32>
    %394 = tpu.reciprocal %393 {approx = true} : vector<8x1xf32> -> vector<8x1xf32>
    %395 = vector.broadcast %394 : vector<8x1xf32> to vector<8x64xf32>
    %396 = arith.mulf %391, %395 : vector<8x64xf32>
    %397 = vector.extract_strided_slice %377 {offsets = [0, 0], sizes = [64, 8], strides = [1, 1]} : vector<64x32xf32> to vector<64x8xf32>
    %398 = arith.truncf %396 : vector<8x64xf32> to vector<8x64xbf16>
    %399 = arith.truncf %397 : vector<64x8xf32> to vector<64x8xbf16>
    %cst_152 = arith.constant dense<0.000000e+00> : vector<8x8xf32>
    %400 = tpu.matmul %398, %399, %cst_152 {dimension_numbers = #tpu.dot_dimension_numbers<[1], [0], [0], [1], [0, 0, 1, 1], [], []>} : vector<8x64xbf16>, vector<64x8xbf16>, vector<8x8xf32> -> vector<8x8xf32>
    %401 = vector.extract_strided_slice %379 {offsets = [0, 8], sizes = [8, 8], strides = [1, 1]} : vector<8x32xf32> to vector<8x8xf32>
    %402 = vector.extract_strided_slice %368 {offsets = [0, 8], sizes = [64, 8], strides = [1, 1]} : vector<64x32xf32> to vector<64x8xf32>
    %403 = arith.truncf %401 : vector<8x8xf32> to vector<8x8xbf16>
    %404 = arith.truncf %402 : vector<64x8xf32> to vector<64x8xbf16>
    %cst_153 = arith.constant dense<0.000000e+00> : vector<8x64xf32>
    %405 = tpu.matmul %403, %404, %cst_153 {dimension_numbers = #tpu.dot_dimension_numbers<[1], [1], [0], [0], [0, 0, 1, 0], [], []>} : vector<8x8xbf16>, vector<64x8xbf16>, vector<8x64xf32> -> vector<8x64xf32>
    %406 = vector.broadcast %7 : vector<1x64xf32> to vector<8x64xf32>
    %407 = arith.addf %405, %406 : vector<8x64xf32>
    %cst_154 = arith.constant dense<0xFF800000> : vector<8xf32>
    %408 = vector.multi_reduction <maximumf>, %407, %cst_154 [1] : vector<8x64xf32> to vector<8xf32>
    %409 = vector.shape_cast %408 : vector<8xf32> to vector<8x1xf32>
    %410 = vector.broadcast %409 : vector<8x1xf32> to vector<8x64xf32>
    %411 = arith.subf %407, %410 : vector<8x64xf32>
    %412 = math.exp %411 : vector<8x64xf32>
    %cst_155 = arith.constant dense<0.000000e+00> : vector<8xf32>
    %413 = vector.multi_reduction <add>, %412, %cst_155 [1] : vector<8x64xf32> to vector<8xf32>
    %414 = vector.shape_cast %413 : vector<8xf32> to vector<8x1xf32>
    %415 = tpu.reciprocal %414 {approx = true} : vector<8x1xf32> -> vector<8x1xf32>
    %416 = vector.broadcast %415 : vector<8x1xf32> to vector<8x64xf32>
    %417 = arith.mulf %412, %416 : vector<8x64xf32>
    %418 = vector.extract_strided_slice %377 {offsets = [0, 8], sizes = [64, 8], strides = [1, 1]} : vector<64x32xf32> to vector<64x8xf32>
    %419 = arith.truncf %417 : vector<8x64xf32> to vector<8x64xbf16>
    %420 = arith.truncf %418 : vector<64x8xf32> to vector<64x8xbf16>
    %cst_156 = arith.constant dense<0.000000e+00> : vector<8x8xf32>
    %421 = tpu.matmul %419, %420, %cst_156 {dimension_numbers = #tpu.dot_dimension_numbers<[1], [0], [0], [1], [0, 0, 1, 1], [], []>} : vector<8x64xbf16>, vector<64x8xbf16>, vector<8x8xf32> -> vector<8x8xf32>
    %422 = vector.extract_strided_slice %379 {offsets = [0, 16], sizes = [8, 8], strides = [1, 1]} : vector<8x32xf32> to vector<8x8xf32>
    %423 = vector.extract_strided_slice %368 {offsets = [0, 16], sizes = [64, 8], strides = [1, 1]} : vector<64x32xf32> to vector<64x8xf32>
    %424 = arith.truncf %422 : vector<8x8xf32> to vector<8x8xbf16>
    %425 = arith.truncf %423 : vector<64x8xf32> to vector<64x8xbf16>
    %cst_157 = arith.constant dense<0.000000e+00> : vector<8x64xf32>
    %426 = tpu.matmul %424, %425, %cst_157 {dimension_numbers = #tpu.dot_dimension_numbers<[1], [1], [0], [0], [0, 0, 1, 0], [], []>} : vector<8x8xbf16>, vector<64x8xbf16>, vector<8x64xf32> -> vector<8x64xf32>
    %427 = vector.broadcast %7 : vector<1x64xf32> to vector<8x64xf32>
    %428 = arith.addf %426, %427 : vector<8x64xf32>
    %cst_158 = arith.constant dense<0xFF800000> : vector<8xf32>
    %429 = vector.multi_reduction <maximumf>, %428, %cst_158 [1] : vector<8x64xf32> to vector<8xf32>
    %430 = vector.shape_cast %429 : vector<8xf32> to vector<8x1xf32>
    %431 = vector.broadcast %430 : vector<8x1xf32> to vector<8x64xf32>
    %432 = arith.subf %428, %431 : vector<8x64xf32>
    %433 = math.exp %432 : vector<8x64xf32>
    %cst_159 = arith.constant dense<0.000000e+00> : vector<8xf32>
    %434 = vector.multi_reduction <add>, %433, %cst_159 [1] : vector<8x64xf32> to vector<8xf32>
    %435 = vector.shape_cast %434 : vector<8xf32> to vector<8x1xf32>
    %436 = tpu.reciprocal %435 {approx = true} : vector<8x1xf32> -> vector<8x1xf32>
    %437 = vector.broadcast %436 : vector<8x1xf32> to vector<8x64xf32>
    %438 = arith.mulf %433, %437 : vector<8x64xf32>
    %439 = vector.extract_strided_slice %377 {offsets = [0, 16], sizes = [64, 8], strides = [1, 1]} : vector<64x32xf32> to vector<64x8xf32>
    %440 = arith.truncf %438 : vector<8x64xf32> to vector<8x64xbf16>
    %441 = arith.truncf %439 : vector<64x8xf32> to vector<64x8xbf16>
    %cst_160 = arith.constant dense<0.000000e+00> : vector<8x8xf32>
    %442 = tpu.matmul %440, %441, %cst_160 {dimension_numbers = #tpu.dot_dimension_numbers<[1], [0], [0], [1], [0, 0, 1, 1], [], []>} : vector<8x64xbf16>, vector<64x8xbf16>, vector<8x8xf32> -> vector<8x8xf32>
    %443 = vector.extract_strided_slice %379 {offsets = [0, 24], sizes = [8, 8], strides = [1, 1]} : vector<8x32xf32> to vector<8x8xf32>
    %444 = vector.extract_strided_slice %368 {offsets = [0, 24], sizes = [64, 8], strides = [1, 1]} : vector<64x32xf32> to vector<64x8xf32>
    %445 = arith.truncf %443 : vector<8x8xf32> to vector<8x8xbf16>
    %446 = arith.truncf %444 : vector<64x8xf32> to vector<64x8xbf16>
    %cst_161 = arith.constant dense<0.000000e+00> : vector<8x64xf32>
    %447 = tpu.matmul %445, %446, %cst_161 {dimension_numbers = #tpu.dot_dimension_numbers<[1], [1], [0], [0], [0, 0, 1, 0], [], []>} : vector<8x8xbf16>, vector<64x8xbf16>, vector<8x64xf32> -> vector<8x64xf32>
    %448 = vector.broadcast %7 : vector<1x64xf32> to vector<8x64xf32>
    %449 = arith.addf %447, %448 : vector<8x64xf32>
    %cst_162 = arith.constant dense<0xFF800000> : vector<8xf32>
    %450 = vector.multi_reduction <maximumf>, %449, %cst_162 [1] : vector<8x64xf32> to vector<8xf32>
    %451 = vector.shape_cast %450 : vector<8xf32> to vector<8x1xf32>
    %452 = vector.broadcast %451 : vector<8x1xf32> to vector<8x64xf32>
    %453 = arith.subf %449, %452 : vector<8x64xf32>
    %454 = math.exp %453 : vector<8x64xf32>
    %cst_163 = arith.constant dense<0.000000e+00> : vector<8xf32>
    %455 = vector.multi_reduction <add>, %454, %cst_163 [1] : vector<8x64xf32> to vector<8xf32>
    %456 = vector.shape_cast %455 : vector<8xf32> to vector<8x1xf32>
    %457 = tpu.reciprocal %456 {approx = true} : vector<8x1xf32> -> vector<8x1xf32>
    %458 = vector.broadcast %457 : vector<8x1xf32> to vector<8x64xf32>
    %459 = arith.mulf %454, %458 : vector<8x64xf32>
    %460 = vector.extract_strided_slice %377 {offsets = [0, 24], sizes = [64, 8], strides = [1, 1]} : vector<64x32xf32> to vector<64x8xf32>
    %461 = arith.truncf %459 : vector<8x64xf32> to vector<8x64xbf16>
    %462 = arith.truncf %460 : vector<64x8xf32> to vector<64x8xbf16>
    %cst_164 = arith.constant dense<0.000000e+00> : vector<8x8xf32>
    %463 = tpu.matmul %461, %462, %cst_164 {dimension_numbers = #tpu.dot_dimension_numbers<[1], [0], [0], [1], [0, 0, 1, 1], [], []>} : vector<8x64xbf16>, vector<64x8xbf16>, vector<8x8xf32> -> vector<8x8xf32>
    %464 = tpu.concatenate %400, %421, %442, %463 in 1 : vector<8x8xf32>, vector<8x8xf32>, vector<8x8xf32>, vector<8x8xf32> -> vector<8x32xf32>
    %c3 = arith.constant 3 : index
    %c0_165 = arith.constant 0 : index
    %c0_166 = arith.constant 0 : index
    %465 = vector.load %arg8[%c3, %c0_165, %c0_166] : memref<16x32x32xf32, #tpu.memory_space<vmem>>, vector<1x32x32xf32>
    %466 = vector.shape_cast %465 : vector<1x32x32xf32> to vector<32x32xf32>
    %467 = arith.truncf %464 : vector<8x32xf32> to vector<8x32xbf16>
    %468 = arith.truncf %466 : vector<32x32xf32> to vector<32x32xbf16>
    %cst_167 = arith.constant dense<0.000000e+00> : vector<8x32xf32>
    %469 = tpu.matmul %467, %468, %cst_167 {dimension_numbers = #tpu.dot_dimension_numbers<[1], [0], [0], [1], [0, 0, 1, 1], [], []>} : vector<8x32xbf16>, vector<32x32xbf16>, vector<8x32xf32> -> vector<8x32xf32>
    %c5_168 = arith.constant 5 : index
    %c0_169 = arith.constant 0 : index
    %c0_170 = arith.constant 0 : index
    %470 = vector.load %arg7[%c5_168, %c0_169, %c0_170] : memref<38x1x32xf32, #tpu.memory_space<vmem>>, vector<1x1x32xf32>
    %471 = vector.shape_cast %470 : vector<1x1x32xf32> to vector<1x32xf32>
    %472 = vector.broadcast %471 : vector<1x32xf32> to vector<8x32xf32>
    %473 = arith.addf %469, %472 : vector<8x32xf32>
    %474 = arith.addf %349, %473 : vector<8x32xf32>
    %cst_171 = arith.constant dense<0.000000e+00> : vector<8xf32>
    %475 = vector.multi_reduction <add>, %474, %cst_171 [1] : vector<8x32xf32> to vector<8xf32>
    %476 = vector.shape_cast %475 : vector<8xf32> to vector<8x1xf32>
    %cst_172 = arith.constant 3.200000e+01 : f32
    %477 = vector.broadcast %cst_172 : f32 to vector<8x1xf32>
    %478 = arith.divf %476, %477 : vector<8x1xf32>
    %479 = vector.broadcast %478 : vector<8x1xf32> to vector<8x32xf32>
    %480 = arith.subf %474, %479 : vector<8x32xf32>
    %481 = arith.mulf %480, %480 : vector<8x32xf32>
    %cst_173 = arith.constant dense<0.000000e+00> : vector<8xf32>
    %482 = vector.multi_reduction <add>, %481, %cst_173 [1] : vector<8x32xf32> to vector<8xf32>
    %483 = vector.shape_cast %482 : vector<8xf32> to vector<8x1xf32>
    %cst_174 = arith.constant 3.200000e+01 : f32
    %484 = vector.broadcast %cst_174 : f32 to vector<8x1xf32>
    %485 = arith.divf %483, %484 : vector<8x1xf32>
    %486 = vector.broadcast %478 : vector<8x1xf32> to vector<8x32xf32>
    %487 = arith.subf %474, %486 : vector<8x32xf32>
    %cst_175 = arith.constant 9.99999974E-6 : f32
    %488 = vector.broadcast %cst_175 : f32 to vector<8x1xf32>
    %489 = arith.addf %485, %488 : vector<8x1xf32>
    %490 = math.rsqrt %489 : vector<8x1xf32>
    %491 = vector.broadcast %490 : vector<8x1xf32> to vector<8x32xf32>
    %492 = arith.mulf %487, %491 : vector<8x32xf32>
    %c12 = arith.constant 12 : index
    %c0_176 = arith.constant 0 : index
    %c0_177 = arith.constant 0 : index
    %493 = vector.load %arg7[%c12, %c0_176, %c0_177] : memref<38x1x32xf32, #tpu.memory_space<vmem>>, vector<1x1x32xf32>
    %494 = vector.shape_cast %493 : vector<1x1x32xf32> to vector<1x32xf32>
    %495 = vector.broadcast %494 : vector<1x32xf32> to vector<8x32xf32>
    %496 = arith.mulf %492, %495 : vector<8x32xf32>
    %c11 = arith.constant 11 : index
    %c0_178 = arith.constant 0 : index
    %c0_179 = arith.constant 0 : index
    %497 = vector.load %arg7[%c11, %c0_178, %c0_179] : memref<38x1x32xf32, #tpu.memory_space<vmem>>, vector<1x1x32xf32>
    %498 = vector.shape_cast %497 : vector<1x1x32xf32> to vector<1x32xf32>
    %499 = vector.broadcast %498 : vector<1x32xf32> to vector<8x32xf32>
    %500 = arith.addf %496, %499 : vector<8x32xf32>
    %c0_180 = arith.constant 0 : index
    %c0_181 = arith.constant 0 : index
    %c0_182 = arith.constant 0 : index
    %501 = vector.load %arg12[%c0_180, %c0_181, %c0_182] : memref<6x32x64xf32, #tpu.memory_space<vmem>>, vector<1x32x64xf32>
    %502 = vector.shape_cast %501 : vector<1x32x64xf32> to vector<32x64xf32>
    %503 = arith.truncf %500 : vector<8x32xf32> to vector<8x32xbf16>
    %504 = arith.truncf %502 : vector<32x64xf32> to vector<32x64xbf16>
    %cst_183 = arith.constant dense<0.000000e+00> : vector<8x64xf32>
    %505 = tpu.matmul %503, %504, %cst_183 {dimension_numbers = #tpu.dot_dimension_numbers<[1], [0], [0], [1], [0, 0, 1, 1], [], []>} : vector<8x32xbf16>, vector<32x64xbf16>, vector<8x64xf32> -> vector<8x64xf32>
    %c0_184 = arith.constant 0 : index
    %c0_185 = arith.constant 0 : index
    %c0_186 = arith.constant 0 : index
    %506 = vector.load %arg11[%c0_184, %c0_185, %c0_186] : memref<6x1x64xf32, #tpu.memory_space<vmem>>, vector<1x1x64xf32>
    %507 = vector.shape_cast %506 : vector<1x1x64xf32> to vector<1x64xf32>
    %508 = vector.broadcast %507 : vector<1x64xf32> to vector<8x64xf32>
    %509 = arith.addf %505, %508 : vector<8x64xf32>
    %cst_187 = arith.constant 0.000000e+00 : f32
    %510 = vector.broadcast %cst_187 : f32 to vector<8x64xf32>
    %511 = arith.maximumf %509, %510 : vector<8x64xf32>
    %c0_188 = arith.constant 0 : index
    %c0_189 = arith.constant 0 : index
    %c0_190 = arith.constant 0 : index
    %512 = vector.load %arg13[%c0_188, %c0_189, %c0_190] : memref<3x64x32xf32, #tpu.memory_space<vmem>>, vector<1x64x32xf32>
    %513 = vector.shape_cast %512 : vector<1x64x32xf32> to vector<64x32xf32>
    %514 = arith.truncf %511 : vector<8x64xf32> to vector<8x64xbf16>
    %515 = arith.truncf %513 : vector<64x32xf32> to vector<64x32xbf16>
    %cst_191 = arith.constant dense<0.000000e+00> : vector<8x32xf32>
    %516 = tpu.matmul %514, %515, %cst_191 {dimension_numbers = #tpu.dot_dimension_numbers<[1], [0], [0], [1], [0, 0, 1, 1], [], []>} : vector<8x64xbf16>, vector<64x32xbf16>, vector<8x32xf32> -> vector<8x32xf32>
    %c8 = arith.constant 8 : index
    %c0_192 = arith.constant 0 : index
    %c0_193 = arith.constant 0 : index
    %517 = vector.load %arg7[%c8, %c0_192, %c0_193] : memref<38x1x32xf32, #tpu.memory_space<vmem>>, vector<1x1x32xf32>
    %518 = vector.shape_cast %517 : vector<1x1x32xf32> to vector<1x32xf32>
    %519 = vector.broadcast %518 : vector<1x32xf32> to vector<8x32xf32>
    %520 = arith.addf %516, %519 : vector<8x32xf32>
    %521 = arith.addf %500, %520 : vector<8x32xf32>
    %cst_194 = arith.constant dense<0.000000e+00> : vector<8xf32>
    %522 = vector.multi_reduction <add>, %521, %cst_194 [1] : vector<8x32xf32> to vector<8xf32>
    %523 = vector.shape_cast %522 : vector<8xf32> to vector<8x1xf32>
    %cst_195 = arith.constant 3.200000e+01 : f32
    %524 = vector.broadcast %cst_195 : f32 to vector<8x1xf32>
    %525 = arith.divf %523, %524 : vector<8x1xf32>
    %526 = vector.broadcast %525 : vector<8x1xf32> to vector<8x32xf32>
    %527 = arith.subf %521, %526 : vector<8x32xf32>
    %528 = arith.mulf %527, %527 : vector<8x32xf32>
    %cst_196 = arith.constant dense<0.000000e+00> : vector<8xf32>
    %529 = vector.multi_reduction <add>, %528, %cst_196 [1] : vector<8x32xf32> to vector<8xf32>
    %530 = vector.shape_cast %529 : vector<8xf32> to vector<8x1xf32>
    %cst_197 = arith.constant 3.200000e+01 : f32
    %531 = vector.broadcast %cst_197 : f32 to vector<8x1xf32>
    %532 = arith.divf %530, %531 : vector<8x1xf32>
    %533 = vector.broadcast %525 : vector<8x1xf32> to vector<8x32xf32>
    %534 = arith.subf %521, %533 : vector<8x32xf32>
    %cst_198 = arith.constant 9.99999974E-6 : f32
    %535 = vector.broadcast %cst_198 : f32 to vector<8x1xf32>
    %536 = arith.addf %532, %535 : vector<8x1xf32>
    %537 = math.rsqrt %536 : vector<8x1xf32>
    %538 = vector.broadcast %537 : vector<8x1xf32> to vector<8x32xf32>
    %539 = arith.mulf %534, %538 : vector<8x32xf32>
    %c14_199 = arith.constant 14 : index
    %c0_200 = arith.constant 0 : index
    %c0_201 = arith.constant 0 : index
    %540 = vector.load %arg7[%c14_199, %c0_200, %c0_201] : memref<38x1x32xf32, #tpu.memory_space<vmem>>, vector<1x1x32xf32>
    %541 = vector.shape_cast %540 : vector<1x1x32xf32> to vector<1x32xf32>
    %542 = vector.broadcast %541 : vector<1x32xf32> to vector<8x32xf32>
    %543 = arith.mulf %539, %542 : vector<8x32xf32>
    %c13 = arith.constant 13 : index
    %c0_202 = arith.constant 0 : index
    %c0_203 = arith.constant 0 : index
    %544 = vector.load %arg7[%c13, %c0_202, %c0_203] : memref<38x1x32xf32, #tpu.memory_space<vmem>>, vector<1x1x32xf32>
    %545 = vector.shape_cast %544 : vector<1x1x32xf32> to vector<1x32xf32>
    %546 = vector.broadcast %545 : vector<1x32xf32> to vector<8x32xf32>
    %547 = arith.addf %543, %546 : vector<8x32xf32>
    %548 = arith.addf %547, %11 : vector<8x32xf32>
    %c3_204 = arith.constant 3 : index
    %c0_205 = arith.constant 0 : index
    %c0_206 = arith.constant 0 : index
    %549 = vector.load %arg12[%c3_204, %c0_205, %c0_206] : memref<6x32x64xf32, #tpu.memory_space<vmem>>, vector<1x32x64xf32>
    %550 = vector.shape_cast %549 : vector<1x32x64xf32> to vector<32x64xf32>
    %551 = arith.truncf %548 : vector<8x32xf32> to vector<8x32xbf16>
    %552 = arith.truncf %550 : vector<32x64xf32> to vector<32x64xbf16>
    %cst_207 = arith.constant dense<0.000000e+00> : vector<8x64xf32>
    %553 = tpu.matmul %551, %552, %cst_207 {dimension_numbers = #tpu.dot_dimension_numbers<[1], [0], [0], [1], [0, 0, 1, 1], [], []>} : vector<8x32xbf16>, vector<32x64xbf16>, vector<8x64xf32> -> vector<8x64xf32>
    %c3_208 = arith.constant 3 : index
    %c0_209 = arith.constant 0 : index
    %c0_210 = arith.constant 0 : index
    %554 = vector.load %arg11[%c3_208, %c0_209, %c0_210] : memref<6x1x64xf32, #tpu.memory_space<vmem>>, vector<1x1x64xf32>
    %555 = vector.shape_cast %554 : vector<1x1x64xf32> to vector<1x64xf32>
    %556 = vector.broadcast %555 : vector<1x64xf32> to vector<8x64xf32>
    %557 = arith.addf %553, %556 : vector<8x64xf32>
    %558 = vector.extract_strided_slice %557 {offsets = [0, 0], sizes = [8, 32], strides = [1, 1]} : vector<8x64xf32> to vector<8x32xf32>
    %559 = vector.extract_strided_slice %557 {offsets = [0, 32], sizes = [8, 32], strides = [1, 1]} : vector<8x64xf32> to vector<8x32xf32>
    %c13_211 = arith.constant 13 : index
    %c0_212 = arith.constant 0 : index
    %c0_213 = arith.constant 0 : index
    %560 = vector.load %arg8[%c13_211, %c0_212, %c0_213] : memref<16x32x32xf32, #tpu.memory_space<vmem>>, vector<1x32x32xf32>
    %561 = vector.shape_cast %560 : vector<1x32x32xf32> to vector<32x32xf32>
    %562 = arith.truncf %547 : vector<8x32xf32> to vector<8x32xbf16>
    %563 = arith.truncf %561 : vector<32x32xf32> to vector<32x32xbf16>
    %cst_214 = arith.constant dense<0.000000e+00> : vector<8x32xf32>
    %564 = tpu.matmul %562, %563, %cst_214 {dimension_numbers = #tpu.dot_dimension_numbers<[1], [0], [0], [1], [0, 0, 1, 1], [], []>} : vector<8x32xbf16>, vector<32x32xbf16>, vector<8x32xf32> -> vector<8x32xf32>
    %c29 = arith.constant 29 : index
    %c0_215 = arith.constant 0 : index
    %c0_216 = arith.constant 0 : index
    %565 = vector.load %arg7[%c29, %c0_215, %c0_216] : memref<38x1x32xf32, #tpu.memory_space<vmem>>, vector<1x1x32xf32>
    %566 = vector.shape_cast %565 : vector<1x1x32xf32> to vector<1x32xf32>
    %567 = vector.broadcast %566 : vector<1x32xf32> to vector<8x32xf32>
    %568 = arith.addf %564, %567 : vector<8x32xf32>
    %cst_217 = arith.constant 0.353553385 : f32
    %569 = vector.broadcast %cst_217 : f32 to vector<8x32xf32>
    %570 = arith.mulf %558, %569 : vector<8x32xf32>
    %571 = vector.extract_strided_slice %570 {offsets = [0, 0], sizes = [8, 8], strides = [1, 1]} : vector<8x32xf32> to vector<8x8xf32>
    %572 = vector.extract_strided_slice %559 {offsets = [0, 0], sizes = [8, 8], strides = [1, 1]} : vector<8x32xf32> to vector<8x8xf32>
    %573 = arith.truncf %571 : vector<8x8xf32> to vector<8x8xbf16>
    %574 = arith.truncf %572 : vector<8x8xf32> to vector<8x8xbf16>
    %cst_218 = arith.constant dense<0.000000e+00> : vector<8x8xf32>
    %575 = tpu.matmul %573, %574, %cst_218 {dimension_numbers = #tpu.dot_dimension_numbers<[1], [1], [0], [0], [0, 0, 1, 0], [], []>} : vector<8x8xbf16>, vector<8x8xbf16>, vector<8x8xf32> -> vector<8x8xf32>
    %cst_219 = arith.constant dense<0xFF800000> : vector<8xf32>
    %576 = vector.multi_reduction <maximumf>, %575, %cst_219 [1] : vector<8x8xf32> to vector<8xf32>
    %577 = vector.shape_cast %576 : vector<8xf32> to vector<8x1xf32>
    %578 = vector.broadcast %577 : vector<8x1xf32> to vector<8x8xf32>
    %579 = arith.subf %575, %578 : vector<8x8xf32>
    %580 = math.exp %579 : vector<8x8xf32>
    %cst_220 = arith.constant dense<0.000000e+00> : vector<8xf32>
    %581 = vector.multi_reduction <add>, %580, %cst_220 [1] : vector<8x8xf32> to vector<8xf32>
    %582 = vector.shape_cast %581 : vector<8xf32> to vector<8x1xf32>
    %583 = tpu.reciprocal %582 {approx = true} : vector<8x1xf32> -> vector<8x1xf32>
    %584 = vector.broadcast %583 : vector<8x1xf32> to vector<8x8xf32>
    %585 = arith.mulf %580, %584 : vector<8x8xf32>
    %586 = vector.extract_strided_slice %568 {offsets = [0, 0], sizes = [8, 8], strides = [1, 1]} : vector<8x32xf32> to vector<8x8xf32>
    %587 = arith.truncf %585 : vector<8x8xf32> to vector<8x8xbf16>
    %588 = arith.truncf %586 : vector<8x8xf32> to vector<8x8xbf16>
    %cst_221 = arith.constant dense<0.000000e+00> : vector<8x8xf32>
    %589 = tpu.matmul %587, %588, %cst_221 {dimension_numbers = #tpu.dot_dimension_numbers<[1], [0], [0], [1], [0, 0, 1, 1], [], []>} : vector<8x8xbf16>, vector<8x8xbf16>, vector<8x8xf32> -> vector<8x8xf32>
    %590 = vector.extract_strided_slice %570 {offsets = [0, 8], sizes = [8, 8], strides = [1, 1]} : vector<8x32xf32> to vector<8x8xf32>
    %591 = vector.extract_strided_slice %559 {offsets = [0, 8], sizes = [8, 8], strides = [1, 1]} : vector<8x32xf32> to vector<8x8xf32>
    %592 = arith.truncf %590 : vector<8x8xf32> to vector<8x8xbf16>
    %593 = arith.truncf %591 : vector<8x8xf32> to vector<8x8xbf16>
    %cst_222 = arith.constant dense<0.000000e+00> : vector<8x8xf32>
    %594 = tpu.matmul %592, %593, %cst_222 {dimension_numbers = #tpu.dot_dimension_numbers<[1], [1], [0], [0], [0, 0, 1, 0], [], []>} : vector<8x8xbf16>, vector<8x8xbf16>, vector<8x8xf32> -> vector<8x8xf32>
    %cst_223 = arith.constant dense<0xFF800000> : vector<8xf32>
    %595 = vector.multi_reduction <maximumf>, %594, %cst_223 [1] : vector<8x8xf32> to vector<8xf32>
    %596 = vector.shape_cast %595 : vector<8xf32> to vector<8x1xf32>
    %597 = vector.broadcast %596 : vector<8x1xf32> to vector<8x8xf32>
    %598 = arith.subf %594, %597 : vector<8x8xf32>
    %599 = math.exp %598 : vector<8x8xf32>
    %cst_224 = arith.constant dense<0.000000e+00> : vector<8xf32>
    %600 = vector.multi_reduction <add>, %599, %cst_224 [1] : vector<8x8xf32> to vector<8xf32>
    %601 = vector.shape_cast %600 : vector<8xf32> to vector<8x1xf32>
    %602 = tpu.reciprocal %601 {approx = true} : vector<8x1xf32> -> vector<8x1xf32>
    %603 = vector.broadcast %602 : vector<8x1xf32> to vector<8x8xf32>
    %604 = arith.mulf %599, %603 : vector<8x8xf32>
    %605 = vector.extract_strided_slice %568 {offsets = [0, 8], sizes = [8, 8], strides = [1, 1]} : vector<8x32xf32> to vector<8x8xf32>
    %606 = arith.truncf %604 : vector<8x8xf32> to vector<8x8xbf16>
    %607 = arith.truncf %605 : vector<8x8xf32> to vector<8x8xbf16>
    %cst_225 = arith.constant dense<0.000000e+00> : vector<8x8xf32>
    %608 = tpu.matmul %606, %607, %cst_225 {dimension_numbers = #tpu.dot_dimension_numbers<[1], [0], [0], [1], [0, 0, 1, 1], [], []>} : vector<8x8xbf16>, vector<8x8xbf16>, vector<8x8xf32> -> vector<8x8xf32>
    %609 = vector.extract_strided_slice %570 {offsets = [0, 16], sizes = [8, 8], strides = [1, 1]} : vector<8x32xf32> to vector<8x8xf32>
    %610 = vector.extract_strided_slice %559 {offsets = [0, 16], sizes = [8, 8], strides = [1, 1]} : vector<8x32xf32> to vector<8x8xf32>
    %611 = arith.truncf %609 : vector<8x8xf32> to vector<8x8xbf16>
    %612 = arith.truncf %610 : vector<8x8xf32> to vector<8x8xbf16>
    %cst_226 = arith.constant dense<0.000000e+00> : vector<8x8xf32>
    %613 = tpu.matmul %611, %612, %cst_226 {dimension_numbers = #tpu.dot_dimension_numbers<[1], [1], [0], [0], [0, 0, 1, 0], [], []>} : vector<8x8xbf16>, vector<8x8xbf16>, vector<8x8xf32> -> vector<8x8xf32>
    %cst_227 = arith.constant dense<0xFF800000> : vector<8xf32>
    %614 = vector.multi_reduction <maximumf>, %613, %cst_227 [1] : vector<8x8xf32> to vector<8xf32>
    %615 = vector.shape_cast %614 : vector<8xf32> to vector<8x1xf32>
    %616 = vector.broadcast %615 : vector<8x1xf32> to vector<8x8xf32>
    %617 = arith.subf %613, %616 : vector<8x8xf32>
    %618 = math.exp %617 : vector<8x8xf32>
    %cst_228 = arith.constant dense<0.000000e+00> : vector<8xf32>
    %619 = vector.multi_reduction <add>, %618, %cst_228 [1] : vector<8x8xf32> to vector<8xf32>
    %620 = vector.shape_cast %619 : vector<8xf32> to vector<8x1xf32>
    %621 = tpu.reciprocal %620 {approx = true} : vector<8x1xf32> -> vector<8x1xf32>
    %622 = vector.broadcast %621 : vector<8x1xf32> to vector<8x8xf32>
    %623 = arith.mulf %618, %622 : vector<8x8xf32>
    %624 = vector.extract_strided_slice %568 {offsets = [0, 16], sizes = [8, 8], strides = [1, 1]} : vector<8x32xf32> to vector<8x8xf32>
    %625 = arith.truncf %623 : vector<8x8xf32> to vector<8x8xbf16>
    %626 = arith.truncf %624 : vector<8x8xf32> to vector<8x8xbf16>
    %cst_229 = arith.constant dense<0.000000e+00> : vector<8x8xf32>
    %627 = tpu.matmul %625, %626, %cst_229 {dimension_numbers = #tpu.dot_dimension_numbers<[1], [0], [0], [1], [0, 0, 1, 1], [], []>} : vector<8x8xbf16>, vector<8x8xbf16>, vector<8x8xf32> -> vector<8x8xf32>
    %628 = vector.extract_strided_slice %570 {offsets = [0, 24], sizes = [8, 8], strides = [1, 1]} : vector<8x32xf32> to vector<8x8xf32>
    %629 = vector.extract_strided_slice %559 {offsets = [0, 24], sizes = [8, 8], strides = [1, 1]} : vector<8x32xf32> to vector<8x8xf32>
    %630 = arith.truncf %628 : vector<8x8xf32> to vector<8x8xbf16>
    %631 = arith.truncf %629 : vector<8x8xf32> to vector<8x8xbf16>
    %cst_230 = arith.constant dense<0.000000e+00> : vector<8x8xf32>
    %632 = tpu.matmul %630, %631, %cst_230 {dimension_numbers = #tpu.dot_dimension_numbers<[1], [1], [0], [0], [0, 0, 1, 0], [], []>} : vector<8x8xbf16>, vector<8x8xbf16>, vector<8x8xf32> -> vector<8x8xf32>
    %cst_231 = arith.constant dense<0xFF800000> : vector<8xf32>
    %633 = vector.multi_reduction <maximumf>, %632, %cst_231 [1] : vector<8x8xf32> to vector<8xf32>
    %634 = vector.shape_cast %633 : vector<8xf32> to vector<8x1xf32>
    %635 = vector.broadcast %634 : vector<8x1xf32> to vector<8x8xf32>
    %636 = arith.subf %632, %635 : vector<8x8xf32>
    %637 = math.exp %636 : vector<8x8xf32>
    %cst_232 = arith.constant dense<0.000000e+00> : vector<8xf32>
    %638 = vector.multi_reduction <add>, %637, %cst_232 [1] : vector<8x8xf32> to vector<8xf32>
    %639 = vector.shape_cast %638 : vector<8xf32> to vector<8x1xf32>
    %640 = tpu.reciprocal %639 {approx = true} : vector<8x1xf32> -> vector<8x1xf32>
    %641 = vector.broadcast %640 : vector<8x1xf32> to vector<8x8xf32>
    %642 = arith.mulf %637, %641 : vector<8x8xf32>
    %643 = vector.extract_strided_slice %568 {offsets = [0, 24], sizes = [8, 8], strides = [1, 1]} : vector<8x32xf32> to vector<8x8xf32>
    %644 = arith.truncf %642 : vector<8x8xf32> to vector<8x8xbf16>
    %645 = arith.truncf %643 : vector<8x8xf32> to vector<8x8xbf16>
    %cst_233 = arith.constant dense<0.000000e+00> : vector<8x8xf32>
    %646 = tpu.matmul %644, %645, %cst_233 {dimension_numbers = #tpu.dot_dimension_numbers<[1], [0], [0], [1], [0, 0, 1, 1], [], []>} : vector<8x8xbf16>, vector<8x8xbf16>, vector<8x8xf32> -> vector<8x8xf32>
    %647 = tpu.concatenate %589, %608, %627, %646 in 1 : vector<8x8xf32>, vector<8x8xf32>, vector<8x8xf32>, vector<8x8xf32> -> vector<8x32xf32>
    %c12_234 = arith.constant 12 : index
    %c0_235 = arith.constant 0 : index
    %c0_236 = arith.constant 0 : index
    %648 = vector.load %arg8[%c12_234, %c0_235, %c0_236] : memref<16x32x32xf32, #tpu.memory_space<vmem>>, vector<1x32x32xf32>
    %649 = vector.shape_cast %648 : vector<1x32x32xf32> to vector<32x32xf32>
    %650 = arith.truncf %647 : vector<8x32xf32> to vector<8x32xbf16>
    %651 = arith.truncf %649 : vector<32x32xf32> to vector<32x32xbf16>
    %cst_237 = arith.constant dense<0.000000e+00> : vector<8x32xf32>
    %652 = tpu.matmul %650, %651, %cst_237 {dimension_numbers = #tpu.dot_dimension_numbers<[1], [0], [0], [1], [0, 0, 1, 1], [], []>} : vector<8x32xbf16>, vector<32x32xbf16>, vector<8x32xf32> -> vector<8x32xf32>
    %c28 = arith.constant 28 : index
    %c0_238 = arith.constant 0 : index
    %c0_239 = arith.constant 0 : index
    %653 = vector.load %arg7[%c28, %c0_238, %c0_239] : memref<38x1x32xf32, #tpu.memory_space<vmem>>, vector<1x1x32xf32>
    %654 = vector.shape_cast %653 : vector<1x1x32xf32> to vector<1x32xf32>
    %655 = vector.broadcast %654 : vector<1x32xf32> to vector<8x32xf32>
    %656 = arith.addf %652, %655 : vector<8x32xf32>
    %657 = arith.addf %547, %656 : vector<8x32xf32>
    %cst_240 = arith.constant dense<0.000000e+00> : vector<8xf32>
    %658 = vector.multi_reduction <add>, %657, %cst_240 [1] : vector<8x32xf32> to vector<8xf32>
    %659 = vector.shape_cast %658 : vector<8xf32> to vector<8x1xf32>
    %cst_241 = arith.constant 3.200000e+01 : f32
    %660 = vector.broadcast %cst_241 : f32 to vector<8x1xf32>
    %661 = arith.divf %659, %660 : vector<8x1xf32>
    %662 = vector.broadcast %661 : vector<8x1xf32> to vector<8x32xf32>
    %663 = arith.subf %657, %662 : vector<8x32xf32>
    %664 = arith.mulf %663, %663 : vector<8x32xf32>
    %cst_242 = arith.constant dense<0.000000e+00> : vector<8xf32>
    %665 = vector.multi_reduction <add>, %664, %cst_242 [1] : vector<8x32xf32> to vector<8xf32>
    %666 = vector.shape_cast %665 : vector<8xf32> to vector<8x1xf32>
    %cst_243 = arith.constant 3.200000e+01 : f32
    %667 = vector.broadcast %cst_243 : f32 to vector<8x1xf32>
    %668 = arith.divf %666, %667 : vector<8x1xf32>
    %669 = vector.broadcast %661 : vector<8x1xf32> to vector<8x32xf32>
    %670 = arith.subf %657, %669 : vector<8x32xf32>
    %cst_244 = arith.constant 9.99999974E-6 : f32
    %671 = vector.broadcast %cst_244 : f32 to vector<8x1xf32>
    %672 = arith.addf %668, %671 : vector<8x1xf32>
    %673 = math.rsqrt %672 : vector<8x1xf32>
    %674 = vector.broadcast %673 : vector<8x1xf32> to vector<8x32xf32>
    %675 = arith.mulf %670, %674 : vector<8x32xf32>
    %c23 = arith.constant 23 : index
    %c0_245 = arith.constant 0 : index
    %c0_246 = arith.constant 0 : index
    %676 = vector.load %arg7[%c23, %c0_245, %c0_246] : memref<38x1x32xf32, #tpu.memory_space<vmem>>, vector<1x1x32xf32>
    %677 = vector.shape_cast %676 : vector<1x1x32xf32> to vector<1x32xf32>
    %678 = vector.broadcast %677 : vector<1x32xf32> to vector<8x32xf32>
    %679 = arith.mulf %675, %678 : vector<8x32xf32>
    %c22 = arith.constant 22 : index
    %c0_247 = arith.constant 0 : index
    %c0_248 = arith.constant 0 : index
    %680 = vector.load %arg7[%c22, %c0_247, %c0_248] : memref<38x1x32xf32, #tpu.memory_space<vmem>>, vector<1x1x32xf32>
    %681 = vector.shape_cast %680 : vector<1x1x32xf32> to vector<1x32xf32>
    %682 = vector.broadcast %681 : vector<1x32xf32> to vector<8x32xf32>
    %683 = arith.addf %679, %682 : vector<8x32xf32>
    %684 = arith.addf %683, %11 : vector<8x32xf32>
    %c10_249 = arith.constant 10 : index
    %c0_250 = arith.constant 0 : index
    %c0_251 = arith.constant 0 : index
    %685 = vector.load %arg8[%c10_249, %c0_250, %c0_251] : memref<16x32x32xf32, #tpu.memory_space<vmem>>, vector<1x32x32xf32>
    %686 = vector.shape_cast %685 : vector<1x32x32xf32> to vector<32x32xf32>
    %687 = arith.truncf %684 : vector<8x32xf32> to vector<8x32xbf16>
    %688 = arith.truncf %686 : vector<32x32xf32> to vector<32x32xbf16>
    %cst_252 = arith.constant dense<0.000000e+00> : vector<8x32xf32>
    %689 = tpu.matmul %687, %688, %cst_252 {dimension_numbers = #tpu.dot_dimension_numbers<[1], [0], [0], [1], [0, 0, 1, 1], [], []>} : vector<8x32xbf16>, vector<32x32xbf16>, vector<8x32xf32> -> vector<8x32xf32>
    %c19 = arith.constant 19 : index
    %c0_253 = arith.constant 0 : index
    %c0_254 = arith.constant 0 : index
    %690 = vector.load %arg7[%c19, %c0_253, %c0_254] : memref<38x1x32xf32, #tpu.memory_space<vmem>>, vector<1x1x32xf32>
    %691 = vector.shape_cast %690 : vector<1x1x32xf32> to vector<1x32xf32>
    %692 = vector.broadcast %691 : vector<1x32xf32> to vector<8x32xf32>
    %693 = arith.addf %689, %692 : vector<8x32xf32>
    %c8_255 = arith.constant 8 : index
    %c0_256 = arith.constant 0 : index
    %c0_257 = arith.constant 0 : index
    %694 = vector.load %arg8[%c8_255, %c0_256, %c0_257] : memref<16x32x32xf32, #tpu.memory_space<vmem>>, vector<1x32x32xf32>
    %695 = vector.shape_cast %694 : vector<1x32x32xf32> to vector<32x32xf32>
    %696 = arith.truncf %213 : vector<64x32xf32> to vector<64x32xbf16>
    %697 = arith.truncf %695 : vector<32x32xf32> to vector<32x32xbf16>
    %cst_258 = arith.constant dense<0.000000e+00> : vector<64x32xf32>
    %698 = tpu.matmul %696, %697, %cst_258 {dimension_numbers = #tpu.dot_dimension_numbers<[1], [0], [0], [1], [0, 0, 1, 1], [], []>} : vector<64x32xbf16>, vector<32x32xbf16>, vector<64x32xf32> -> vector<64x32xf32>
    %c17 = arith.constant 17 : index
    %c0_259 = arith.constant 0 : index
    %c0_260 = arith.constant 0 : index
    %699 = vector.load %arg7[%c17, %c0_259, %c0_260] : memref<38x1x32xf32, #tpu.memory_space<vmem>>, vector<1x1x32xf32>
    %700 = vector.shape_cast %699 : vector<1x1x32xf32> to vector<1x32xf32>
    %701 = vector.broadcast %700 : vector<1x32xf32> to vector<64x32xf32>
    %702 = arith.addf %698, %701 : vector<64x32xf32>
    %c11_261 = arith.constant 11 : index
    %c0_262 = arith.constant 0 : index
    %c0_263 = arith.constant 0 : index
    %703 = vector.load %arg8[%c11_261, %c0_262, %c0_263] : memref<16x32x32xf32, #tpu.memory_space<vmem>>, vector<1x32x32xf32>
    %704 = vector.shape_cast %703 : vector<1x32x32xf32> to vector<32x32xf32>
    %705 = arith.truncf %211 : vector<64x32xf32> to vector<64x32xbf16>
    %706 = arith.truncf %704 : vector<32x32xf32> to vector<32x32xbf16>
    %cst_264 = arith.constant dense<0.000000e+00> : vector<64x32xf32>
    %707 = tpu.matmul %705, %706, %cst_264 {dimension_numbers = #tpu.dot_dimension_numbers<[1], [0], [0], [1], [0, 0, 1, 1], [], []>} : vector<64x32xbf16>, vector<32x32xbf16>, vector<64x32xf32> -> vector<64x32xf32>
    %c20 = arith.constant 20 : index
    %c0_265 = arith.constant 0 : index
    %c0_266 = arith.constant 0 : index
    %708 = vector.load %arg7[%c20, %c0_265, %c0_266] : memref<38x1x32xf32, #tpu.memory_space<vmem>>, vector<1x1x32xf32>
    %709 = vector.shape_cast %708 : vector<1x1x32xf32> to vector<1x32xf32>
    %710 = vector.broadcast %709 : vector<1x32xf32> to vector<64x32xf32>
    %711 = arith.addf %707, %710 : vector<64x32xf32>
    %cst_267 = arith.constant 0.353553385 : f32
    %712 = vector.broadcast %cst_267 : f32 to vector<8x32xf32>
    %713 = arith.mulf %693, %712 : vector<8x32xf32>
    %714 = vector.extract_strided_slice %713 {offsets = [0, 0], sizes = [8, 8], strides = [1, 1]} : vector<8x32xf32> to vector<8x8xf32>
    %715 = vector.extract_strided_slice %702 {offsets = [0, 0], sizes = [64, 8], strides = [1, 1]} : vector<64x32xf32> to vector<64x8xf32>
    %716 = arith.truncf %714 : vector<8x8xf32> to vector<8x8xbf16>
    %717 = arith.truncf %715 : vector<64x8xf32> to vector<64x8xbf16>
    %cst_268 = arith.constant dense<0.000000e+00> : vector<8x64xf32>
    %718 = tpu.matmul %716, %717, %cst_268 {dimension_numbers = #tpu.dot_dimension_numbers<[1], [1], [0], [0], [0, 0, 1, 0], [], []>} : vector<8x8xbf16>, vector<64x8xbf16>, vector<8x64xf32> -> vector<8x64xf32>
    %719 = vector.broadcast %7 : vector<1x64xf32> to vector<8x64xf32>
    %720 = arith.addf %718, %719 : vector<8x64xf32>
    %cst_269 = arith.constant dense<0xFF800000> : vector<8xf32>
    %721 = vector.multi_reduction <maximumf>, %720, %cst_269 [1] : vector<8x64xf32> to vector<8xf32>
    %722 = vector.shape_cast %721 : vector<8xf32> to vector<8x1xf32>
    %723 = vector.broadcast %722 : vector<8x1xf32> to vector<8x64xf32>
    %724 = arith.subf %720, %723 : vector<8x64xf32>
    %725 = math.exp %724 : vector<8x64xf32>
    %cst_270 = arith.constant dense<0.000000e+00> : vector<8xf32>
    %726 = vector.multi_reduction <add>, %725, %cst_270 [1] : vector<8x64xf32> to vector<8xf32>
    %727 = vector.shape_cast %726 : vector<8xf32> to vector<8x1xf32>
    %728 = tpu.reciprocal %727 {approx = true} : vector<8x1xf32> -> vector<8x1xf32>
    %729 = vector.broadcast %728 : vector<8x1xf32> to vector<8x64xf32>
    %730 = arith.mulf %725, %729 : vector<8x64xf32>
    %731 = vector.extract_strided_slice %711 {offsets = [0, 0], sizes = [64, 8], strides = [1, 1]} : vector<64x32xf32> to vector<64x8xf32>
    %732 = arith.truncf %730 : vector<8x64xf32> to vector<8x64xbf16>
    %733 = arith.truncf %731 : vector<64x8xf32> to vector<64x8xbf16>
    %cst_271 = arith.constant dense<0.000000e+00> : vector<8x8xf32>
    %734 = tpu.matmul %732, %733, %cst_271 {dimension_numbers = #tpu.dot_dimension_numbers<[1], [0], [0], [1], [0, 0, 1, 1], [], []>} : vector<8x64xbf16>, vector<64x8xbf16>, vector<8x8xf32> -> vector<8x8xf32>
    %735 = vector.extract_strided_slice %713 {offsets = [0, 8], sizes = [8, 8], strides = [1, 1]} : vector<8x32xf32> to vector<8x8xf32>
    %736 = vector.extract_strided_slice %702 {offsets = [0, 8], sizes = [64, 8], strides = [1, 1]} : vector<64x32xf32> to vector<64x8xf32>
    %737 = arith.truncf %735 : vector<8x8xf32> to vector<8x8xbf16>
    %738 = arith.truncf %736 : vector<64x8xf32> to vector<64x8xbf16>
    %cst_272 = arith.constant dense<0.000000e+00> : vector<8x64xf32>
    %739 = tpu.matmul %737, %738, %cst_272 {dimension_numbers = #tpu.dot_dimension_numbers<[1], [1], [0], [0], [0, 0, 1, 0], [], []>} : vector<8x8xbf16>, vector<64x8xbf16>, vector<8x64xf32> -> vector<8x64xf32>
    %740 = vector.broadcast %7 : vector<1x64xf32> to vector<8x64xf32>
    %741 = arith.addf %739, %740 : vector<8x64xf32>
    %cst_273 = arith.constant dense<0xFF800000> : vector<8xf32>
    %742 = vector.multi_reduction <maximumf>, %741, %cst_273 [1] : vector<8x64xf32> to vector<8xf32>
    %743 = vector.shape_cast %742 : vector<8xf32> to vector<8x1xf32>
    %744 = vector.broadcast %743 : vector<8x1xf32> to vector<8x64xf32>
    %745 = arith.subf %741, %744 : vector<8x64xf32>
    %746 = math.exp %745 : vector<8x64xf32>
    %cst_274 = arith.constant dense<0.000000e+00> : vector<8xf32>
    %747 = vector.multi_reduction <add>, %746, %cst_274 [1] : vector<8x64xf32> to vector<8xf32>
    %748 = vector.shape_cast %747 : vector<8xf32> to vector<8x1xf32>
    %749 = tpu.reciprocal %748 {approx = true} : vector<8x1xf32> -> vector<8x1xf32>
    %750 = vector.broadcast %749 : vector<8x1xf32> to vector<8x64xf32>
    %751 = arith.mulf %746, %750 : vector<8x64xf32>
    %752 = vector.extract_strided_slice %711 {offsets = [0, 8], sizes = [64, 8], strides = [1, 1]} : vector<64x32xf32> to vector<64x8xf32>
    %753 = arith.truncf %751 : vector<8x64xf32> to vector<8x64xbf16>
    %754 = arith.truncf %752 : vector<64x8xf32> to vector<64x8xbf16>
    %cst_275 = arith.constant dense<0.000000e+00> : vector<8x8xf32>
    %755 = tpu.matmul %753, %754, %cst_275 {dimension_numbers = #tpu.dot_dimension_numbers<[1], [0], [0], [1], [0, 0, 1, 1], [], []>} : vector<8x64xbf16>, vector<64x8xbf16>, vector<8x8xf32> -> vector<8x8xf32>
    %756 = vector.extract_strided_slice %713 {offsets = [0, 16], sizes = [8, 8], strides = [1, 1]} : vector<8x32xf32> to vector<8x8xf32>
    %757 = vector.extract_strided_slice %702 {offsets = [0, 16], sizes = [64, 8], strides = [1, 1]} : vector<64x32xf32> to vector<64x8xf32>
    %758 = arith.truncf %756 : vector<8x8xf32> to vector<8x8xbf16>
    %759 = arith.truncf %757 : vector<64x8xf32> to vector<64x8xbf16>
    %cst_276 = arith.constant dense<0.000000e+00> : vector<8x64xf32>
    %760 = tpu.matmul %758, %759, %cst_276 {dimension_numbers = #tpu.dot_dimension_numbers<[1], [1], [0], [0], [0, 0, 1, 0], [], []>} : vector<8x8xbf16>, vector<64x8xbf16>, vector<8x64xf32> -> vector<8x64xf32>
    %761 = vector.broadcast %7 : vector<1x64xf32> to vector<8x64xf32>
    %762 = arith.addf %760, %761 : vector<8x64xf32>
    %cst_277 = arith.constant dense<0xFF800000> : vector<8xf32>
    %763 = vector.multi_reduction <maximumf>, %762, %cst_277 [1] : vector<8x64xf32> to vector<8xf32>
    %764 = vector.shape_cast %763 : vector<8xf32> to vector<8x1xf32>
    %765 = vector.broadcast %764 : vector<8x1xf32> to vector<8x64xf32>
    %766 = arith.subf %762, %765 : vector<8x64xf32>
    %767 = math.exp %766 : vector<8x64xf32>
    %cst_278 = arith.constant dense<0.000000e+00> : vector<8xf32>
    %768 = vector.multi_reduction <add>, %767, %cst_278 [1] : vector<8x64xf32> to vector<8xf32>
    %769 = vector.shape_cast %768 : vector<8xf32> to vector<8x1xf32>
    %770 = tpu.reciprocal %769 {approx = true} : vector<8x1xf32> -> vector<8x1xf32>
    %771 = vector.broadcast %770 : vector<8x1xf32> to vector<8x64xf32>
    %772 = arith.mulf %767, %771 : vector<8x64xf32>
    %773 = vector.extract_strided_slice %711 {offsets = [0, 16], sizes = [64, 8], strides = [1, 1]} : vector<64x32xf32> to vector<64x8xf32>
    %774 = arith.truncf %772 : vector<8x64xf32> to vector<8x64xbf16>
    %775 = arith.truncf %773 : vector<64x8xf32> to vector<64x8xbf16>
    %cst_279 = arith.constant dense<0.000000e+00> : vector<8x8xf32>
    %776 = tpu.matmul %774, %775, %cst_279 {dimension_numbers = #tpu.dot_dimension_numbers<[1], [0], [0], [1], [0, 0, 1, 1], [], []>} : vector<8x64xbf16>, vector<64x8xbf16>, vector<8x8xf32> -> vector<8x8xf32>
    %777 = vector.extract_strided_slice %713 {offsets = [0, 24], sizes = [8, 8], strides = [1, 1]} : vector<8x32xf32> to vector<8x8xf32>
    %778 = vector.extract_strided_slice %702 {offsets = [0, 24], sizes = [64, 8], strides = [1, 1]} : vector<64x32xf32> to vector<64x8xf32>
    %779 = arith.truncf %777 : vector<8x8xf32> to vector<8x8xbf16>
    %780 = arith.truncf %778 : vector<64x8xf32> to vector<64x8xbf16>
    %cst_280 = arith.constant dense<0.000000e+00> : vector<8x64xf32>
    %781 = tpu.matmul %779, %780, %cst_280 {dimension_numbers = #tpu.dot_dimension_numbers<[1], [1], [0], [0], [0, 0, 1, 0], [], []>} : vector<8x8xbf16>, vector<64x8xbf16>, vector<8x64xf32> -> vector<8x64xf32>
    %782 = vector.broadcast %7 : vector<1x64xf32> to vector<8x64xf32>
    %783 = arith.addf %781, %782 : vector<8x64xf32>
    %cst_281 = arith.constant dense<0xFF800000> : vector<8xf32>
    %784 = vector.multi_reduction <maximumf>, %783, %cst_281 [1] : vector<8x64xf32> to vector<8xf32>
    %785 = vector.shape_cast %784 : vector<8xf32> to vector<8x1xf32>
    %786 = vector.broadcast %785 : vector<8x1xf32> to vector<8x64xf32>
    %787 = arith.subf %783, %786 : vector<8x64xf32>
    %788 = math.exp %787 : vector<8x64xf32>
    %cst_282 = arith.constant dense<0.000000e+00> : vector<8xf32>
    %789 = vector.multi_reduction <add>, %788, %cst_282 [1] : vector<8x64xf32> to vector<8xf32>
    %790 = vector.shape_cast %789 : vector<8xf32> to vector<8x1xf32>
    %791 = tpu.reciprocal %790 {approx = true} : vector<8x1xf32> -> vector<8x1xf32>
    %792 = vector.broadcast %791 : vector<8x1xf32> to vector<8x64xf32>
    %793 = arith.mulf %788, %792 : vector<8x64xf32>
    %794 = vector.extract_strided_slice %711 {offsets = [0, 24], sizes = [64, 8], strides = [1, 1]} : vector<64x32xf32> to vector<64x8xf32>
    %795 = arith.truncf %793 : vector<8x64xf32> to vector<8x64xbf16>
    %796 = arith.truncf %794 : vector<64x8xf32> to vector<64x8xbf16>
    %cst_283 = arith.constant dense<0.000000e+00> : vector<8x8xf32>
    %797 = tpu.matmul %795, %796, %cst_283 {dimension_numbers = #tpu.dot_dimension_numbers<[1], [0], [0], [1], [0, 0, 1, 1], [], []>} : vector<8x64xbf16>, vector<64x8xbf16>, vector<8x8xf32> -> vector<8x8xf32>
    %798 = tpu.concatenate %734, %755, %776, %797 in 1 : vector<8x8xf32>, vector<8x8xf32>, vector<8x8xf32>, vector<8x8xf32> -> vector<8x32xf32>
    %c9_284 = arith.constant 9 : index
    %c0_285 = arith.constant 0 : index
    %c0_286 = arith.constant 0 : index
    %799 = vector.load %arg8[%c9_284, %c0_285, %c0_286] : memref<16x32x32xf32, #tpu.memory_space<vmem>>, vector<1x32x32xf32>
    %800 = vector.shape_cast %799 : vector<1x32x32xf32> to vector<32x32xf32>
    %801 = arith.truncf %798 : vector<8x32xf32> to vector<8x32xbf16>
    %802 = arith.truncf %800 : vector<32x32xf32> to vector<32x32xbf16>
    %cst_287 = arith.constant dense<0.000000e+00> : vector<8x32xf32>
    %803 = tpu.matmul %801, %802, %cst_287 {dimension_numbers = #tpu.dot_dimension_numbers<[1], [0], [0], [1], [0, 0, 1, 1], [], []>} : vector<8x32xbf16>, vector<32x32xbf16>, vector<8x32xf32> -> vector<8x32xf32>
    %c18 = arith.constant 18 : index
    %c0_288 = arith.constant 0 : index
    %c0_289 = arith.constant 0 : index
    %804 = vector.load %arg7[%c18, %c0_288, %c0_289] : memref<38x1x32xf32, #tpu.memory_space<vmem>>, vector<1x1x32xf32>
    %805 = vector.shape_cast %804 : vector<1x1x32xf32> to vector<1x32xf32>
    %806 = vector.broadcast %805 : vector<1x32xf32> to vector<8x32xf32>
    %807 = arith.addf %803, %806 : vector<8x32xf32>
    %808 = arith.addf %683, %807 : vector<8x32xf32>
    %cst_290 = arith.constant dense<0.000000e+00> : vector<8xf32>
    %809 = vector.multi_reduction <add>, %808, %cst_290 [1] : vector<8x32xf32> to vector<8xf32>
    %810 = vector.shape_cast %809 : vector<8xf32> to vector<8x1xf32>
    %cst_291 = arith.constant 3.200000e+01 : f32
    %811 = vector.broadcast %cst_291 : f32 to vector<8x1xf32>
    %812 = arith.divf %810, %811 : vector<8x1xf32>
    %813 = vector.broadcast %812 : vector<8x1xf32> to vector<8x32xf32>
    %814 = arith.subf %808, %813 : vector<8x32xf32>
    %815 = arith.mulf %814, %814 : vector<8x32xf32>
    %cst_292 = arith.constant dense<0.000000e+00> : vector<8xf32>
    %816 = vector.multi_reduction <add>, %815, %cst_292 [1] : vector<8x32xf32> to vector<8xf32>
    %817 = vector.shape_cast %816 : vector<8xf32> to vector<8x1xf32>
    %cst_293 = arith.constant 3.200000e+01 : f32
    %818 = vector.broadcast %cst_293 : f32 to vector<8x1xf32>
    %819 = arith.divf %817, %818 : vector<8x1xf32>
    %820 = vector.broadcast %812 : vector<8x1xf32> to vector<8x32xf32>
    %821 = arith.subf %808, %820 : vector<8x32xf32>
    %cst_294 = arith.constant 9.99999974E-6 : f32
    %822 = vector.broadcast %cst_294 : f32 to vector<8x1xf32>
    %823 = arith.addf %819, %822 : vector<8x1xf32>
    %824 = math.rsqrt %823 : vector<8x1xf32>
    %825 = vector.broadcast %824 : vector<8x1xf32> to vector<8x32xf32>
    %826 = arith.mulf %821, %825 : vector<8x32xf32>
    %c25 = arith.constant 25 : index
    %c0_295 = arith.constant 0 : index
    %c0_296 = arith.constant 0 : index
    %827 = vector.load %arg7[%c25, %c0_295, %c0_296] : memref<38x1x32xf32, #tpu.memory_space<vmem>>, vector<1x1x32xf32>
    %828 = vector.shape_cast %827 : vector<1x1x32xf32> to vector<1x32xf32>
    %829 = vector.broadcast %828 : vector<1x32xf32> to vector<8x32xf32>
    %830 = arith.mulf %826, %829 : vector<8x32xf32>
    %c24 = arith.constant 24 : index
    %c0_297 = arith.constant 0 : index
    %c0_298 = arith.constant 0 : index
    %831 = vector.load %arg7[%c24, %c0_297, %c0_298] : memref<38x1x32xf32, #tpu.memory_space<vmem>>, vector<1x1x32xf32>
    %832 = vector.shape_cast %831 : vector<1x1x32xf32> to vector<1x32xf32>
    %833 = vector.broadcast %832 : vector<1x32xf32> to vector<8x32xf32>
    %834 = arith.addf %830, %833 : vector<8x32xf32>
    %c2_299 = arith.constant 2 : index
    %c0_300 = arith.constant 0 : index
    %c0_301 = arith.constant 0 : index
    %835 = vector.load %arg12[%c2_299, %c0_300, %c0_301] : memref<6x32x64xf32, #tpu.memory_space<vmem>>, vector<1x32x64xf32>
    %836 = vector.shape_cast %835 : vector<1x32x64xf32> to vector<32x64xf32>
    %837 = arith.truncf %834 : vector<8x32xf32> to vector<8x32xbf16>
    %838 = arith.truncf %836 : vector<32x64xf32> to vector<32x64xbf16>
    %cst_302 = arith.constant dense<0.000000e+00> : vector<8x64xf32>
    %839 = tpu.matmul %837, %838, %cst_302 {dimension_numbers = #tpu.dot_dimension_numbers<[1], [0], [0], [1], [0, 0, 1, 1], [], []>} : vector<8x32xbf16>, vector<32x64xbf16>, vector<8x64xf32> -> vector<8x64xf32>
    %c2_303 = arith.constant 2 : index
    %c0_304 = arith.constant 0 : index
    %c0_305 = arith.constant 0 : index
    %840 = vector.load %arg11[%c2_303, %c0_304, %c0_305] : memref<6x1x64xf32, #tpu.memory_space<vmem>>, vector<1x1x64xf32>
    %841 = vector.shape_cast %840 : vector<1x1x64xf32> to vector<1x64xf32>
    %842 = vector.broadcast %841 : vector<1x64xf32> to vector<8x64xf32>
    %843 = arith.addf %839, %842 : vector<8x64xf32>
    %cst_306 = arith.constant 0.000000e+00 : f32
    %844 = vector.broadcast %cst_306 : f32 to vector<8x64xf32>
    %845 = arith.maximumf %843, %844 : vector<8x64xf32>
    %c1_307 = arith.constant 1 : index
    %c0_308 = arith.constant 0 : index
    %c0_309 = arith.constant 0 : index
    %846 = vector.load %arg13[%c1_307, %c0_308, %c0_309] : memref<3x64x32xf32, #tpu.memory_space<vmem>>, vector<1x64x32xf32>
    %847 = vector.shape_cast %846 : vector<1x64x32xf32> to vector<64x32xf32>
    %848 = arith.truncf %845 : vector<8x64xf32> to vector<8x64xbf16>
    %849 = arith.truncf %847 : vector<64x32xf32> to vector<64x32xbf16>
    %cst_310 = arith.constant dense<0.000000e+00> : vector<8x32xf32>
    %850 = tpu.matmul %848, %849, %cst_310 {dimension_numbers = #tpu.dot_dimension_numbers<[1], [0], [0], [1], [0, 0, 1, 1], [], []>} : vector<8x64xbf16>, vector<64x32xbf16>, vector<8x32xf32> -> vector<8x32xf32>
    %c21 = arith.constant 21 : index
    %c0_311 = arith.constant 0 : index
    %c0_312 = arith.constant 0 : index
    %851 = vector.load %arg7[%c21, %c0_311, %c0_312] : memref<38x1x32xf32, #tpu.memory_space<vmem>>, vector<1x1x32xf32>
    %852 = vector.shape_cast %851 : vector<1x1x32xf32> to vector<1x32xf32>
    %853 = vector.broadcast %852 : vector<1x32xf32> to vector<8x32xf32>
    %854 = arith.addf %850, %853 : vector<8x32xf32>
    %855 = arith.addf %834, %854 : vector<8x32xf32>
    %cst_313 = arith.constant dense<0.000000e+00> : vector<8xf32>
    %856 = vector.multi_reduction <add>, %855, %cst_313 [1] : vector<8x32xf32> to vector<8xf32>
    %857 = vector.shape_cast %856 : vector<8xf32> to vector<8x1xf32>
    %cst_314 = arith.constant 3.200000e+01 : f32
    %858 = vector.broadcast %cst_314 : f32 to vector<8x1xf32>
    %859 = arith.divf %857, %858 : vector<8x1xf32>
    %860 = vector.broadcast %859 : vector<8x1xf32> to vector<8x32xf32>
    %861 = arith.subf %855, %860 : vector<8x32xf32>
    %862 = arith.mulf %861, %861 : vector<8x32xf32>
    %cst_315 = arith.constant dense<0.000000e+00> : vector<8xf32>
    %863 = vector.multi_reduction <add>, %862, %cst_315 [1] : vector<8x32xf32> to vector<8xf32>
    %864 = vector.shape_cast %863 : vector<8xf32> to vector<8x1xf32>
    %cst_316 = arith.constant 3.200000e+01 : f32
    %865 = vector.broadcast %cst_316 : f32 to vector<8x1xf32>
    %866 = arith.divf %864, %865 : vector<8x1xf32>
    %867 = vector.broadcast %859 : vector<8x1xf32> to vector<8x32xf32>
    %868 = arith.subf %855, %867 : vector<8x32xf32>
    %cst_317 = arith.constant 9.99999974E-6 : f32
    %869 = vector.broadcast %cst_317 : f32 to vector<8x1xf32>
    %870 = arith.addf %866, %869 : vector<8x1xf32>
    %871 = math.rsqrt %870 : vector<8x1xf32>
    %872 = vector.broadcast %871 : vector<8x1xf32> to vector<8x32xf32>
    %873 = arith.mulf %868, %872 : vector<8x32xf32>
    %c27 = arith.constant 27 : index
    %c0_318 = arith.constant 0 : index
    %c0_319 = arith.constant 0 : index
    %874 = vector.load %arg7[%c27, %c0_318, %c0_319] : memref<38x1x32xf32, #tpu.memory_space<vmem>>, vector<1x1x32xf32>
    %875 = vector.shape_cast %874 : vector<1x1x32xf32> to vector<1x32xf32>
    %876 = vector.broadcast %875 : vector<1x32xf32> to vector<8x32xf32>
    %877 = arith.mulf %873, %876 : vector<8x32xf32>
    %c26 = arith.constant 26 : index
    %c0_320 = arith.constant 0 : index
    %c0_321 = arith.constant 0 : index
    %878 = vector.load %arg7[%c26, %c0_320, %c0_321] : memref<38x1x32xf32, #tpu.memory_space<vmem>>, vector<1x1x32xf32>
    %879 = vector.shape_cast %878 : vector<1x1x32xf32> to vector<1x32xf32>
    %880 = vector.broadcast %879 : vector<1x32xf32> to vector<8x32xf32>
    %881 = arith.addf %877, %880 : vector<8x32xf32>
    %cst_322 = arith.constant dense<0.000000e+00> : vector<8xf32>
    %882 = vector.multi_reduction <add>, %881, %cst_322 [1] : vector<8x32xf32> to vector<8xf32>
    %883 = vector.shape_cast %882 : vector<8xf32> to vector<8x1xf32>
    %cst_323 = arith.constant 3.200000e+01 : f32
    %884 = vector.broadcast %cst_323 : f32 to vector<8x1xf32>
    %885 = arith.divf %883, %884 : vector<8x1xf32>
    %886 = vector.broadcast %885 : vector<8x1xf32> to vector<8x32xf32>
    %887 = arith.subf %881, %886 : vector<8x32xf32>
    %888 = arith.mulf %887, %887 : vector<8x32xf32>
    %cst_324 = arith.constant dense<0.000000e+00> : vector<8xf32>
    %889 = vector.multi_reduction <add>, %888, %cst_324 [1] : vector<8x32xf32> to vector<8xf32>
    %890 = vector.shape_cast %889 : vector<8xf32> to vector<8x1xf32>
    %cst_325 = arith.constant 3.200000e+01 : f32
    %891 = vector.broadcast %cst_325 : f32 to vector<8x1xf32>
    %892 = arith.divf %890, %891 : vector<8x1xf32>
    %893 = vector.broadcast %885 : vector<8x1xf32> to vector<8x32xf32>
    %894 = arith.subf %881, %893 : vector<8x32xf32>
    %cst_326 = arith.constant 9.99999974E-6 : f32
    %895 = vector.broadcast %cst_326 : f32 to vector<8x1xf32>
    %896 = arith.addf %892, %895 : vector<8x1xf32>
    %897 = math.rsqrt %896 : vector<8x1xf32>
    %898 = vector.broadcast %897 : vector<8x1xf32> to vector<8x32xf32>
    %899 = arith.mulf %894, %898 : vector<8x32xf32>
    %c3_327 = arith.constant 3 : index
    %c0_328 = arith.constant 0 : index
    %c0_329 = arith.constant 0 : index
    %900 = vector.load %arg7[%c3_327, %c0_328, %c0_329] : memref<38x1x32xf32, #tpu.memory_space<vmem>>, vector<1x1x32xf32>
    %901 = vector.shape_cast %900 : vector<1x1x32xf32> to vector<1x32xf32>
    %902 = vector.broadcast %901 : vector<1x32xf32> to vector<8x32xf32>
    %903 = arith.mulf %899, %902 : vector<8x32xf32>
    %c2_330 = arith.constant 2 : index
    %c0_331 = arith.constant 0 : index
    %c0_332 = arith.constant 0 : index
    %904 = vector.load %arg7[%c2_330, %c0_331, %c0_332] : memref<38x1x32xf32, #tpu.memory_space<vmem>>, vector<1x1x32xf32>
    %905 = vector.shape_cast %904 : vector<1x1x32xf32> to vector<1x32xf32>
    %906 = vector.broadcast %905 : vector<1x32xf32> to vector<8x32xf32>
    %907 = arith.addf %903, %906 : vector<8x32xf32>
    %c0_333 = arith.constant 0 : index
    %c0_334 = arith.constant 0 : index
    %c0_335 = arith.constant 0 : index
    %908 = vector.load %arg8[%c0_333, %c0_334, %c0_335] : memref<16x32x32xf32, #tpu.memory_space<vmem>>, vector<1x32x32xf32>
    %909 = vector.shape_cast %908 : vector<1x32x32xf32> to vector<32x32xf32>
    %910 = arith.truncf %907 : vector<8x32xf32> to vector<8x32xbf16>
    %911 = arith.truncf %909 : vector<32x32xf32> to vector<32x32xbf16>
    %cst_336 = arith.constant dense<0.000000e+00> : vector<8x32xf32>
    %912 = tpu.matmul %910, %911, %cst_336 {dimension_numbers = #tpu.dot_dimension_numbers<[1], [0], [0], [1], [0, 0, 1, 1], [], []>} : vector<8x32xbf16>, vector<32x32xbf16>, vector<8x32xf32> -> vector<8x32xf32>
    %c0_337 = arith.constant 0 : index
    %c0_338 = arith.constant 0 : index
    %c0_339 = arith.constant 0 : index
    %913 = vector.load %arg7[%c0_337, %c0_338, %c0_339] : memref<38x1x32xf32, #tpu.memory_space<vmem>>, vector<1x1x32xf32>
    %914 = vector.shape_cast %913 : vector<1x1x32xf32> to vector<1x32xf32>
    %915 = vector.broadcast %914 : vector<1x32xf32> to vector<8x32xf32>
    %916 = arith.addf %912, %915 : vector<8x32xf32>
    %cst_340 = arith.constant 0.000000e+00 : f32
    %917 = vector.broadcast %cst_340 : f32 to vector<8x32xf32>
    %918 = arith.maximumf %916, %917 : vector<8x32xf32>
    %c1_341 = arith.constant 1 : index
    %c0_342 = arith.constant 0 : index
    %c0_343 = arith.constant 0 : index
    %919 = vector.load %arg8[%c1_341, %c0_342, %c0_343] : memref<16x32x32xf32, #tpu.memory_space<vmem>>, vector<1x32x32xf32>
    %920 = vector.shape_cast %919 : vector<1x32x32xf32> to vector<32x32xf32>
    %921 = arith.truncf %918 : vector<8x32xf32> to vector<8x32xbf16>
    %922 = arith.truncf %920 : vector<32x32xf32> to vector<32x32xbf16>
    %cst_344 = arith.constant dense<0.000000e+00> : vector<8x32xf32>
    %923 = tpu.matmul %921, %922, %cst_344 {dimension_numbers = #tpu.dot_dimension_numbers<[1], [0], [0], [1], [0, 0, 1, 1], [], []>} : vector<8x32xbf16>, vector<32x32xbf16>, vector<8x32xf32> -> vector<8x32xf32>
    %c1_345 = arith.constant 1 : index
    %c0_346 = arith.constant 0 : index
    %c0_347 = arith.constant 0 : index
    %924 = vector.load %arg7[%c1_345, %c0_346, %c0_347] : memref<38x1x32xf32, #tpu.memory_space<vmem>>, vector<1x1x32xf32>
    %925 = vector.shape_cast %924 : vector<1x1x32xf32> to vector<1x32xf32>
    %926 = vector.broadcast %925 : vector<1x32xf32> to vector<8x32xf32>
    %927 = arith.addf %923, %926 : vector<8x32xf32>
    %cst_348 = arith.constant 0.000000e+00 : f32
    %928 = vector.broadcast %cst_348 : f32 to vector<8x32xf32>
    %929 = arith.maximumf %927, %928 : vector<8x32xf32>
    %c0_349 = arith.constant 0 : index
    %c0_350 = arith.constant 0 : index
    %c0_351 = arith.constant 0 : index
    %930 = vector.load %arg10[%c0_349, %c0_350, %c0_351] : memref<1x32x2xf32, #tpu.memory_space<vmem>>, vector<1x32x2xf32>
    %931 = vector.shape_cast %930 : vector<1x32x2xf32> to vector<32x2xf32>
    %932 = arith.truncf %929 : vector<8x32xf32> to vector<8x32xbf16>
    %933 = arith.truncf %931 : vector<32x2xf32> to vector<32x2xbf16>
    %cst_352 = arith.constant dense<0.000000e+00> : vector<8x2xf32>
    %934 = tpu.matmul %932, %933, %cst_352 {dimension_numbers = #tpu.dot_dimension_numbers<[1], [0], [0], [1], [0, 0, 1, 1], [], []>} : vector<8x32xbf16>, vector<32x2xbf16>, vector<8x2xf32> -> vector<8x2xf32>
    %c0_353 = arith.constant 0 : index
    %c0_354 = arith.constant 0 : index
    %c0_355 = arith.constant 0 : index
    %935 = vector.load %arg9[%c0_353, %c0_354, %c0_355] : memref<1x1x2xf32, #tpu.memory_space<vmem>>, vector<1x1x2xf32>
    %936 = vector.shape_cast %935 : vector<1x1x2xf32> to vector<1x2xf32>
    %937 = vector.broadcast %936 : vector<1x2xf32> to vector<8x2xf32>
    %938 = arith.addf %934, %937 : vector<8x2xf32>
    %939 = arith.negf %938 : vector<8x2xf32>
    %940 = math.exp %939 : vector<8x2xf32>
    %cst_356 = arith.constant 1.000000e+00 : f32
    %941 = vector.broadcast %cst_356 : f32 to vector<8x2xf32>
    %942 = arith.addf %941, %940 : vector<8x2xf32>
    %943 = arith.divf %941, %942 : vector<8x2xf32>
    %cst_357 = arith.constant 1.250000e+00 : f32
    %944 = vector.broadcast %cst_357 : f32 to vector<8x2xf32>
    %945 = arith.mulf %943, %944 : vector<8x2xf32>
    %cst_358 = arith.constant 6.250000e-01 : f32
    %946 = vector.broadcast %cst_358 : f32 to vector<8x2xf32>
    %947 = arith.subf %945, %946 : vector<8x2xf32>
    %948 = vector.extract_strided_slice %947 {offsets = [0, 0], sizes = [8, 1], strides = [1, 1]} : vector<8x2xf32> to vector<8x1xf32>
    %949 = vector.extract_strided_slice %9 {offsets = [0, 2], sizes = [1, 1], strides = [1, 1]} : vector<1x4xf32> to vector<1x1xf32>
    %950 = vector.broadcast %949 : vector<1x1xf32> to vector<8x1xf32>
    %951 = arith.mulf %948, %950 : vector<8x1xf32>
    %952 = vector.extract_strided_slice %9 {offsets = [0, 0], sizes = [1, 1], strides = [1, 1]} : vector<1x4xf32> to vector<1x1xf32>
    %953 = vector.broadcast %952 : vector<1x1xf32> to vector<8x1xf32>
    %954 = arith.addf %951, %953 : vector<8x1xf32>
    %cst_359 = arith.constant 0.000000e+00 : f32
    %cst_360 = arith.constant 1.000000e+00 : f32
    %955 = vector.broadcast %cst_359 : f32 to vector<8x1xf32>
    %956 = arith.maximumf %955, %954 : vector<8x1xf32>
    %957 = vector.broadcast %cst_360 : f32 to vector<8x1xf32>
    %958 = arith.minimumf %957, %956 : vector<8x1xf32>
    %959 = vector.extract_strided_slice %947 {offsets = [0, 1], sizes = [8, 1], strides = [1, 1]} : vector<8x2xf32> to vector<8x1xf32>
    %960 = vector.extract_strided_slice %9 {offsets = [0, 3], sizes = [1, 1], strides = [1, 1]} : vector<1x4xf32> to vector<1x1xf32>
    %961 = vector.broadcast %960 : vector<1x1xf32> to vector<8x1xf32>
    %962 = arith.mulf %959, %961 : vector<8x1xf32>
    %963 = vector.extract_strided_slice %9 {offsets = [0, 1], sizes = [1, 1], strides = [1, 1]} : vector<1x4xf32> to vector<1x1xf32>
    %964 = vector.broadcast %963 : vector<1x1xf32> to vector<8x1xf32>
    %965 = arith.addf %962, %964 : vector<8x1xf32>
    %cst_361 = arith.constant 0.000000e+00 : f32
    %cst_362 = arith.constant 1.000000e+00 : f32
    %966 = vector.broadcast %cst_361 : f32 to vector<8x1xf32>
    %967 = arith.maximumf %966, %965 : vector<8x1xf32>
    %968 = vector.broadcast %cst_362 : f32 to vector<8x1xf32>
    %969 = arith.minimumf %968, %967 : vector<8x1xf32>
    %970 = tpu.concatenate %958, %969 in 1 : vector<8x1xf32>, vector<8x1xf32> -> vector<8x2xf32>
    %c0_363 = arith.constant 0 : index
    %c0_364 = arith.constant 0 : index
    %c0_365 = arith.constant 0 : index
    %971 = vector.load %arg16[%c0_363, %c0_364, %c0_365] : memref<1x8x2xf32, #tpu.memory_space<vmem>>, vector<1x8x2xf32>
    %972 = vector.shape_cast %971 : vector<1x8x2xf32> to vector<8x2xf32>
    %973 = vector.shape_cast %970 : vector<8x2xf32> to vector<1x8x2xf32>
    tpu.vector_store %arg16[%c0_363, %c0_364, %c0_365], %973 {strides = array<i32>} : memref<1x8x2xf32, #tpu.memory_space<vmem>>, vector<1x8x2xf32>,
    %c0_366 = arith.constant 0 : index
    %c0_367 = arith.constant 0 : index
    %c0_368 = arith.constant 0 : index
    %974 = vector.load %arg6[%c0_366, %c0_367, %c0_368] : memref<1x32x5xf32, #tpu.memory_space<vmem>>, vector<1x32x5xf32>
    %975 = vector.shape_cast %974 : vector<1x32x5xf32> to vector<32x5xf32>
    %976 = arith.truncf %907 : vector<8x32xf32> to vector<8x32xbf16>
    %977 = arith.truncf %975 : vector<32x5xf32> to vector<32x5xbf16>
    %cst_369 = arith.constant dense<0.000000e+00> : vector<8x5xf32>
    %978 = tpu.matmul %976, %977, %cst_369 {dimension_numbers = #tpu.dot_dimension_numbers<[1], [0], [0], [1], [0, 0, 1, 1], [], []>} : vector<8x32xbf16>, vector<32x5xbf16>, vector<8x5xf32> -> vector<8x5xf32>
    %c0_370 = arith.constant 0 : index
    %c0_371 = arith.constant 0 : index
    %c0_372 = arith.constant 0 : index
    %979 = vector.load %arg5[%c0_370, %c0_371, %c0_372] : memref<1x1x5xf32, #tpu.memory_space<vmem>>, vector<1x1x5xf32>
    %980 = vector.shape_cast %979 : vector<1x1x5xf32> to vector<1x5xf32>
    %981 = vector.broadcast %980 : vector<1x5xf32> to vector<8x5xf32>
    %982 = arith.addf %978, %981 : vector<8x5xf32>
    %c0_373 = arith.constant 0 : index
    %c0_374 = arith.constant 0 : index
    %c0_375 = arith.constant 0 : index
    %983 = vector.load %arg17[%c0_373, %c0_374, %c0_375] : memref<1x8x5xf32, #tpu.memory_space<vmem>>, vector<1x8x5xf32>
    %984 = vector.shape_cast %983 : vector<1x8x5xf32> to vector<8x5xf32>
    %985 = vector.shape_cast %982 : vector<8x5xf32> to vector<1x8x5xf32>
    tpu.vector_store %arg17[%c0_373, %c0_374, %c0_375], %985 {strides = array<i32>} : memref<1x8x5xf32, #tpu.memory_space<vmem>>, vector<1x8x5xf32>,
    return
  }
  func.func @transform_0(%arg0: i32) -> (i32, i32, i32) {
    %c0_i32 = arith.constant 0 : i32
    %c0_i32_0 = arith.constant 0 : i32
    %c0_i32_1 = arith.constant 0 : i32
    return %arg0, %c0_i32, %c0_i32_0 : i32, i32, i32
  }
  func.func @transform_1(%arg0: i32) -> (i32, i32, i32) {
    %c0_i32 = arith.constant 0 : i32
    %c0_i32_0 = arith.constant 0 : i32
    %c0_i32_1 = arith.constant 0 : i32
    return %arg0, %c0_i32, %c0_i32_0 : i32, i32, i32
  }
  func.func @transform_2(%arg0: i32) -> (i32, i32, i32) {
    %c0_i32 = arith.constant 0 : i32
    %c0_i32_0 = arith.constant 0 : i32
    %c0_i32_1 = arith.constant 0 : i32
    return %arg0, %c0_i32, %c0_i32_0 : i32, i32, i32
  }
  func.func @transform_3(%arg0: i32) -> (i32, i32, i32) {
    %c0_i32 = arith.constant 0 : i32
    %c0_i32_0 = arith.constant 0 : i32
    %c0_i32_1 = arith.constant 0 : i32
    return %arg0, %c0_i32, %c0_i32_0 : i32, i32, i32
  }
  func.func @transform_4(%arg0: i32) -> (i32, i32, i32) {
    %c0_i32 = arith.constant 0 : i32
    %c0_i32_0 = arith.constant 0 : i32
    %c0_i32_1 = arith.constant 0 : i32
    %c0_i32_2 = arith.constant 0 : i32
    return %c0_i32, %c0_i32_0, %c0_i32_1 : i32, i32, i32
  }
  func.func @transform_5(%arg0: i32) -> (i32, i32, i32) {
    %c0_i32 = arith.constant 0 : i32
    %c0_i32_0 = arith.constant 0 : i32
    %c0_i32_1 = arith.constant 0 : i32
    %c0_i32_2 = arith.constant 0 : i32
    return %c0_i32, %c0_i32_0, %c0_i32_1 : i32, i32, i32
  }
  func.func @transform_6(%arg0: i32) -> (i32, i32, i32) {
    %c0_i32 = arith.constant 0 : i32
    %c0_i32_0 = arith.constant 0 : i32
    %c0_i32_1 = arith.constant 0 : i32
    %c0_i32_2 = arith.constant 0 : i32
    return %c0_i32, %c0_i32_0, %c0_i32_1 : i32, i32, i32
  }
  func.func @transform_7(%arg0: i32) -> (i32, i32, i32) {
    %c0_i32 = arith.constant 0 : i32
    %c0_i32_0 = arith.constant 0 : i32
    %c0_i32_1 = arith.constant 0 : i32
    %c0_i32_2 = arith.constant 0 : i32
    return %c0_i32, %c0_i32_0, %c0_i32_1 : i32, i32, i32
  }
  func.func @transform_8(%arg0: i32) -> (i32, i32, i32) {
    %c0_i32 = arith.constant 0 : i32
    %c0_i32_0 = arith.constant 0 : i32
    %c0_i32_1 = arith.constant 0 : i32
    %c0_i32_2 = arith.constant 0 : i32
    return %c0_i32, %c0_i32_0, %c0_i32_1 : i32, i32, i32
  }
  func.func @transform_9(%arg0: i32) -> (i32, i32, i32) {
    %c0_i32 = arith.constant 0 : i32
    %c0_i32_0 = arith.constant 0 : i32
    %c0_i32_1 = arith.constant 0 : i32
    %c0_i32_2 = arith.constant 0 : i32
    return %c0_i32, %c0_i32_0, %c0_i32_1 : i32, i32, i32
  }
  func.func @transform_10(%arg0: i32) -> (i32, i32, i32) {
    %c0_i32 = arith.constant 0 : i32
    %c0_i32_0 = arith.constant 0 : i32
    %c0_i32_1 = arith.constant 0 : i32
    %c0_i32_2 = arith.constant 0 : i32
    return %c0_i32, %c0_i32_0, %c0_i32_1 : i32, i32, i32
  }
  func.func @transform_11(%arg0: i32) -> (i32, i32, i32) {
    %c0_i32 = arith.constant 0 : i32
    %c0_i32_0 = arith.constant 0 : i32
    %c0_i32_1 = arith.constant 0 : i32
    %c0_i32_2 = arith.constant 0 : i32
    return %c0_i32, %c0_i32_0, %c0_i32_1 : i32, i32, i32
  }
  func.func @transform_12(%arg0: i32) -> (i32, i32, i32) {
    %c0_i32 = arith.constant 0 : i32
    %c0_i32_0 = arith.constant 0 : i32
    %c0_i32_1 = arith.constant 0 : i32
    %c0_i32_2 = arith.constant 0 : i32
    return %c0_i32, %c0_i32_0, %c0_i32_1 : i32, i32, i32
  }
  func.func @transform_13(%arg0: i32) -> (i32, i32, i32) {
    %c0_i32 = arith.constant 0 : i32
    %c0_i32_0 = arith.constant 0 : i32
    %c0_i32_1 = arith.constant 0 : i32
    %c0_i32_2 = arith.constant 0 : i32
    return %c0_i32, %c0_i32_0, %c0_i32_1 : i32, i32, i32
  }
  func.func @transform_14(%arg0: i32) -> (i32, i32, i32) {
    %c0_i32 = arith.constant 0 : i32
    %c0_i32_0 = arith.constant 0 : i32
    %c0_i32_1 = arith.constant 0 : i32
    %c0_i32_2 = arith.constant 0 : i32
    return %c0_i32, %c0_i32_0, %c0_i32_1 : i32, i32, i32
  }
  func.func @transform_15(%arg0: i32) -> (i32, i32, i32) {
    %c0_i32 = arith.constant 0 : i32
    %c0_i32_0 = arith.constant 0 : i32
    %c0_i32_1 = arith.constant 0 : i32
    return %arg0, %c0_i32, %c0_i32_0 : i32, i32, i32
  }
  func.func @transform_16(%arg0: i32) -> (i32, i32, i32) {
    %c0_i32 = arith.constant 0 : i32
    %c0_i32_0 = arith.constant 0 : i32
    %c0_i32_1 = arith.constant 0 : i32
    return %arg0, %c0_i32, %c0_i32_0 : i32, i32, i32
  }
}

</mosaic_0001>

<bundles_post_ra>
// kernel: detr_kpts_forward.1
= control target key start
LH: loop header
LB: loop body
LE: loop exit
PB: predicated region body
PF: predicated region fallthrough
CT: control target
= control target key end

     0   :  { %s7569_s0 = inlined_call_operand.vmem [shape: f32[2,64,4], index: 0, kind: input, shape index: {}]   ;;  %s7570_s1 = inlined_call_operand.hbm [shape: f32[2,64,32], index: 1, kind: input, shape index: {}]   ;;  %s7571_s2 = inlined_call_operand.vmem [shape: f32[2,1,64], index: 2, kind: input, shape index: {}]   ;;  %s7572_s3 = inlined_call_operand.vmem [shape: f32[2,1,4], index: 3, kind: input, shape index: {}]   ;;  %s7573_s4 = inlined_call_operand.vmem [shape: f32[1,1,5], index: 4, kind: input, shape index: {}]   ;;  %s7574_s5 = inlined_call_operand.hbm [shape: f32[1,32,5], index: 5, kind: input, shape index: {}]   ;;  %s7575_s6 = inlined_call_operand.vmem [shape: f32[38,1,32], index: 6, kind: input, shape index: {}]   ;;  %s7576_s7 = inlined_call_operand.hbm [shape: f32[16,32,32], index: 7, kind: input, shape index: {}]   ;;  %s7577_s8 = inlined_call_operand.vmem [shape: f32[1,1,2], index: 8, kind: input, shape index: {}]   ;;  %s7578_s9 = inlined_call_operand.hbm [shape: f32[1,32,2], index: 9, kind: input, shape index: {}]   ;;  %s7579_s10 = inlined_call_operand.vmem [shape: f32[6,1,64], index: 10, kind: input, shape index: {}]   ;;  %s7580_s11 = inlined_call_operand.vmem [shape: f32[6,32,64], index: 11, kind: input, shape index: {}]   ;;  %s7581_s12 = inlined_call_operand.hbm [shape: f32[3,64,32], index: 12, kind: input, shape index: {}]   ;;  %s7582_s13 = inlined_call_operand.vmem [shape: f32[1,4,32], index: 13, kind: input, shape index: {}]   ;;  %s7583_s14 = inlined_call_operand.vmem [shape: f32[1,8,32], index: 14, kind: input, shape index: {}]   ;;  %s7584_s15 = inlined_call_operand.vmem [shape: f32[2,8,2], index: 15, kind: output, shape index: {0}]   ;;  %s7585_s16 = inlined_call_operand.vmem [shape: f32[2,8,5], index: 16, kind: output, shape index: {1}]  }
   0x1   :  { %7597 = sst [smem:[#allocation13_spill]] %s7569_s0 }
   0x2   :  { %7598 = sst [smem:[#allocation14_spill]] %s7574_s5 }
   0x3   :  { %7599 = sst [smem:[#allocation15_spill]] %s7576_s7 }
   0x4   :  { %7600 = sst [smem:[#allocation16_spill]] %s7577_s8 }
   0x5   :  { %7601 = sst [smem:[#allocation17_spill]] %s7578_s9 }
   0x6   :  { %7602 = sst [smem:[#allocation18_spill]] %s7581_s12 }
   0x7   :  { %7603 = sst [smem:[#allocation19_spill]] %s7584_s15 }
   0x8   :  { %22 = vsyncpa [#allocation3], 0 }
   0x9   :  { %24 = vsyncpa [#allocation3 + $0x1], 0 }
   0xa   :  { %25 = vsyncpa [#allocation5], 0 }
   0xb   :  { %26 = vsyncpa [#allocation8], 0  ;;  %s5746_s21 = smov 0   ;;  %s5748_s22 = smov 0  }
   0xc   :  { %s5750_s23 = smov 0   ;;  %s5752_s24 = smov 0  }
   0xd LB: > { %s5765_s25 = sadd.s32 4294967295, %s5640_s24   ;;  %p78_p0 = scmp.ne.s32.totalorder %s5632_s22, %s5628_s21  ;;  %s5640_s24 = sphi %s5752_s24, %s7628_s24   ;;  %s5636_s23 = sphi %s5750_s23, %s7627_s23   ;;  %s5632_s22 = sphi %s5748_s22, %s7626_s22   ;;  %s5628_s21 = sphi %s5746_s21, %s7625_s21  }
   0xe   : > { %p79_p1 = scmp.eq.s32.totalorder %s5765_s25, 0  ;;  %p4784_p2 = scmp.ge.s32.totalorder %s5640_s24, 1 }
   0xf   : > { %p424_p3 = scmp.lt.s32.totalorder %s5640_s24, 3  ;;  %s7605_s5 = sld [smem:[#allocation14_spill]] }
  0x10   : > { %p5773_p4 = por %p79_p1, %p78_p0  ;;  %s5642_s0 = smov [#allocation4]  }
  0x11   : > { %p5780_p5 = pnand %p4784_p2, %p424_p3  ;;  %s440_s17 = sshll.u32 %s5642_s0, 4  ;;  %s441_s17 = int_to_ptr.vmem [resolvable:$true] %s440_s17 }
  0x12   : > { %s7608_s9 = sld [smem:[#allocation17_spill]]  ;;  %s7586_s27 = smov 128  }
  0x13   : > { %p5010_p6 = pneg %p5780_p5  ;;  %s7587_s28 = smov 8  }
  0x14   : > { %s5645_s0 = smov [#allocation7]   ;;  %s7609_s7 = sld [smem:[#allocation15_spill]] }
  0x15   : > { %s438_s29 = sshll.u32 %s7605_s5, 4  ;;  %p5788_p7 = pnand %p5010_p6, %p79_p1  ;;  %s439_s29 = int_to_ptr.hbm [resolvable:$true] %s438_s29 }
  0x16   : > { %s474_s5 = sshll.u32 %s5645_s0, 4  ;;  %s7610_s12 = sld [smem:[#allocation18_spill]]  ;;  %s475_s5 = int_to_ptr.vmem [resolvable:$true] %s474_s5 }
  0x17   : > { %5013 = dma.hbm_to_vmem [thread:$0]  (!%p5788_p7), %s439_s29, 512, %s441_s17, [#allocation5], %s7586_s27, %s7586_s27, %s7587_s28  }
  0x18   : > { %s472_s21 = sshll.u32 %s7608_s9, 4  ;;  %s5646_s0 = smov [#allocation6]   ;;  %s473_s21 = int_to_ptr.hbm [resolvable:$true] %s472_s21 }
  0x19   : > { %5019 = dma.hbm_to_vmem [thread:$0]  (!%p5788_p7), %s473_s21, 512, %s475_s5, [#allocation8], %s7586_s27, %s7586_s27, %s7587_s28  }
  0x1a   : > { %s455_s19 = sshll.u32 %s7609_s7, 4  ;;  %s457_s8 = sshll.u32 %s5646_s0, 4  ;;  %s456_s19 = int_to_ptr.hbm [resolvable:$true] %s455_s19  ;;  %s458_s8 = int_to_ptr.vmem [resolvable:$true] %s457_s8 }
  0x1b   : > { %5016 = dma.hbm_to_vmem [thread:$0]  (!%p5788_p7), %s456_s19, 8192, %s458_s8, [#allocation5], %s7586_s27, %s7586_s27, %s7587_s28  }
  0x1c   : > { %s492_s20 = sshll.u32 %s7610_s12, 4  ;;  %s5647_s15 = smov [#allocation9]   ;;  %s493_s20 = int_to_ptr.hbm [resolvable:$true] %s492_s20 }
  0x1d   : > { %s494_s5 = sshll.u32 %s5647_s15, 4  ;;  %s5822_s21 = sadd.s32 1, %s5640_s24   ;;  %s495_s5 = int_to_ptr.vmem [resolvable:$true] %s494_s5 }
  0x1e   : > { %5022 = dma.hbm_to_vmem [thread:$0]  (!%p5788_p7), %s493_s20, 3072, %s495_s5, [#allocation8], %s7586_s27, %s7586_s27, %s7587_s28  }
  0x1f   : > { %s65_s29 = sadd.s32 1, %s5636_s23  ;;  %s62_s17 = ssub.s32 %s5640_s24, %s5822_s21 }
  0x20   : > { %p72_p8 = scmp.ne.s32.totalorder %s5636_s23, %s5632_s22  ;;  %p63_p9 = scmp.eq.s32.totalorder %s62_s17, 0 }
  0x21   : > { %p73_p10 = scmp.eq.s32.totalorder %s5640_s24, 0  ;;  %s522_s0 = sand.u32 1, %s5636_s23  }
  0x22   : > { %s5832_s7 = scalar_select %p63_p9, %s5636_s23, %s65_s29  }
  0x23   : > { %p74_p11 = por %p73_p10, %p72_p8  ;;  %p5031_p12 = scmp.lt.s32.totalorder %s5640_s24, 2 }
  0x24   : > { %s4790_s19 = sshll.u32 %s522_s0, 6  ;;  %s4990_s8 = sshll.u32 %s5640_s24, 6 }
  0x25   : > { %s531_s9 = scalar_lea.hbm %s7570_s1, %s4990_s8  ;;  %s526_s5 = scalar_lea.vmem [#allocation2], %s4790_s19 }
  0x26   : > { %s532_s20 = sshll.u32 %s531_s9, 4  ;;  %s534_s27 = sshll.u32 %s526_s5, 4  ;;  %s533_s20 = int_to_ptr.hbm [resolvable:$true] %s532_s20  ;;  %s535_s27 = int_to_ptr.vmem [resolvable:$true] %s534_s27 }
  0x27   : > { %p5839_p13 = pnand %p5031_p12, %p74_p11  ;;  %s523_s29 = scalar_lea.sflag [#allocation3], %s522_s0 }
  0x28   : > { %s5568_s17 = sshra.s32 %s533_s20, 4  ;;  %s5575_s19 = scalar_lea.hbm %s7570_s1, 128  ;;  %s5569_s17 = int_to_ptr.hbm [resolvable:$true] %s5568_s17 }
  0x29   : > { %s5570_s12 = scalar_lea.hbm %s5569_s17, 64  ;;  %p5572_p2 = pneg %p5839_p13 }
  0x2a   : > { %p5571_p0 = scmp.ne.s32.totalorder %s5569_s17, %s5570_s12  ;;  %p5576_p7 = scmp.lt.s32.totalorder %s5569_s17, %s7570_s1 }
  0x2b   : > { %p5577_p8 = scmp.lt.s32.totalorder %s5575_s19, %s5570_s12 }
  0x2c   : > { %p5573_p3 = pnand %p5572_p2, %p5571_p0 }
  0x2d   : > { %p5578_p9 = por %p5577_p8, %p5576_p7 }
  0x2e   : > { %p5574_p6 = pneg %p5573_p3 }
  0x30   : > { %p5579_p10 = pnand %p5578_p9, %p5574_p6 }
  0x32   : > { %5582 = shalt.err (!%p5579_p10)
}
  0x33   : > { %s7612_s0 = smov 8   ;;  %s7613_s15 = smov 128  }
  0x34   : > { %5026 = dma.hbm_to_vmem [thread:$0]  (!%p5839_p13), %s533_s20, 1024, %s535_s27, %s523_s29, %s7613_s15, %s7613_s15, %s7612_s0  }
  0x35   : > { %558 = sbr.rel (%p5780_p5) target bundleno = 9408 (0x24c0), region = 80  ;;  %s560_s5 = sand.u32 (!%p5780_p5), 1, %s5632_s22  }
  0x36   : > { %s4794_s24 = sshll.u32 (!%p5780_p5), %s560_s5, 6  ;;  %s561_s9 = scalar_lea.sflag (!%p5780_p5), [#allocation3], %s560_s5 }
  0x37   : > { %s5859_s8 = scalar_lea.vmem (!%p5780_p5), [#allocation2], %s4794_s24 }
  0x3a   : > { %5615 = dma.done.wait (%p5773_p4), %s561_s9, 1024  }
  0x3b   : > { %5617 = vsyncadd (%p5773_p4), %s561_s9, 4294966272 }
  0x3c   : > { %5619 = dma.done.wait (%p79_p1), [#allocation5], 8704  }
  0x3d   : > { %5621 = vsyncadd (%p79_p1), [#allocation5], 4294958592 }
  0x3e   : > { %5623 = dma.done.wait (%p79_p1), [#allocation8], 3584  }
  0x3f   : > { %5625 = vsyncadd (%p79_p1), [#allocation8], 4294963712  ;;  %p648_p5 = scmp.lt.s32.totalorder %s5765_s25, 1  ;;  %s7614_s27 = sld [smem:[#allocation13_spill]]  ;;  %v688_v0 = vld [vmem:[%s7582_s13] sm:$0xf] }
  0x40   : > { %vm712_vm0 = vcmask 1041408   ;;  %v693_v3 = vpack.c.bf16 %v688_v0, %v688_v0  ;;  %vm699_vm1 = vcmask 31744   ;;  %v814_v15 = vld [vmem:[#allocation6 + $0x1f0] sm:$0xff]  ;;  %v815_v16 = vld [vmem:[#allocation6 + $0x1f8] sm:$0xff]  ;;  %v812_v21 = vld [vmem:[#allocation6 + $0x1e0] sm:$0xff]  ;;  %vm769_vm2 = vcmask 261120  }
  0x41   : > { %s7630_s25 = smov (!%p648_p5, %s5765_s25), 1  ;;  %v821_v17 = vpack.c.bf16 %v815_v16, %v814_v15  ;;  %v4810_v18 = vld [vmem:[%s7580_s11 + $0xb0] sm:$0xff]  ;;  %v4811_v19 = vld [vmem:[%s7580_s11 + $0xb8] sm:$0xff]  ;;  %v813_v22 = vld [vmem:[#allocation6 + $0x1e8] sm:$0xff]  ;;  %s5649_s20 = smov 88   ;;  %vm899_vm3 = vcmask 64512  }
  0x42   : > { %s4991_s12 = sshll.u32 %s7630_s25, 6  ;;  %v714_v4 = vsel %vm712_vm0, %v693_v3, 0  ;;  %v763_v20 = vpack.c.bf16 %v4811_v19, %v4810_v18  ;;  %v820_v23 = vpack.c.bf16 %v813_v22, %v812_v21  ;;  %v4808_v24 = vld [vmem:[%s7580_s11 + $0xa0] sm:$0xff]  ;;  %v4809_v25 = vld [vmem:[%s7580_s11 + $0xa8] sm:$0xff]  ;;  %v678_v40 = vld [vmem:[%s5859_s8 + $0x10] sm:$0xff]  ;;  %s5650_s29 = smov 120  }
  0x43   : > { %723 = vmatpush.bf16.msra.mxu0 %v714_v4  ;;  %845 = vmatpush.bf16.msra.mxu2 %v821_v17  ;;  %v762_v26 = vpack.c.bf16 %v4809_v25, %v4808_v24  ;;  %v5147_v28 = vld [vmem:[%s7575_s6 + $0x25] ss:$0 sm:$0xff]  ;;  %v677_v32 = vld [vmem:[%s5859_s8 + $0x8] sm:$0xff]  ;;  %v679_v42 = vld [vmem:[%s5859_s8 + $0x18] sm:$0xff]  ;;  %s5651_s18 = smov 72   ;;  %s7594_s0 = smov 80  }
  0x44   : > { %788 = vmatpush.bf16.msra.mxu1 %v763_v20  ;;  %v676_v30 = vld [vmem:[%s5859_s8] sm:$0xff]  ;;  %v681_v52 = vld [vmem:[%s5859_s8 + $0x28] sm:$0xff]  ;;  %v682_v60 = vld [vmem:[%s5859_s8 + $0x30] sm:$0xff]  ;;  %s7595_s15 = smov 112   ;;  %s5654_s5 = smov 104   ;;  %vm953_vm4 = vcmask 523264  }
  0x45   : > { %s652_s28 = scalar_lea.vmem %s7614_s27, %s4991_s12  ;;  %v680_v50 = vld [vmem:[%s5859_s8 + $0x20] sm:$0xff]  ;;  %v683_v62 = vld [vmem:[%s5859_s8 + $0x38] sm:$0xff]  ;;  %s655_s12 = scalar_lea.vmem %s7571_s2, %s7630_s25  ;;  %vm1845_vm5 = vcmask 130048   ;;  %vm1854_vm6 = vcmask 195584  }
  0x46   : > { %v668_v1 = vld [vmem:[%s652_s28] sm:$0xff]  ;;  %v669_v2 = vld [vmem:[%s652_s28 + $0x8] sm:$0xff]  ;;  %v670_v6 = vld [vmem:[%s652_s28 + $0x10] sm:$0xff]  ;;  %s7592_s26 = smov 8   ;;  %s7588_s30 = smov 24  }
  0x47   : > { %v689_v5 = vpack.c.bf16 %v669_v2, %v668_v1  ;;  %v671_v7 = vld [vmem:[%s652_s28 + $0x18] sm:$0xff]  ;;  %v672_v9 = vld [vmem:[%s652_s28 + $0x20] sm:$0xff]  ;;  %v673_v10 = vld [vmem:[%s652_s28 + $0x28] sm:$0xff]  ;;  %846 = vmatpush.bf16.msra.mxu2 %v820_v23  ;;  %s7590_s27 = smov 16   ;;  %s7615_s17 = smov 8  }
  0x48   : > { %v690_v8 = vpack.c.bf16 %v671_v7, %v670_v6  ;;  %v691_v11 = vpack.c.bf16 %v673_v10, %v672_v9  ;;  %v674_v12 = vld [vmem:[%s652_s28 + $0x30] sm:$0xff]  ;;  %v675_v13 = vld [vmem:[%s652_s28 + $0x38] sm:$0xff]  ;;  %789 = vmatpush.bf16.msra.mxu1 %v762_v26  ;;  %v5148_v10 = vld [vmem:[%s7579_s10 + $0x5] ss:$0 sm:$0xff]  ;;  %s5648_s28 = smov 96   ;;  %s7616_s19 = smov 16  }
  0x49   : > { %4804 = vmatmul.msk.bf16.vlgmr.msra.gmra.mxu0 %vm699_vm1, %v689_v5  ;;  %v692_v14 = vpack.c.bf16 %v675_v13, %v674_v12  ;;  %s7617_s24 = smov 24  }
  0x59   : > { %4805 = vmatmul.msk.bf16.gmra.mxu0 %vm699_vm1, %v690_v8 }
  0x69   : > { %4806 = vmatmul.msk.bf16.gmra.mxu0 %vm699_vm1, %v691_v11 }
  0x79   : > { %4807 = vmatmul.msk.bf16.gmra.mxu0 %vm699_vm1, %v692_v14 }
  0xc6   : > { %v725_v27 = vpop.f32.mrf.mxu0 }
  0xc7   : > { %v5899_v29 = vadd.f32 %v5147_v28, %v725_v27 }
  0xc9   : > { %v745_v34 = vadd.f32 %v5899_v29, %v676_v30 }
  0xce   : > { %v727_v31 = vpop.f32.mrf.mxu0 }
  0xcf   : > { %v5903_v33 = vadd.f32 %v5147_v28, %v727_v31 }
  0xd1   : > { %v816_v35 = vpack.c.bf16 %v5903_v33, %v5899_v29  ;;  %v746_v36 = vadd.f32 %v5903_v33, %v677_v32 }
  0xd3   : > { %4818 = vmatmul.msk.bf16.vlgmr.msra.gmra.mxu2 %vm769_vm2, %v816_v35  ;;  %v758_v37 = vpack.c.bf16 %v746_v36, %v745_v34 }
  0xd5   : > { %4813 = vmatmul.msk.bf16.vlgmr.msra.gmra.mxu1 %vm769_vm2, %v758_v37 }
  0xd6   : > { %v730_v38 = vpop.f32.mrf.mxu0 }
  0xd7   : > { %v5911_v39 = vadd.f32 %v5147_v28, %v730_v38  ;;  %v5149_v38 = vld [vmem:[%s7575_s6 + $0x24] ss:$0 sm:$0xff] }
  0xd9   : > { %v747_v44 = vadd.f32 %v5911_v39, %v678_v40 }
  0xde   : > { %v732_v41 = vpop.f32.mrf.mxu0 }
  0xdf   : > { %v5915_v43 = vadd.f32 %v5147_v28, %v732_v41 }
  0xe1   : > { %v817_v45 = vpack.c.bf16 %v5915_v43, %v5911_v39  ;;  %v748_v46 = vadd.f32 %v5915_v43, %v679_v42 }
  0xe3   : > { %4819 = vmatmul.msk.bf16.gmra.mxu2 %vm769_vm2, %v817_v45  ;;  %v759_v47 = vpack.c.bf16 %v748_v46, %v747_v44 }
  0xe5   : > { %4814 = vmatmul.msk.bf16.gmra.mxu1 %vm769_vm2, %v759_v47 }
  0xe6   : > { %v735_v48 = vpop.f32.mrf.mxu0 }
  0xe7   : > { %v5923_v49 = vadd.f32 %v5147_v28, %v735_v48 }
  0xe9   : > { %v749_v54 = vadd.f32 %v5923_v49, %v680_v50 }
  0xee   : > { %v737_v51 = vpop.f32.mrf.mxu0 }
  0xef   : > { %v5927_v53 = vadd.f32 %v5147_v28, %v737_v51 }
  0xf1   : > { %v818_v55 = vpack.c.bf16 %v5927_v53, %v5923_v49  ;;  %v750_v56 = vadd.f32 %v5927_v53, %v681_v52 }
  0xf3   : > { %4820 = vmatmul.msk.bf16.gmra.mxu2 %vm769_vm2, %v818_v55  ;;  %v760_v57 = vpack.c.bf16 %v750_v56, %v749_v54 }
  0xf5   : > { %4815 = vmatmul.msk.bf16.gmra.mxu1 %vm769_vm2, %v760_v57 }
  0xf6   : > { %v740_v58 = vpop.f32.mrf.mxu0 }
  0xf7   : > { %v5935_v59 = vadd.f32 %v5147_v28, %v740_v58 }
  0xf9   : > { %v751_v0 = vadd.f32 %v5935_v59, %v682_v60 }
  0xfe   : > { %v742_v61 = vpop.f32.mrf.mxu0 }
  0xff   : > { %v5939_v63 = vadd.f32 %v5147_v28, %v742_v61 }
 0x101   : > { %v819_v1 = vpack.c.bf16 %v5939_v63, %v5935_v59  ;;  %v752_v2 = vadd.f32 %v5939_v63, %v683_v62 }
 0x103   : > { %4821 = vmatmul.msk.bf16.gmra.mxu2 %vm769_vm2, %v819_v1  ;;  %v761_v3 = vpack.c.bf16 %v752_v2, %v751_v0 }
 0x105   : > { %4816 = vmatmul.msk.bf16.gmra.mxu1 %vm769_vm2, %v761_v3 }
 0x152   : > { %v791_v4 = vpop.f32.mrf.mxu1 }
 0x153   : > { %v792_v19 = vadd.f32 %v5148_v10, %v791_v4 }
 0x155   : > { %v868_v22 = vmul.f32 0.35355338, %v792_v19 }
 0x156   : > { %v5947_v5 = vpop.f32.mrf.mxu2 }
 0x157   : > { %v849_v56 = vadd.f32 %v5149_v38, %v5947_v5 }
 0x15a   : > { %v793_v6 = vpop.f32.mrf.mxu1 }
 0x15b   : > { %v794_v17 = vadd.f32 %v5148_v10, %v793_v6 }
 0x15d   : > { %v869_v20 = vmul.f32 0.35355338, %v794_v17  ;;  %v880_v40 = vpack.c.bf16 %v794_v17, %v792_v19 }
 0x15e   : > { %v850_v7 = vpop.f32.mrf.mxu2 }
 0x15f   : > { %v5964_v25 = vpack.c.bf16 %v869_v20, %v868_v22  ;;  %v851_v54 = vadd.f32 %v5149_v38, %v850_v7 }
 0x161   : > { %v5994_v57 = vpack.c.bf16 %v851_v54, %v849_v56 }
 0x162   : > { %v796_v8 = vpop.f32.mrf.mxu1 }
 0x163   : > { %v5952_v12 = vadd.f32 %v5148_v10, %v796_v8 }
 0x165   : > { %v870_v60 = vmul.f32 0.35355338, %v5952_v12 }
 0x166   : > { %v853_v9 = vpop.f32.mrf.mxu2 }
 0x167   : > { %v854_v52 = vadd.f32 %v5149_v38, %v853_v9 }
 0x16a   : > { %v798_v11 = vpop.f32.mrf.mxu1 }
 0x16b   : > { %v5954_v13 = vadd.f32 %v5148_v10, %v798_v11 }
 0x16d   : > { %v5958_v14 = vpack.c.bf16 %v5954_v13, %v5952_v12  ;;  %v871_v58 = vmul.f32 0.35355338, %v5954_v13 }
 0x16e   : > { %v855_v15 = vpop.f32.mrf.mxu2 }
 0x16f   : > { %893 = vrot.lane.b32.xlu2 %v5958_v14, %s5648_s28  ;;  %v856_v50 = vadd.f32 %v5149_v38, %v855_v15  ;;  %v6003_v61 = vpack.c.bf16 %v871_v58, %v870_v60 }
 0x171   : > { %v5990_v55 = vpack.c.bf16 %v856_v50, %v854_v52 }
 0x172   : > { %v801_v16 = vpop.f32.mrf.mxu1 }
 0x173   : > { %v802_v23 = vadd.f32 %v5148_v10, %v801_v16 }
 0x175   : > { %v872_v31 = vmul.f32 0.35355338, %v802_v23 }
 0x176   : > { %v858_v18 = vpop.f32.mrf.mxu2 }
 0x177   : > { %1105 = vrot.lane.b32.xlu2 %v5958_v14, %s5649_s20  ;;  %v859_v48 = vadd.f32 %v5149_v38, %v858_v18 }
 0x17a   : > { %v803_v21 = vpop.f32.mrf.mxu1 }
 0x17b   : > { %v804_v24 = vadd.f32 %v5148_v10, %v803_v21 }
 0x17d   : > { %v882_v26 = vpack.c.bf16 %v804_v24, %v802_v23  ;;  %v873_v28 = vmul.f32 0.35355338, %v804_v24 }
 0x17e   : > { %v860_v27 = vpop.f32.mrf.mxu2 }
 0x17f   : > { %895 = vrot.lane.b32.xlu1 %v882_v26, %s5648_s28  ;;  %1095 = vrot.lane.b32.xlu2 %v5964_v25, %s5650_s29  ;;  %v5969_v32 = vpack.c.bf16 %v873_v28, %v872_v31  ;;  %v861_v46 = vadd.f32 %v5149_v38, %v860_v27 }
 0x181   : > { %v5983_v51 = vpack.c.bf16 %v861_v46, %v859_v48 }
 0x182   : > { %v806_v30 = vpop.f32.mrf.mxu1 }
 0x183   : > { %v807_v36 = vadd.f32 %v5148_v10, %v806_v30 }
 0x185   : > { %v874_v0 = vmul.f32 0.35355338, %v807_v36 }
 0x186   : > { %v863_v34 = vpop.f32.mrf.mxu2 }
 0x187   : > { %1107 = vrot.lane.b32.xlu1 %v882_v26, %s5649_s20  ;;  %1099 = vrot.lane.b32.xlu2 %v5969_v32, %s5650_s29  ;;  %v864_v44 = vadd.f32 %v5149_v38, %v863_v34 }
 0x18a   : > { %v808_v35 = vpop.f32.mrf.mxu1 }
 0x18b   : > { %v809_v37 = vadd.f32 %v5148_v10, %v808_v35 }
 0x18d   : > { %v883_v41 = vpack.c.bf16 %v809_v37, %v807_v36  ;;  %v875_v62 = vmul.f32 0.35355338, %v809_v37 }
 0x18e   : > { %v865_v42 = vpop.f32.mrf.mxu2 }
 0x18f   : > { %v866_v45 = vadd.f32 %v5149_v38, %v865_v42  ;;  %897 = vrot.lane.b32.xlu0 %v883_v41, %s5648_s28  ;;  %1103 = vrot.lane.b32.xlu1 %v880_v40, %s5649_s20  ;;  %v6015_v1 = vpack.c.bf16 %v875_v62, %v874_v0 }
 0x190   : > { %1539 = vrot.lane.b32.xlu2 %v882_v26, %s5651_s18 }
 0x191   : > { %v5980_v47 = vpack.c.bf16 %v866_v45, %v864_v44 }
 0x193   : > { %1066 = vmatpush.bf16.msrb.mxu0 %v5980_v47 }
 0x197   : > { %1067 = vmatpush.bf16.msrb.mxu0 %v5983_v51  ;;  %1109 = vrot.lane.b32.xlu0 %v883_v41, %s5649_s20 }
 0x198   : > { %1327 = vrot.lane.b32.xlu1 %v883_v41, %s7594_s0  ;;  %1537 = vrot.lane.b32.xlu2 %v5958_v14, %s5651_s18 }
 0x19b   : > { %1068 = vmatpush.bf16.msrb.mxu0 %v5990_v55 }
 0x19f   : > { %1069 = vmatpush.bf16.msrb.mxu0 %v5994_v57  ;;  %891 = vrot.lane.b32.xlu0 %v880_v40, %s5648_s28 }
 0x1a0   : > { %1325 = vrot.lane.b32.xlu1 %v882_v26, %s7594_s0  ;;  %1313 = vrot.lane.b32.xlu2 %v5964_v25, %s7595_s15 }
 0x1a7   : > { %1097 = vrot.lane.b32.xlu0 %v6003_v61, %s5650_s29 }
 0x1a8   : > { %1535 = vrot.lane.b32.xlu1 %v880_v40, %s5651_s18  ;;  %1529 = vrot.lane.b32.xlu2 %v6003_v61, %s5654_s5 }
 0x1af   : > { %1541 = vrot.lane.b32.xlu0 %v883_v41, %s5651_s18 }
 0x1b0   : > { %1315 = vrot.lane.b32.xlu1 %v6003_v61, %s7595_s15  ;;  %1692 = vrot.lane.b32.xlu2 %v5983_v51, %s5654_s5 }
 0x1b7   : > { %1323 = vrot.lane.b32.xlu0 %v5958_v14, %s7594_s0 }
 0x1b8   : > { %1531 = vrot.lane.b32.xlu1 %v5969_v32, %s5654_s5  ;;  %1319 = vrot.lane.b32.xlu2 %v6015_v1, %s7595_s15 }
 0x1bf   : > { %1321 = vrot.lane.b32.xlu0 %v880_v40, %s7594_s0 }
 0x1c0   : > { %1262 = vrot.lane.b32.xlu1 %v5990_v55, %s5650_s29  ;;  %1266 = vrot.lane.b32.xlu2 %v5980_v47, %s5650_s29 }
 0x1c7   : > { %1527 = vrot.lane.b32.xlu0 %v5964_v25, %s5654_s5 }
 0x1c8   : > { %1101 = vrot.lane.b32.xlu1 %v6015_v1, %s5650_s29 }
 0x1c9   : > { %v894_v2 = vpop.permute.xlu2 %893 }
 0x1ca   : > { %v916_v21 = vsel %vm899_vm3, %v894_v2, 0 }
 0x1cf   : > { %1317 = vrot.lane.b32.xlu0 %v5969_v32, %s7595_s15 }
 0x1d1   : > { %v1106_v3 = vpop.permute.xlu2 %1105 }
 0x1d2   : > { %v1127_v28 = vsel %vm899_vm3, %v1106_v3, 0 }
 0x1d7   : > { %1264 = vrot.lane.b32.xlu0 %v5983_v51, %s5650_s29 }
 0x1d9   : > { %v1096_v4 = vpop.permute.xlu2 %1095 }
 0x1df   : > { %1260 = vrot.lane.b32.xlu0 %v5994_v57, %s5650_s29 }
 0x1e1   : > { %v6038_v5 = vpop.permute.xlu2 %1099 }
 0x1e7   : > { %1533 = vrot.lane.b32.xlu0 %v6015_v1, %s5654_s5 }
 0x1ea   : > { %v1540_v6 = vpop.permute.xlu2 %1539 }
 0x1eb   : > { %v1562_v41 = vsel %vm899_vm3, %v1540_v6, 0 }
 0x1ef   : > { %1694 = vrot.lane.b32.xlu0 %v5980_v47, %s5654_s5 }
 0x1f1   : > { %v896_v8 = vpop.permute.xlu1 %895 }
 0x1f2   : > { %v1538_v7 = vpop.permute.xlu2 %1537  ;;  %v919_v16 = vsel %vm899_vm3, %v896_v8, 0 }
 0x1f3   : > { %v1559_v45 = vsel %vm899_vm3, %v1538_v7, 0 }
 0x1f9   : > { %v1108_v11 = vpop.permute.xlu1 %1107 }
 0x1fa   : > { %v6044_v9 = vpop.permute.xlu2 %1313  ;;  %v1130_v22 = vsel %vm899_vm3, %v1108_v11, 0 }
 0x201   : > { %v898_v10 = vpop.permute.xlu0 %897  ;;  %v1104_v18 = vpop.permute.xlu1 %1103 }
 0x202   : > { %v6046_v12 = vpop.permute.xlu2 %1529  ;;  %v922_v13 = vsel %vm899_vm3, %v898_v10, 0  ;;  %v1124_v36 = vsel %vm899_vm3, %v1104_v18, 0 }
 0x203   : > { %928 = vmatpush.bf16.xpose.msra.mxu3 %v922_v13 }
 0x209   : > { %v1110_v14 = vpop.permute.xlu0 %1109 }
 0x20a   : > { %v6049_v15 = vpop.permute.xlu2 %1692  ;;  %v1133_v17 = vsel %vm899_vm3, %v1110_v14, 0  ;;  %v1328_v23 = vpop.permute.xlu1 %1327 }
 0x20b   : > { %929 = vmatpush.bf16.xpose.msra.mxu3 %v919_v16  ;;  %1139 = vmatpush.bf16.xpose.msrb.mxu1 %v1133_v17  ;;  %v1351_v30 = vsel %vm899_vm3, %v1328_v23, 0 }
 0x211   : > { %v892_v19 = vpop.permute.xlu0 %891 }
 0x212   : > { %v6053_v20 = vpop.permute.xlu2 %1319  ;;  %v913_v27 = vsel %vm899_vm3, %v892_v19, 0  ;;  %v1326_v31 = vpop.permute.xlu1 %1325 }
 0x213   : > { %930 = vmatpush.bf16.xpose.msra.mxu3 %v916_v21  ;;  %1140 = vmatpush.bf16.xpose.msrb.mxu1 %v1130_v22  ;;  %v1348_v37 = vsel %vm899_vm3, %v1326_v31, 0 }
 0x219   : > { %v1098_v24 = vpop.permute.xlu0 %1097 }
 0x21a   : > { %v1267_v26 = vpop.permute.xlu2 %1266  ;;  %v1536_v42 = vpop.permute.xlu1 %1535 }
 0x21b   : > { %1288 = vmatpush.bf16.msrb.mxu2 %v1267_v26  ;;  %931 = vmatpush.bf16.xpose.msra.mxu3 %v913_v27  ;;  %v1556_v50 = vsel %vm899_vm3, %v1536_v42, 0 }
 0x21c   : > { %1141 = vmatpush.bf16.xpose.msrb.mxu1 %v1127_v28 }
 0x221   : > { %v1542_v34 = vpop.permute.xlu0 %1541 }
 0x222   : > { %v1565_v35 = vsel %vm899_vm3, %v1542_v34, 0  ;;  %4822 = vmatmul.msk.bf16.vlgmr.msra.gmra.mxu3 %vm899_vm3, %v5964_v25  ;;  %v1316_v46 = vpop.permute.xlu1 %1315 }
 0x223   : > { %1357 = vmatpush.bf16.xpose.msrb.mxu3 %v1351_v30 }
 0x224   : > { %1142 = vmatpush.bf16.xpose.msrb.mxu1 %v1124_v36 }
 0x229   : > { %v1324_v38 = vpop.permute.xlu0 %1323 }
 0x22a   : > { %v1345_v40 = vsel %vm899_vm3, %v1324_v38, 0  ;;  %v1532_v54 = vpop.permute.xlu1 %1531 }
 0x22b   : > { %1358 = vmatpush.bf16.xpose.msrb.mxu3 %v1348_v37  ;;  %4830 = vmatmul.msk.bf16.vlgmr.msrb.gmra.mxu1 %vm899_vm3, %v1096_v4 }
 0x22c   : > { %1571 = vmatpush.bf16.xpose.msra.mxu1 %v1565_v35 }
 0x231   : > { %v1322_v44 = vpop.permute.xlu0 %1321 }
 0x232   : > { %4823 = vmatmul.msk.bf16.gmra.mxu3 %vm899_vm3, %v6003_v61  ;;  %v1342_v25 = vsel %vm899_vm3, %v1322_v44, 0  ;;  %v1263_v58 = vpop.permute.xlu1 %1262 }
 0x233   : > { %1359 = vmatpush.bf16.xpose.msrb.mxu3 %v1345_v40 }
 0x234   : > { %1572 = vmatpush.bf16.xpose.msra.mxu1 %v1562_v41 }
 0x239   : > { %v1528_v48 = vpop.permute.xlu0 %1527 }
 0x23a   : > { %v1102_v62 = vpop.permute.xlu1 %1101 }
 0x23b   : > { %1360 = vmatpush.bf16.xpose.msrb.mxu3 %v1342_v25  ;;  %4831 = vmatmul.msk.bf16.gmra.mxu1 %vm899_vm3, %v1098_v24 }
 0x23c   : > { %1573 = vmatpush.bf16.xpose.msra.mxu1 %v1559_v45 }
 0x241   : > { %v1318_v52 = vpop.permute.xlu0 %1317 }
 0x242   : > { %4824 = vmatmul.msk.bf16.gmra.mxu3 %vm899_vm3, %v5969_v32  ;;  %v684_v32 = vld [vmem:[%s655_s12] sm:$0x1] }
 0x244   : > { %1574 = vmatpush.bf16.xpose.msra.mxu1 %v1556_v50 }
 0x249   : > { %v1265_v56 = vpop.permute.xlu0 %1264 }
 0x24a   : > { %1289 = vmatpush.bf16.msrb.mxu2 %v1265_v56 }
 0x24b   : > { %4832 = vmatmul.msk.bf16.gmra.mxu1 %vm899_vm3, %v6038_v5 }
 0x24e   : > { %1290 = vmatpush.bf16.msrb.mxu2 %v1263_v58 }
 0x251   : > { %v1261_v60 = vpop.permute.xlu0 %1260 }
 0x252   : > { %4825 = vmatmul.msk.bf16.gmra.mxu3 %vm899_vm3, %v6015_v1  ;;  %1291 = vmatpush.bf16.msrb.mxu2 %v1261_v60  ;;  %v685_v1 = vmul.f32 -1e+09, %v684_v32 }
 0x254   : > { %v6097_v2 = vperm.slane %v685_v1, 0 }
 0x259   : > { %v1534_v61 = vpop.permute.xlu0 %1533 }
 0x25b   : > { %4833 = vmatmul.msk.bf16.gmra.mxu1 %vm899_vm3, %v1102_v62 }
 0x261   : > { %v1695_v0 = vpop.permute.xlu0 %1694 }
 0x262   : > { %4838 = vmatmul.msk.bf16.vlgmr.msrb.gmra.mxu3 %vm899_vm3, %v6044_v9  ;;  %1716 = vmatpush.bf16.msra.mxu2 %v1695_v0 }
 0x266   : > { %1717 = vmatpush.bf16.msra.mxu2 %v6049_v15 }
 0x26b   : > { %4846 = vmatmul.msk.bf16.vlgmr.msra.gmra.mxu1 %vm899_vm3, %v1528_v48 }
 0x272   : > { %4839 = vmatmul.msk.bf16.gmra.mxu3 %vm899_vm3, %v1316_v46 }
 0x27b   : > { %4847 = vmatmul.msk.bf16.gmra.mxu1 %vm899_vm3, %v6046_v12 }
 0x282   : > { %4840 = vmatmul.msk.bf16.gmra.mxu3 %vm899_vm3, %v1318_v52 }
 0x28b   : > { %4848 = vmatmul.msk.bf16.gmra.mxu1 %vm899_vm3, %v1532_v54 }
 0x292   : > { %4841 = vmatmul.msk.bf16.gmra.mxu3 %vm899_vm3, %v6053_v20 }
 0x29b   : > { %4849 = vmatmul.msk.bf16.gmra.mxu1 %vm899_vm3, %v1534_v61 }
 0x2a5   : > { %v933_v3 = vpop.f32.mrf.mxu3 }
 0x2a6   : > { %v6100_v4 = vadd.f32 %v933_v3, %v6097_v2 }
 0x2a8   : > { %v1144_v5 = vpop.f32.mrf.mxu1  ;;  %v954_v6 = vsel %vm953_vm4, %v6100_v4, -inf }
 0x2a9   : > { %v6105_v7 = vadd.f32 %v1144_v5, %v6097_v2  ;;  %955 = vmax.xlane.f32.xlu0 %v954_v6 }
 0x2ab   : > { %v1164_v8 = vsel %vm953_vm4, %v6105_v7, -inf }
 0x2ac   : > { %1165 = vmax.xlane.f32.xlu1 %v1164_v8 }
 0x2ad   : > { %v935_v9 = vpop.f32.mrf.mxu3 }
 0x2ae   : > { %v6118_v15 = vadd.f32 %v935_v9, %v6097_v2 }
 0x2b0   : > { %v1146_v10 = vpop.f32.mrf.mxu1  ;;  %v957_v20 = vsel %vm953_vm4, %v6118_v15, -inf }
 0x2b1   : > { %v6110_v11 = vadd.f32 %v1146_v10, %v6097_v2 }
 0x2b3   : > { %v1167_v12 = vsel %vm953_vm4, %v6110_v11, -inf }
 0x2b4   : > { %1168 = vmax.xlane.f32.xlu2 %v1167_v12 }
 0x2b5   : > { %v938_v13 = vpop.f32.mrf.mxu3 }
 0x2b6   : > { %v6115_v14 = vadd.f32 %v938_v13, %v6097_v2 }
 0x2b8   : > { %v1149_v16 = vpop.f32.mrf.mxu1  ;;  %v960_v17 = vsel %vm953_vm4, %v6115_v14, -inf }
 0x2b9   : > { %v6123_v18 = vadd.f32 %v1149_v16, %v6097_v2  ;;  %961 = vmax.xlane.f32.xlu0 %v960_v17 }
 0x2bb   : > { %v1170_v19 = vsel %vm953_vm4, %v6123_v18, -inf }
 0x2bc   : > { %1171 = vmax.xlane.f32.xlu1 %v1170_v19  ;;  %958 = vmax.xlane.f32.xlu2 %v957_v20 }
 0x2bd   : > { %v940_v21 = vpop.f32.mrf.mxu3 }
 0x2be   : > { %v6130_v22 = vadd.f32 %v940_v21, %v6097_v2 }
 0x2c0   : > { %v1151_v23 = vpop.f32.mrf.mxu1  ;;  %v963_v26 = vsel %vm953_vm4, %v6130_v22, -inf }
 0x2c1   : > { %v6133_v24 = vadd.f32 %v1151_v23, %v6097_v2 }
 0x2c3   : > { %v1173_v27 = vsel %vm953_vm4, %v6133_v24, -inf }
 0x2c4   : > { %964 = vmax.xlane.f32.xlu1 %v963_v26  ;;  %1174 = vmax.xlane.f32.xlu2 %v1173_v27 }
 0x2c5   : > { %v943_v28 = vpop.f32.mrf.mxu3 }
 0x2c6   : > { %v6140_v30 = vadd.f32 %v943_v28, %v6097_v2 }
 0x2c8   : > { %v1154_v31 = vpop.f32.mrf.mxu1  ;;  %v966_v35 = vsel %vm953_vm4, %v6140_v30, -inf }
 0x2c9   : > { %v6143_v34 = vadd.f32 %v1154_v31, %v6097_v2 }
 0x2cb   : > { %v1176_v36 = vsel %vm953_vm4, %v6143_v34, -inf }
 0x2cc   : > { %967 = vmax.xlane.f32.xlu1 %v966_v35  ;;  %1177 = vmax.xlane.f32.xlu2 %v1176_v36 }
 0x2cd   : > { %v945_v37 = vpop.f32.mrf.mxu3 }
 0x2ce   : > { %v6150_v38 = vadd.f32 %v945_v37, %v6097_v2 }
 0x2d0   : > { %v1156_v40 = vpop.f32.mrf.mxu1  ;;  %v969_v42 = vsel %vm953_vm4, %v6150_v38, -inf }
 0x2d1   : > { %v6153_v41 = vadd.f32 %v1156_v40, %v6097_v2 }
 0x2d3   : > { %v1179_v44 = vsel %vm953_vm4, %v6153_v41, -inf }
 0x2d4   : > { %970 = vmax.xlane.f32.xlu2 %v969_v42  ;;  %1180 = vmax.xlane.f32.xlu0 %v1179_v44 }
 0x2d5   : > { %v948_v25 = vpop.f32.mrf.mxu3 }
 0x2d6   : > { %v6165_v52 = vadd.f32 %v948_v25, %v6097_v2 }
 0x2d8   : > { %v1159_v45 = vpop.f32.mrf.mxu1  ;;  %v972_v60 = vsel %vm953_vm4, %v6165_v52, -inf }
 0x2d9   : > { %v6160_v46 = vadd.f32 %v1159_v45, %v6097_v2 }
 0x2db   : > { %v1182_v48 = vsel %vm953_vm4, %v6160_v46, -inf }
 0x2dc   : > { %1183 = vmax.xlane.f32.xlu0 %v1182_v48 }
 0x2dd   : > { %v950_v50 = vpop.f32.mrf.mxu3 }
 0x2de   : > { %v6178_v0 = vadd.f32 %v950_v50, %v6097_v2 }
 0x2e0   : > { %v1161_v54 = vpop.f32.mrf.mxu1  ;;  %v975_v5 = vsel %vm953_vm4, %v6178_v0, -inf }
 0x2e1   : > { %v6168_v56 = vadd.f32 %v1161_v54, %v6097_v2 }
 0x2e3   : > { %v1185_v58 = vsel %vm953_vm4, %v6168_v56, -inf }
 0x2e4   : > { %1186 = vmax.xlane.f32.xlu1 %v1185_v58  ;;  %973 = vmax.xlane.f32.xlu0 %v972_v60 }
 0x2e5   : > { %v1362_v61 = vpop.f32.mrf.mxu3 }
 0x2e6   : > { %v6175_v62 = vadd.f32 %v1362_v61, %v6097_v2 }
 0x2e8   : > { %v1576_v32 = vpop.f32.mrf.mxu1  ;;  %v1382_v1 = vsel %vm953_vm4, %v6175_v62, -inf }
 0x2e9   : > { %v6183_v3 = vadd.f32 %v1576_v32, %v6097_v2  ;;  %1383 = vmax.xlane.f32.xlu2 %v1382_v1 }
 0x2eb   : > { %v1596_v6 = vsel %vm953_vm4, %v6183_v3, -inf }
 0x2ec   : > { %976 = vmax.xlane.f32.xlu1 %v975_v5  ;;  %1597 = vmax.xlane.f32.xlu0 %v1596_v6 }
 0x2ed   : > { %v1364_v8 = vpop.f32.mrf.mxu3 }
 0x2ee   : > { %v6190_v9 = vadd.f32 %v1364_v8, %v6097_v2 }
 0x2f0   : > { %v1578_v10 = vpop.f32.mrf.mxu1  ;;  %v1385_v16 = vsel %vm953_vm4, %v6190_v9, -inf }
 0x2f1   : > { %v6193_v12 = vadd.f32 %v1578_v10, %v6097_v2 }
 0x2f3   : > { %v1599_v13 = vsel %vm953_vm4, %v6193_v12, -inf }
 0x2f4   : > { %1600 = vmax.xlane.f32.xlu1 %v1599_v13  ;;  %1386 = vmax.xlane.f32.xlu0 %v1385_v16 }
 0x2f5   : > { %v1367_v17 = vpop.f32.mrf.mxu3 }
 0x2f6   : > { %v6200_v19 = vadd.f32 %v1367_v17, %v6097_v2 }
 0x2f8   : > { %v1581_v20 = vpop.f32.mrf.mxu1  ;;  %v1388_v21 = vsel %vm953_vm4, %v6200_v19, -inf }
 0x2f9   : > { %v6205_v23 = vadd.f32 %v1581_v20, %v6097_v2  ;;  %1389 = vmax.xlane.f32.xlu2 %v1388_v21 }
 0x2fb   : > { %v1602_v26 = vsel %vm953_vm4, %v6205_v23, -inf }
 0x2fc   : > { %1603 = vmax.xlane.f32.xlu0 %v1602_v26 }
 0x2fd   : > { %v1369_v27 = vpop.f32.mrf.mxu3 }
 0x2fe   : > { %v6210_v28 = vadd.f32 %v1369_v27, %v6097_v2 }
 0x300   : > { %v1583_v31 = vpop.f32.mrf.mxu1  ;;  %v1391_v35 = vsel %vm953_vm4, %v6210_v28, -inf }
 0x301   : > { %v6215_v36 = vadd.f32 %v1583_v31, %v6097_v2  ;;  %1392 = vmax.xlane.f32.xlu1 %v1391_v35 }
 0x303   : > { %v1605_v37 = vsel %vm953_vm4, %v6215_v36, -inf }
 0x304   : > { %1606 = vmax.xlane.f32.xlu2 %v1605_v37 }
 0x305   : > { %v1372_v40 = vpop.f32.mrf.mxu3 }
 0x306   : > { %v6220_v42 = vadd.f32 %v1372_v40, %v6097_v2 }
 0x308   : > { %v1586_v44 = vpop.f32.mrf.mxu1  ;;  %v1394_v25 = vsel %vm953_vm4, %v6220_v42, -inf }
 0x309   : > { %v6225_v45 = vadd.f32 %v1586_v44, %v6097_v2  ;;  %1395 = vmax.xlane.f32.xlu0 %v1394_v25 }
 0x30b   : > { %v1608_v48 = vsel %vm953_vm4, %v6225_v45, -inf }
 0x30c   : > { %1609 = vmax.xlane.f32.xlu1 %v1608_v48 }
 0x30d   : > { %v1374_v50 = vpop.f32.mrf.mxu3 }
 0x30e   : > { %v6230_v54 = vadd.f32 %v1374_v50, %v6097_v2 }
 0x310   : > { %v1588_v58 = vpop.f32.mrf.mxu1  ;;  %v1397_v60 = vsel %vm953_vm4, %v6230_v54, -inf }
 0x311   : > { %v6235_v61 = vadd.f32 %v1588_v58, %v6097_v2  ;;  %1398 = vmax.xlane.f32.xlu2 %v1397_v60 }
 0x313   : > { %v1611_v32 = vsel %vm953_vm4, %v6235_v61, -inf }
 0x314   : > { %1612 = vmax.xlane.f32.xlu0 %v1611_v32 }
 0x315   : > { %v1377_v6 = vpop.f32.mrf.mxu3 }
 0x316   : > { %v6245_v10 = vadd.f32 %v1377_v6, %v6097_v2 }
 0x318   : > { %v1591_v1 = vpop.f32.mrf.mxu1  ;;  %v1400_v35 = vsel %vm953_vm4, %v6245_v10, -inf }
 0x319   : > { %v6240_v5 = vadd.f32 %v1591_v1, %v6097_v2 }
 0x31b   : > { %v1614_v8 = vsel %vm953_vm4, %v6240_v5, -inf }
 0x31c   : > { %1615 = vmax.xlane.f32.xlu2 %v1614_v8  ;;  %v956_v13 = vpop.xlane.xlu0 %955 }
 0x31d   : > { %v978_v26 = vsub.f32 %v6100_v4, %v956_v13  ;;  %v1379_v37 = vpop.f32.mrf.mxu3 }
 0x31f   : > { %v1166_v16 = vpop.xlane.xlu1 %1165  ;;  %v986_v40 = vmul.f32 1.442695, %v978_v26 }
 0x320   : > { %v1188_v17 = vsub.f32 %v6105_v7, %v1166_v16  ;;  %v1593_v20 = vpop.f32.mrf.mxu1  ;;  %v6257_v7 = vadd.f32 %v1379_v37, %v6097_v2 }
 0x321   : > { %v6249_v21 = vadd.f32 %v1593_v20, %v6097_v2 }
 0x322   : > { %v1196_v27 = vmul.f32 1.442695, %v1188_v17  ;;  %v1403_v48 = vsel %vm953_vm4, %v6257_v7, -inf }
 0x323   : > { %v1617_v31 = vsel %vm953_vm4, %v6249_v21, -inf }
 0x324   : > { %5194 = vpow2.f32 %v1196_v27  ;;  %1618 = vmax.xlane.f32.xlu1 %v1617_v31  ;;  %1401 = vmax.xlane.f32.xlu2 %v1400_v35 }
 0x325   : > { %5196 = vpow2.f32 %v986_v40 }
 0x327   : > { %v1169_v44 = vpop.xlane.xlu2 %1168 }
 0x328   : > { %v1189_v4 = vsub.f32 %v6110_v11, %v1169_v44 }
 0x32a   : > { %v6259_v25 = vpop.eup %5194  ;;  %v1198_v58 = vmul.f32 1.442695, %v1189_v4 }
 0x32b   : > { %v1212_v50 = vsel %vm953_vm4, %v6259_v25, 0.0  ;;  %v6266_v1 = vpop.eup %5196 }
 0x32c   : > { %1404 = vmax.xlane.f32.xlu1 %v1403_v48  ;;  %1213 = vadd.xlane.f32.xlu0 %v1212_v50  ;;  %5198 = vpow2.f32 %v1198_v58  ;;  %v1002_v11 = vsel %vm953_vm4, %v6266_v1, 0.0  ;;  %v962_v27 = vpop.xlane.xlu0 %961 }
 0x32f   : > { %v1172_v60 = vpop.xlane.xlu1 %1171  ;;  %v959_v32 = vpop.xlane.xlu2 %958 }
 0x330   : > { %v979_v6 = vsub.f32 %v6118_v15, %v959_v32  ;;  %v1190_v13 = vsub.f32 %v6123_v18, %v1172_v60  ;;  %v980_v15 = vsub.f32 %v6115_v14, %v962_v27 }
 0x332   : > { %v988_v8 = vmul.f32 1.442695, %v979_v6  ;;  %v1200_v16 = vmul.f32 1.442695, %v1190_v13  ;;  %v6272_v26 = vpop.eup %5198  ;;  %v990_v44 = vmul.f32 1.442695, %v980_v15 }
 0x333   : > { %v1215_v18 = vsel %vm953_vm4, %v6272_v26, 0.0 }
 0x334   : > { %1003 = vadd.xlane.f32.xlu1 %v1002_v11  ;;  %5200 = vpow2.f32 %v988_v8 }
 0x335   : > { %5202 = vpow2.f32 %v1200_v16 }
 0x337   : > { %v965_v17 = vpop.xlane.xlu1 %964  ;;  %v1175_v20 = vpop.xlane.xlu2 %1174 }
 0x338   : > { %v981_v31 = vsub.f32 %v6130_v22, %v965_v17  ;;  %v1191_v6 = vsub.f32 %v6133_v24, %v1175_v20 }
 0x33a   : > { %v992_v35 = vmul.f32 1.442695, %v981_v31  ;;  %v6275_v37 = vpop.eup %5200 }
 0x33b   : > { %v1005_v40 = vsel %vm953_vm4, %v6275_v37, 0.0  ;;  %v6284_v58 = vpop.eup %5202 }
 0x33c   : > { %5204 = vpow2.f32 %v992_v35  ;;  %1216 = vadd.xlane.f32.xlu1 %v1215_v18  ;;  %1006 = vadd.xlane.f32.xlu2 %v1005_v40  ;;  %v1218_v13 = vsel %vm953_vm4, %v6284_v58, 0.0 }
 0x33d   : > { %5206 = vpow2.f32 %v990_v44 }
 0x33f   : > { %v968_v4 = vpop.xlane.xlu1 %967  ;;  %v1178_v48 = vpop.xlane.xlu2 %1177 }
 0x340   : > { %v982_v22 = vsub.f32 %v6140_v30, %v968_v4  ;;  %v1192_v50 = vsub.f32 %v6143_v34, %v1178_v48  ;;  %v1202_v30 = vmul.f32 1.442695, %v1191_v6 }
 0x342   : > { %v6286_v14 = vpop.eup %5204  ;;  %v994_v60 = vmul.f32 1.442695, %v982_v22  ;;  %v1204_v32 = vmul.f32 1.442695, %v1192_v50 }
 0x343   : > { %v1011_v8 = vsel %vm953_vm4, %v6286_v14, 0.0  ;;  %v6294_v16 = vpop.eup %5206 }
 0x344   : > { %5208 = vpow2.f32 %v994_v60  ;;  %1012 = vadd.xlane.f32.xlu1 %v1011_v8  ;;  %1219 = vadd.xlane.f32.xlu2 %v1218_v13  ;;  %v1008_v35 = vsel %vm953_vm4, %v6294_v16, 0.0 }
 0x345   : > { %5210 = vpow2.f32 %v1204_v32 }
 0x346   : > { %5212 = vpow2.f32 %v1202_v30 }
 0x347   : > { %v1181_v34 = vpop.xlane.xlu0 %1180  ;;  %v971_v50 = vpop.xlane.xlu2 %970 }
 0x348   : > { %v1193_v11 = vsub.f32 %v6153_v41, %v1181_v34 }
 0x34a   : > { %v6296_v17 = vpop.eup %5208  ;;  %v1206_v27 = vmul.f32 1.442695, %v1193_v11 }
 0x34b   : > { %v6298_v24 = vpop.eup %5210  ;;  %v1014_v20 = vsel %vm953_vm4, %v6296_v17, 0.0 }
 0x34c   : > { %1015 = vadd.xlane.f32.xlu0 %v1014_v20  ;;  %v1224_v31 = vsel %vm953_vm4, %v6298_v24, 0.0  ;;  %5214 = vpow2.f32 %v1206_v27  ;;  %1009 = vadd.xlane.f32.xlu2 %v1008_v35  ;;  %v6306_v41 = vpop.eup %5212 }
 0x34d   : > { %1225 = vadd.xlane.f32.xlu1 %v1224_v31  ;;  %v1221_v18 = vsel %vm953_vm4, %v6306_v41, 0.0 }
 0x34f   : > { %v1184_v44 = vpop.xlane.xlu0 %1183 }
 0x352   : > { %v6308_v15 = vpop.eup %5214 }
 0x353   : > { %v1227_v40 = vsel %vm953_vm4, %v6308_v15, 0.0 }
 0x354   : > { %1222 = vadd.xlane.f32.xlu2 %v1221_v18  ;;  %1228 = vadd.xlane.f32.xlu0 %v1227_v40 }
 0x357   : > { %v1187_v4 = vpop.xlane.xlu1 %1186  ;;  %v974_v48 = vpop.xlane.xlu0 %973 }
 0x358   : > { %v984_v32 = vsub.f32 %v6165_v52, %v974_v48  ;;  %v983_v52 = vsub.f32 %v6150_v38, %v971_v50  ;;  %v1194_v50 = vsub.f32 %v6160_v46, %v1184_v44 }
 0x35a   : > { %v998_v30 = vmul.f32 1.442695, %v984_v32 }
 0x35c   : > { %v1384_v6 = vpop.xlane.xlu2 %1383  ;;  %5216 = vpow2.f32 %v998_v30 }
 0x35f   : > { %v977_v22 = vpop.xlane.xlu1 %976  ;;  %v1598_v60 = vpop.xlane.xlu0 %1597 }
 0x360   : > { %v985_v13 = vsub.f32 %v6178_v0, %v977_v22  ;;  %v1406_v0 = vsub.f32 %v6175_v62, %v1384_v6  ;;  %v996_v22 = vmul.f32 1.442695, %v983_v52  ;;  %v1620_v52 = vsub.f32 %v6183_v3, %v1598_v60 }
 0x362   : > { %v1000_v34 = vmul.f32 1.442695, %v985_v13  ;;  %v6326_v35 = vpop.eup %5216  ;;  %v1414_v32 = vmul.f32 1.442695, %v1406_v0 }
 0x364   : > { %5218 = vpow2.f32 %v1000_v34 }
 0x366   : > { %1690 = vrot.lane.b32.xlu1 %v5990_v55, %s5654_s5 }
 0x367   : > { %v1601_v8 = vpop.xlane.xlu1 %1600  ;;  %v1387_v11 = vpop.xlane.xlu0 %1386 }
 0x368   : > { %1480 = vrot.lane.b32.xlu0 %v5980_v47, %s7595_s15  ;;  %v1195_v47 = vsub.f32 %v6168_v56, %v1187_v4  ;;  %v1407_v20 = vsub.f32 %v6190_v9, %v1387_v11  ;;  %v1020_v4 = vsel %vm953_vm4, %v6326_v35, 0.0  ;;  %v1621_v30 = vsub.f32 %v6193_v12, %v1601_v8 }
 0x36a   : > { %v1210_v31 = vmul.f32 1.442695, %v1195_v47  ;;  %v1416_v18 = vmul.f32 1.442695, %v1407_v20  ;;  %v6332_v48 = vpop.eup %5218  ;;  %v1630_v46 = vmul.f32 1.442695, %v1621_v30 }
 0x36b   : > { %v1023_v38 = vsel %vm953_vm4, %v6332_v48, 0.0 }
 0x36c   : > { %1478 = vrot.lane.b32.xlu2 %v5983_v51, %s7595_s15  ;;  %v1390_v51 = vpop.xlane.xlu2 %1389  ;;  %5220 = vpow2.f32 %v1210_v31 }
 0x36d   : > { %5222 = vpow2.f32 %v1416_v18  ;;  %v1408_v9 = vsub.f32 %v6200_v19, %v1390_v51  ;;  %v1208_v51 = vmul.f32 1.442695, %v1194_v50 }
 0x36e   : > { %5224 = vpow2.f32 %v996_v22 }
 0x36f   : > { %v6337_v13 = vpop.xlane.xlu0 %1603  ;;  %v1418_v6 = vmul.f32 1.442695, %v1408_v9  ;;  %5226 = vpow2.f32 %v1414_v32  ;;  %v1628_v9 = vmul.f32 1.442695, %v1620_v52 }
 0x371   : > { %5228 = vpow2.f32 %v1418_v6 }
 0x372   : > { %v6341_v62 = vpop.eup %5220  ;;  %5230 = vpow2.f32 %v1208_v51 }
 0x373   : > { %v6347_v47 = vpop.eup %5222  ;;  %v1233_v11 = vsel %vm953_vm4, %v6341_v62, 0.0  ;;  %5232 = vpow2.f32 %v1630_v46 }
 0x374   : > { %1688 = vrot.lane.b32.xlu2 %v5994_v57, %s5654_s5  ;;  %v1393_v27 = vpop.xlane.xlu1 %1392  ;;  %v6354_v31 = vpop.eup %5224  ;;  %v1433_v12 = vsel %vm953_vm4, %v6347_v47, 0.0 }
 0x375   : > { %v1409_v20 = vsub.f32 %v6210_v28, %v1393_v27  ;;  %v6358_v8 = vpop.eup %5226  ;;  %v1017_v0 = vsel %vm953_vm4, %v6354_v31, 0.0 }
 0x376   : > { %v1430_v22 = vsel %vm953_vm4, %v6358_v8, 0.0 }
 0x377   : > { %v6330_v40 = vpop.xlane.xlu2 %1606  ;;  %v1420_v18 = vmul.f32 1.442695, %v1409_v20  ;;  %v6365_v28 = vpop.eup %5228 }
 0x378   : > { %v6372_v60 = vpop.eup %5230 }
 0x379   : > { %5234 = vpow2.f32 %v1420_v18  ;;  %v6376_v50 = vpop.eup %5232 }
 0x37a   : > { %5236 = vpow2.f32 %v1628_v9 }
 0x37c   : > { %v1396_v44 = vpop.xlane.xlu0 %1395 }
 0x37f   : > { %v1610_v56 = vpop.xlane.xlu1 %1609  ;;  %v6381_v51 = vpop.eup %5234 }
 0x380   : > { %v1624_v3 = vsub.f32 %v6225_v45, %v1610_v56  ;;  %v1647_v56 = vsel %vm953_vm4, %v6376_v50, 0.0 }
 0x382   : > { %v1636_v6 = vmul.f32 1.442695, %v1624_v3  ;;  %v1410_v3 = vsub.f32 %v6220_v42, %v1396_v44 }
 0x384   : > { %v6345_v34 = vpop.xlane.xlu2 %1398  ;;  %5238 = vpow2.f32 %v1636_v6 }
 0x387   : > { %v1613_v32 = vpop.xlane.xlu0 %1612 }
 0x388   : > { %v1625_v30 = vsub.f32 %v6235_v61, %v1613_v32  ;;  %v1439_v61 = vsel %vm953_vm4, %v6381_v51, 0.0 }
 0x38a   : > { %v1638_v46 = vmul.f32 1.442695, %v1625_v30 }
 0x38c   : > { %5240 = vpow2.f32 %v1638_v46 }
 0x390   : > { %1021 = vadd.xlane.f32.xlu1 %v1020_v4  ;;  %v6363_v4 = vpop.xlane.xlu2 %1615 }
 0x392   : > { %1024 = vadd.xlane.f32.xlu0 %v1023_v38  ;;  %v1436_v38 = vsel %vm953_vm4, %v6365_v28, 0.0 }
 0x397   : > { %v6349_v19 = vpop.xlane.xlu1 %1618 }
 0x398   : > { %1234 = vadd.xlane.f32.xlu1 %v1233_v11  ;;  %v1230_v11 = vsel %vm953_vm4, %v6372_v60, 0.0  ;;  %v6385_v20 = vpop.xlane.xlu2 %1401 }
 0x39a   : > { %1434 = vadd.xlane.f32.xlu0 %v1433_v12  ;;  %v6387_v12 = vpop.eup %5236 }
 0x39b   : > { %v1644_v18 = vsel %vm953_vm4, %v6387_v12, 0.0 }
 0x39d   : > { %1018 = vadd.xlane.f32.xlu2 %v1017_v0  ;;  %v6393_v0 = vpop.eup %5238 }
 0x39e   : > { %v1656_v32 = vsel %vm953_vm4, %v6393_v0, 0.0 }
 0x39f   : > { %v6367_v27 = vpop.xlane.xlu1 %1404  ;;  %v1214_v52 = vpop.xlane.xlu0 %1213 }
 0x3a0   : > { %1431 = vadd.xlane.f32.xlu1 %v1430_v22  ;;  %5242 = vrcp.f32 %v1214_v52 }
 0x3a2   : > { %1437 = vadd.xlane.f32.xlu0 %v1436_v38  ;;  %v6398_v38 = vpop.eup %5240 }
 0x3a5   : > { %1231 = vadd.xlane.f32.xlu2 %v1230_v11  ;;  %v1422_v11 = vmul.f32 1.442695, %v1410_v3 }
 0x3a6   : > { %v5243_v6 = vpop.eup %5242 }
 0x3a7   : > { %v1004_v45 = vpop.xlane.xlu1 %1003 }
 0x3a8   : > { %1648 = vadd.xlane.f32.xlu1 %v1647_v56  ;;  %5244 = vrcp.f32 %v1004_v45 }
 0x3aa   : > { %1440 = vadd.xlane.f32.xlu0 %v1439_v61  ;;  %v1244_v61 = vmul.f32 %v5243_v6, %v6259_v25 }
 0x3ad   : > { %1645 = vadd.xlane.f32.xlu2 %v1644_v18  ;;  %v1627_v18 = vsub.f32 %v6249_v21, %v6349_v19 }
 0x3ae   : > { %v5245_v30 = vpop.eup %5244 }
 0x3af   : > { %v1217_v22 = vpop.xlane.xlu1 %1216  ;;  %v1007_v9 = vpop.xlane.xlu2 %1006  ;;  %v1034_v52 = vmul.f32 %v5245_v30, %v6266_v1  ;;  %v1642_v25 = vmul.f32 1.442695, %v1627_v18 }
 0x3b0   : > { %5246 = vrcp.f32 %v1217_v22 }
 0x3b1   : > { %5248 = vrcp.f32 %v1007_v9  ;;  %v1659_v9 = vsel %vm953_vm4, %v6398_v38, 0.0 }
 0x3b2   : > { %1657 = vadd.xlane.f32.xlu0 %v1656_v32  ;;  %5250 = vpow2.f32 %v1422_v11 }
 0x3b6   : > { %v5247_v56 = vpop.eup %5246 }
 0x3b7   : > { %v5249_v46 = vpop.eup %5248  ;;  %v1245_v45 = vmul.f32 %v5247_v56, %v6272_v26  ;;  %v1220_v44 = vpop.xlane.xlu2 %1219 }
 0x3b8   : > { %v1035_v42 = vmul.f32 %v5249_v46, %v6275_v37  ;;  %v1013_v26 = vpop.xlane.xlu1 %1012  ;;  %v6410_v1 = vpop.eup %5250 }
 0x3b9   : > { %v1252_v22 = vpack.c.bf16 %v1245_v45, %v1244_v61  ;;  %5252 = vrcp.f32 %v1013_v26  ;;  %v1442_v21 = vsel %vm953_vm4, %v6410_v1, 0.0 }
 0x3ba   : > { %v1042_v3 = vpack.c.bf16 %v1035_v42, %v1034_v52  ;;  %1660 = vadd.xlane.f32.xlu0 %v1659_v9  ;;  %5254 = vpow2.f32 %v1642_v25 }
 0x3bb   : > { %4834 = vmatmul.msk.bf16.vlgmr.msrb.gmra.mxu2 %vm953_vm4, %v1252_v22 }
 0x3bc   : > { %4826 = vmatmul.msk.bf16.vlgmr.msrb.gmra.mxu0 %vm953_vm4, %v1042_v3 }
 0x3bf   : > { %v1010_v37 = vpop.xlane.xlu2 %1009  ;;  %v5253_v19 = vpop.eup %5252 }
 0x3c0   : > { %5256 = vrcp.f32 %v1010_v37  ;;  %v6418_v32 = vpop.eup %5254  ;;  %v6420_v30 = vpop.xlane.xlu0 %1015 }
 0x3c1   : > { %1476 = vrot.lane.b32.xlu1 %v5990_v55, %s7595_s15  ;;  %5258 = vrcp.f32 %v1220_v44  ;;  %v1037_v55 = vmul.f32 %v5253_v19, %v6286_v14  ;;  %v1665_v46 = vsel %vm953_vm4, %v6418_v32, 0.0  ;;  %v1226_v52 = vpop.xlane.xlu1 %1225 }
 0x3c2   : > { %1443 = vadd.xlane.f32.xlu0 %v1442_v21 }
 0x3c5   : > { %1474 = vrot.lane.b32.xlu2 %v5994_v57, %s7595_s15 }
 0x3c6   : > { %v5257_v6 = vpop.eup %5256 }
 0x3c7   : > { %v1223_v11 = vpop.xlane.xlu2 %1222  ;;  %v1036_v56 = vmul.f32 %v5257_v6, %v6294_v16  ;;  %v5259_v45 = vpop.eup %5258  ;;  %v1622_v16 = vsub.f32 %v6205_v23, %v6337_v13  ;;  %v1411_v23 = vsub.f32 %v6230_v54, %v6345_v34  ;;  %v1413_v34 = vsub.f32 %v6257_v7, %v6367_v27 }
 0x3c8   : > { %5260 = vrcp.f32 %v1223_v11  ;;  %v1246_v42 = vmul.f32 %v5259_v45, %v6284_v58  ;;  %v1229_v18 = vpop.xlane.xlu0 %1228 }
 0x3c9   : > { %v1043_v61 = vpack.c.bf16 %v1037_v55, %v1036_v56  ;;  %5262 = vrcp.f32 %v1229_v18  ;;  %v1632_v58 = vmul.f32 1.442695, %v1622_v16  ;;  %v1424_v11 = vmul.f32 1.442695, %v1411_v23 }
 0x3ca   : > { %1666 = vadd.xlane.f32.xlu0 %v1665_v46  ;;  %5264 = vrcp.f32 %v1226_v52  ;;  %v1626_v56 = vsub.f32 %v6240_v5, %v6363_v4  ;;  %v1428_v46 = vmul.f32 1.442695, %v1413_v34 }
 0x3cb   : > { %5266 = vpow2.f32 %v1632_v58 }
 0x3cc   : > { %4827 = vmatmul.msk.bf16.gmra.mxu0 %vm953_vm4, %v1043_v61 }
 0x3ce   : > { %v5261_v57 = vpop.eup %5260 }
 0x3cf   : > { %v1247_v44 = vmul.f32 %v5261_v57, %v6306_v41  ;;  %v1479_v22 = vpop.permute.xlu2 %1478  ;;  %v5263_v3 = vpop.eup %5262  ;;  %v1623_v41 = vsub.f32 %v6215_v36, %v6330_v40 }
 0x3d0   : > { %v5265_v37 = vpop.eup %5264  ;;  %v1249_v21 = vmul.f32 %v5263_v3, %v6308_v15  ;;  %v1640_v15 = vmul.f32 1.442695, %v1626_v56 }
 0x3d1   : > { %v1253_v9 = vpack.c.bf16 %v1247_v44, %v1246_v42  ;;  %v1248_v19 = vmul.f32 %v5265_v37, %v6298_v24  ;;  %v1634_v6 = vmul.f32 1.442695, %v1623_v41  ;;  %v6441_v36 = vpop.eup %5266  ;;  %v1412_v24 = vsub.f32 %v6245_v10, %v6385_v20 }
 0x3d2   : > { %v1650_v40 = vsel %vm953_vm4, %v6441_v36, 0.0 }
 0x3d3   : > { %4835 = vmatmul.msk.bf16.gmra.mxu2 %vm953_vm4, %v1253_v9  ;;  %v1254_v13 = vpack.c.bf16 %v1249_v21, %v1248_v19  ;;  %5268 = vpow2.f32 %v1634_v6  ;;  %v1426_v54 = vmul.f32 1.442695, %v1412_v24 }
 0x3d4   : > { %5270 = vpow2.f32 %v1424_v11 }
 0x3d5   : > { %5272 = vpow2.f32 %v1640_v15 }
 0x3d6   : > { %5274 = vpow2.f32 %v1426_v54 }
 0x3d7   : > { %v1689_v26 = vpop.permute.xlu2 %1688  ;;  %5276 = vpow2.f32 %v1428_v46 }
 0x3d8   : > { %v1691_v14 = vpop.permute.xlu1 %1690  ;;  %5278 = vrcp.f32 %v6420_v30 }
 0x3d9   : > { %1718 = vmatpush.bf16.msra.mxu2 %v1691_v14  ;;  %v6447_v55 = vpop.eup %5268 }
 0x3da   : > { %v1481_v25 = vpop.permute.xlu0 %1480  ;;  %v1653_v5 = vsel %vm953_vm4, %v6447_v55, 0.0  ;;  %v6453_v4 = vpop.eup %5270 }
 0x3db   : > { %1502 = vmatpush.bf16.msra.mxu0 %v1481_v25  ;;  %v1445_v10 = vsel %vm953_vm4, %v6453_v4, 0.0  ;;  %v6457_v20 = vpop.eup %5272 }
 0x3dc   : > { %v1662_v61 = vsel %vm953_vm4, %v6457_v20, 0.0  ;;  %v6461_v45 = vpop.eup %5274 }
 0x3dd   : > { %1719 = vmatpush.bf16.msra.mxu2 %v1689_v26  ;;  %v1448_v7 = vsel %vm953_vm4, %v6461_v45, 0.0  ;;  %v6465_v27 = vpop.eup %5276 }
 0x3de   : > { %v1451_v57 = vsel %vm953_vm4, %v6465_v27, 0.0  ;;  %v5279_v18 = vpop.eup %5278 }
 0x3df   : > { %1503 = vmatpush.bf16.msra.mxu0 %v1479_v22  ;;  %v1038_v14 = vmul.f32 %v5279_v18, %v6296_v17 }
 0x3e3   : > { %4836 = vmatmul.msk.bf16.gmra.mxu2 %vm953_vm4, %v1254_v13 }
 0x3eb   : > { %1651 = vadd.xlane.f32.xlu1 %v1650_v40 }
 0x3ee   : > { %1654 = vadd.xlane.f32.xlu2 %v1653_v5 }
 0x3f3   : > { %1446 = vadd.xlane.f32.xlu1 %v1445_v10 }
 0x3f6   : > { %1663 = vadd.xlane.f32.xlu2 %v1662_v61 }
 0x3fb   : > { %1449 = vadd.xlane.f32.xlu1 %v1448_v7 }
 0x3fe   : > { %1452 = vadd.xlane.f32.xlu2 %v1451_v57 }
 0x403   : > { %v1022_v52 = vpop.xlane.xlu1 %1021 }
 0x405   : > { %v1025_v3 = vpop.xlane.xlu0 %1024 }
 0x40b   : > { %v1235_v42 = vpop.xlane.xlu1 %1234 }
 0x40d   : > { %v1435_v23 = vpop.xlane.xlu0 %1434 }
 0x410   : > { %v1019_v44 = vpop.xlane.xlu2 %1018 }
 0x411   : > { %5280 = vrcp.f32 %v1019_v44 }
 0x412   : > { %5282 = vrcp.f32 %v1235_v42 }
 0x413   : > { %v1432_v25 = vpop.xlane.xlu1 %1431 }
 0x415   : > { %v1438_v24 = vpop.xlane.xlu0 %1437 }
 0x417   : > { %v5281_v22 = vpop.eup %5280 }
 0x418   : > { %v1232_v9 = vpop.xlane.xlu2 %1231  ;;  %v1039_v16 = vmul.f32 %v5281_v22, %v6354_v31  ;;  %v5283_v37 = vpop.eup %5282 }
 0x419   : > { %5284 = vrcp.f32 %v1232_v9  ;;  %v1251_v41 = vmul.f32 %v5283_v37, %v6341_v62 }
 0x41a   : > { %v1044_v26 = vpack.c.bf16 %v1039_v16, %v1038_v14  ;;  %5286 = vrcp.f32 %v1025_v3 }
 0x41b   : > { %5288 = vrcp.f32 %v1022_v52  ;;  %v1649_v17 = vpop.xlane.xlu1 %1648 }
 0x41c   : > { %4828 = vmatmul.msk.bf16.gmra.mxu0 %vm953_vm4, %v1044_v26 }
 0x41d   : > { %v1441_v7 = vpop.xlane.xlu0 %1440 }
 0x41f   : > { %v5285_v30 = vpop.eup %5284 }
 0x420   : > { %v1250_v58 = vmul.f32 %v5285_v30, %v6372_v60  ;;  %v1646_v21 = vpop.xlane.xlu2 %1645  ;;  %v5287_v6 = vpop.eup %5286 }
 0x421   : > { %v5289_v31 = vpop.eup %5288  ;;  %5290 = vrcp.f32 %v1646_v21  ;;  %v1041_v13 = vmul.f32 %v5287_v6, %v6332_v48 }
 0x422   : > { %v1255_v19 = vpack.c.bf16 %v1251_v41, %v1250_v58  ;;  %5292 = vrcp.f32 %v1649_v17  ;;  %v1040_v11 = vmul.f32 %v5289_v31, %v6326_v35 }
 0x423   : > { %5294 = vrcp.f32 %v1432_v25 }
 0x424   : > { %4837 = vmatmul.msk.bf16.gmra.mxu2 %vm953_vm4, %v1255_v19  ;;  %v1045_v56 = vpack.c.bf16 %v1041_v13, %v1040_v11  ;;  %5296 = vrcp.f32 %v1435_v23 }
 0x425   : > { %5298 = vrcp.f32 %v1441_v7 }
 0x426   : > { %5300 = vrcp.f32 %v1438_v24 }
 0x427   : > { %v5291_v15 = vpop.eup %5290 }
 0x428   : > { %v5293_v60 = vpop.eup %5292  ;;  %v1676_v62 = vmul.f32 %v5291_v15, %v6387_v12  ;;  %v1475_v46 = vpop.permute.xlu2 %1474 }
 0x429   : > { %v1677_v40 = vmul.f32 %v5293_v60, %v6376_v50  ;;  %v5295_v5 = vpop.eup %5294 }
 0x42a   : > { %v5297_v48 = vpop.eup %5296  ;;  %v1462_v35 = vmul.f32 %v5295_v5, %v6358_v8 }
 0x42b   : > { %v1684_v54 = vpack.c.bf16 %v1677_v40, %v1676_v62  ;;  %v1463_v10 = vmul.f32 %v5297_v48, %v6347_v47  ;;  %v5299_v50 = vpop.eup %5298  ;;  %v1658_v47 = vpop.xlane.xlu0 %1657 }
 0x42c   : > { %4829 = vmatmul.msk.bf16.gmra.mxu0 %vm953_vm4, %v1045_v56  ;;  %v5301_v57 = vpop.eup %5300  ;;  %v1465_v44 = vmul.f32 %v5299_v50, %v6381_v51 }
 0x42d   : > { %v1470_v61 = vpack.c.bf16 %v1463_v10, %v1462_v35  ;;  %v1464_v8 = vmul.f32 %v5301_v57, %v6365_v28 }
 0x42f   : > { %v1471_v18 = vpack.c.bf16 %v1465_v44, %v1464_v8 }
 0x433   : > { %v1477_v34 = vpop.permute.xlu1 %1476  ;;  %v1661_v9 = vpop.xlane.xlu0 %1660 }
 0x434   : > { %1504 = vmatpush.bf16.msra.mxu0 %v1477_v34  ;;  %4850 = vmatmul.msk.bf16.vlgmr.msra.gmra.mxu2 %vm953_vm4, %v1684_v54 }
 0x438   : > { %1505 = vmatpush.bf16.msra.mxu0 %v1475_v46 }
 0x43b   : > { %v1444_v25 = vpop.xlane.xlu0 %1443 }
 0x43c   : > { %4842 = vmatmul.msk.bf16.vlgmr.msra.gmra.mxu0 %vm953_vm4, %v1470_v61 }
 0x43e   : > { %v1293_v12 = vpop.f32.mrf.mxu2 }
 0x443   : > { %v1667_v40 = vpop.xlane.xlu0 %1666 }
 0x446   : > { %v1295_v52 = vpop.f32.mrf.mxu2 }
 0x447   : > { %v5087_v42 = vpack.i.bf16 %v1295_v52, %v1293_v12 }
 0x449   : > { %5088 = vrot.lane.b32.xlu0 %v5087_v42, %s7592_s26 }
 0x44c   : > { %4843 = vmatmul.msk.bf16.gmra.mxu0 %vm953_vm4, %v1471_v18 }
 0x456   : > { %v1298_v22 = vpop.f32.mrf.mxu2 }
 0x45e   : > { %v1652_v14 = vpop.xlane.xlu1 %1651  ;;  %v1300_v16 = vpop.f32.mrf.mxu2 }
 0x45f   : > { %v5102_v3 = vpack.i.bf16 %v1300_v16, %v1298_v22  ;;  %5302 = vrcp.f32 %v1652_v14 }
 0x461   : > { %v1655_v26 = vpop.xlane.xlu2 %1654  ;;  %5103 = vrot.lane.b32.xlu0 %v5102_v3, %s7592_s26 }
 0x462   : > { %5304 = vrcp.f32 %v1655_v26 }
 0x463   : > { %5306 = vrcp.f32 %v1444_v25 }
 0x465   : > { %v5303_v37 = vpop.eup %5302 }
 0x466   : > { %v1447_v51 = vpop.xlane.xlu1 %1446  ;;  %v1678_v58 = vmul.f32 %v5303_v37, %v6441_v36  ;;  %v6496_v36 = vpop.f32.mrf.mxu0 }
 0x467   : > { %5308 = vrcp.f32 %v1447_v51  ;;  %v1303_v61 = vpop.f32.mrf.mxu2 }
 0x468   : > { %v5305_v28 = vpop.eup %5304  ;;  %5310 = vrcp.f32 %v1661_v9 }
 0x469   : > { %v1664_v30 = vpop.xlane.xlu2 %1663  ;;  %v1679_v41 = vmul.f32 %v5305_v28, %v6447_v55  ;;  %v5307_v21 = vpop.eup %5306  ;;  %5312 = vrcp.f32 %v1658_v47 }
 0x46a   : > { %v1466_v17 = vmul.f32 %v5307_v21, %v6410_v1 }
 0x46b   : > { %v1685_v19 = vpack.c.bf16 %v1679_v41, %v1678_v58  ;;  %v1866_v58 = vld [vmem:[#allocation6 + $0x1d0] sm:$0xff]  ;;  %v1867_v41 = vld [vmem:[#allocation6 + $0x1d8] sm:$0xff] }
 0x46d   : > { %v5309_v6 = vpop.eup %5308  ;;  %4851 = vmatmul.msk.bf16.gmra.mxu2 %vm953_vm4, %v1685_v19  ;;  %v1873_v19 = vpack.c.bf16 %v1867_v41, %v1866_v58 }
 0x46e   : > { %v1467_v31 = vmul.f32 %v5309_v6, %v6453_v4  ;;  %v1450_v13 = vpop.xlane.xlu1 %1449  ;;  %v5311_v55 = vpop.eup %5310 }
 0x46f   : > { %v5313_v56 = vpop.eup %5312  ;;  %v1681_v15 = vmul.f32 %v5311_v55, %v6398_v38  ;;  %v6501_v54 = vpop.f32.mrf.mxu0  ;;  %1897 = vmatpush.bf16.msra.mxu3 %v1873_v19 }
 0x470   : > { %v1472_v23 = vpack.c.bf16 %v1467_v31, %v1466_v17  ;;  %v1680_v1 = vmul.f32 %v5313_v56, %v6393_v0  ;;  %v1305_v7 = vpop.f32.mrf.mxu2  ;;  %v1864_v56 = vld [vmem:[#allocation6 + $0x1c0] sm:$0xff] }
 0x471   : > { %v1453_v11 = vpop.xlane.xlu2 %1452  ;;  %v5117_v22 = vpack.i.bf16 %v1305_v7, %v1303_v61 }
 0x472   : > { %4844 = vmatmul.msk.bf16.gmra.mxu0 %vm953_vm4, %v1472_v23  ;;  %5314 = vrcp.f32 %v1453_v11  ;;  %v1686_v4 = vpack.c.bf16 %v1681_v15, %v1680_v1  ;;  %v1865_v15 = vld [vmem:[#allocation6 + $0x1c8] sm:$0xff] }
 0x473   : > { %5316 = vrcp.f32 %v1450_v13  ;;  %v1872_v1 = vpack.c.bf16 %v1865_v15, %v1864_v56 }
 0x474   : > { %5318 = vrcp.f32 %v1664_v30 }
 0x475   : > { %5320 = vrcp.f32 %v1667_v40  ;;  %1898 = vmatpush.bf16.msra.mxu3 %v1872_v1 }
 0x477   : > { %v6506_v35 = vpop.f32.mrf.mxu0 }
 0x478   : > { %v5315_v60 = vpop.eup %5314 }
 0x479   : > { %v5317_v62 = vpop.eup %5316  ;;  %v1469_v24 = vmul.f32 %v5315_v60, %v6465_v27 }
 0x47a   : > { %v1468_v34 = vmul.f32 %v5317_v62, %v6461_v45  ;;  %v5319_v38 = vpop.eup %5318 }
 0x47b   : > { %v5321_v48 = vpop.eup %5320  ;;  %v1682_v0 = vmul.f32 %v5319_v38, %v6457_v20 }
 0x47c   : > { %v1473_v5 = vpack.c.bf16 %v1469_v24, %v1468_v34  ;;  %v1683_v27 = vmul.f32 %v5321_v48, %v6418_v32 }
 0x47d   : > { %4852 = vmatmul.msk.bf16.gmra.mxu2 %vm953_vm4, %v1686_v4 }
 0x47e   : > { %v1687_v46 = vpack.c.bf16 %v1683_v27, %v1682_v0 }
 0x47f   : > { %v6511_v10 = vpop.f32.mrf.mxu0 }
 0x482   : > { %4845 = vmatmul.msk.bf16.gmra.mxu0 %vm953_vm4, %v1473_v5 }
 0x48d   : > { %4853 = vmatmul.msk.bf16.gmra.mxu2 %vm953_vm4, %v1687_v46 }
 0x499   : > { %v6513_v45 = vpop.f32.mrf.mxu0 }
 0x4a1   : > { %v6515_v12 = vpop.f32.mrf.mxu0 }
 0x4a7   : > { %v1308_v50 = vpop.f32.mrf.mxu2 }
 0x4a9   : > { %v6517_v57 = vpop.f32.mrf.mxu0 }
 0x4af   : > { %v1310_v52 = vpop.f32.mrf.mxu2 }
 0x4b0   : > { %v5132_v14 = vpack.i.bf16 %v1310_v52, %v1308_v50 }
 0x4b1   : > { %v6519_v42 = vpop.f32.mrf.mxu0 }
 0x4b7   : > { %v1721_v20 = vpop.f32.mrf.mxu2 }
 0x4b9   : > { %v1507_v44 = vpop.f32.mrf.mxu0 }
 0x4bb   : > { %v5089_v62 = vpop.permute.xlu0 %5088 }
 0x4bc   : > { %v5091_v4 = vunpack.i.h.bf16 %v5089_v62  ;;  %v5090_v24 = vunpack.i.l.bf16 %v5089_v62 }
 0x4be   : > { %v1838_v48 = vsel %vm899_vm3, %v6501_v54, %v5091_v4  ;;  %v1837_v0 = vsel %vm899_vm3, %v6496_v36, %v5090_v24 }
 0x4bf   : > { %v1723_v32 = vpop.f32.mrf.mxu2 }
 0x4c0   : > { %v5097_v8 = vpack.i.bf16 %v1723_v32, %v1721_v20 }
 0x4c1   : > { %v1509_v18 = vpop.f32.mrf.mxu0 }
 0x4c2   : > { %v5092_v47 = vpack.i.bf16 %v1509_v18, %v1507_v44  ;;  %5098 = vrot.lane.b32.xlu2 %v5097_v8, %s7588_s30 }
 0x4c4   : > { %5093 = vrot.lane.b32.xlu1 %v5092_v47, %s7590_s27 }
 0x4c9   : > { %v1512_v9 = vpop.f32.mrf.mxu0 }
 0x4ca   : > { %5118 = vrot.lane.b32.xlu2 %v5117_v22, %s7592_s26 }
 0x4d1   : > { %v1514_v16 = vpop.f32.mrf.mxu0 }
 0x4d2   : > { %v5107_v3 = vpack.i.bf16 %v1514_v16, %v1512_v9  ;;  %5133 = vrot.lane.b32.xlu2 %v5132_v14, %s7592_s26  ;;  %s7622_s26 = sld [smem:[#allocation16_spill]] }
 0x4d3   : > { %v5104_v44 = vpop.permute.xlu0 %5103 }
 0x4d4   : > { %5108 = vrot.lane.b32.xlu1 %v5107_v3, %s7590_s27  ;;  %v5106_v8 = vunpack.i.h.bf16 %v5104_v44  ;;  %v5105_v54 = vunpack.i.l.bf16 %v5104_v44 }
 0x4d6   : > { %v1840_v22 = vsel %vm899_vm3, %v6511_v10, %v5106_v8  ;;  %v1839_v9 = vsel %vm899_vm3, %v6506_v35, %v5105_v54 }
 0x4ef   : > { %v1517_v25 = vpop.f32.mrf.mxu0 }
 0x4f0   : > { %v1726_v26 = vpop.f32.mrf.mxu2 }
 0x4f7   : > { %v1519_v51 = vpop.f32.mrf.mxu0 }
 0x4f8   : > { %v5122_v37 = vpack.i.bf16 %v1519_v51, %v1517_v25  ;;  %v1728_v28 = vpop.f32.mrf.mxu2 }
 0x4f9   : > { %v5112_v30 = vpack.i.bf16 %v1728_v28, %v1726_v26 }
 0x4fa   : > { %5123 = vrot.lane.b32.xlu1 %v5122_v37, %s7590_s27 }
 0x4fb   : > { %5113 = vrot.lane.b32.xlu0 %v5112_v30, %s7588_s30 }
 0x4ff   : > { %v1522_v21 = vpop.f32.mrf.mxu0 }
 0x500   : > { %v1731_v6 = vpop.f32.mrf.mxu2 }
 0x507   : > { %v1524_v17 = vpop.f32.mrf.mxu0 }
 0x508   : > { %v5137_v31 = vpack.i.bf16 %v1524_v17, %v1522_v21  ;;  %v1733_v23 = vpop.f32.mrf.mxu2 }
 0x509   : > { %v5127_v13 = vpack.i.bf16 %v1733_v23, %v1731_v6 }
 0x50a   : > { %5138 = vrot.lane.b32.xlu1 %v5137_v31, %s7590_s27 }
 0x50b   : > { %5128 = vrot.lane.b32.xlu0 %v5127_v13, %s7588_s30 }
 0x510   : > { %v1736_v11 = vpop.f32.mrf.mxu2 }
 0x518   : > { %v1738_v55 = vpop.f32.mrf.mxu2 }
 0x519   : > { %v5142_v60 = vpack.i.bf16 %v1738_v55, %v1736_v11 }
 0x51b   : > { %5143 = vrot.lane.b32.xlu0 %v5142_v60, %s7588_s30 }
 0x51c   : > { %v5099_v40 = vpop.permute.xlu2 %5098 }
 0x51d   : > { %v5101_v27 = vunpack.i.h.bf16 %v5099_v40  ;;  %v5100_v46 = vunpack.i.l.bf16 %v5099_v40 }
 0x524   : > { %v5119_v28 = vpop.permute.xlu2 %5118 }
 0x525   : > { %v5121_v58 = vunpack.i.h.bf16 %v5119_v28  ;;  %v5120_v10 = vunpack.i.l.bf16 %v5119_v28 }
 0x527   : > { %v1842_v19 = vsel %vm899_vm3, %v6515_v12, %v5121_v58  ;;  %v1841_v6 = vsel %vm899_vm3, %v6513_v45, %v5120_v10 }
 0x52c   : > { %v5134_v15 = vpop.permute.xlu2 %5133 }
 0x52d   : > { %v5136_v1 = vunpack.i.h.bf16 %v5134_v15  ;;  %v5135_v12 = vunpack.i.l.bf16 %v5134_v15 }
 0x52f   : > { %v1843_v24 = vsel %vm899_vm3, %v6517_v57, %v5135_v12  ;;  %v1844_v40 = vsel %vm899_vm3, %v6519_v42, %v5136_v1  ;;  %v5150_v57 = vld [vmem:[%s7575_s6 + $0x23] ss:$0 sm:$0xff] }
 0x536   : > { %v5094_v34 = vpop.permute.xlu1 %5093 }
 0x537   : > { %v5096_v5 = vunpack.i.h.bf16 %v5094_v34  ;;  %v5095_v38 = vunpack.i.l.bf16 %v5094_v34 }
 0x539   : > { %v1846_v61 = vsel %vm1845_vm5, %v1837_v0, %v5095_v38  ;;  %v1847_v7 = vsel %vm1845_vm5, %v1838_v48, %v5096_v5 }
 0x53a   : > { %v1855_v50 = vsel %vm1854_vm6, %v1846_v61, %v5100_v46  ;;  %v1856_v52 = vsel %vm1854_vm6, %v1847_v7, %v5101_v27 }
 0x53b   : > { %v1868_v20 = vpack.c.bf16 %v1856_v52, %v1855_v50 }
 0x53d   : > { %4855 = vmatmul.msk.bf16.vlgmr.msra.gmra.mxu3 %vm769_vm2, %v1868_v20 }
 0x546   : > { %v5109_v32 = vpop.permute.xlu1 %5108 }
 0x547   : > { %v5111_v18 = vunpack.i.h.bf16 %v5109_v32  ;;  %v5110_v47 = vunpack.i.l.bf16 %v5109_v32 }
 0x549   : > { %v1848_v3 = vsel %vm1845_vm5, %v1839_v9, %v5110_v47  ;;  %v1849_v25 = vsel %vm1845_vm5, %v1840_v22, %v5111_v18  ;;  %v4879_v18 = vld [vmem:[%s7580_s11 + $0x30] sm:$0xff]  ;;  %v4878_v9 = vld [vmem:[%s7580_s11 + $0x28] sm:$0xff] }
 0x56c   : > { %v5124_v30 = vpop.permute.xlu1 %5123 }
 0x56d   : > { %v5114_v36 = vpop.permute.xlu0 %5113  ;;  %v5126_v41 = vunpack.i.h.bf16 %v5124_v30  ;;  %v5125_v21 = vunpack.i.l.bf16 %v5124_v30 }
 0x56e   : > { %v5116_v14 = vunpack.i.h.bf16 %v5114_v36  ;;  %v5115_v16 = vunpack.i.l.bf16 %v5114_v36 }
 0x56f   : > { %v1850_v23 = vsel %vm1845_vm5, %v1841_v6, %v5125_v21  ;;  %v1851_v13 = vsel %vm1845_vm5, %v1842_v19, %v5126_v41 }
 0x570   : > { %v1857_v26 = vsel %vm1854_vm6, %v1848_v3, %v5115_v16  ;;  %v1858_v51 = vsel %vm1854_vm6, %v1849_v25, %v5116_v14  ;;  %v687_v3 = vld [vmem:[%s7583_s14] sm:$0xff] }
 0x571   : > { %v1869_v37 = vpack.c.bf16 %v1858_v51, %v1857_v26  ;;  %v2489_v25 = vpack.c.bf16 %v687_v3, %v687_v3 }
 0x573   : > { %4856 = vmatmul.msk.bf16.gmra.mxu3 %vm769_vm2, %v1869_v37 }
 0x57c   : > { %v5139_v60 = vpop.permute.xlu1 %5138 }
 0x57d   : > { %v5129_v35 = vpop.permute.xlu0 %5128  ;;  %v5141_v62 = vunpack.i.h.bf16 %v5139_v60  ;;  %v5140_v4 = vunpack.i.l.bf16 %v5139_v60 }
 0x57e   : > { %v5131_v17 = vunpack.i.h.bf16 %v5129_v35  ;;  %v5130_v31 = vunpack.i.l.bf16 %v5129_v35 }
 0x57f   : > { %v1853_v38 = vsel %vm1845_vm5, %v1844_v40, %v5141_v62  ;;  %v1852_v48 = vsel %vm1845_vm5, %v1843_v24, %v5140_v4 }
 0x580   : > { %v1859_v11 = vsel %vm1854_vm6, %v1850_v23, %v5130_v31  ;;  %v1860_v55 = vsel %vm1854_vm6, %v1851_v13, %v5131_v17  ;;  %v5658_v31 = vmov 32.0  }
 0x581   : > { %v1870_v56 = vpack.c.bf16 %v1860_v55, %v1859_v11  ;;  %5322 = vrcp.f32 %v5658_v31 }
 0x583   : > { %4857 = vmatmul.msk.bf16.gmra.mxu3 %vm769_vm2, %v1870_v56 }
 0x58d   : > { %v5144_v45 = vpop.permute.xlu0 %5143 }
 0x58e   : > { %v5146_v34 = vunpack.i.h.bf16 %v5144_v45  ;;  %v5145_v5 = vunpack.i.l.bf16 %v5144_v45 }
 0x590   : > { %v1861_v0 = vsel %vm1854_vm6, %v1852_v48, %v5145_v5  ;;  %v1862_v27 = vsel %vm1854_vm6, %v1853_v38, %v5146_v34 }
 0x591   : > { %v1871_v46 = vpack.c.bf16 %v1862_v27, %v1861_v0 }
 0x593   : > { %4858 = vmatmul.msk.bf16.gmra.mxu3 %vm769_vm2, %v1871_v46 }
 0x5c0   : > { %v1900_v61 = vpop.f32.mrf.mxu3 }
 0x5c1   : > { %v1901_v7 = vadd.f32 %v5150_v57, %v1900_v61 }
 0x5c3   : > { %v1920_v42 = vadd.f32 %v1901_v7, %v5899_v29  ;;  %v4880_v29 = vld [vmem:[%s7580_s11 + $0x38] sm:$0xff] }
 0x5c4   : > { %v2491_v47 = vpack.c.bf16 %v4880_v29, %v4879_v18 }
 0x5c5   : > { %v1928_v50 = vsel %vm769_vm2, %v1920_v42, 0.0 }
 0x5c6   : > { %1929 = vadd.xlane.f32.xlu2 %v1928_v50  ;;  %2506 = vmatpush.bf16.msrb.mxu2 %v2491_v47 }
 0x5c8   : > { %v1902_v52 = vpop.f32.mrf.mxu3 }
 0x5c9   : > { %v1903_v20 = vadd.f32 %v5150_v57, %v1902_v52 }
 0x5cb   : > { %v1921_v44 = vadd.f32 %v1903_v20, %v5903_v33  ;;  %v4877_v33 = vld [vmem:[%s7580_s11 + $0x20] sm:$0xff] }
 0x5cc   : > { %v2490_v14 = vpack.c.bf16 %v4878_v9, %v4877_v33 }
 0x5cd   : > { %v1931_v32 = vsel %vm769_vm2, %v1921_v44, 0.0 }
 0x5ce   : > { %1932 = vadd.xlane.f32.xlu1 %v1931_v32  ;;  %2507 = vmatpush.bf16.msrb.mxu2 %v2490_v14 }
 0x5d1   : > { %4882 = vmatmul.msk.bf16.vlgmr.msrb.gmra.mxu2 %vm769_vm2, %v2489_v25  ;;  %v5151_v25 = vld [vmem:[%s7579_s10 + $0x1] ss:$0 sm:$0xff] }
 0x5f6   : > { %v1905_v8 = vpop.f32.mrf.mxu3 }
 0x5f7   : > { %v1906_v54 = vadd.f32 %v5150_v57, %v1905_v8 }
 0x5f9   : > { %v1922_v36 = vadd.f32 %v1906_v54, %v5911_v39 }
 0x5fb   : > { %v1934_v22 = vsel %vm769_vm2, %v1922_v36, 0.0 }
 0x5fc   : > { %1935 = vadd.xlane.f32.xlu0 %v1934_v22 }
 0x5fe   : > { %v1907_v16 = vpop.f32.mrf.mxu3 }
 0x5ff   : > { %v1908_v39 = vadd.f32 %v5150_v57, %v1907_v16 }
 0x601   : > { %v1923_v26 = vadd.f32 %v1908_v39, %v5915_v43 }
 0x603   : > { %v1937_v51 = vsel %vm769_vm2, %v1923_v26, 0.0 }
 0x604   : > { %1938 = vadd.xlane.f32.xlu2 %v1937_v51 }
 0x606   : > { %v1910_v37 = vpop.f32.mrf.mxu3 }
 0x607   : > { %v1911_v28 = vadd.f32 %v5150_v57, %v1910_v37  ;;  %v4863_v37 = vld [vmem:[%s7580_s11 + $0x90] sm:$0xff] }
 0x609   : > { %v1924_v30 = vadd.f32 %v1911_v28, %v5923_v49  ;;  %v5323_v49 = vpop.eup %5322  ;;  %v4864_v28 = vld [vmem:[%s7580_s11 + $0x98] sm:$0xff] }
 0x60a   : > { %v1953_v23 = vmul.f32 32.0, %v5323_v49  ;;  %vm1957_vm7 = vweird.f32 %v5323_v49 }
 0x60b   : > { %v1940_v58 = vsel %vm769_vm2, %v1924_v30, 0.0 }
 0x60c   : > { %1941 = vadd.xlane.f32.xlu1 %v1940_v58  ;;  %v1954_v13 = vsub.f32 1.0, %v1953_v23 }
 0x60e   : > { %v1912_v10 = vpop.f32.mrf.mxu3  ;;  %v1955_v11 = vmul.f32 %v5323_v49, %v1954_v13 }
 0x60f   : > { %v1913_v41 = vadd.f32 %v5150_v57, %v1912_v10 }
 0x610   : > { %v1956_v55 = vadd.f32 %v5323_v49, %v1955_v11 }
 0x611   : > { %v1925_v21 = vadd.f32 %v1913_v41, %v5927_v53 }
 0x612   : > { %v6600_v56 = vsel %vm1957_vm7, %v5323_v49, %v1956_v55 }
 0x613   : > { %v1943_v35 = vsel %vm769_vm2, %v1925_v21, 0.0 }
 0x614   : > { %1944 = vadd.xlane.f32.xlu0 %v1943_v35  ;;  %v4862_v35 = vld [vmem:[%s7580_s11 + $0x88] sm:$0xff] }
 0x616   : > { %v1915_v43 = vpop.f32.mrf.mxu3 }
 0x617   : > { %v1916_v19 = vadd.f32 %v5150_v57, %v1915_v43 }
 0x619   : > { %v1926_v6 = vadd.f32 %v1916_v19, %v5935_v59 }
 0x61b   : > { %v1946_v17 = vsel %vm769_vm2, %v1926_v6, 0.0 }
 0x61c   : > { %1947 = vadd.xlane.f32.xlu0 %v1946_v17 }
 0x61e   : > { %v1917_v1 = vpop.f32.mrf.mxu3 }
 0x61f   : > { %v1918_v12 = vadd.f32 %v5150_v57, %v1917_v1 }
 0x621   : > { %v6612_v40 = vadd.f32 %v1918_v12, %v5939_v63 }
 0x623   : > { %v1949_v38 = vsel %vm769_vm2, %v6612_v40, 0.0 }
 0x639   : > { %v1930_v53 = vpop.xlane.xlu2 %1929 }
 0x63a   : > { %v1959_v15 = vmul.f32 %v6600_v56, %v1930_v53 }
 0x63c   : > { %v6603_v60 = vsub.f32 %v1920_v42, %v1959_v15 }
 0x63e   : > { %v1975_v59 = vmul.f32 %v6603_v60, %v6603_v60 }
 0x640   : > { %v1983_v62 = vsel %vm769_vm2, %v1975_v59, 0.0 }
 0x641   : > { %v1933_v4 = vpop.xlane.xlu1 %1932  ;;  %1984 = vadd.xlane.f32.xlu2 %v1983_v62 }
 0x642   : > { %v1960_v45 = vmul.f32 %v6600_v56, %v1933_v4 }
 0x644   : > { %v6609_v24 = vsub.f32 %v1921_v44, %v1960_v45 }
 0x646   : > { %v1976_v34 = vmul.f32 %v6609_v24, %v6609_v24 }
 0x648   : > { %v1986_v5 = vsel %vm769_vm2, %v1976_v34, 0.0 }
 0x649   : > { %1987 = vadd.xlane.f32.xlu1 %v1986_v5  ;;  %1950 = vadd.xlane.f32.xlu2 %v1949_v38 }
 0x654   : > { %v2509_v8 = vpop.f32.mrf.mxu2 }
 0x65c   : > { %v2511_v22 = vpop.f32.mrf.mxu2 }
 0x66f   : > { %v1936_v48 = vpop.xlane.xlu0 %1935 }
 0x670   : > { %v1961_v0 = vmul.f32 %v6600_v56, %v1936_v48 }
 0x672   : > { %v6620_v27 = vsub.f32 %v1922_v36, %v1961_v0  ;;  %v6684_v0 = vld [vmem:[%s7575_s6 + $0x20] ss:$0 sm:$0xff] }
 0x674   : > { %v1977_v46 = vmul.f32 %v6620_v27, %v6620_v27 }
 0x676   : > { %v1989_v63 = vsel %vm769_vm2, %v1977_v46, 0.0 }
 0x677   : > { %1990 = vadd.xlane.f32.xlu1 %v1989_v63  ;;  %v1939_v57 = vpop.xlane.xlu2 %1938 }
 0x678   : > { %v1962_v61 = vmul.f32 %v6600_v56, %v1939_v57 }
 0x67a   : > { %v6626_v7 = vsub.f32 %v1923_v26, %v1962_v61  ;;  %v2510_v26 = vadd.f32 %v5151_v25, %v2509_v8  ;;  %v6690_v61 = vld [vmem:[%s7575_s6 + $0x1f] ss:$0 sm:$0xff] }
 0x67c   : > { %v1978_v42 = vmul.f32 %v6626_v7, %v6626_v7  ;;  %v2543_v51 = vpack.c.bf16 %v2510_v26, %v2510_v26  ;;  %v2541_v10 = vmul.f32 0.35355338, %v2510_v26 }
 0x67e   : > { %v1992_v50 = vsel %vm769_vm2, %v1978_v42, 0.0 }
 0x67f   : > { %v1942_v52 = vpop.xlane.xlu1 %1941  ;;  %1993 = vadd.xlane.f32.xlu0 %v1992_v50 }
 0x680   : > { %v1963_v20 = vmul.f32 %v6600_v56, %v1942_v52 }
 0x682   : > { %v6632_v44 = vsub.f32 %v1924_v30, %v1963_v20  ;;  %v2147_v30 = vpack.c.bf16 %v4864_v28, %v4863_v37 }
 0x684   : > { %v1979_v32 = vmul.f32 %v6632_v44, %v6632_v44  ;;  %2171 = vmatpush.bf16.msrb.mxu0 %v2147_v30 }
 0x686   : > { %v1995_v54 = vsel %vm769_vm2, %v1979_v32, 0.0 }
 0x687   : > { %v1945_v18 = vpop.xlane.xlu0 %1944  ;;  %1996 = vadd.xlane.f32.xlu2 %v1995_v54 }
 0x688   : > { %v1964_v29 = vmul.f32 %v6600_v56, %v1945_v18 }
 0x68a   : > { %v6638_v47 = vsub.f32 %v1925_v21, %v1964_v29  ;;  %v4861_v21 = vld [vmem:[%s7580_s11 + $0x80] sm:$0xff] }
 0x68b   : > { %v2146_v19 = vpack.c.bf16 %v4862_v35, %v4861_v21 }
 0x68c   : > { %v1980_v36 = vmul.f32 %v6638_v47, %v6638_v47 }
 0x68d   : > { %2172 = vmatpush.bf16.msrb.mxu0 %v2146_v19 }
 0x68e   : > { %v1998_v33 = vsel %vm769_vm2, %v1980_v36, 0.0 }
 0x68f   : > { %v1948_v9 = vpop.xlane.xlu0 %1947  ;;  %1999 = vadd.xlane.f32.xlu1 %v1998_v33 }
 0x690   : > { %v1965_v14 = vmul.f32 %v6600_v56, %v1948_v9 }
 0x692   : > { %v6644_v16 = vsub.f32 %v1926_v6, %v1965_v14  ;;  %v6669_v6 = vpack.c.bf16 %v2541_v10, %v2541_v10 }
 0x694   : > { %v1981_v3 = vmul.f32 %v6644_v16, %v6644_v16 }
 0x696   : > { %v2001_v39 = vsel %vm769_vm2, %v1981_v3, 0.0 }
 0x697   : > { %2002 = vadd.xlane.f32.xlu0 %v2001_v39 }
 0x6a8   : > { %2545 = vrot.lane.b32.xlu1 %v2543_v51, %s5648_s28 }
 0x6ab   : > { %2602 = vrot.lane.b32.xlu0 %v2543_v51, %s5649_s20 }
 0x6b0   : > { %2715 = vrot.lane.b32.xlu1 %v2543_v51, %s5651_s18 }
 0x6b3   : > { %2659 = vrot.lane.b32.xlu0 %v2543_v51, %s7594_s0  ;;  %s7620_s0 = smov 112  }
 0x6b4   : > { %v1985_v58 = vpop.xlane.xlu2 %1984 }
 0x6b5   : > { %v2007_v41 = vmul.f32 %v1985_v58, %v6600_v56 }
 0x6b7   : > { %v2015_v43 = vadd.f32 1e-05, %v2007_v41 }
 0x6b9   : > { %5324 = vrsqrt.f32 %v2015_v43  ;;  %vm2029_vm9 = vweird.f32 %v2015_v43 }
 0x6bb   : > { %2713 = vrot.lane.b32.xlu0 %v6669_v6, %s5654_s5 }
 0x6bc   : > { %v1988_v17 = vpop.xlane.xlu1 %1987  ;;  %v1951_v31 = vpop.xlane.xlu2 %1950 }
 0x6bd   : > { %v2008_v49 = vmul.f32 %v1988_v17, %v6600_v56  ;;  %v1966_v23 = vmul.f32 %v6600_v56, %v1951_v31 }
 0x6bf   : > { %v5325_v13 = vpop.eup %5324  ;;  %v2016_v11 = vadd.f32 1e-05, %v2008_v49  ;;  %v6676_v55 = vsub.f32 %v6612_v40, %v1966_v23 }
 0x6c0   : > { %v2024_v53 = vmul.f32 %v5325_v13, %v2015_v43  ;;  %vm2030_vm8 = vweird.f32 %v5325_v13 }
 0x6c1   : > { %5326 = vrsqrt.f32 %v2016_v11  ;;  %v1982_v15 = vmul.f32 %v6676_v55, %v6676_v55  ;;  %vm2031_vm10 = vmor %vm2029_vm9, %vm2030_vm8  ;;  %vm2039_vm12 = vweird.f32 %v2016_v11 }
 0x6c2   : > { %v2025_v1 = vmul.f32 %v5325_v13, %v2024_v53 }
 0x6c3   : > { %v2004_v59 = vsel %vm769_vm2, %v1982_v15, 0.0 }
 0x6c4   : > { %v2026_v12 = vmul.f32 0.5, %v2025_v1  ;;  %2005 = vadd.xlane.f32.xlu2 %v2004_v59 }
 0x6c6   : > { %v2027_v62 = vsub.f32 1.5, %v2026_v12 }
 0x6c7   : > { %v5327_v4 = vpop.eup %5326 }
 0x6c8   : > { %v2028_v45 = vmul.f32 %v5325_v13, %v2027_v62  ;;  %v2034_v34 = vmul.f32 %v5327_v4, %v2016_v11  ;;  %vm2040_vm11 = vweird.f32 %v5327_v4 }
 0x6c9   : > { %vm2041_vm13 = vmor %vm2039_vm12, %vm2040_vm11 }
 0x6ca   : > { %v2035_v5 = vmul.f32 %v5327_v4, %v2034_v34  ;;  %v2032_v40 = vsel %vm2031_vm10, %v5325_v13, %v2028_v45 }
 0x6cb   : > { %v2103_v46 = vmul.f32 %v2032_v40, %v6603_v60 }
 0x6cc   : > { %v2036_v38 = vmul.f32 0.5, %v2035_v5 }
 0x6cd   : > { %v2116_v42 = vmul.f32 %v6684_v0, %v2103_v46 }
 0x6ce   : > { %v2037_v48 = vsub.f32 1.5, %v2036_v38 }
 0x6cf   : > { %v6696_v20 = vadd.f32 %v6690_v61, %v2116_v42 }
 0x6d0   : > { %v2038_v63 = vmul.f32 %v5327_v4, %v2037_v48 }
 0x6d2   : > { %v2042_v57 = vsel %vm2041_vm13, %v5327_v4, %v2038_v63 }
 0x6d3   : > { %v2104_v50 = vmul.f32 %v2042_v57, %v6609_v24 }
 0x6d5   : > { %v2117_v52 = vmul.f32 %v6684_v0, %v2104_v50 }
 0x6d7   : > { %v6699_v60 = vadd.f32 %v6690_v61, %v2117_v52 }
 0x6d9   : > { %v2142_v32 = vpack.c.bf16 %v6699_v60, %v6696_v20 }
 0x6db   : > { %4866 = vmatmul.msk.bf16.vlgmr.msrb.gmra.mxu0 %vm769_vm2, %v2142_v32 }
 0x6dc   : > { %2600 = vrot.lane.b32.xlu2 %v6669_v6, %s5650_s29 }
 0x6e4   : > { %2657 = vrot.lane.b32.xlu2 %v6669_v6, %s7595_s15 }
 0x6ea   : > { %v1991_v24 = vpop.xlane.xlu1 %1990 }
 0x6eb   : > { %v2009_v8 = vmul.f32 %v1991_v24, %v6600_v56 }
 0x6ed   : > { %v2017_v54 = vadd.f32 1e-05, %v2009_v8 }
 0x6ef   : > { %5328 = vrsqrt.f32 %v2017_v54  ;;  %vm2049_vm15 = vweird.f32 %v2017_v54 }
 0x6f2   : > { %v1994_v18 = vpop.xlane.xlu0 %1993 }
 0x6f3   : > { %v2010_v29 = vmul.f32 %v1994_v18, %v6600_v56 }
 0x6f5   : > { %v5329_v36 = vpop.eup %5328  ;;  %v2018_v22 = vadd.f32 1e-05, %v2010_v29 }
 0x6f6   : > { %v2044_v33 = vmul.f32 %v5329_v36, %v2017_v54  ;;  %vm2050_vm14 = vweird.f32 %v5329_v36 }
 0x6f7   : > { %5330 = vrsqrt.f32 %v2018_v22  ;;  %vm2051_vm0 = vmor %vm2049_vm15, %vm2050_vm14  ;;  %vm2059_vm7 = vweird.f32 %v2018_v22 }
 0x6f8   : > { %v2045_v9 = vmul.f32 %v5329_v36, %v2044_v33 }
 0x6fa   : > { %v2046_v14 = vmul.f32 0.5, %v2045_v9  ;;  %v1997_v3 = vpop.xlane.xlu2 %1996 }
 0x6fb   : > { %v2011_v39 = vmul.f32 %v1997_v3, %v6600_v56  ;;  %v2209_v3 = vld [vmem:[#allocation9 + $0xb0] sm:$0xff] }
 0x6fc   : > { %v2047_v25 = vsub.f32 1.5, %v2046_v14 }
 0x6fd   : > { %v5331_v26 = vpop.eup %5330  ;;  %v2019_v51 = vadd.f32 1e-05, %v2011_v39  ;;  %v2210_v39 = vld [vmem:[#allocation9 + $0xb8] sm:$0xff] }
 0x6fe   : > { %v2048_v37 = vmul.f32 %v5329_v36, %v2047_v25  ;;  %v2054_v28 = vmul.f32 %v5331_v26, %v2018_v22  ;;  %vm2060_vm1 = vweird.f32 %v5331_v26 }
 0x6ff   : > { %5332 = vrsqrt.f32 %v2019_v51  ;;  %vm2061_vm8 = vmor %vm2059_vm7, %vm2060_vm1  ;;  %vm2069_vm10 = vweird.f32 %v2019_v51 }
 0x700   : > { %v2055_v30 = vmul.f32 %v5331_v26, %v2054_v28  ;;  %v2052_v58 = vsel %vm2051_vm0, %v5329_v36, %v2048_v37 }
 0x701   : > { %v2105_v19 = vmul.f32 %v2052_v58, %v6620_v27  ;;  %v2208_v58 = vld [vmem:[#allocation9 + $0xa8] sm:$0xff] }
 0x702   : > { %v2056_v10 = vmul.f32 0.5, %v2055_v30  ;;  %v2000_v41 = vpop.xlane.xlu1 %1999  ;;  %v2207_v30 = vld [vmem:[#allocation9 + $0xa0] sm:$0xff] }
 0x703   : > { %v2012_v21 = vmul.f32 %v2000_v41, %v6600_v56  ;;  %v2118_v53 = vmul.f32 %v6684_v0, %v2105_v19  ;;  %v2205_v41 = vld [vmem:[#allocation9 + $0x90] sm:$0xff] }
 0x704   : > { %v2057_v35 = vsub.f32 1.5, %v2056_v10  ;;  %v2217_v10 = vpack.c.bf16 %v2208_v58, %v2207_v30 }
 0x705   : > { %v5333_v43 = vpop.eup %5332  ;;  %v2020_v17 = vadd.f32 1e-05, %v2012_v21  ;;  %v6717_v62 = vadd.f32 %v6690_v61, %v2118_v53  ;;  %v2206_v21 = vld [vmem:[#allocation9 + $0x98] sm:$0xff] }
 0x706   : > { %v2058_v31 = vmul.f32 %v5331_v26, %v2057_v35  ;;  %v2064_v49 = vmul.f32 %v5333_v43, %v2019_v51  ;;  %vm2070_vm9 = vweird.f32 %v5333_v43  ;;  %v2218_v51 = vpack.c.bf16 %v2210_v39, %v2209_v3 }
 0x707   : > { %5334 = vrsqrt.f32 %v2020_v17  ;;  %vm2071_vm11 = vmor %vm2069_vm10, %vm2070_vm9  ;;  %vm2079_vm13 = vweird.f32 %v2020_v17  ;;  %v2216_v19 = vpack.c.bf16 %v2206_v21, %v2205_v41  ;;  %v2517_v41 = vld [vmem:[#allocation6 + $0xf8] sm:$0xff]  ;;  %v2514_v21 = vld [vmem:[#allocation6 + $0xe0] sm:$0xff]  ;;  %vm2582_vm10 = vcmask 1043456  }
 0x708   : > { %v2062_v23 = vsel %vm2061_vm8, %v5331_v26, %v2058_v31  ;;  %v2065_v13 = vmul.f32 %v5333_v43, %v2064_v49  ;;  %2240 = vmatpush.bf16.msrb.mxu1 %v2218_v51  ;;  %v2203_v31 = vld [vmem:[#allocation9 + $0x80] sm:$0xff]  ;;  %v2204_v49 = vld [vmem:[#allocation9 + $0x88] sm:$0xff] }
 0x709   : > { %v2106_v11 = vmul.f32 %v2062_v23, %v6626_v7 }
 0x70a   : > { %v2066_v15 = vmul.f32 0.5, %v2065_v13  ;;  %v2003_v46 = vpop.xlane.xlu0 %2002 }
 0x70b   : > { %v2119_v1 = vmul.f32 %v6684_v0, %v2106_v11  ;;  %v2013_v29 = vmul.f32 %v2003_v46, %v6600_v56  ;;  %v2215_v11 = vpack.c.bf16 %v2204_v49, %v2203_v31 }
 0x70c   : > { %v2067_v59 = vsub.f32 1.5, %v2066_v15  ;;  %2241 = vmatpush.bf16.msrb.mxu1 %v2217_v10  ;;  %v2516_v10 = vld [vmem:[#allocation6 + $0xf0] sm:$0xff] }
 0x70d   : > { %v5335_v12 = vpop.eup %5334  ;;  %v6720_v27 = vadd.f32 %v6690_v61, %v2119_v1  ;;  %v2021_v36 = vadd.f32 1e-05, %v2013_v29 }
 0x70e   : > { %v2068_v4 = vmul.f32 %v5333_v43, %v2067_v59  ;;  %v2074_v45 = vmul.f32 %v5335_v12, %v2020_v17  ;;  %vm2080_vm12 = vweird.f32 %v5335_v12 }
 0x70f   : > { %v2143_v34 = vpack.c.bf16 %v6720_v27, %v6717_v62  ;;  %vm2081_vm14 = vmor %vm2079_vm13, %vm2080_vm12  ;;  %5336 = vrsqrt.f32 %v2021_v36  ;;  %vm2089_vm0 = vweird.f32 %v2021_v36 }
 0x710   : > { %v2075_v7 = vmul.f32 %v5335_v12, %v2074_v45  ;;  %v2072_v5 = vsel %vm2071_vm11, %v5333_v43, %v2068_v4  ;;  %2242 = vmatpush.bf16.msrb.mxu1 %v2216_v19  ;;  %v2519_v19 = vpack.c.bf16 %v2517_v41, %v2516_v10 }
 0x711   : > { %4867 = vmatmul.msk.bf16.gmra.mxu0 %vm769_vm2, %v2143_v34  ;;  %v2107_v48 = vmul.f32 %v2072_v5, %v6632_v44 }
 0x712   : > { %v2076_v40 = vmul.f32 0.5, %v2075_v7  ;;  %2534 = vmatpush.bf16.msra.mxu2 %v2519_v19 }
 0x713   : > { %v2120_v50 = vmul.f32 %v6684_v0, %v2107_v48 }
 0x714   : > { %v2077_v38 = vsub.f32 1.5, %v2076_v40  ;;  %2243 = vmatpush.bf16.msrb.mxu1 %v2215_v11 }
 0x715   : > { %v6731_v8 = vadd.f32 %v6690_v61, %v2120_v50  ;;  %v5337_v9 = vpop.eup %5336 }
 0x716   : > { %v2078_v63 = vmul.f32 %v5335_v12, %v2077_v38  ;;  %v2084_v14 = vmul.f32 %v5337_v9, %v2021_v36  ;;  %vm2090_vm15 = vweird.f32 %v5337_v9 }
 0x717   : > { %vm2091_vm1 = vmor %vm2089_vm0, %vm2090_vm15 }
 0x718   : > { %v2082_v57 = vsel %vm2081_vm14, %v5335_v12, %v2078_v63  ;;  %v2085_v25 = vmul.f32 %v5337_v9, %v2084_v14 }
 0x719   : > { %v2108_v42 = vmul.f32 %v2082_v57, %v6638_v47 }
 0x71a   : > { %v2546_v52 = vpop.permute.xlu1 %2545 }
 0x71b   : > { %v2551_v32 = vsel %vm899_vm3, %v2546_v52, 0  ;;  %v2121_v24 = vmul.f32 %v6684_v0, %v2108_v42 }
 0x71c   : > { %2560 = vmatpush.bf16.xpose.msrb.mxu3 %v2551_v32 }
 0x71d   : > { %v6734_v44 = vadd.f32 %v6690_v61, %v2121_v24  ;;  %v2603_v54 = vpop.permute.xlu0 %2602 }
 0x71e   : > { %v2608_v18 = vsel %vm899_vm3, %v2603_v54, 0 }
 0x71f   : > { %v2144_v47 = vpack.c.bf16 %v6734_v44, %v6731_v8 }
 0x721   : > { %4868 = vmatmul.msk.bf16.gmra.mxu0 %vm769_vm2, %v2144_v47 }
 0x722   : > { %v2716_v32 = vpop.permute.xlu1 %2715 }
 0x723   : > { %4884 = vmatmul.msk.bf16.vlgmr.msrb.gmra.mxu3 %vm899_vm3, %v6669_v6  ;;  %v2086_v6 = vmul.f32 0.5, %v2085_v25  ;;  %v2721_v24 = vsel %vm899_vm3, %v2716_v32, 0 }
 0x724   : > { %2617 = vmatpush.bf16.xpose.msra.mxu3 %v2608_v18  ;;  %2730 = vmatpush.bf16.xpose.msra.mxu1 %v2721_v24 }
 0x725   : > { %v2660_v22 = vpop.permute.xlu0 %2659  ;;  %v2087_v35 = vsub.f32 1.5, %v2086_v6 }
 0x726   : > { %v2665_v33 = vsel %vm899_vm3, %v2660_v22, 0 }
 0x727   : > { %v2088_v23 = vmul.f32 %v5337_v9, %v2087_v35 }
 0x729   : > { %v2092_v15 = vsel %vm2091_vm1, %v5337_v9, %v2088_v23 }
 0x72a   : > { %v2109_v12 = vmul.f32 %v2092_v15, %v6644_v16  ;;  %v5659_v15 = vmov 0  }
 0x72c   : > { %2674 = vmatpush.bf16.xpose.msrb.mxu3 %v2665_v33  ;;  %v2122_v5 = vmul.f32 %v6684_v0, %v2109_v12 }
 0x72e   : > { %v6752_v38 = vadd.f32 %v6690_v61, %v2122_v5 }
 0x737   : > { %v2006_v26 = vpop.xlane.xlu2 %2005 }
 0x738   : > { %v2014_v37 = vmul.f32 %v2006_v26, %v6600_v56 }
 0x73a   : > { %v2022_v28 = vadd.f32 1e-05, %v2014_v37 }
 0x73c   : > { %5338 = vrsqrt.f32 %v2022_v28  ;;  %vm2099_vm8 = vweird.f32 %v2022_v28 }
 0x73f   : > { %v2601_v43 = vpop.permute.xlu2 %2600 }
 0x740   : > { %4886 = vmatmul.msk.bf16.vlgmr.msra.gmra.mxu3 %vm899_vm3, %v2601_v43 }
 0x742   : > { %v5339_v17 = vpop.eup %5338 }
 0x743   : > { %v2094_v13 = vmul.f32 %v5339_v17, %v2022_v28  ;;  %vm2100_vm7 = vweird.f32 %v5339_v17 }
 0x744   : > { %vm2101_vm9 = vmor %vm2099_vm8, %vm2100_vm7 }
 0x745   : > { %v2095_v53 = vmul.f32 %v5339_v17, %v2094_v13 }
 0x747   : > { %v2096_v1 = vmul.f32 0.5, %v2095_v53  ;;  %v2658_v34 = vpop.permute.xlu2 %2657 }
 0x749   : > { %v2097_v59 = vsub.f32 1.5, %v2096_v1 }
 0x74b   : > { %v2098_v4 = vmul.f32 %v5339_v17, %v2097_v59 }
 0x74d   : > { %v2102_v45 = vsel %vm2101_vm9, %v5339_v17, %v2098_v4  ;;  %v2515_v17 = vld [vmem:[#allocation6 + $0xe8] sm:$0xff]  ;;  %v2714_v4 = vpop.permute.xlu0 %2713 }
 0x74e   : > { %v2110_v7 = vmul.f32 %v2102_v45, %v6676_v55  ;;  %v5154_v55 = vld [vmem:[%s7579_s10 + $0x4] ss:$0 sm:$0xff]  ;;  %v2518_v49 = vpack.c.bf16 %v2515_v17, %v2514_v21 }
 0x750   : > { %4888 = vmatmul.msk.bf16.vlgmr.msrb.gmra.mxu3 %vm899_vm3, %v2658_v34  ;;  %v2123_v40 = vmul.f32 %v6684_v0, %v2110_v7  ;;  %2535 = vmatpush.bf16.msra.mxu2 %v2518_v49 }
 0x752   : > { %v6755_v48 = vadd.f32 %v6690_v61, %v2123_v40 }
 0x753   : > { %2536 = vmatmul.bf16.vlgmr.msra.gmra.mxu2 %v5659_v15 }
 0x754   : > { %v2145_v16 = vpack.c.bf16 %v6755_v48, %v6752_v38 }
 0x756   : > { %4869 = vmatmul.msk.bf16.gmra.mxu0 %vm769_vm2, %v2145_v16 }
 0x758   : > { %v2174_v46 = vpop.f32.mrf.mxu0 }
 0x759   : > { %v2175_v63 = vadd.f32 %v5154_v55, %v2174_v46 }
 0x75b   : > { %v2194_v0 = vmax.f32 %v2175_v63, 0.0 }
 0x760   : > { %v2176_v57 = vpop.f32.mrf.mxu0 }
 0x761   : > { %v2177_v42 = vadd.f32 %v5154_v55, %v2176_v57 }
 0x763   : > { %v2195_v50 = vmax.f32 %v2177_v42, 0.0 }
 0x765   : > { %v2211_v52 = vpack.c.bf16 %v2195_v50, %v2194_v0  ;;  %v5156_v50 = vld [vmem:[%s7575_s6 + $0x10] ss:$0 sm:$0xff] }
 0x767   : > { %4871 = vmatmul.msk.bf16.vlgmr.msrb.gmra.mxu1 %vm953_vm4, %v2211_v52 }
 0x78e   : > { %v2179_v61 = vpop.f32.mrf.mxu0 }
 0x78f   : > { %v2180_v54 = vadd.f32 %v5154_v55, %v2179_v61 }
 0x791   : > { %v2196_v29 = vmax.f32 %v2180_v54, 0.0 }
 0x796   : > { %v2181_v18 = vpop.f32.mrf.mxu0 }
 0x797   : > { %v2182_v47 = vadd.f32 %v5154_v55, %v2181_v18 }
 0x799   : > { %v2197_v36 = vmax.f32 %v2182_v47, 0.0 }
 0x79b   : > { %v2212_v22 = vpack.c.bf16 %v2197_v36, %v2196_v29 }
 0x79d   : > { %4872 = vmatmul.msk.bf16.gmra.mxu1 %vm953_vm4, %v2212_v22 }
 0x79e   : > { %v2184_v33 = vpop.f32.mrf.mxu0 }
 0x79f   : > { %v2185_v9 = vadd.f32 %v5154_v55, %v2184_v33 }
 0x7a1   : > { %v2198_v26 = vmax.f32 %v2185_v9, 0.0 }
 0x7a6   : > { %v2186_v14 = vpop.f32.mrf.mxu0  ;;  %v2562_v3 = vpop.f32.mrf.mxu3 }
 0x7a7   : > { %v2187_v39 = vadd.f32 %v5154_v55, %v2186_v14  ;;  %v2566_v25 = vsel %vm899_vm3, %v2562_v3, -inf }
 0x7a8   : > { %2567 = vmax.xlane.f32.xlu1 %v2566_v25 }
 0x7a9   : > { %v2199_v51 = vmax.f32 %v2187_v39, 0.0 }
 0x7ab   : > { %v2213_v37 = vpack.c.bf16 %v2199_v51, %v2198_v26 }
 0x7ad   : > { %4873 = vmatmul.msk.bf16.gmra.mxu1 %vm953_vm4, %v2213_v37 }
 0x7ae   : > { %v2564_v28 = vpop.f32.mrf.mxu3 }
 0x7c3   : > { %v2619_v30 = vpop.f32.mrf.mxu3 }
 0x7c4   : > { %v2623_v58 = vsel %vm899_vm3, %v2619_v30, -inf }
 0x7c5   : > { %2624 = vmax.xlane.f32.xlu2 %v2623_v58 }
 0x7cb   : > { %v2621_v6 = vpop.f32.mrf.mxu3 }
 0x7d3   : > { %v2189_v35 = vpop.f32.mrf.mxu0  ;;  %v2676_v43 = vpop.f32.mrf.mxu3 }
 0x7d4   : > { %v2680_v31 = vsel %vm899_vm3, %v2676_v43, -inf  ;;  %v2190_v23 = vadd.f32 %v5154_v55, %v2189_v35 }
 0x7d5   : > { %2681 = vmax.xlane.f32.xlu2 %v2680_v31 }
 0x7d6   : > { %v2200_v1 = vmax.f32 %v2190_v23, 0.0  ;;  %v2537_v52 = vpop.f32.mrf.mxu2 }
 0x7d7   : > { %v2538_v32 = vadd.f32 %v5156_v50, %v2537_v52 }
 0x7d9   : > { %v2578_v24 = vpack.c.bf16 %v2538_v32, %v2538_v32 }
 0x7db   : > { %v2191_v13 = vpop.f32.mrf.mxu0  ;;  %v2678_v11 = vpop.f32.mrf.mxu3  ;;  %v2584_v37 = vsel %vm2582_vm10, %v2578_v24, 0 }
 0x7dc   : > { %v2192_v53 = vadd.f32 %v5154_v55, %v2191_v13  ;;  %2593 = vmatpush.bf16.msrb.mxu2 %v2584_v37 }
 0x7de   : > { %v2201_v59 = vmax.f32 %v2192_v53, 0.0  ;;  %v2539_v47 = vpop.f32.mrf.mxu2 }
 0x7e0   : > { %v2214_v12 = vpack.c.bf16 %v2201_v59, %v2200_v1 }
 0x7e2   : > { %4874 = vmatmul.msk.bf16.gmra.mxu1 %vm953_vm4, %v2214_v12 }
 0x7e4   : > { %v6772_v40 = vpop.f32.mrf.mxu1 }
 0x7ec   : > { %v6775_v46 = vpop.f32.mrf.mxu1 }
 0x7ed   : > { %2636 = vrot.lane.b32.xlu2 %v2578_v24, %s5650_s29 }
 0x7f2   : > { %4890 = vmatmul.msk.bf16.vlgmr.msra.gmra.mxu1 %vm899_vm3, %v2714_v4  ;;  %v6808_v4 = vld [vmem:[%s7575_s6 + $0x1e] ss:$0 sm:$0xff] }
 0x81a   : > { %v6777_v55 = vpop.f32.mrf.mxu1 }
 0x81b   : > { %v2568_v45 = vpop.xlane.xlu1 %2567 }
 0x81c   : > { %v2569_v34 = vsub.f32 %v2562_v3, %v2568_v45 }
 0x81e   : > { %v2570_v7 = vmul.f32 1.442695, %v2569_v34  ;;  %v2246_v34 = vadd.f32 %v6808_v4, %v6772_v40 }
 0x820   : > { %5340 = vpow2.f32 %v2570_v7  ;;  %v2265_v7 = vadd.f32 %v2246_v34, %v6696_v20 }
 0x822   : > { %v6779_v63 = vpop.f32.mrf.mxu1  ;;  %v2273_v50 = vsel %vm769_vm2, %v2265_v7, 0.0 }
 0x826   : > { %v5341_v5 = vpop.eup %5340 }
 0x827   : > { %v2572_v16 = vsel %vm899_vm3, %v5341_v5, 0.0 }
 0x828   : > { %2573 = vadd.xlane.f32.xlu1 %v2572_v16  ;;  %v2253_v16 = vadd.f32 %v6808_v4, %v6779_v63 }
 0x82a   : > { %v6781_v57 = vpop.f32.mrf.mxu1  ;;  %v6819_v52 = vadd.f32 %v2253_v16, %v6720_v27  ;;  %v2786_v16 = vld [vmem:[#allocation6 + $0xc8] sm:$0xff] }
 0x832   : > { %v6783_v42 = vpop.f32.mrf.mxu1 }
 0x838   : > { %v2625_v61 = vpop.xlane.xlu2 %2624 }
 0x839   : > { %v2626_v54 = vsub.f32 %v2619_v30, %v2625_v61  ;;  %v2282_v61 = vsel %vm769_vm2, %v6819_v52, 0.0 }
 0x83b   : > { %v2627_v29 = vmul.f32 1.442695, %v2626_v54 }
 0x83d   : > { %5342 = vpow2.f32 %v2627_v29 }
 0x843   : > { %v5343_v3 = vpop.eup %5342 }
 0x844   : > { %v2629_v25 = vsel %vm899_vm3, %v5343_v3, 0.0 }
 0x848   : > { %v2682_v36 = vpop.xlane.xlu2 %2681 }
 0x849   : > { %v2683_v22 = vsub.f32 %v2676_v43, %v2682_v36 }
 0x84b   : > { %v2684_v14 = vmul.f32 1.442695, %v2683_v22 }
 0x84d   : > { %5344 = vpow2.f32 %v2684_v14 }
 0x850   : > { %v2637_v10 = vpop.permute.xlu2 %2636 }
 0x851   : > { %v2642_v41 = vsel %vm2582_vm10, %v2637_v10, 0 }
 0x852   : > { %2651 = vmatpush.bf16.msra.mxu2 %v2642_v41 }
 0x853   : > { %v5345_v26 = vpop.eup %5344 }
 0x854   : > { %v2686_v51 = vsel %vm899_vm3, %v5345_v26, 0.0 }
 0x85f   : > { %v6785_v0 = vpop.f32.mrf.mxu1 }
 0x867   : > { %v6790_v18 = vpop.f32.mrf.mxu1 }
 0x86f   : > { %v2732_v33 = vpop.f32.mrf.mxu1 }
 0x870   : > { %v2736_v9 = vsel %vm899_vm3, %v2732_v33, -inf }
 0x871   : > { %2737 = vmax.xlane.f32.xlu0 %v2736_v9  ;;  %v2248_v9 = vadd.f32 %v6808_v4, %v6775_v46 }
 0x877   : > { %v2734_v39 = vpop.f32.mrf.mxu1 }
 0x878   : > { %v2263_v39 = vadd.f32 %v6808_v4, %v6790_v18 }
 0x879   : > { %2630 = vadd.xlane.f32.xlu0 %v2629_v25 }
 0x87a   : > { %v6842_v46 = vadd.f32 %v2263_v39, %v6755_v48  ;;  %v2251_v48 = vadd.f32 %v6808_v4, %v6777_v55  ;;  %v2258_v55 = vadd.f32 %v6808_v4, %v6783_v42  ;;  %v2261_v42 = vadd.f32 %v6808_v4, %v6785_v0 }
 0x881   : > { %2687 = vadd.xlane.f32.xlu0 %v2686_v51  ;;  %v2256_v51 = vadd.f32 %v6808_v4, %v6781_v57 }
 0x895   : > { %2692 = vrot.lane.b32.xlu0 %v2578_v24, %s7595_s15 }
 0x89b   : > { %v2574_v28 = vpop.xlane.xlu1 %2573 }
 0x89c   : > { %5346 = vrcp.f32 %v2574_v28  ;;  %v2269_v28 = vadd.f32 %v2256_v51, %v6731_v8  ;;  %v2787_v8 = vld [vmem:[#allocation6 + $0xd0] sm:$0xff] }
 0x89e   : > { %v2285_v18 = vsel %vm769_vm2, %v2269_v28, 0.0 }
 0x8a2   : > { %v5347_v30 = vpop.eup %5346 }
 0x8a3   : > { %v2576_v58 = vmul.f32 %v5347_v30, %v5341_v5  ;;  %v2294_v30 = vsel %vm769_vm2, %v6842_v46, 0.0 }
 0x8a5   : > { %v2577_v6 = vpack.c.bf16 %v2576_v58, %v2576_v58 }
 0x8a7   : > { %4885 = vmatmul.msk.bf16.vlgmr.msrb.gmra.mxu2 %vm899_vm3, %v2577_v6 }
 0x8e4   : > { %v2738_v21 = vpop.xlane.xlu0 %2737 }
 0x8e5   : > { %v2739_v35 = vsub.f32 %v2732_v33, %v2738_v21  ;;  %v2788_v21 = vld [vmem:[#allocation6 + $0xd8] sm:$0xff] }
 0x8e7   : > { %v2740_v43 = vmul.f32 1.442695, %v2739_v35  ;;  %v2791_v35 = vpack.c.bf16 %v2788_v21, %v2787_v8 }
 0x8e9   : > { %5348 = vpow2.f32 %v2740_v43  ;;  %2806 = vmatpush.bf16.msra.mxu3 %v2791_v35 }
 0x8ec   : > { %v2631_v19 = vpop.xlane.xlu0 %2630 }
 0x8ed   : > { %5350 = vrcp.f32 %v2631_v19  ;;  %v6855_v19 = vadd.f32 %v2251_v48, %v6717_v62  ;;  %v6868_v62 = vadd.f32 %v2258_v55, %v6734_v44 }
 0x8ef   : > { %v5349_v17 = vpop.eup %5348 }
 0x8f0   : > { %v2742_v31 = vsel %vm899_vm3, %v5349_v17, 0.0 }
 0x8f1   : > { %2743 = vadd.xlane.f32.xlu1 %v2742_v31 }
 0x8f3   : > { %v5351_v49 = vpop.eup %5350 }
 0x8f4   : > { %v2633_v23 = vmul.f32 %v5351_v49, %v5343_v3  ;;  %v2688_v11 = vpop.xlane.xlu0 %2687 }
 0x8f5   : > { %5352 = vrcp.f32 %v2688_v11 }
 0x8f6   : > { %v2634_v13 = vpack.c.bf16 %v2633_v23, %v2633_v23  ;;  %v2279_v23 = vsel %vm769_vm2, %v6855_v19, 0.0 }
 0x8f8   : > { %4887 = vmatmul.msk.bf16.vlgmr.msra.gmra.mxu2 %vm899_vm3, %v2634_v13 }
 0x8fb   : > { %v5353_v53 = vpop.eup %5352 }
 0x8fc   : > { %v2690_v15 = vmul.f32 %v5353_v53, %v5345_v26  ;;  %v2266_v26 = vadd.f32 %v2248_v9, %v6699_v60  ;;  %v2936_v9 = vld [vmem:[#allocation6 + $0xa0] sm:$0xff] }
 0x8fe   : > { %v2691_v12 = vpack.c.bf16 %v2690_v15, %v2690_v15  ;;  %v2276_v37 = vsel %vm769_vm2, %v2266_v26, 0.0 }
 0x907   : > { %v2693_v1 = vpop.permute.xlu0 %2692 }
 0x908   : > { %v2698_v59 = vsel %vm2582_vm10, %v2693_v1, 0  ;;  %v2288_v1 = vsel %vm769_vm2, %v6868_v62, 0.0 }
 0x909   : > { %2707 = vmatpush.bf16.msra.mxu0 %v2698_v59 }
 0x90a   : > { %2748 = vrot.lane.b32.xlu1 %v2578_v24, %s5654_s5 }
 0x90c   : > { %4889 = vmatmul.msk.bf16.vlgmr.msra.gmra.mxu0 %vm899_vm3, %v2691_v12  ;;  %v6878_v12 = vadd.f32 %v2261_v42, %v6752_v38 }
 0x92a   : > { %v6810_v45 = vpop.f32.mrf.mxu2 }
 0x932   : > { %v2597_v5 = vpop.f32.mrf.mxu2 }
 0x933   : > { %v2785_v5 = vld [vmem:[#allocation6 + $0xc0] sm:$0xff] }
 0x934   : > { %2274 = vadd.xlane.f32.xlu1 %v2273_v50  ;;  %v2790_v50 = vpack.c.bf16 %v2786_v16, %v2785_v5 }
 0x936   : > { %2807 = vmatpush.bf16.msra.mxu3 %v2790_v50 }
 0x93c   : > { %2283 = vadd.xlane.f32.xlu1 %v2282_v61 }
 0x964   : > { %v2744_v32 = vpop.xlane.xlu1 %2743 }
 0x965   : > { %5354 = vrcp.f32 %v2744_v32 }
 0x96b   : > { %v5355_v24 = vpop.eup %5354 }
 0x96c   : > { %v2746_v40 = vmul.f32 %v5355_v24, %v5349_v17 }
 0x96e   : > { %v2747_v47 = vpack.c.bf16 %v2746_v40, %v2746_v40 }
 0x97b   : > { %v2653_v54 = vpop.f32.mrf.mxu2 }
 0x97c   : > { %v2749_v20 = vpop.permute.xlu1 %2748  ;;  %2770 = vrot.lane.b32.xlu2 %v2653_v54, %s7615_s17 }
 0x97d   : > { %v2754_v63 = vsel %vm2582_vm10, %v2749_v20, 0 }
 0x97e   : > { %2763 = vmatpush.bf16.msrb.mxu2 %v2754_v63  ;;  %v2938_v63 = vld [vmem:[#allocation6 + $0xb0] sm:$0xff] }
 0x981   : > { %4891 = vmatmul.msk.bf16.vlgmr.msrb.gmra.mxu2 %vm899_vm3, %v2747_v47  ;;  %v2939_v47 = vld [vmem:[#allocation6 + $0xb8] sm:$0xff] }
 0x983   : > { %v2655_v27 = vpop.f32.mrf.mxu2 }
 0x989   : > { %v2709_v29 = vpop.f32.mrf.mxu0 }
 0x98a   : > { %2774 = vrot.lane.b32.xlu2 %v2709_v29, %s7616_s19  ;;  %v2945_v29 = vpack.c.bf16 %v2939_v47, %v2938_v63  ;;  %v5439_v63 = vld [vmem:[%s5859_s8 + $0x8] sm:$0xff] }
 0x98c   : > { %2969 = vmatpush.bf16.msra.mxu2 %v2945_v29  ;;  %v5159_v29 = vld [vmem:[%s7575_s6 + $0xf] ss:$0 sm:$0xff] }
 0x991   : > { %v2711_v36 = vpop.f32.mrf.mxu0 }
 0x992   : > { %v2881_v36 = vld [vmem:[#allocation6 + $0x50] sm:$0xff] }
 0x9a7   : > { %v2275_v22 = vpop.xlane.xlu1 %2274 }
 0x9a8   : > { %v2297_v33 = vmul.f32 %v2275_v22, %v6600_v56  ;;  %v2882_v22 = vld [vmem:[#allocation6 + $0x58] sm:$0xff] }
 0x9aa   : > { %v6830_v14 = vsub.f32 %v2265_v7, %v2297_v33  ;;  %v2291_v7 = vsel %vm769_vm2, %v6878_v12, 0.0 }
 0x9ac   : > { %v2313_v3 = vmul.f32 %v6830_v14, %v6830_v14 }
 0x9ae   : > { %v2321_v25 = vsel %vm769_vm2, %v2313_v3, 0.0  ;;  %v2937_v3 = vld [vmem:[#allocation6 + $0xa8] sm:$0xff] }
 0x9af   : > { %2322 = vadd.xlane.f32.xlu1 %v2321_v25  ;;  %v2284_v59 = vpop.xlane.xlu1 %2283  ;;  %v2944_v39 = vpack.c.bf16 %v2937_v3, %v2936_v9  ;;  %v2879_v25 = vld [vmem:[#allocation6 + $0x40] sm:$0xff] }
 0x9b0   : > { %v2300_v44 = vmul.f32 %v2284_v59, %v6600_v56  ;;  %v6917_v59 = vld [vmem:[%s7575_s6 + $0x22] ss:$0 sm:$0xff] }
 0x9b1   : > { %2970 = vmatpush.bf16.msra.mxu2 %v2944_v39 }
 0x9b2   : > { %v6882_v34 = vsub.f32 %v6819_v52, %v2300_v44 }
 0x9b3   : > { %2277 = vadd.xlane.f32.xlu2 %v2276_v37 }
 0x9b4   : > { %v2316_v0 = vmul.f32 %v6882_v34, %v6882_v34 }
 0x9b6   : > { %v2330_v4 = vsel %vm769_vm2, %v2316_v0, 0.0 }
 0x9b7   : > { %2295 = vadd.xlane.f32.xlu1 %v2294_v30 }
 0x9bb   : > { %2286 = vadd.xlane.f32.xlu2 %v2285_v18 }
 0x9d6   : > { %v2771_v57 = vpop.permute.xlu2 %2770 }
 0x9d7   : > { %v2781_v38 = vsel %vm899_vm3, %v6810_v45, %v2771_v57  ;;  %v2888_v45 = vpack.c.bf16 %v2882_v22, %v2881_v36 }
 0x9d9   : > { %2912 = vmatpush.bf16.msrb.mxu1 %v2888_v45 }
 0x9e4   : > { %v2775_v6 = vpop.permute.xlu2 %2774 }
 0x9e5   : > { %v2782_v52 = vsel %vm1845_vm5, %v2781_v38, %v2775_v6 }
 0xa04   : > { %v2765_v60 = vpop.f32.mrf.mxu2 }
 0xa05   : > { %2778 = vrot.lane.b32.xlu0 %v2765_v60, %s7617_s24 }
 0xa0c   : > { %v2767_v58 = vpop.f32.mrf.mxu2 }
 0xa22   : > { %v2323_v40 = vpop.xlane.xlu1 %2322 }
 0xa23   : > { %v2345_v54 = vmul.f32 %v2323_v40, %v6600_v56 }
 0xa25   : > { %v2353_v20 = vadd.f32 1e-05, %v2345_v54  ;;  %v5438_v54 = vld [vmem:[%s5859_s8] sm:$0xff] }
 0xa26   : > { %v2278_v10 = vpop.xlane.xlu2 %2277 }
 0xa27   : > { %v2298_v41 = vmul.f32 %v2278_v10, %v6600_v56  ;;  %5356 = vrsqrt.f32 %v2353_v20  ;;  %vm2367_vm12 = vweird.f32 %v2353_v20 }
 0xa29   : > { %v6852_v43 = vsub.f32 %v2266_v26, %v2298_v41  ;;  %v2880_v26 = vld [vmem:[#allocation6 + $0x48] sm:$0xff] }
 0xa2a   : > { %v2887_v51 = vpack.c.bf16 %v2880_v26, %v2879_v25  ;;  %v2296_v8 = vpop.xlane.xlu1 %2295 }
 0xa2b   : > { %v2314_v17 = vmul.f32 %v6852_v43, %v6852_v43  ;;  %v2304_v55 = vmul.f32 %v2296_v8, %v6600_v56 }
 0xa2c   : > { %2913 = vmatpush.bf16.msrb.mxu1 %v2887_v51 }
 0xa2d   : > { %v2324_v31 = vsel %vm769_vm2, %v2314_v17, 0.0  ;;  %v5357_v27 = vpop.eup %5356 }
 0xa2e   : > { %2325 = vadd.xlane.f32.xlu2 %v2324_v31  ;;  %v2287_v49 = vpop.xlane.xlu2 %2286  ;;  %v2362_v33 = vmul.f32 %v5357_v27, %v2353_v20  ;;  %vm2368_vm11 = vweird.f32 %v5357_v27 }
 0xa2f   : > { %v2301_v13 = vmul.f32 %v2287_v49, %v6600_v56  ;;  %2280 = vadd.xlane.f32.xlu0 %v2279_v23  ;;  %vm2369_vm13 = vmor %vm2367_vm12, %vm2368_vm11 }
 0xa30   : > { %v2363_v37 = vmul.f32 %v5357_v27, %v2362_v33 }
 0xa31   : > { %v6865_v11 = vsub.f32 %v2269_v28, %v2301_v13 }
 0xa32   : > { %v2364_v60 = vmul.f32 0.5, %v2363_v37 }
 0xa33   : > { %v2317_v53 = vmul.f32 %v6865_v11, %v6865_v11 }
 0xa34   : > { %v2365_v48 = vsub.f32 1.5, %v2364_v60 }
 0xa35   : > { %v2333_v15 = vsel %vm769_vm2, %v2317_v53, 0.0 }
 0xa36   : > { %2334 = vadd.xlane.f32.xlu1 %v2333_v15  ;;  %v2366_v35 = vmul.f32 %v5357_v27, %v2365_v48  ;;  %v6911_v15 = vsub.f32 %v6842_v46, %v2304_v55 }
 0xa37   : > { %2289 = vadd.xlane.f32.xlu0 %v2288_v1 }
 0xa38   : > { %v2370_v23 = vsel %vm2369_vm13, %v5357_v27, %v2366_v35  ;;  %v2320_v5 = vmul.f32 %v6911_v15, %v6911_v15 }
 0xa3f   : > { %2292 = vadd.xlane.f32.xlu0 %v2291_v7 }
 0xa47   : > { %2331 = vadd.xlane.f32.xlu0 %v2330_v4 }
 0xa77   : > { %v2779_v61 = vpop.permute.xlu0 %2778 }
 0xa78   : > { %v2783_v32 = vsel %vm1854_vm6, %v2782_v52, %v2779_v61 }
 0xa79   : > { %v2789_v24 = vpack.c.bf16 %v2783_v32, %v2783_v32 }
 0xa7b   : > { %4893 = vmatmul.msk.bf16.vlgmr.msra.gmra.mxu3 %vm769_vm2, %v2789_v24 }
 0xaa1   : > { %v2326_v28 = vpop.xlane.xlu2 %2325 }
 0xaa2   : > { %v2346_v30 = vmul.f32 %v2326_v28, %v6600_v56  ;;  %v2281_v18 = vpop.xlane.xlu0 %2280 }
 0xaa3   : > { %v2299_v58 = vmul.f32 %v2281_v18, %v6600_v56 }
 0xaa4   : > { %v2354_v57 = vadd.f32 1e-05, %v2346_v30 }
 0xaa5   : > { %v6898_v6 = vsub.f32 %v6855_v19, %v2299_v58 }
 0xaa6   : > { %5358 = vrsqrt.f32 %v2354_v57  ;;  %vm2377_vm15 = vweird.f32 %v2354_v57 }
 0xaa7   : > { %v2315_v10 = vmul.f32 %v6898_v6, %v6898_v6 }
 0xaa9   : > { %v2327_v41 = vsel %vm769_vm2, %v2315_v10, 0.0  ;;  %v2335_v25 = vpop.xlane.xlu1 %2334 }
 0xaaa   : > { %2328 = vadd.xlane.f32.xlu2 %v2327_v41  ;;  %v2290_v21 = vpop.xlane.xlu0 %2289  ;;  %v2349_v51 = vmul.f32 %v2335_v25, %v6600_v56  ;;  %v5440_v25 = vld [vmem:[%s5859_s8 + $0x10] sm:$0xff] }
 0xaab   : > { %v2302_v17 = vmul.f32 %v2290_v21, %v6600_v56 }
 0xaac   : > { %v5359_v31 = vpop.eup %5358  ;;  %v2357_v28 = vadd.f32 1e-05, %v2349_v51  ;;  %v5441_v51 = vld [vmem:[%s5859_s8 + $0x18] sm:$0xff] }
 0xaad   : > { %v2372_v19 = vmul.f32 %v5359_v31, %v2354_v57  ;;  %v6906_v49 = vsub.f32 %v6868_v62, %v2302_v17  ;;  %v2441_v62 = vmul.f32 %v2370_v23, %v6830_v14  ;;  %vm2378_vm14 = vweird.f32 %v5359_v31  ;;  %v6929_v14 = vld [vmem:[%s7575_s6 + $0x21] ss:$0 sm:$0xff] }
 0xaae   : > { %vm2379_vm0 = vmor %vm2377_vm15, %vm2378_vm14  ;;  %vm2407_vm15 = vweird.f32 %v2357_v28 }
 0xaaf   : > { %v2373_v13 = vmul.f32 %v5359_v31, %v2372_v19  ;;  %v2318_v53 = vmul.f32 %v6906_v49, %v6906_v49  ;;  %v2454_v16 = vmul.f32 %v6917_v59, %v2441_v62 }
 0xab1   : > { %v2374_v42 = vmul.f32 0.5, %v2373_v13  ;;  %v2336_v1 = vsel %vm769_vm2, %v2318_v53, 0.0  ;;  %v2467_v32 = vadd.f32 %v6929_v14, %v2454_v16 }
 0xab2   : > { %2337 = vadd.xlane.f32.xlu2 %v2336_v1  ;;  %v2293_v44 = vpop.xlane.xlu0 %2292 }
 0xab3   : > { %v2375_v7 = vsub.f32 1.5, %v2374_v42  ;;  %v2303_v0 = vmul.f32 %v2293_v44, %v6600_v56  ;;  %v2475_v20 = vadd.f32 %v5438_v54, %v2467_v32 }
 0xab5   : > { %v2376_v4 = vmul.f32 %v5359_v31, %v2375_v7  ;;  %v6922_v46 = vsub.f32 %v6878_v12, %v2303_v0  ;;  %v2342_v12 = vsel %vm769_vm2, %v2320_v5, 0.0 }
 0xab7   : > { %v2380_v50 = vsel %vm2379_vm0, %v5359_v31, %v2376_v4  ;;  %v2319_v38 = vmul.f32 %v6922_v46, %v6922_v46 }
 0xab8   : > { %v2442_v52 = vmul.f32 %v2380_v50, %v6852_v43 }
 0xab9   : > { %v2339_v61 = vsel %vm769_vm2, %v2319_v38, 0.0 }
 0xaba   : > { %v2455_v24 = vmul.f32 %v6917_v59, %v2442_v52  ;;  %2343 = vadd.xlane.f32.xlu2 %v2342_v12  ;;  %2340 = vadd.xlane.f32.xlu1 %v2339_v61  ;;  %v2332_v33 = vpop.xlane.xlu0 %2331 }
 0xabb   : > { %v2348_v9 = vmul.f32 %v2332_v33, %v6600_v56 }
 0xabc   : > { %v2468_v40 = vadd.f32 %v6929_v14, %v2455_v24 }
 0xabd   : > { %v2356_v39 = vadd.f32 1e-05, %v2348_v9 }
 0xabe   : > { %v2476_v47 = vadd.f32 %v5439_v63, %v2468_v40  ;;  %v6942_v27 = vpack.c.bf16 %v2468_v40, %v2467_v32 }
 0xabf   : > { %5360 = vrsqrt.f32 %v2356_v39  ;;  %vm2397_vm7 = vweird.f32 %v2356_v39 }
 0xac0   : > { %4904 = vmatmul.msk.bf16.vlgmr.msra.gmra.mxu2 %vm769_vm2, %v6942_v27  ;;  %v6946_v43 = vpack.c.bf16 %v2476_v47, %v2475_v20  ;;  %5362 = vrsqrt.f32 %v2357_v28 }
 0xac2   : > { %4899 = vmatmul.msk.bf16.vlgmr.msrb.gmra.mxu1 %vm769_vm2, %v6946_v43 }
 0xac5   : > { %v5361_v26 = vpop.eup %5360 }
 0xac6   : > { %v2392_v37 = vmul.f32 %v5361_v26, %v2356_v39  ;;  %v6960_v10 = vpop.eup %5362  ;;  %vm2398_vm1 = vweird.f32 %v5361_v26 }
 0xac7   : > { %v2402_v21 = vmul.f32 %v6960_v10, %v2357_v28  ;;  %vm2399_vm8 = vmor %vm2397_vm7, %vm2398_vm1  ;;  %vm2408_vm13 = vweird.f32 %v6960_v10 }
 0xac8   : > { %v2393_v30 = vmul.f32 %v5361_v26, %v2392_v37  ;;  %vm6975_vm0 = vmor %vm2407_vm15, %vm2408_vm13 }
 0xac9   : > { %v2403_v19 = vmul.f32 %v6960_v10, %v2402_v21 }
 0xaca   : > { %v2394_v58 = vmul.f32 0.5, %v2393_v30 }
 0xacb   : > { %v2404_v0 = vmul.f32 0.5, %v2403_v19  ;;  %v5442_v19 = vld [vmem:[%s5859_s8 + $0x28] sm:$0xff] }
 0xacc   : > { %v2395_v48 = vsub.f32 1.5, %v2394_v58 }
 0xacd   : > { %v2405_v61 = vsub.f32 1.5, %v2404_v0 }
 0xace   : > { %v2396_v35 = vmul.f32 %v5361_v26, %v2395_v48 }
 0xacf   : > { %v2406_v63 = vmul.f32 %v6960_v10, %v2405_v61 }
 0xad0   : > { %v2400_v23 = vsel %vm2399_vm8, %v5361_v26, %v2396_v35 }
 0xad1   : > { %v2444_v62 = vmul.f32 %v2400_v23, %v6882_v34  ;;  %v2410_v28 = vsel %vm6975_vm0, %v6960_v10, %v2406_v63 }
 0xad3   : > { %v2457_v12 = vmul.f32 %v6917_v59, %v2444_v62 }
 0xad5   : > { %v2470_v20 = vadd.f32 %v6929_v14, %v2457_v12 }
 0xad7   : > { %v2478_v37 = vadd.f32 %v5441_v51, %v2470_v20  ;;  %v2850_v51 = vld [vmem:[#allocation6 + $0x80] sm:$0xff] }
 0xafe   : > { %v2809_v36 = vpop.f32.mrf.mxu3 }
 0xaff   : > { %v6953_v22 = vadd.f32 %v5159_v29, %v2809_v36 }
 0xb01   : > { %v2814_v45 = vsel %vm769_vm2, %v6953_v22, 0.0 }
 0xb02   : > { %2815 = vadd.xlane.f32.xlu0 %v2814_v45 }
 0xb06   : > { %v2811_v3 = vpop.f32.mrf.mxu3 }
 0xb1d   : > { %v2329_v18 = vpop.xlane.xlu2 %2328 }
 0xb1e   : > { %v2347_v60 = vmul.f32 %v2329_v18, %v6600_v56 }
 0xb20   : > { %v2355_v57 = vadd.f32 1e-05, %v2347_v60 }
 0xb22   : > { %5364 = vrsqrt.f32 %v2355_v57  ;;  %vm2387_vm11 = vweird.f32 %v2355_v57 }
 0xb25   : > { %v2338_v41 = vpop.xlane.xlu2 %2337 }
 0xb26   : > { %v2350_v8 = vmul.f32 %v2338_v41, %v6600_v56  ;;  %v2445_v41 = vmul.f32 %v2410_v28, %v6865_v11 }
 0xb28   : > { %v5365_v17 = vpop.eup %5364  ;;  %v2358_v31 = vadd.f32 1e-05, %v2350_v8 }
 0xb29   : > { %v2382_v55 = vmul.f32 %v5365_v17, %v2355_v57  ;;  %vm2388_vm9 = vweird.f32 %v5365_v17 }
 0xb2a   : > { %5366 = vrsqrt.f32 %v2358_v31  ;;  %vm2389_vm12 = vmor %vm2387_vm11, %vm2388_vm9  ;;  %vm2417_vm1 = vweird.f32 %v2358_v31 }
 0xb2b   : > { %v2383_v13 = vmul.f32 %v5365_v17, %v2382_v55 }
 0xb2d   : > { %v2384_v53 = vmul.f32 0.5, %v2383_v13  ;;  %v2344_v42 = vpop.xlane.xlu2 %2343  ;;  %v2341_v1 = vpop.xlane.xlu1 %2340 }
 0xb2e   : > { %v2352_v44 = vmul.f32 %v2344_v42, %v6600_v56  ;;  %v2351_v7 = vmul.f32 %v2341_v1, %v6600_v56  ;;  %v5443_v1 = vld [vmem:[%s5859_s8 + $0x20] sm:$0xff] }
 0xb2f   : > { %v2385_v4 = vsub.f32 1.5, %v2384_v53 }
 0xb30   : > { %v5367_v5 = vpop.eup %5366  ;;  %v2360_v16 = vadd.f32 1e-05, %v2352_v44  ;;  %v2359_v50 = vadd.f32 1e-05, %v2351_v7 }
 0xb31   : > { %v2386_v38 = vmul.f32 %v5365_v17, %v2385_v4  ;;  %v2412_v52 = vmul.f32 %v5367_v5, %v2358_v31  ;;  %vm2418_vm14 = vweird.f32 %v5367_v5 }
 0xb32   : > { %5368 = vrsqrt.f32 %v2360_v16  ;;  %vm2419_vm7 = vmor %vm2417_vm1, %vm2418_vm14  ;;  %vm2437_vm11 = vweird.f32 %v2360_v16  ;;  %vm2427_vm13 = vweird.f32 %v2359_v50 }
 0xb33   : > { %v2390_v32 = vsel %vm2389_vm12, %v5365_v17, %v2386_v38  ;;  %v2413_v34 = vmul.f32 %v5367_v5, %v2412_v52  ;;  %5370 = vrsqrt.f32 %v2359_v50  ;;  %v5444_v38 = vld [vmem:[%s5859_s8 + $0x30] sm:$0xff]  ;;  %v5445_v52 = vld [vmem:[%s5859_s8 + $0x38] sm:$0xff] }
 0xb34   : > { %v2443_v24 = vmul.f32 %v2390_v32, %v6898_v6 }
 0xb35   : > { %v2414_v40 = vmul.f32 0.5, %v2413_v34 }
 0xb36   : > { %v2456_v54 = vmul.f32 %v6917_v59, %v2443_v24 }
 0xb37   : > { %v2415_v47 = vsub.f32 1.5, %v2414_v40 }
 0xb38   : > { %v5369_v29 = vpop.eup %5368  ;;  %v2469_v36 = vadd.f32 %v6929_v14, %v2456_v54 }
 0xb39   : > { %v5371_v45 = vpop.eup %5370  ;;  %v2416_v33 = vmul.f32 %v5367_v5, %v2415_v47  ;;  %v2432_v9 = vmul.f32 %v5369_v29, %v2360_v16  ;;  %vm2438_vm8 = vweird.f32 %v5369_v29 }
 0xb3a   : > { %v2422_v3 = vmul.f32 %v5371_v45, %v2359_v50  ;;  %v6979_v39 = vpack.c.bf16 %v2470_v20, %v2469_v36  ;;  %v2477_v26 = vadd.f32 %v5440_v25, %v2469_v36  ;;  %vm2428_vm9 = vweird.f32 %v5371_v45  ;;  %vm2439_vm12 = vmor %vm2437_vm11, %vm2438_vm8  ;;  %v5160_v36 = vld [vmem:[%s7575_s6 + $0x4] ss:$0 sm:$0xff] }
 0xb3b   : > { %v2420_v30 = vsel %vm2419_vm7, %v5367_v5, %v2416_v33  ;;  %v2433_v18 = vmul.f32 %v5369_v29, %v2432_v9  ;;  %vm2429_vm14 = vmor %vm2427_vm13, %vm2428_vm9  ;;  %v2852_v33 = vld [vmem:[#allocation6 + $0x90] sm:$0xff]  ;;  %v2853_v9 = vld [vmem:[#allocation6 + $0x98] sm:$0xff] }
 0xb3c   : > { %v2446_v60 = vmul.f32 %v2420_v30, %v6906_v49  ;;  %v2423_v58 = vmul.f32 %v5371_v45, %v2422_v3  ;;  %4905 = vmatmul.msk.bf16.gmra.mxu2 %vm769_vm2, %v6979_v39  ;;  %v6989_v57 = vpack.c.bf16 %v2478_v37, %v2477_v26  ;;  %v2458_v49 = vmul.f32 %v6917_v59, %v2445_v41  ;;  %v2851_v37 = vld [vmem:[#allocation6 + $0x88] sm:$0xff] }
 0xb3d   : > { %v2434_v48 = vmul.f32 0.5, %v2433_v18  ;;  %v2856_v25 = vpack.c.bf16 %v2853_v9, %v2852_v33  ;;  %v2855_v30 = vpack.c.bf16 %v2851_v37, %v2850_v51  ;;  %v5163_v33 = vld [vmem:[%s7575_s6 + $0x9] ss:$0 sm:$0xff]  ;;  %v7092_v51 = vld [vmem:[%s7583_s14] sm:$0xff] }
 0xb3e   : > { %v2424_v8 = vmul.f32 0.5, %v2423_v58  ;;  %4900 = vmatmul.msk.bf16.gmra.mxu1 %vm769_vm2, %v6989_v57  ;;  %v2459_v10 = vmul.f32 %v6917_v59, %v2446_v60  ;;  %v2471_v11 = vadd.f32 %v6929_v14, %v2458_v49 }
 0xb3f   : > { %v2435_v21 = vsub.f32 1.5, %v2434_v48  ;;  %v2915_v40 = vpop.f32.mrf.mxu1  ;;  %2871 = vmatpush.bf16.msrb.mxu0 %v2856_v25 }
 0xb40   : > { %v2425_v35 = vsub.f32 1.5, %v2424_v8  ;;  %v2472_v17 = vadd.f32 %v6929_v14, %v2459_v10  ;;  %v2479_v62 = vadd.f32 %v5443_v1, %v2471_v11  ;;  %v2916_v60 = vadd.f32 %v5160_v36, %v2915_v40 }
 0xb41   : > { %v2436_v31 = vmul.f32 %v5369_v29, %v2435_v21 }
 0xb42   : > { %v2426_v55 = vmul.f32 %v5371_v45, %v2425_v35  ;;  %v2480_v23 = vadd.f32 %v5442_v19, %v2472_v17  ;;  %v6999_v42 = vpack.c.bf16 %v2472_v17, %v2471_v11 }
 0xb43   : > { %v2440_v13 = vsel %vm2439_vm12, %v5369_v29, %v2436_v31  ;;  %v2972_v54 = vpop.f32.mrf.mxu2  ;;  %2872 = vmatpush.bf16.msrb.mxu0 %v2855_v30  ;;  %v5161_v31 = vld [vmem:[%s7575_s6 + $0x7] ss:$0 sm:$0xff] }
 0xb44   : > { %v2430_v53 = vsel %vm2429_vm14, %v5371_v45, %v2426_v55  ;;  %v2448_v44 = vmul.f32 %v2440_v13, %v6911_v15  ;;  %v7006_v0 = vpack.c.bf16 %v2480_v23, %v2479_v62 }
 0xb45   : > { %v2447_v7 = vmul.f32 %v2430_v53, %v6922_v46 }
 0xb46   : > { %v2461_v5 = vmul.f32 %v6917_v59, %v2448_v44 }
 0xb47   : > { %v2460_v4 = vmul.f32 %v6917_v59, %v2447_v7  ;;  %v2917_v20 = vpop.f32.mrf.mxu1 }
 0xb48   : > { %v2474_v50 = vadd.f32 %v6929_v14, %v2461_v5  ;;  %v2918_v28 = vadd.f32 %v5160_v36, %v2917_v20 }
 0xb49   : > { %v2473_v16 = vadd.f32 %v6929_v14, %v2460_v4 }
 0xb4a   : > { %v2482_v46 = vadd.f32 %v5445_v52, %v2474_v50  ;;  %v7038_v58 = vpack.c.bf16 %v2918_v28, %v2916_v60 }
 0xb4b   : > { %v2481_v15 = vadd.f32 %v5444_v38, %v2473_v16  ;;  %v7016_v12 = vpack.c.bf16 %v2474_v50, %v2473_v16  ;;  %v2974_v63 = vpop.f32.mrf.mxu2 }
 0xb4c   : > { %4906 = vmatmul.msk.bf16.gmra.mxu2 %vm769_vm2, %v6999_v42 }
 0xb4d   : > { %v7020_v61 = vpack.c.bf16 %v2482_v46, %v2481_v15  ;;  %v2975_v46 = vadd.f32 %v5161_v31, %v2974_v63 }
 0xb4e   : > { %4901 = vmatmul.msk.bf16.gmra.mxu1 %vm769_vm2, %v7006_v0 }
 0xb5c   : > { %4907 = vmatmul.msk.bf16.gmra.mxu2 %vm769_vm2, %v7016_v12 }
 0xb5e   : > { %4902 = vmatmul.msk.bf16.gmra.mxu1 %vm769_vm2, %v7020_v61 }
 0xb75   : > { %v2816_v32 = vpop.xlane.xlu0 %2815 }
 0xb76   : > { %v2817_v59 = vmul.f32 %v2816_v32, %v6600_v56 }
 0xb78   : > { %v7026_v34 = vsub.f32 %v6953_v22, %v2817_v59 }
 0xb7a   : > { %v2819_v14 = vmul.f32 %v7026_v34, %v7026_v34 }
 0xb7c   : > { %v2820_v24 = vsel %vm769_vm2, %v2819_v14, 0.0  ;;  %v2973_v14 = vadd.f32 %v5161_v31, %v2972_v54  ;;  %v3002_v54 = vsel %vm899_vm3, %v7038_v58, 0 }
 0xb7d   : > { %2821 = vadd.xlane.f32.xlu0 %v2820_v24 }
 0xb7e   : > { %v7067_v24 = vpack.c.bf16 %v2975_v46, %v2973_v14 }
 0xbbb   : > { %v2920_v47 = vpop.f32.mrf.mxu1 }
 0xbbc   : > { %v2921_v6 = vadd.f32 %v5160_v36, %v2920_v47 }
 0xbbf   : > { %v2977_v29 = vpop.f32.mrf.mxu2 }
 0xbc0   : > { %v2978_v50 = vadd.f32 %v5161_v31, %v2977_v29 }
 0xbc3   : > { %v2922_v45 = vpop.f32.mrf.mxu1 }
 0xbc4   : > { %v2923_v22 = vadd.f32 %v5160_v36, %v2922_v45 }
 0xbc6   : > { %v7034_v3 = vpack.c.bf16 %v2923_v22, %v2921_v6  ;;  %v5162_v6 = vld [vmem:[%s7575_s6 + $0xa] ss:$0 sm:$0xff] }
 0xbc7   : > { %v2979_v26 = vpop.f32.mrf.mxu2 }
 0xbc8   : > { %3067 = vrot.lane.b32.xlu0 %v7034_v3, %s5650_s29  ;;  %v2980_v5 = vadd.f32 %v5161_v31, %v2979_v26  ;;  %v3005_v40 = vsel %vm899_vm3, %v7034_v3, 0 }
 0xbca   : > { %v7064_v32 = vpack.c.bf16 %v2980_v5, %v2978_v50 }
 0xbcb   : > { %v2925_v18 = vpop.f32.mrf.mxu1 }
 0xbcc   : > { %v2926_v1 = vadd.f32 %v5160_v36, %v2925_v18 }
 0xbcf   : > { %v2982_v48 = vpop.f32.mrf.mxu2 }
 0xbd0   : > { %3065 = vrot.lane.b32.xlu0 %v7038_v58, %s5650_s29  ;;  %v2983_v7 = vadd.f32 %v5161_v31, %v2982_v48 }
 0xbd3   : > { %v2927_v41 = vpop.f32.mrf.mxu1 }
 0xbd4   : > { %v2928_v19 = vadd.f32 %v5160_v36, %v2927_v41 }
 0xbd6   : > { %v7053_v4 = vpack.c.bf16 %v2928_v19, %v2926_v1 }
 0xbd7   : > { %v2984_v8 = vpop.f32.mrf.mxu2 }
 0xbd8   : > { %v2985_v62 = vadd.f32 %v5161_v31, %v2984_v8  ;;  %v3008_v15 = vsel %vm899_vm3, %v7053_v4, 0 }
 0xbda   : > { %v7056_v16 = vpack.c.bf16 %v2985_v62, %v2983_v7 }
 0xbdb   : > { %v2930_v10 = vpop.f32.mrf.mxu1 }
 0xbdc   : > { %v2931_v49 = vadd.f32 %v5160_v36, %v2930_v10 }
 0xbdf   : > { %v2987_v21 = vpop.f32.mrf.mxu2 }
 0xbe0   : > { %v2988_v23 = vadd.f32 %v5161_v31, %v2987_v21 }
 0xbe3   : > { %v2932_v35 = vpop.f32.mrf.mxu1 }
 0xbe4   : > { %v2933_v17 = vadd.f32 %v5160_v36, %v2932_v35 }
 0xbe6   : > { %v7045_v55 = vpack.c.bf16 %v2933_v17, %v2931_v49  ;;  %v5164_v49 = vld [vmem:[%s7575_s6 + $0x6] ss:$0 sm:$0xff] }
 0xbe7   : > { %v2989_v11 = vpop.f32.mrf.mxu2 }
 0xbe8   : > { %v2990_v13 = vadd.f32 %v5161_v31, %v2989_v11  ;;  %3071 = vrot.lane.b32.xlu2 %v7045_v55, %s5650_s29  ;;  %v3011_v53 = vsel %vm899_vm3, %v7045_v55, 0 }
 0xbe9   : > { %3017 = vmatpush.bf16.xpose.msrb.mxu3 %v3011_v53 }
 0xbea   : > { %v7051_v44 = vpack.c.bf16 %v2990_v13, %v2988_v23 }
 0xbec   : > { %3049 = vmatpush.bf16.msra.mxu0 %v7051_v44 }
 0xbf0   : > { %3153 = vrot.lane.b32.xlu2 %v7045_v55, %s7595_s15  ;;  %v2822_v38 = vpop.xlane.xlu0 %2821  ;;  %3050 = vmatpush.bf16.msra.mxu0 %v7056_v16 }
 0xbf1   : > { %v2823_v52 = vmul.f32 %v2822_v38, %v6600_v56  ;;  %3018 = vmatpush.bf16.xpose.msrb.mxu3 %v3008_v15 }
 0xbf3   : > { %v2824_v59 = vadd.f32 1e-05, %v2823_v52 }
 0xbf4   : > { %3051 = vmatpush.bf16.msra.mxu0 %v7064_v32 }
 0xbf5   : > { %5372 = vrsqrt.f32 %v2824_v59  ;;  %vm2831_vm0 = vweird.f32 %v2824_v59 }
 0xbf8   : > { %3151 = vrot.lane.b32.xlu2 %v7053_v4, %s7595_s15  ;;  %3052 = vmatpush.bf16.msra.mxu0 %v7067_v24 }
 0xbf9   : > { %3019 = vmatpush.bf16.xpose.msrb.mxu3 %v3005_v40 }
 0xbfb   : > { %v5373_v20 = vpop.eup %5372 }
 0xbfc   : > { %v2826_v63 = vmul.f32 %v5373_v20, %v2824_v59  ;;  %vm2832_vm15 = vweird.f32 %v5373_v20 }
 0xbfd   : > { %vm2833_vm1 = vmor %vm2831_vm0, %vm2832_vm15 }
 0xbfe   : > { %v2827_v47 = vmul.f32 %v5373_v20, %v2826_v63 }
 0xc00   : > { %v2828_v29 = vmul.f32 0.5, %v2827_v47  ;;  %3149 = vrot.lane.b32.xlu2 %v7034_v3, %s7595_s15 }
 0xc01   : > { %3020 = vmatpush.bf16.xpose.msrb.mxu3 %v3002_v54 }
 0xc02   : > { %v2829_v36 = vsub.f32 1.5, %v2828_v29 }
 0xc04   : > { %v2830_v45 = vmul.f32 %v5373_v20, %v2829_v36 }
 0xc06   : > { %v2834_v22 = vsel %vm2833_vm1, %v5373_v20, %v2830_v45 }
 0xc07   : > { %v2835_v9 = vmul.f32 %v2834_v22, %v7026_v34 }
 0xc08   : > { %3225 = vrot.lane.b32.xlu2 %v7038_v58, %s5654_s5 }
 0xc09   : > { %v2841_v25 = vmul.f32 %v5162_v6, %v2835_v9 }
 0xc0b   : > { %v7087_v26 = vadd.f32 %v5163_v33, %v2841_v25 }
 0xc0d   : > { %v2848_v37 = vadd.f32 %v7092_v51, %v7087_v26 }
 0xc0f   : > { %v2854_v28 = vpack.c.bf16 %v2848_v37, %v2848_v37 }
 0xc10   : > { %3123 = vrot.lane.b32.xlu2 %v7051_v44, %s5650_s29 }
 0xc11   : > { %4897 = vmatmul.msk.bf16.vlgmr.msrb.gmra.mxu0 %vm769_vm2, %v2854_v28 }
 0xc42   : > { %v3072_v34 = vpop.permute.xlu2 %3071 }
 0xc43   : > { %v3086_v30 = vsel %vm899_vm3, %v3072_v34, 0 }
 0xc44   : > { %3092 = vmatpush.bf16.xpose.msrb.mxu0 %v3086_v30 }
 0xc4a   : > { %v3154_v18 = vpop.permute.xlu2 %3153 }
 0xc4b   : > { %v3168_v60 = vsel %vm899_vm3, %v3154_v18, 0 }
 0xc4c   : > { %3174 = vmatpush.bf16.xpose.msra.mxu1 %v3168_v60 }
 0xc52   : > { %v3152_v48 = vpop.permute.xlu2 %3151 }
 0xc53   : > { %v3165_v41 = vsel %vm899_vm3, %v3152_v48, 0 }
 0xc54   : > { %3175 = vmatpush.bf16.xpose.msra.mxu1 %v3165_v41 }
 0xc5a   : > { %v3150_v8 = vpop.permute.xlu2 %3149 }
 0xc5b   : > { %v3162_v10 = vsel %vm899_vm3, %v3150_v8, 0 }
 0xc5c   : > { %3176 = vmatpush.bf16.xpose.msra.mxu1 %v3162_v10 }
 0xc62   : > { %v3226_v21 = vpop.permute.xlu2 %3225 }
 0xc63   : > { %v3237_v54 = vsel %vm899_vm3, %v3226_v21, 0 }
 0xc6a   : > { %v3124_v35 = vpop.permute.xlu2 %3123 }
 0xc6b   : > { %3136 = vmatpush.bf16.msra.mxu3 %v3124_v35 }
 0xc8e   : > { %v2874_v17 = vpop.f32.mrf.mxu0 }
 0xc8f   : > { %v2875_v31 = vadd.f32 %v5164_v49, %v2874_v17 }
 0xc91   : > { %v2992_v11 = vmul.f32 0.35355338, %v2875_v31 }
 0xc93   : > { %v2993_v19 = vpack.c.bf16 %v2992_v11, %v2992_v11 }
 0xc95   : > { %3059 = vrot.lane.b32.xlu0 %v2993_v19, %s5650_s29  ;;  %4908 = vmatmul.msk.bf16.vlgmr.msrb.gmra.mxu3 %vm899_vm3, %v2993_v19 }
 0xc96   : > { %v2876_v23 = vpop.f32.mrf.mxu0 }
 0xd18   : > { %v3022_v13 = vpop.f32.mrf.mxu3 }
 0xd19   : > { %v3023_v53 = vadd.f32 %v3022_v13, %v6097_v2 }
 0xd1b   : > { %v3026_v1 = vsel %vm953_vm4, %v3023_v53, -inf }
 0xd1c   : > { %3027 = vmax.xlane.f32.xlu1 %v3026_v1 }
 0xd20   : > { %v3024_v62 = vpop.f32.mrf.mxu3 }
 0xd35   : > { %3069 = vrot.lane.b32.xlu1 %v7053_v4, %s5650_s29 }
 0xd3d   : > { %3231 = vrot.lane.b32.xlu1 %v7045_v55, %s5654_s5  ;;  %v3068_v55 = vpop.permute.xlu0 %3067 }
 0xd45   : > { %3229 = vrot.lane.b32.xlu1 %v7053_v4, %s5654_s5  ;;  %v3080_v4 = vsel %vm899_vm3, %v3068_v55, 0  ;;  %v3066_v14 = vpop.permute.xlu0 %3065 }
 0xd46   : > { %v3077_v20 = vsel %vm899_vm3, %v3066_v14, 0 }
 0xd4d   : > { %3227 = vrot.lane.b32.xlu1 %v7034_v3, %s5654_s5 }
 0xd55   : > { %3145 = vrot.lane.b32.xlu1 %v2993_v19, %s7595_s15 }
 0xd8f   : > { %v3028_v7 = vpop.xlane.xlu1 %3027 }
 0xd90   : > { %v3029_v5 = vsub.f32 %v3023_v53, %v3028_v7 }
 0xd92   : > { %v3030_v50 = vmul.f32 1.442695, %v3029_v5 }
 0xd94   : > { %5374 = vpow2.f32 %v3030_v50 }
 0xd9a   : > { %v5375_v38 = vpop.eup %5374 }
 0xd9b   : > { %v3032_v15 = vsel %vm953_vm4, %v5375_v38, 0.0 }
 0xd9c   : > { %3033 = vadd.xlane.f32.xlu0 %v3032_v15 }
 0xda7   : > { %v3070_v52 = vpop.permute.xlu1 %3069 }
 0xda8   : > { %v3083_v46 = vsel %vm899_vm3, %v3070_v52, 0 }
 0xda9   : > { %3093 = vmatpush.bf16.xpose.msrb.mxu0 %v3083_v46 }
 0xdaf   : > { %v3232_v59 = vpop.permute.xlu1 %3231 }
 0xdb0   : > { %v3246_v3 = vsel %vm899_vm3, %v3232_v59, 0  ;;  %3147 = vrot.lane.b32.xlu0 %v7038_v58, %s7595_s15  ;;  %v3060_v58 = vpop.permute.xlu0 %3059 }
 0xdb1   : > { %3094 = vmatpush.bf16.xpose.msrb.mxu0 %v3080_v4  ;;  %3252 = vmatpush.bf16.xpose.msrb.mxu2 %v3246_v3 }
 0xdb7   : > { %v3230_v40 = vpop.permute.xlu1 %3229 }
 0xdb8   : > { %v3243_v63 = vsel %vm899_vm3, %v3230_v40, 0  ;;  %3223 = vrot.lane.b32.xlu0 %v2993_v19, %s5654_s5 }
 0xdb9   : > { %3095 = vmatpush.bf16.xpose.msrb.mxu0 %v3077_v20  ;;  %3253 = vmatpush.bf16.xpose.msrb.mxu2 %v3243_v63 }
 0xdbf   : > { %v3228_v47 = vpop.permute.xlu1 %3227 }
 0xdc0   : > { %v3240_v29 = vsel %vm899_vm3, %v3228_v47, 0 }
 0xdc1   : > { %3254 = vmatpush.bf16.xpose.msrb.mxu2 %v3240_v29 }
 0xdc7   : > { %v3146_v25 = vpop.permute.xlu1 %3145 }
 0xdc9   : > { %3255 = vmatpush.bf16.xpose.msrb.mxu2 %v3237_v54 }
 0xe0f   : > { %v3034_v36 = vpop.xlane.xlu0 %3033 }
 0xe10   : > { %5376 = vrcp.f32 %v3034_v36 }
 0xe16   : > { %v5377_v45 = vpop.eup %5376 }
 0xe17   : > { %v3036_v6 = vmul.f32 %v5377_v45, %v5375_v38 }
 0xe19   : > { %v3037_v22 = vpack.c.bf16 %v3036_v6, %v3036_v6 }
 0xe1b   : > { %4909 = vmatmul.msk.bf16.vlgmr.msra.gmra.mxu0 %vm953_vm4, %v3037_v22 }
 0xe22   : > { %v3148_v33 = vpop.permute.xlu0 %3147 }
 0xe23   : > { %v3159_v9 = vsel %vm899_vm3, %v3148_v33, 0 }
 0xe24   : > { %3177 = vmatpush.bf16.xpose.msra.mxu1 %v3159_v9 }
 0xe2a   : > { %v3224_v37 = vpop.permute.xlu0 %3223 }
 0xe2b   : > { %4910 = vmatmul.msk.bf16.vlgmr.msrb.gmra.mxu0 %vm899_vm3, %v3060_v58  ;;  %4912 = vmatmul.msk.bf16.vlgmr.msra.gmra.mxu1 %vm899_vm3, %v3146_v25 }
 0xe2c   : > { %4914 = vmatmul.msk.bf16.vlgmr.msrb.gmra.mxu2 %vm899_vm3, %v3224_v37 }
 0xe98   : > { %v7135_v28 = vpop.f32.mrf.mxu0 }
 0xea0   : > { %v3056_v34 = vpop.f32.mrf.mxu0 }
 0xea8   : > { %v3097_v30 = vpop.f32.mrf.mxu0  ;;  %v3179_v18 = vpop.f32.mrf.mxu1 }
 0xea9   : > { %v3098_v60 = vadd.f32 %v3097_v30, %v6097_v2  ;;  %v3180_v48 = vadd.f32 %v3179_v18, %v6097_v2 }
 0xeab   : > { %v3183_v41 = vsel %vm953_vm4, %v3180_v48, -inf  ;;  %v3101_v8 = vsel %vm953_vm4, %v3098_v60, -inf }
 0xeac   : > { %3184 = vmax.xlane.f32.xlu1 %v3183_v41  ;;  %3102 = vmax.xlane.f32.xlu2 %v3101_v8  ;;  %v3319_v8 = vld [vmem:[#allocation6 + $0x70] sm:$0xff] }
 0xeaf   : > { %v3257_v10 = vpop.f32.mrf.mxu2 }
 0xeb0   : > { %v3258_v21 = vadd.f32 %v3257_v10, %v6097_v2  ;;  %v3099_v35 = vpop.f32.mrf.mxu0  ;;  %v3181_v49 = vpop.f32.mrf.mxu1  ;;  %v3320_v10 = vld [vmem:[#allocation6 + $0x78] sm:$0xff] }
 0xeb1   : > { %v3317_v35 = vld [vmem:[#allocation6 + $0x60] sm:$0xff]  ;;  %v3318_v49 = vld [vmem:[#allocation6 + $0x68] sm:$0xff] }
 0xeb2   : > { %v3261_v17 = vsel %vm953_vm4, %v3258_v21, -inf }
 0xeb3   : > { %3262 = vmax.xlane.f32.xlu0 %v3261_v17  ;;  %v3322_v17 = vpack.c.bf16 %v3318_v49, %v3317_v35  ;;  %v3409_v35 = vld [vmem:[#allocation9 + $0x8] sm:$0xff] }
 0xeb7   : > { %v3259_v31 = vpop.f32.mrf.mxu2 }
 0xec4   : > { %3117 = vrot.lane.b32.xlu2 %v7067_v24, %s5650_s29 }
 0xec5   : > { %3119 = vrot.lane.b32.xlu1 %v7064_v32, %s5650_s29 }
 0xec7   : > { %3121 = vrot.lane.b32.xlu0 %v7056_v16, %s5650_s29 }
 0xecf   : > { %3201 = vrot.lane.b32.xlu0 %v7051_v44, %s7595_s15 }
 0xed7   : > { %3199 = vrot.lane.b32.xlu0 %v7056_v16, %s7595_s15 }
 0xedf   : > { %3197 = vrot.lane.b32.xlu0 %v7064_v32, %s7595_s15 }
 0xee7   : > { %3277 = vrot.lane.b32.xlu0 %v7056_v16, %s5654_s5 }
 0xeef   : > { %3195 = vrot.lane.b32.xlu0 %v7067_v24, %s7595_s15  ;;  %s7621_s15 = smov 80  }
 0xef7   : > { %3275 = vrot.lane.b32.xlu0 %v7064_v32, %s5654_s5 }
 0xf1f   : > { %v3185_v11 = vpop.xlane.xlu1 %3184  ;;  %v3103_v19 = vpop.xlane.xlu2 %3102 }
 0xf20   : > { %v3186_v23 = vsub.f32 %v3180_v48, %v3185_v11  ;;  %v3104_v13 = vsub.f32 %v3098_v60, %v3103_v19 }
 0xf22   : > { %v3187_v53 = vmul.f32 1.442695, %v3186_v23  ;;  %v3105_v1 = vmul.f32 1.442695, %v3104_v13 }
 0xf24   : > { %5378 = vpow2.f32 %v3187_v53 }
 0xf25   : > { %5380 = vpow2.f32 %v3105_v1 }
 0xf26   : > { %v3263_v50 = vpop.xlane.xlu0 %3262 }
 0xf27   : > { %v3118_v15 = vpop.permute.xlu2 %3117  ;;  %v3264_v4 = vsub.f32 %v3258_v21, %v3263_v50  ;;  %v3323_v21 = vpack.c.bf16 %v3320_v10, %v3319_v8  ;;  %v3411_v8 = vld [vmem:[#allocation9 + $0x18] sm:$0xff] }
 0xf29   : > { %v3265_v14 = vmul.f32 1.442695, %v3264_v4  ;;  %v3380_v4 = vld [vmem:[%s7580_s11] sm:$0xff] }
 0xf2a   : > { %v5379_v62 = vpop.eup %5378 }
 0xf2b   : > { %v5381_v7 = vpop.eup %5380  ;;  %v3189_v5 = vsel %vm953_vm4, %v5379_v62, 0.0  ;;  %5382 = vpow2.f32 %v3265_v14 }
 0xf2c   : > { %3190 = vadd.xlane.f32.xlu2 %v3189_v5  ;;  %v3107_v16 = vsel %vm953_vm4, %v5381_v7, 0.0 }
 0xf2d   : > { %3108 = vadd.xlane.f32.xlu1 %v3107_v16 }
 0xf31   : > { %v5383_v40 = vpop.eup %5382 }
 0xf32   : > { %v3267_v20 = vsel %vm953_vm4, %v5383_v40, 0.0 }
 0xf37   : > { %v3120_v32 = vpop.permute.xlu1 %3119 }
 0xf39   : > { %v3122_v38 = vpop.permute.xlu0 %3121 }
 0xf3a   : > { %3137 = vmatpush.bf16.msra.mxu3 %v3122_v38 }
 0xf3e   : > { %3138 = vmatpush.bf16.msra.mxu3 %v3120_v32 }
 0xf41   : > { %v3202_v52 = vpop.permute.xlu0 %3201 }
 0xf42   : > { %3139 = vmatpush.bf16.msra.mxu3 %v3118_v15 }
 0xf44   : > { %3273 = vrot.lane.b32.xlu2 %v7067_v24, %s5654_s5 }
 0xf46   : > { %3214 = vmatpush.bf16.msrb.mxu3 %v3202_v52  ;;  %3279 = vrot.lane.b32.xlu1 %v7051_v44, %s5654_s5 }
 0xf49   : > { %v3200_v46 = vpop.permute.xlu0 %3199 }
 0xf4a   : > { %3215 = vmatpush.bf16.msrb.mxu3 %v3200_v46 }
 0xf51   : > { %v3198_v55 = vpop.permute.xlu0 %3197 }
 0xf52   : > { %3216 = vmatpush.bf16.msrb.mxu3 %v3198_v55  ;;  %v3382_v55 = vld [vmem:[%s7580_s11 + $0x10] sm:$0xff] }
 0xf59   : > { %v3278_v59 = vpop.permute.xlu0 %3277 }
 0xf61   : > { %v3196_v3 = vpop.permute.xlu0 %3195 }
 0xf62   : > { %3217 = vmatpush.bf16.msrb.mxu3 %v3196_v3  ;;  %v3381_v3 = vld [vmem:[%s7580_s11 + $0x8] sm:$0xff] }
 0xf63   : > { %v3385_v14 = vpack.c.bf16 %v3381_v3, %v3380_v4  ;;  %v3508_v3 = vld [vmem:[#allocation6 + $0x1a0] sm:$0xff] }
 0xf69   : > { %v3276_v6 = vpop.permute.xlu0 %3275 }
 0xf70   : > { %3268 = vadd.xlane.f32.xlu1 %v3267_v20  ;;  %v3415_v20 = vld [vmem:[#allocation9 + $0x38] sm:$0xff] }
 0xf9f   : > { %v3191_v44 = vpop.xlane.xlu2 %3190 }
 0xfa0   : > { %v3109_v63 = vpop.xlane.xlu1 %3108 }
 0xfa1   : > { %5384 = vrcp.f32 %v3109_v63  ;;  %v3412_v63 = vld [vmem:[#allocation9 + $0x20] sm:$0xff] }
 0xfa2   : > { %5386 = vrcp.f32 %v3191_v44 }
 0xfa7   : > { %v5385_v24 = vpop.eup %5384  ;;  %v3274_v22 = vpop.permute.xlu2 %3273 }
 0xfa8   : > { %v3111_v47 = vmul.f32 %v5385_v24, %v5381_v7  ;;  %v5387_v54 = vpop.eup %5386 }
 0xfa9   : > { %v3193_v58 = vmul.f32 %v5387_v54, %v5379_v62  ;;  %v5165_v62 = vld [vmem:[%s7575_s6 + $0x5] ss:$0 sm:$0xff] }
 0xfaa   : > { %v3112_v29 = vpack.c.bf16 %v3111_v47, %v3111_v47 }
 0xfab   : > { %v3194_v45 = vpack.c.bf16 %v3193_v58, %v3193_v58 }
 0xfac   : > { %4911 = vmatmul.msk.bf16.vlgmr.msra.gmra.mxu3 %vm953_vm4, %v3112_v29  ;;  %v3413_v29 = vld [vmem:[#allocation9 + $0x28] sm:$0xff] }
 0xfad   : > { %3338 = vmatpush.bf16.msra.mxu3 %v3323_v21  ;;  %v3419_v54 = vpack.c.bf16 %v3413_v29, %v3412_v63  ;;  %v3408_v21 = vld [vmem:[#allocation9] sm:$0xff]  ;;  %v4926_v63 = vld [vmem:[%s7580_s11 + $0x68] sm:$0xff] }
 0xfae   : > { %v3417_v49 = vpack.c.bf16 %v3409_v35, %v3408_v21 }
 0xfb1   : > { %3339 = vmatpush.bf16.msra.mxu3 %v3322_v17  ;;  %v5168_v17 = vld [vmem:[%s7579_s10] ss:$0 sm:$0xff] }
 0xfb8   : > { %v3280_v36 = vpop.permute.xlu1 %3279 }
 0xfb9   : > { %3292 = vmatpush.bf16.msra.mxu0 %v3280_v36 }
 0xfbc   : > { %4913 = vmatmul.msk.bf16.vlgmr.msrb.gmra.mxu3 %vm953_vm4, %v3194_v45 }
 0xfbd   : > { %3293 = vmatpush.bf16.msra.mxu0 %v3278_v59 }
 0xfc1   : > { %3294 = vmatpush.bf16.msra.mxu0 %v3276_v6 }
 0xfc5   : > { %3295 = vmatpush.bf16.msra.mxu0 %v3274_v22 }
 0xfe3   : > { %v3269_v33 = vpop.xlane.xlu1 %3268 }
 0xfe4   : > { %5388 = vrcp.f32 %v3269_v33 }
 0xfea   : > { %v5389_v9 = vpop.eup %5388 }
 0xfeb   : > { %v3271_v25 = vmul.f32 %v5389_v9, %v5383_v40  ;;  %v3414_v40 = vld [vmem:[#allocation9 + $0x30] sm:$0xff] }
 0xfec   : > { %v3420_v47 = vpack.c.bf16 %v3415_v20, %v3414_v40  ;;  %v4925_v20 = vld [vmem:[%s7580_s11 + $0x60] sm:$0xff] }
 0xfed   : > { %v3272_v37 = vpack.c.bf16 %v3271_v25, %v3271_v25  ;;  %v5166_v25 = vld [vmem:[%s7575_s6 + $0xc] ss:$0 sm:$0xff] }
 0xfee   : > { %3433 = vmatpush.bf16.msrb.mxu1 %v3420_v47 }
 0xfef   : > { %4915 = vmatmul.msk.bf16.vlgmr.msra.gmra.mxu0 %vm953_vm4, %v3272_v37 }
 0xff2   : > { %3434 = vmatpush.bf16.msrb.mxu1 %v3419_v54 }
0x102f   : > { %v3141_v34 = vpop.f32.mrf.mxu3 }
0x1030   : > { %3302 = vrot.lane.b32.xlu0 %v3141_v34, %s7615_s17  ;;  %v5167_v34 = vld [vmem:[%s7575_s6 + $0xb] ss:$0 sm:$0xff] }
0x1037   : > { %v3143_v30 = vpop.f32.mrf.mxu3 }
0x103f   : > { %v3219_v18 = vpop.f32.mrf.mxu3 }
0x1040   : > { %3306 = vrot.lane.b32.xlu0 %v3219_v18, %s7616_s19 }
0x1047   : > { %v3221_v60 = vpop.f32.mrf.mxu3 }
0x106c   : > { %v3297_v48 = vpop.f32.mrf.mxu0 }
0x106d   : > { %3310 = vrot.lane.b32.xlu1 %v3297_v48, %s7617_s24 }
0x1074   : > { %v3299_v41 = vpop.f32.mrf.mxu0 }
0x1075   : > { %v3410_v41 = vld [vmem:[#allocation9 + $0x10] sm:$0xff] }
0x1076   : > { %v3418_v10 = vpack.c.bf16 %v3411_v8, %v3410_v41  ;;  %v5172_v41 = vld [vmem:[%s7575_s6 + $0x1d] ss:$0 sm:$0xff]  ;;  %v5173_v8 = vld [vmem:[%s7579_s10 + $0x3] ss:$0 sm:$0xff] }
0x1078   : > { %3435 = vmatpush.bf16.msrb.mxu1 %v3418_v10 }
0x107c   : > { %3436 = vmatpush.bf16.msrb.mxu1 %v3417_v49 }
0x10a2   : > { %v3303_v31 = vpop.permute.xlu0 %3302 }
0x10a3   : > { %v3313_v19 = vsel %vm899_vm3, %v7135_v28, %v3303_v31 }
0x10b2   : > { %v3307_v11 = vpop.permute.xlu0 %3306 }
0x10b3   : > { %v3314_v23 = vsel %vm1845_vm5, %v3313_v19, %v3307_v11 }
0x10df   : > { %v3311_v13 = vpop.permute.xlu1 %3310 }
0x10e0   : > { %v3315_v53 = vsel %vm1854_vm6, %v3314_v23, %v3311_v13 }
0x10e1   : > { %v3321_v1 = vpack.c.bf16 %v3315_v53, %v3315_v53  ;;  %v5169_v53 = vld [vmem:[%s7575_s6 + $0x8] ss:$0 sm:$0xff] }
0x10e3   : > { %4917 = vmatmul.msk.bf16.vlgmr.msra.gmra.mxu3 %vm769_vm2, %v3321_v1 }
0x1166   : > { %v3341_v7 = vpop.f32.mrf.mxu3 }
0x1167   : > { %v3342_v5 = vadd.f32 %v5165_v62, %v3341_v7 }
0x1169   : > { %v3345_v16 = vadd.f32 %v3342_v5, %v7087_v26  ;;  %v3383_v26 = vld [vmem:[%s7580_s11 + $0x18] sm:$0xff] }
0x116a   : > { %v3386_v59 = vpack.c.bf16 %v3383_v26, %v3382_v55  ;;  %v4927_v26 = vld [vmem:[%s7580_s11 + $0x70] sm:$0xff] }
0x116b   : > { %v3346_v50 = vsel %vm769_vm2, %v3345_v16, 0.0 }
0x116c   : > { %3347 = vadd.xlane.f32.xlu0 %v3346_v50  ;;  %3400 = vmatpush.bf16.msrb.mxu0 %v3386_v59  ;;  %v4928_v59 = vld [vmem:[%s7580_s11 + $0x78] sm:$0xff] }
0x116d   : > { %v3485_v4 = vpack.c.bf16 %v4928_v59, %v4927_v26 }
0x116e   : > { %v3343_v28 = vpop.f32.mrf.mxu3 }
0x116f   : > { %3500 = vmatpush.bf16.msra.mxu2 %v3485_v4 }
0x1170   : > { %3401 = vmatpush.bf16.msrb.mxu0 %v3385_v14  ;;  %v3509_v14 = vld [vmem:[#allocation6 + $0x1a8] sm:$0xff] }
0x1171   : > { %v3513_v40 = vpack.c.bf16 %v3509_v14, %v3508_v3 }
0x11df   : > { %v3348_v38 = vpop.xlane.xlu0 %3347 }
0x11e0   : > { %v3349_v32 = vmul.f32 %v3348_v38, %v6600_v56 }
0x11e2   : > { %v3350_v15 = vsub.f32 %v3345_v16, %v3349_v32 }
0x11e4   : > { %v3351_v52 = vmul.f32 %v3350_v15, %v3350_v15 }
0x11e6   : > { %v3352_v46 = vsel %vm769_vm2, %v3351_v52, 0.0  ;;  %v3510_v52 = vld [vmem:[#allocation6 + $0x1b0] sm:$0xff] }
0x11e7   : > { %3353 = vadd.xlane.f32.xlu2 %v3352_v46  ;;  %v3511_v46 = vld [vmem:[#allocation6 + $0x1b8] sm:$0xff] }
0x11e8   : > { %v3514_v55 = vpack.c.bf16 %v3511_v46, %v3510_v52 }
0x11ea   : > { %3529 = vmatpush.bf16.msrb.mxu3 %v3514_v55 }
0x11ee   : > { %3530 = vmatpush.bf16.msrb.mxu3 %v3513_v40 }
0x125a   : > { %v3354_v24 = vpop.xlane.xlu2 %3353 }
0x125b   : > { %v3355_v44 = vmul.f32 %v3354_v24, %v6600_v56  ;;  %v3484_v24 = vpack.c.bf16 %v4926_v63, %v4925_v20 }
0x125d   : > { %v3356_v58 = vadd.f32 1e-05, %v3355_v44  ;;  %3501 = vmatpush.bf16.msra.mxu2 %v3484_v24 }
0x125f   : > { %5390 = vrsqrt.f32 %v3356_v58  ;;  %vm3363_vm8 = vweird.f32 %v3356_v58 }
0x1265   : > { %v5391_v36 = vpop.eup %5390 }
0x1266   : > { %v3358_v45 = vmul.f32 %v5391_v36, %v3356_v58  ;;  %vm3364_vm7 = vweird.f32 %v5391_v36 }
0x1267   : > { %vm3365_vm9 = vmor %vm3363_vm8, %vm3364_vm7 }
0x1268   : > { %v3359_v6 = vmul.f32 %v5391_v36, %v3358_v45 }
0x126a   : > { %v3360_v22 = vmul.f32 0.5, %v3359_v6 }
0x126c   : > { %v3361_v33 = vsub.f32 1.5, %v3360_v22 }
0x126e   : > { %v3362_v9 = vmul.f32 %v5391_v36, %v3361_v33  ;;  %v5170_v33 = vld [vmem:[%s7575_s6 + $0xe] ss:$0 sm:$0xff] }
0x1270   : > { %v3366_v37 = vsel %vm3365_vm9, %v5391_v36, %v3362_v9 }
0x1271   : > { %v3367_v30 = vmul.f32 %v3366_v37, %v3350_v15 }
0x1273   : > { %v3373_v18 = vmul.f32 %v5166_v25, %v3367_v30  ;;  %v5171_v25 = vld [vmem:[%s7575_s6 + $0xd] ss:$0 sm:$0xff] }
0x1275   : > { %v3379_v60 = vadd.f32 %v5167_v34, %v3373_v18 }
0x1277   : > { %v3384_v48 = vpack.c.bf16 %v3379_v60, %v3379_v60 }
0x1279   : > { %4920 = vmatmul.msk.bf16.vlgmr.msrb.gmra.mxu0 %vm769_vm2, %v3384_v48 }
0x12f6   : > { %v3403_v31 = vpop.f32.mrf.mxu0 }
0x12f7   : > { %v3404_v11 = vadd.f32 %v5168_v17, %v3403_v31 }
0x12f9   : > { %v3407_v19 = vmax.f32 %v3404_v11, 0.0 }
0x12fb   : > { %v3416_v23 = vpack.c.bf16 %v3407_v19, %v3407_v19 }
0x12fd   : > { %4922 = vmatmul.msk.bf16.vlgmr.msrb.gmra.mxu1 %vm953_vm4, %v3416_v23 }
0x12fe   : > { %v3405_v13 = vpop.f32.mrf.mxu0 }
0x137a   : > { %v3438_v1 = vpop.f32.mrf.mxu1 }
0x137b   : > { %v3439_v62 = vadd.f32 %v5169_v53, %v3438_v1 }
0x137d   : > { %v3442_v7 = vadd.f32 %v3439_v62, %v3379_v60 }
0x137f   : > { %v3443_v5 = vsel %vm769_vm2, %v3442_v7, 0.0 }
0x1380   : > { %3444 = vadd.xlane.f32.xlu1 %v3443_v5 }
0x1382   : > { %v3440_v16 = vpop.f32.mrf.mxu1 }
0x1383   : > { %v3875_v16 = vld [vmem:[#allocation6 + $0x110] sm:$0xff] }
0x13f3   : > { %v3445_v50 = vpop.xlane.xlu1 %3444 }
0x13f4   : > { %v3446_v28 = vmul.f32 %v3445_v50, %v6600_v56  ;;  %v3876_v50 = vld [vmem:[#allocation6 + $0x118] sm:$0xff] }
0x13f6   : > { %v3447_v38 = vsub.f32 %v3442_v7, %v3446_v28  ;;  %v3878_v28 = vpack.c.bf16 %v3876_v50, %v3875_v16 }
0x13f8   : > { %v3448_v32 = vmul.f32 %v3447_v38, %v3447_v38 }
0x13fa   : > { %v3449_v15 = vsel %vm769_vm2, %v3448_v32, 0.0  ;;  %v3873_v32 = vld [vmem:[#allocation6 + $0x100] sm:$0xff] }
0x13fb   : > { %3450 = vadd.xlane.f32.xlu0 %v3449_v15  ;;  %v3874_v15 = vld [vmem:[#allocation6 + $0x108] sm:$0xff] }
0x13fc   : > { %v3877_v46 = vpack.c.bf16 %v3874_v15, %v3873_v32 }
0x146e   : > { %v3451_v47 = vpop.xlane.xlu0 %3450 }
0x146f   : > { %v3452_v29 = vmul.f32 %v3451_v47, %v6600_v56 }
0x1471   : > { %v3453_v44 = vadd.f32 1e-05, %v3452_v29 }
0x1473   : > { %5392 = vrsqrt.f32 %v3453_v44  ;;  %vm3460_vm12 = vweird.f32 %v3453_v44 }
0x1479   : > { %v5393_v54 = vpop.eup %5392 }
0x147a   : > { %v3455_v58 = vmul.f32 %v5393_v54, %v3453_v44  ;;  %vm3461_vm11 = vweird.f32 %v5393_v54 }
0x147b   : > { %vm3462_vm13 = vmor %vm3460_vm12, %vm3461_vm11  ;;  %vm4617_vm11 = vcmask 39936  }
0x147c   : > { %v3456_v36 = vmul.f32 %v5393_v54, %v3455_v58 }
0x147e   : > { %v3457_v45 = vmul.f32 0.5, %v3456_v36 }
0x1480   : > { %v3458_v6 = vsub.f32 1.5, %v3457_v45 }
0x1482   : > { %v3459_v22 = vmul.f32 %v5393_v54, %v3458_v6 }
0x1484   : > { %v3463_v9 = vsel %vm3462_vm13, %v5393_v54, %v3459_v22  ;;  %v5174_v54 = vld [vmem:[%s7575_s6 + $0x11] ss:$0 sm:$0xff] }
0x1485   : > { %v3464_v37 = vmul.f32 %v3463_v9, %v3447_v38  ;;  %v3782_v9 = vld [vmem:[#allocation6 + $0x198] sm:$0xff] }
0x1487   : > { %v3470_v34 = vmul.f32 %v5170_v33, %v3464_v37  ;;  %v3781_v33 = vld [vmem:[#allocation6 + $0x190] sm:$0xff] }
0x1489   : > { %v7235_v30 = vadd.f32 %v5171_v25, %v3470_v34  ;;  %v3785_v25 = vpack.c.bf16 %v3782_v9, %v3781_v33  ;;  %v3779_v34 = vld [vmem:[#allocation6 + $0x180] sm:$0xff]  ;;  %v3916_v33 = vld [vmem:[#allocation6 + $0x170] sm:$0xff]  ;;  %v3917_v9 = vld [vmem:[#allocation6 + $0x178] sm:$0xff] }
0x148b   : > { %v3512_v18 = vpack.c.bf16 %v7235_v30, %v7235_v30  ;;  %v3477_v60 = vadd.f32 %v7092_v51, %v7235_v30 }
0x148d   : > { %4932 = vmatmul.msk.bf16.vlgmr.msrb.gmra.mxu3 %vm769_vm2, %v3512_v18  ;;  %v3483_v48 = vpack.c.bf16 %v3477_v60, %v3477_v60  ;;  %v3780_v18 = vld [vmem:[#allocation6 + $0x188] sm:$0xff] }
0x148e   : > { %v3784_v60 = vpack.c.bf16 %v3780_v18, %v3779_v34  ;;  %v3914_v18 = vld [vmem:[#allocation6 + $0x160] sm:$0xff] }
0x148f   : > { %4930 = vmatmul.msk.bf16.vlgmr.msra.gmra.mxu2 %vm769_vm2, %v3483_v48 }
0x1510   : > { %v3532_v10 = vpop.f32.mrf.mxu3 }
0x1511   : > { %v3533_v21 = vadd.f32 %v5172_v41, %v3532_v10 }
0x1512   : > { %v3503_v35 = vpop.f32.mrf.mxu2 }
0x1513   : > { %v7249_v49 = vpack.c.bf16 %v3533_v21, %v3533_v21  ;;  %v3504_v17 = vadd.f32 %v5173_v8, %v3503_v35 }
0x1515   : > { %v3536_v51 = vmul.f32 0.35355338, %v3504_v17  ;;  %v3538_v31 = vpack.c.bf16 %v3504_v17, %v3504_v17  ;;  %v3578_v11 = vsel %vm2582_vm10, %v7249_v49, 0 }
0x1516   : > { %3587 = vmatpush.bf16.msra.mxu1 %v3578_v11 }
0x1517   : > { %v3537_v19 = vpack.c.bf16 %v3536_v51, %v3536_v51  ;;  %3540 = vrot.lane.b32.xlu1 %v3538_v31, %s5648_s28  ;;  %3596 = vrot.lane.b32.xlu2 %v3538_v31, %s5649_s20  ;;  %s4801_s28 = sshll.u32 %s7630_s25, 3 }
0x1518   : > { %v3534_v23 = vpop.f32.mrf.mxu3 }
0x1519   : > { %3594 = vrot.lane.b32.xlu0 %v3537_v19, %s5650_s29 }
0x151a   : > { %v3505_v13 = vpop.f32.mrf.mxu2 }
0x151f   : > { %3707 = vrot.lane.b32.xlu2 %v3537_v19, %s5654_s5 }
0x1521   : > { %3709 = vrot.lane.b32.xlu0 %v3538_v31, %s5651_s18  ;;  %s7623_s18 = sld [smem:[#allocation19_spill]] }
0x1527   : > { %3651 = vrot.lane.b32.xlu2 %v3537_v19, %s7620_s0  ;;  %s662_s30 = scalar_lea.vmem %s7623_s18, %s4801_s28 }
0x1529   : > { %3653 = vrot.lane.b32.xlu0 %v3538_v31, %s7621_s15 }
0x1571   : > { %v3597_v53 = vpop.permute.xlu2 %3596 }
0x1572   : > { %v3602_v1 = vsel %vm899_vm3, %v3597_v53, 0 }
0x1573   : > { %3611 = vmatpush.bf16.xpose.msrb.mxu2 %v3602_v1 }
0x1579   : > { %v3708_v55 = vpop.permute.xlu2 %3707 }
0x1581   : > { %v3652_v4 = vpop.permute.xlu2 %3651 }
0x1589   : > { %v3541_v62 = vpop.permute.xlu1 %3540 }
0x158a   : > { %v3546_v7 = vsel %vm899_vm3, %v3541_v62, 0 }
0x158b   : > { %3555 = vmatpush.bf16.xpose.msra.mxu0 %v3546_v7  ;;  %v3595_v5 = vpop.permute.xlu0 %3594 }
0x158c   : > { %4935 = vmatmul.msk.bf16.vlgmr.msrb.gmra.mxu2 %vm899_vm3, %v3595_v5 }
0x1592   : > { %4933 = vmatmul.msk.bf16.vlgmr.msra.gmra.mxu0 %vm899_vm3, %v3537_v19 }
0x1593   : > { %v3710_v38 = vpop.permute.xlu0 %3709 }
0x1594   : > { %v3715_v52 = vsel %vm899_vm3, %v3710_v38, 0 }
0x1595   : > { %3724 = vmatpush.bf16.xpose.msra.mxu2 %v3715_v52 }
0x159b   : > { %v3654_v26 = vpop.permute.xlu0 %3653 }
0x159c   : > { %v3659_v59 = vsel %vm899_vm3, %v3654_v26, 0  ;;  %4939 = vmatmul.msk.bf16.vlgmr.msra.gmra.mxu2 %vm899_vm3, %v3708_v55 }
0x159d   : > { %3890 = vmatpush.bf16.msrb.mxu2 %v3878_v28  ;;  %3668 = vmatpush.bf16.xpose.msrb.mxu0 %v3659_v59 }
0x15a1   : > { %3891 = vmatpush.bf16.msrb.mxu2 %v3877_v46 }
0x15a4   : > { %4937 = vmatmul.msk.bf16.vlgmr.msrb.gmra.mxu0 %vm899_vm3, %v3652_v4 }
0x15a5   : > { %3800 = vmatpush.bf16.msra.mxu0 %v3785_v25 }
0x15a9   : > { %3801 = vmatpush.bf16.msra.mxu0 %v3784_v60  ;;  %v3915_v60 = vld [vmem:[#allocation6 + $0x168] sm:$0xff] }
0x15ac   : > { %4948 = vmatmul.msk.bf16.vlgmr.msrb.gmra.mxu2 %vm769_vm2, %v6946_v43 }
0x15bc   : > { %4949 = vmatmul.msk.bf16.gmra.mxu2 %vm769_vm2, %v6989_v57 }
0x15cc   : > { %4950 = vmatmul.msk.bf16.gmra.mxu2 %vm769_vm2, %v7006_v0 }
0x15dc   : > { %4951 = vmatmul.msk.bf16.gmra.mxu2 %vm769_vm2, %v7020_v61 }
0x160f   : > { %v3557_v3 = vpop.f32.mrf.mxu0  ;;  %v3613_v14 = vpop.f32.mrf.mxu2 }
0x1610   : > { %v3617_v40 = vsel %vm899_vm3, %v3613_v14, -inf  ;;  %v3561_v20 = vsel %vm899_vm3, %v3557_v3, -inf }
0x1611   : > { %3618 = vmax.xlane.f32.xlu0 %v3617_v40  ;;  %3562 = vmax.xlane.f32.xlu2 %v3561_v20 }
0x1617   : > { %v3559_v63 = vpop.f32.mrf.mxu0  ;;  %v3615_v24 = vpop.f32.mrf.mxu2 }
0x161f   : > { %v7278_v43 = vpop.f32.mrf.mxu2 }
0x1620   : > { %v3730_v57 = vsel %vm899_vm3, %v7278_v43, -inf }
0x1621   : > { %3731 = vmax.xlane.f32.xlu1 %v3730_v57  ;;  %v7282_v0 = vpop.f32.mrf.mxu0 }
0x1622   : > { %v3674_v61 = vsel %vm899_vm3, %v7282_v0, -inf }
0x1623   : > { %3675 = vmax.xlane.f32.xlu0 %v3674_v61 }
0x1627   : > { %v3728_v47 = vpop.f32.mrf.mxu2 }
0x1629   : > { %v3672_v29 = vpop.f32.mrf.mxu0 }
0x162f   : > { %v3893_v44 = vpop.f32.mrf.mxu2 }
0x1630   : > { %v3894_v36 = vadd.f32 %v5174_v54, %v3893_v44 }
0x1637   : > { %v3895_v58 = vpop.f32.mrf.mxu2  ;;  %3630 = vrot.lane.b32.xlu0 %v7249_v49, %s5650_s29 }
0x1638   : > { %v3896_v45 = vadd.f32 %v5174_v54, %v3895_v58 }
0x163a   : > { %v7291_v6 = vpack.c.bf16 %v3896_v45, %v3894_v36 }
0x163c   : > { %v3964_v16 = vsel %vm899_vm3, %v7291_v6, 0 }
0x163f   : > { %v3898_v22 = vpop.f32.mrf.mxu2 }
0x1640   : > { %v3899_v53 = vadd.f32 %v5174_v54, %v3898_v22 }
0x1647   : > { %v3900_v37 = vpop.f32.mrf.mxu2 }
0x1648   : > { %v3901_v23 = vadd.f32 %v5174_v54, %v3900_v37 }
0x164a   : > { %v7301_v1 = vpack.c.bf16 %v3901_v23, %v3899_v53 }
0x164c   : > { %v3967_v62 = vsel %vm899_vm3, %v7301_v1, 0 }
0x164f   : > { %v3903_v48 = vpop.f32.mrf.mxu2 }
0x1650   : > { %v3904_v11 = vadd.f32 %v5174_v54, %v3903_v48 }
0x1657   : > { %v3905_v41 = vpop.f32.mrf.mxu2 }
0x1658   : > { %v3906_v51 = vadd.f32 %v5174_v54, %v3905_v41 }
0x165a   : > { %v7297_v19 = vpack.c.bf16 %v3906_v51, %v3904_v11 }
0x165c   : > { %v3970_v13 = vsel %vm899_vm3, %v7297_v19, 0 }
0x165f   : > { %v3908_v8 = vpop.f32.mrf.mxu2 }
0x1660   : > { %v3909_v21 = vadd.f32 %v5174_v54, %v3908_v8  ;;  %v3918_v8 = vpack.c.bf16 %v3915_v60, %v3914_v18 }
0x1667   : > { %v3910_v10 = vpop.f32.mrf.mxu2 }
0x1668   : > { %v3911_v35 = vadd.f32 %v5174_v54, %v3910_v10 }
0x166a   : > { %v7293_v17 = vpack.c.bf16 %v3911_v35, %v3909_v21 }
0x166c   : > { %v3973_v31 = vsel %vm899_vm3, %v7293_v17, 0 }
0x166d   : > { %3979 = vmatpush.bf16.xpose.msrb.mxu0 %v3973_v31 }
0x1675   : > { %3980 = vmatpush.bf16.xpose.msrb.mxu0 %v3970_v13 }
0x167d   : > { %3981 = vmatpush.bf16.xpose.msrb.mxu0 %v3967_v62 }
0x1684   : > { %v3619_v7 = vpop.xlane.xlu0 %3618  ;;  %v3563_v5 = vpop.xlane.xlu2 %3562 }
0x1685   : > { %v3620_v50 = vsub.f32 %v3613_v14, %v3619_v7  ;;  %v3564_v28 = vsub.f32 %v3557_v3, %v3563_v5  ;;  %3982 = vmatpush.bf16.xpose.msrb.mxu0 %v3964_v16 }
0x1687   : > { %v3621_v38 = vmul.f32 1.442695, %v3620_v50  ;;  %v3565_v32 = vmul.f32 1.442695, %v3564_v28  ;;  %v3846_v28 = vld [vmem:[#allocation6 + $0x150] sm:$0xff] }
0x1689   : > { %5394 = vpow2.f32 %v3621_v38  ;;  %v3847_v38 = vld [vmem:[#allocation6 + $0x158] sm:$0xff] }
0x168a   : > { %5396 = vpow2.f32 %v3565_v32 }
0x168f   : > { %v5395_v15 = vpop.eup %5394 }
0x1690   : > { %v5397_v52 = vpop.eup %5396  ;;  %v3623_v46 = vsel %vm899_vm3, %v5395_v15, 0.0 }
0x1691   : > { %3624 = vadd.xlane.f32.xlu2 %v3623_v46  ;;  %v3567_v55 = vsel %vm899_vm3, %v5397_v52, 0.0 }
0x1692   : > { %3568 = vadd.xlane.f32.xlu1 %v3567_v55 }
0x1694   : > { %v3732_v26 = vpop.xlane.xlu1 %3731 }
0x1695   : > { %v3733_v59 = vsub.f32 %v7278_v43, %v3732_v26 }
0x1696   : > { %v3676_v4 = vpop.xlane.xlu0 %3675 }
0x1697   : > { %v3734_v40 = vmul.f32 1.442695, %v3733_v59  ;;  %v3677_v3 = vsub.f32 %v7282_v0, %v3676_v4  ;;  %v5175_v4 = vld [vmem:[%s7575_s6 + $0x14] ss:$0 sm:$0xff] }
0x1699   : > { %5398 = vpow2.f32 %v3734_v40  ;;  %v3678_v14 = vmul.f32 1.442695, %v3677_v3 }
0x169b   : > { %5400 = vpow2.f32 %v3678_v14 }
0x169f   : > { %v5399_v20 = vpop.eup %5398 }
0x16a0   : > { %v3736_v63 = vsel %vm899_vm3, %v5399_v20, 0.0 }
0x16a1   : > { %v5401_v24 = vpop.eup %5400  ;;  %3737 = vadd.xlane.f32.xlu2 %v3736_v63 }
0x16a2   : > { %v3680_v57 = vsel %vm899_vm3, %v5401_v24, 0.0 }
0x16a3   : > { %3681 = vadd.xlane.f32.xlu1 %v3680_v57 }
0x16a9   : > { %v3631_v61 = vpop.permute.xlu0 %3630 }
0x16aa   : > { %v3636_v47 = vsel %vm2582_vm10, %v3631_v61, 0 }
0x16ab   : > { %3645 = vmatpush.bf16.msra.mxu3 %v3636_v47 }
0x16b9   : > { %3742 = vrot.lane.b32.xlu2 %v7249_v49, %s5654_s5 }
0x16bc   : > { %3686 = vrot.lane.b32.xlu1 %v7249_v49, %s7620_s0  ;;  %v3919_v49 = vpack.c.bf16 %v3917_v9, %v3916_v33 }
0x1704   : > { %v3625_v43 = vpop.xlane.xlu2 %3624 }
0x1705   : > { %v3569_v0 = vpop.xlane.xlu1 %3568  ;;  %5402 = vrcp.f32 %v3625_v43 }
0x1706   : > { %5404 = vrcp.f32 %v3569_v0 }
0x170b   : > { %v5403_v29 = vpop.eup %5402 }
0x170c   : > { %v5405_v44 = vpop.eup %5404  ;;  %v3627_v54 = vmul.f32 %v5403_v29, %v5395_v15  ;;  %v3844_v15 = vld [vmem:[#allocation6 + $0x140] sm:$0xff] }
0x170d   : > { %v3571_v58 = vmul.f32 %v5405_v44, %v5397_v52  ;;  %v3845_v52 = vld [vmem:[#allocation6 + $0x148] sm:$0xff] }
0x170e   : > { %v3628_v36 = vpack.c.bf16 %v3627_v54, %v3627_v54  ;;  %v3849_v46 = vpack.c.bf16 %v3845_v52, %v3844_v15  ;;  %v5447_v15 = vld [vmem:[%s7583_s14] sm:$0xff] }
0x170f   : > { %v3572_v45 = vpack.c.bf16 %v3571_v58, %v3571_v58 }
0x1710   : > { %4936 = vmatmul.msk.bf16.vlgmr.msra.gmra.mxu3 %vm899_vm3, %v3628_v36 }
0x1711   : > { %4934 = vmatmul.msk.bf16.vlgmr.msra.gmra.mxu1 %vm899_vm3, %v3572_v45 }
0x1714   : > { %v3738_v22 = vpop.xlane.xlu2 %3737 }
0x1715   : > { %5406 = vrcp.f32 %v3738_v22 }
0x1716   : > { %v3682_v10 = vpop.xlane.xlu1 %3681 }
0x1717   : > { %5408 = vrcp.f32 %v3682_v10 }
0x171b   : > { %v5407_v25 = vpop.eup %5406 }
0x171c   : > { %v3740_v37 = vmul.f32 %v5407_v25, %v5399_v20  ;;  %v3743_v34 = vpop.permute.xlu2 %3742  ;;  %v5176_v25 = vld [vmem:[%s7575_s6 + $0x1c] ss:$0 sm:$0xff] }
0x171d   : > { %v3748_v48 = vsel %vm2582_vm10, %v3743_v34, 0  ;;  %v5409_v21 = vpop.eup %5408 }
0x171e   : > { %v3741_v41 = vpack.c.bf16 %v3740_v37, %v3740_v37  ;;  %3757 = vmatpush.bf16.msrb.mxu3 %v3748_v48  ;;  %v3684_v35 = vmul.f32 %v5409_v21, %v5401_v24 }
0x1720   : > { %v3685_v11 = vpack.c.bf16 %v3684_v35, %v3684_v35 }
0x1721   : > { %4940 = vmatmul.msk.bf16.vlgmr.msrb.gmra.mxu3 %vm899_vm3, %v3741_v41 }
0x1722   : > { %3931 = vmatpush.bf16.msra.mxu3 %v3919_v49 }
0x1726   : > { %3932 = vmatpush.bf16.msra.mxu3 %v3918_v8 }
0x172e   : > { %v3687_v51 = vpop.permute.xlu1 %3686 }
0x172f   : > { %v3692_v31 = vsel %vm2582_vm10, %v3687_v51, 0 }
0x1730   : > { %3701 = vmatpush.bf16.msrb.mxu1 %v3692_v31 }
0x1731   : > { %4953 = vmatmul.msk.bf16.vlgmr.msra.gmra.mxu3 %vm769_vm2, %v6942_v27 }
0x1733   : > { %4938 = vmatmul.msk.bf16.vlgmr.msrb.gmra.mxu1 %vm899_vm3, %v3685_v11 }
0x1741   : > { %4954 = vmatmul.msk.bf16.gmra.mxu3 %vm769_vm2, %v6979_v39 }
0x1751   : > { %4955 = vmatmul.msk.bf16.gmra.mxu3 %vm769_vm2, %v6999_v42 }
0x1761   : > { %4956 = vmatmul.msk.bf16.gmra.mxu3 %vm769_vm2, %v7016_v12  ;;  %v3850_v12 = vpack.c.bf16 %v3847_v38, %v3846_v28 }
0x1763   : > { %3865 = vmatpush.bf16.msra.mxu1 %v3850_v12 }
0x1767   : > { %3866 = vmatpush.bf16.msra.mxu1 %v3849_v46 }
0x178e   : > { %v3589_v23 = vpop.f32.mrf.mxu1 }
0x1793   : > { %v3647_v13 = vpop.f32.mrf.mxu3 }
0x1794   : > { %3764 = vrot.lane.b32.xlu0 %v3647_v13, %s7615_s17 }
0x1796   : > { %v3591_v53 = vpop.f32.mrf.mxu1 }
0x179b   : > { %v3649_v62 = vpop.f32.mrf.mxu3 }
0x17a4   : > { %v3759_v7 = vpop.f32.mrf.mxu3 }
0x17a5   : > { %3772 = vrot.lane.b32.xlu2 %v3759_v7, %s7617_s24 }
0x17ac   : > { %v3761_v27 = vpop.f32.mrf.mxu3 }
0x17b0   : > { %v3703_v5 = vpop.f32.mrf.mxu1 }
0x17b1   : > { %3768 = vrot.lane.b32.xlu0 %v3703_v5, %s7616_s19 }
0x17b4   : > { %v3934_v39 = vpop.f32.mrf.mxu3 }
0x17b5   : > { %v3935_v29 = vadd.f32 %v5175_v4, %v3934_v39 }
0x17b8   : > { %v3705_v16 = vpop.f32.mrf.mxu1 }
0x17b9   : > { %v5178_v16 = vld [vmem:[%s7575_s6 + $0x16] ss:$0 sm:$0xff] }
0x17bc   : > { %v3936_v50 = vpop.f32.mrf.mxu3 }
0x17bd   : > { %v3937_v43 = vadd.f32 %v5175_v4, %v3936_v50 }
0x17bf   : > { %v7347_v44 = vpack.c.bf16 %v3937_v43, %v3935_v29 }
0x17c4   : > { %v3939_v42 = vpop.f32.mrf.mxu3 }
0x17c5   : > { %v3940_v47 = vadd.f32 %v5175_v4, %v3939_v42 }
0x17cc   : > { %v3941_v32 = vpop.f32.mrf.mxu3 }
0x17cd   : > { %v3942_v57 = vadd.f32 %v5175_v4, %v3941_v32 }
0x17cf   : > { %v7344_v0 = vpack.c.bf16 %v3942_v57, %v3940_v47  ;;  %v5179_v47 = vld [vmem:[%s7575_s6 + $0x13] ss:$0 sm:$0xff] }
0x17d4   : > { %v3944_v55 = vpop.f32.mrf.mxu3 }
0x17d5   : > { %v3945_v24 = vadd.f32 %v5175_v4, %v3944_v55 }
0x17dc   : > { %v3946_v26 = vpop.f32.mrf.mxu3 }
0x17dd   : > { %v3947_v20 = vadd.f32 %v5175_v4, %v3946_v26 }
0x17df   : > { %v7341_v61 = vpack.c.bf16 %v3947_v20, %v3945_v24 }
0x17e4   : > { %v3949_v59 = vpop.f32.mrf.mxu3 }
0x17e5   : > { %v3950_v3 = vadd.f32 %v5175_v4, %v3949_v59 }
0x17ec   : > { %v3951_v40 = vpop.f32.mrf.mxu3 }
0x17ed   : > { %v3952_v14 = vadd.f32 %v5175_v4, %v3951_v40 }
0x17ef   : > { %v7338_v63 = vpack.c.bf16 %v3952_v14, %v3950_v3 }
0x17f1   : > { %4011 = vmatpush.bf16.msrb.mxu1 %v7338_v63 }
0x17f5   : > { %4012 = vmatpush.bf16.msrb.mxu1 %v7341_v61 }
0x17f9   : > { %4013 = vmatpush.bf16.msrb.mxu1 %v7344_v0 }
0x17fd   : > { %4014 = vmatpush.bf16.msrb.mxu1 %v7347_v44 }
0x17ff   : > { %v3773_v45 = vpop.permute.xlu2 %3772 }
0x1806   : > { %v3765_v54 = vpop.permute.xlu0 %3764 }
0x1807   : > { %v3775_v58 = vsel %vm899_vm3, %v3589_v23, %v3765_v54 }
0x1823   : > { %v3769_v36 = vpop.permute.xlu0 %3768 }
0x1824   : > { %v3776_v22 = vsel %vm1845_vm5, %v3775_v58, %v3769_v36 }
0x1825   : > { %v3777_v33 = vsel %vm1854_vm6, %v3776_v22, %v3773_v45 }
0x1826   : > { %v3783_v9 = vpack.c.bf16 %v3777_v33, %v3777_v33 }
0x1828   : > { %4942 = vmatmul.msk.bf16.vlgmr.msra.gmra.mxu0 %vm769_vm2, %v3783_v9 }
0x18a5   : > { %v3803_v49 = vpop.f32.mrf.mxu0 }
0x18a6   : > { %v3804_v37 = vadd.f32 %v5176_v25, %v3803_v49 }
0x18a8   : > { %v3807_v34 = vadd.f32 %v3804_v37, %v7235_v30 }
0x18aa   : > { %v3808_v18 = vsel %vm769_vm2, %v3807_v34, 0.0 }
0x18ab   : > { %3809 = vadd.xlane.f32.xlu0 %v3808_v18 }
0x18ad   : > { %v3805_v60 = vpop.f32.mrf.mxu0 }
0x18bf   : > { %4033 = vrot.lane.b32.xlu0 %v7293_v17, %s5650_s29 }
0x18c7   : > { %4193 = vrot.lane.b32.xlu0 %v7293_v17, %s5654_s5 }
0x18cf   : > { %4113 = vrot.lane.b32.xlu0 %v7297_v19, %s7620_s0 }
0x18d7   : > { %4111 = vrot.lane.b32.xlu0 %v7301_v1, %s7620_s0 }
0x18df   : > { %4109 = vrot.lane.b32.xlu0 %v7291_v6, %s7620_s0 }
0x191e   : > { %v3810_v30 = vpop.xlane.xlu0 %3809 }
0x191f   : > { %v3811_v48 = vmul.f32 %v3810_v30, %v6600_v56 }
0x1921   : > { %v3812_v41 = vsub.f32 %v3807_v34, %v3811_v48 }
0x1923   : > { %v3813_v8 = vmul.f32 %v3812_v41, %v3812_v41 }
0x1925   : > { %v3814_v10 = vsel %vm769_vm2, %v3813_v8, 0.0 }
0x1926   : > { %3815 = vadd.xlane.f32.xlu1 %v3814_v10 }
0x1931   : > { %v4034_v21 = vpop.permute.xlu0 %4033 }
0x1932   : > { %v4048_v26 = vsel %vm899_vm3, %v4034_v21, 0 }
0x1939   : > { %v4194_v35 = vpop.permute.xlu0 %4193 }
0x193a   : > { %v4208_v51 = vsel %vm899_vm3, %v4194_v35, 0 }
0x193b   : > { %4214 = vmatpush.bf16.xpose.msrb.mxu3 %v4208_v51 }
0x193f   : > { %4115 = vrot.lane.b32.xlu1 %v7293_v17, %s7620_s0  ;;  %v5177_v17 = vld [vmem:[%s7575_s6 + $0x17] ss:$0 sm:$0xff] }
0x1941   : > { %v4114_v12 = vpop.permute.xlu0 %4113 }
0x1942   : > { %v4127_v59 = vsel %vm899_vm3, %v4114_v12, 0 }
0x1947   : > { %4191 = vrot.lane.b32.xlu1 %v7297_v19, %s5654_s5 }
0x1949   : > { %v4112_v40 = vpop.permute.xlu0 %4111 }
0x194a   : > { %v4124_v14 = vsel %vm899_vm3, %v4112_v40, 0 }
0x194f   : > { %4189 = vrot.lane.b32.xlu1 %v7301_v1, %s5654_s5 }
0x1951   : > { %v4110_v24 = vpop.permute.xlu0 %4109 }
0x1952   : > { %v4121_v57 = vsel %vm899_vm3, %v4110_v24, 0 }
0x1999   : > { %v3816_v31 = vpop.xlane.xlu1 %3815 }
0x199a   : > { %v3817_v11 = vmul.f32 %v3816_v31, %v6600_v56 }
0x199c   : > { %v3818_v23 = vadd.f32 1e-05, %v3817_v11 }
0x199e   : > { %5410 = vrsqrt.f32 %v3818_v23  ;;  %vm3825_vm14 = vweird.f32 %v3818_v23 }
0x19a4   : > { %v5411_v13 = vpop.eup %5410 }
0x19a5   : > { %v3820_v53 = vmul.f32 %v5411_v13, %v3818_v23  ;;  %vm3826_vm10 = vweird.f32 %v5411_v13 }
0x19a6   : > { %vm3827_vm15 = vmor %vm3825_vm14, %vm3826_vm10  ;;  %vm4592_vm14 = vcmask 15360  }
0x19a7   : > { %v3821_v62 = vmul.f32 %v5411_v13, %v3820_v53 }
0x19a9   : > { %v3822_v7 = vmul.f32 0.5, %v3821_v62 }
0x19ab   : > { %v3823_v27 = vsub.f32 1.5, %v3822_v7 }
0x19ad   : > { %v3824_v5 = vmul.f32 %v5411_v13, %v3823_v27 }
0x19af   : > { %v3828_v39 = vsel %vm3827_vm15, %v5411_v13, %v3824_v5 }
0x19b0   : > { %v3829_v50 = vmul.f32 %v3828_v39, %v3812_v41 }
0x19b1   : > { %v4116_v42 = vpop.permute.xlu1 %4115 }
0x19b2   : > { %v3835_v28 = vmul.f32 %v5177_v17, %v3829_v50  ;;  %v4130_v38 = vsel %vm899_vm3, %v4116_v42, 0 }
0x19b3   : > { %4136 = vmatpush.bf16.xpose.msra.mxu2 %v4130_v38 }
0x19b4   : > { %v7386_v32 = vadd.f32 %v5178_v16, %v3835_v28 }
0x19b6   : > { %v3842_v52 = vadd.f32 %v5447_v15, %v7386_v32 }
0x19b8   : > { %v3848_v46 = vpack.c.bf16 %v3842_v52, %v3842_v52 }
0x19b9   : > { %v4192_v55 = vpop.permute.xlu1 %4191 }
0x19ba   : > { %v4205_v4 = vsel %vm899_vm3, %v4192_v55, 0  ;;  %4946 = vmatmul.msk.bf16.vlgmr.msra.gmra.mxu1 %vm769_vm2, %v3848_v46 }
0x19bb   : > { %4054 = vmatpush.bf16.xpose.msra.mxu1 %v4048_v26  ;;  %4137 = vmatpush.bf16.xpose.msra.mxu2 %v4127_v59 }
0x19bc   : > { %4215 = vmatpush.bf16.xpose.msrb.mxu3 %v4205_v4 }
0x19c1   : > { %v4190_v3 = vpop.permute.xlu1 %4189 }
0x19c2   : > { %v4202_v20 = vsel %vm899_vm3, %v4190_v3, 0 }
0x19c3   : > { %4138 = vmatpush.bf16.xpose.msra.mxu2 %v4124_v14 }
0x19c4   : > { %4216 = vmatpush.bf16.xpose.msrb.mxu3 %v4202_v20 }
0x19cb   : > { %4139 = vmatpush.bf16.xpose.msra.mxu2 %v4121_v57 }
0x1a37   : > { %v3868_v43 = vpop.f32.mrf.mxu1 }
0x1a38   : > { %v3869_v29 = vadd.f32 %v5179_v47, %v3868_v43 }
0x1a3a   : > { %v3954_v54 = vmul.f32 0.35355338, %v3869_v29 }
0x1a3c   : > { %v3955_v58 = vpack.c.bf16 %v3954_v54, %v3954_v54 }
0x1a3e   : > { %4185 = vrot.lane.b32.xlu0 %v3955_v58, %s5654_s5  ;;  %4957 = vmatmul.msk.bf16.vlgmr.msrb.gmra.mxu0 %vm899_vm3, %v3955_v58 }
0x1a3f   : > { %v3870_v36 = vpop.f32.mrf.mxu1 }
0x1ab0   : > { %v4186_v13 = vpop.permute.xlu0 %4185 }
0x1abb   : > { %v3984_v45 = vpop.f32.mrf.mxu0 }
0x1abc   : > { %v3985_v22 = vadd.f32 %v3984_v45, %v6097_v2 }
0x1abe   : > { %v3988_v33 = vsel %vm953_vm4, %v3985_v22, -inf }
0x1abf   : > { %3989 = vmax.xlane.f32.xlu2 %v3988_v33 }
0x1ac3   : > { %v3986_v9 = vpop.f32.mrf.mxu0 }
0x1ad7   : > { %4031 = vrot.lane.b32.xlu2 %v7297_v19, %s5650_s29 }
0x1adf   : > { %4029 = vrot.lane.b32.xlu2 %v7301_v1, %s5650_s29 }
0x1ae7   : > { %4027 = vrot.lane.b32.xlu2 %v7291_v6, %s5650_s29 }
0x1aef   : > { %4021 = vrot.lane.b32.xlu2 %v3955_v58, %s5650_s29 }
0x1af7   : > { %4107 = vrot.lane.b32.xlu2 %v3955_v58, %s7620_s0 }
0x1b32   : > { %v3990_v25 = vpop.xlane.xlu2 %3989 }
0x1b33   : > { %v3991_v49 = vsub.f32 %v3985_v22, %v3990_v25 }
0x1b35   : > { %v3992_v37 = vmul.f32 1.442695, %v3991_v49 }
0x1b37   : > { %5412 = vpow2.f32 %v3992_v37 }
0x1b3a   : > { %v4032_v34 = vpop.permute.xlu2 %4031 }
0x1b3b   : > { %v4045_v18 = vsel %vm899_vm3, %v4032_v34, 0 }
0x1b3c   : > { %4055 = vmatpush.bf16.xpose.msra.mxu1 %v4045_v18 }
0x1b3d   : > { %v5413_v60 = vpop.eup %5412 }
0x1b3e   : > { %v3994_v19 = vsel %vm953_vm4, %v5413_v60, 0.0 }
0x1b3f   : > { %3995 = vadd.xlane.f32.xlu1 %v3994_v19 }
0x1b42   : > { %v4030_v1 = vpop.permute.xlu2 %4029 }
0x1b43   : > { %v4042_v30 = vsel %vm899_vm3, %v4030_v1, 0 }
0x1b44   : > { %4056 = vmatpush.bf16.xpose.msra.mxu1 %v4042_v30 }
0x1b4a   : > { %v4028_v48 = vpop.permute.xlu2 %4027 }
0x1b4b   : > { %v4039_v41 = vsel %vm899_vm3, %v4028_v48, 0 }
0x1b4c   : > { %4057 = vmatpush.bf16.xpose.msra.mxu1 %v4039_v41 }
0x1b52   : > { %v4022_v8 = vpop.permute.xlu2 %4021 }
0x1b58   : > { %4187 = vrot.lane.b32.xlu1 %v7291_v6, %s5654_s5 }
0x1b5a   : > { %v4108_v10 = vpop.permute.xlu2 %4107 }
0x1b5b   : > { %4961 = vmatmul.msk.bf16.vlgmr.msra.gmra.mxu2 %vm899_vm3, %v4108_v10 }
0x1bb2   : > { %v3996_v21 = vpop.xlane.xlu1 %3995 }
0x1bb3   : > { %5414 = vrcp.f32 %v3996_v21 }
0x1bb9   : > { %v5415_v35 = vpop.eup %5414 }
0x1bba   : > { %v3998_v51 = vmul.f32 %v5415_v35, %v5413_v60 }
0x1bbc   : > { %v3999_v31 = vpack.c.bf16 %v3998_v51, %v3998_v51 }
0x1bbe   : > { %4958 = vmatmul.msk.bf16.vlgmr.msrb.gmra.mxu1 %vm953_vm4, %v3999_v31 }
0x1bca   : > { %v4188_v11 = vpop.permute.xlu1 %4187 }
0x1bcb   : > { %v4199_v23 = vsel %vm899_vm3, %v4188_v11, 0  ;;  %v4281_v11 = vld [vmem:[#allocation6 + $0x130] sm:$0xff] }
0x1bcc   : > { %4217 = vmatpush.bf16.xpose.msrb.mxu3 %v4199_v23  ;;  %v4282_v23 = vld [vmem:[#allocation6 + $0x138] sm:$0xff] }
0x1bce   : > { %4959 = vmatmul.msk.bf16.vlgmr.msra.gmra.mxu1 %vm899_vm3, %v4022_v8 }
0x1bd3   : > { %4963 = vmatmul.msk.bf16.vlgmr.msrb.gmra.mxu3 %vm899_vm3, %v4186_v13  ;;  %v4285_v13 = vpack.c.bf16 %v4282_v23, %v4281_v11  ;;  %v5184_v23 = vld [vmem:[%s7575_s6 + $0x15] ss:$0 sm:$0xff] }
0x1bde   : > { %v4141_v6 = vpop.f32.mrf.mxu2 }
0x1bdf   : > { %v4142_v53 = vadd.f32 %v4141_v6, %v6097_v2  ;;  %v4279_v6 = vld [vmem:[#allocation6 + $0x120] sm:$0xff] }
0x1be1   : > { %v4145_v62 = vsel %vm953_vm4, %v4142_v53, -inf }
0x1be2   : > { %4146 = vmax.xlane.f32.xlu2 %v4145_v62 }
0x1be6   : > { %v4143_v7 = vpop.f32.mrf.mxu2 }
0x1bfa   : > { %4081 = vrot.lane.b32.xlu2 %v7344_v0, %s5650_s29 }
0x1c02   : > { %4161 = vrot.lane.b32.xlu2 %v7341_v61, %s7620_s0 }
0x1c0a   : > { %4239 = vrot.lane.b32.xlu2 %v7341_v61, %s5654_s5 }
0x1c12   : > { %4159 = vrot.lane.b32.xlu2 %v7344_v0, %s7620_s0 }
0x1c1a   : > { %4237 = vrot.lane.b32.xlu2 %v7344_v0, %s5654_s5 }
0x1c22   : > { %4157 = vrot.lane.b32.xlu2 %v7347_v44, %s7620_s0 }
0x1c3b   : > { %v7439_v27 = vpop.f32.mrf.mxu1 }
0x1c43   : > { %v4018_v5 = vpop.f32.mrf.mxu1 }
0x1c4b   : > { %v4059_v17 = vpop.f32.mrf.mxu1 }
0x1c4c   : > { %v4060_v39 = vadd.f32 %v4059_v17, %v6097_v2 }
0x1c4e   : > { %v4063_v16 = vsel %vm953_vm4, %v4060_v39, -inf }
0x1c4f   : > { %4064 = vmax.xlane.f32.xlu1 %v4063_v16 }
0x1c53   : > { %v4061_v50 = vpop.f32.mrf.mxu1 }
0x1c56   : > { %v4219_v42 = vpop.f32.mrf.mxu3 }
0x1c57   : > { %v4220_v28 = vadd.f32 %v4219_v42, %v6097_v2  ;;  %v4147_v2 = vpop.xlane.xlu2 %4146 }
0x1c58   : > { %v4148_v12 = vsub.f32 %v4142_v53, %v4147_v2  ;;  %v4280_v53 = vld [vmem:[#allocation6 + $0x128] sm:$0xff] }
0x1c59   : > { %v4223_v38 = vsel %vm953_vm4, %v4220_v28, -inf  ;;  %v4284_v62 = vpack.c.bf16 %v4280_v53, %v4279_v6 }
0x1c5a   : > { %4224 = vmax.xlane.f32.xlu0 %v4223_v38  ;;  %v4149_v15 = vmul.f32 1.442695, %v4148_v12 }
0x1c5c   : > { %5416 = vpow2.f32 %v4149_v15 }
0x1c5e   : > { %v4221_v0 = vpop.f32.mrf.mxu3 }
0x1c5f   : > { %v4082_v26 = vpop.permute.xlu2 %4081 }
0x1c62   : > { %v5417_v52 = vpop.eup %5416 }
0x1c63   : > { %v4151_v46 = vsel %vm953_vm4, %v5417_v52, 0.0 }
0x1c67   : > { %v4162_v40 = vpop.permute.xlu2 %4161 }
0x1c68   : > { %4085 = vrot.lane.b32.xlu1 %v7338_v63, %s5650_s29 }
0x1c6e   : > { %4083 = vrot.lane.b32.xlu0 %v7341_v61, %s5650_s29 }
0x1c6f   : > { %v4240_v24 = vpop.permute.xlu2 %4239 }
0x1c70   : > { %4163 = vrot.lane.b32.xlu1 %v7338_v63, %s7620_s0  ;;  %s5660_s0 = smov 126  }
0x1c76   : > { %4079 = vrot.lane.b32.xlu0 %v7347_v44, %s5650_s29 }
0x1c77   : > { %v4160_v54 = vpop.permute.xlu2 %4159 }
0x1c7e   : > { %4241 = vrot.lane.b32.xlu0 %v7338_v63, %s5654_s5 }
0x1c7f   : > { %v4238_v45 = vpop.permute.xlu2 %4237 }
0x1c87   : > { %v4158_v33 = vpop.permute.xlu2 %4157 }
0x1c9a   : > { %4152 = vadd.xlane.f32.xlu1 %v4151_v46 }
0x1cc2   : > { %v4065_v55 = vpop.xlane.xlu1 %4064 }
0x1cc3   : > { %v4066_v61 = vsub.f32 %v4060_v39, %v4065_v55 }
0x1cc5   : > { %v4067_v59 = vmul.f32 1.442695, %v4066_v61  ;;  %v4971_v61 = vld [vmem:[%s7580_s11 + $0x50] sm:$0xff] }
0x1cc7   : > { %5418 = vpow2.f32 %v4067_v59 }
0x1ccd   : > { %v5419_v4 = vpop.eup %5418  ;;  %v4225_v3 = vpop.xlane.xlu0 %4224 }
0x1cce   : > { %v4226_v14 = vsub.f32 %v4220_v28, %v4225_v3  ;;  %v4069_v20 = vsel %vm953_vm4, %v5419_v4, 0.0  ;;  %v5180_v28 = vld [vmem:[%s7575_s6 + $0x12] ss:$0 sm:$0xff] }
0x1ccf   : > { %4070 = vadd.xlane.f32.xlu2 %v4069_v20  ;;  %v4380_v20 = vld [vmem:[#allocation9 + $0x78] sm:$0xff] }
0x1cd0   : > { %v4227_v63 = vmul.f32 1.442695, %v4226_v14  ;;  %v4379_v14 = vld [vmem:[#allocation9 + $0x70] sm:$0xff] }
0x1cd2   : > { %5420 = vpow2.f32 %v4227_v63  ;;  %v4377_v63 = vld [vmem:[#allocation9 + $0x60] sm:$0xff] }
0x1cd8   : > { %v5421_v57 = vpop.eup %5420 }
0x1cd9   : > { %v4229_v47 = vsel %vm953_vm4, %v5421_v57, 0.0 }
0x1cda   : > { %v4086_v43 = vpop.permute.xlu1 %4085  ;;  %4230 = vadd.xlane.f32.xlu0 %v4229_v47  ;;  %v4378_v47 = vld [vmem:[#allocation9 + $0x68] sm:$0xff] }
0x1cdb   : > { %4098 = vmatpush.bf16.msra.mxu0 %v4086_v43 }
0x1ce0   : > { %v4084_v29 = vpop.permute.xlu0 %4083 }
0x1ce1   : > { %4099 = vmatpush.bf16.msra.mxu0 %v4084_v29  ;;  %v4384_v29 = vpack.c.bf16 %v4378_v47, %v4377_v63  ;;  %v4596_v47 = vld [vmem:[#allocation4 + $0x10] sm:$0xff] }
0x1ce2   : > { %v4164_v36 = vpop.permute.xlu1 %4163 }
0x1ce5   : > { %4100 = vmatpush.bf16.msra.mxu0 %v4082_v26 }
0x1ce7   : > { %4235 = vrot.lane.b32.xlu2 %v7347_v44, %s5654_s5  ;;  %s666_s5 = scalar_lea.vmem %s7585_s16, %s4801_s28 }
0x1ce8   : > { %v4080_v58 = vpop.permute.xlu0 %4079 }
0x1ce9   : > { %4101 = vmatpush.bf16.msra.mxu0 %v4080_v58 }
0x1ced   : > { %4176 = vmatpush.bf16.msrb.mxu0 %v4164_v36 }
0x1cf0   : > { %v4242_v22 = vpop.permute.xlu0 %4241 }
0x1cf1   : > { %4177 = vmatpush.bf16.msrb.mxu0 %v4162_v40  ;;  %4254 = vmatpush.bf16.msrb.mxu1 %v4242_v22  ;;  %v4970_v40 = vld [vmem:[%s7580_s11 + $0x48] sm:$0xff] }
0x1cf5   : > { %4178 = vmatpush.bf16.msrb.mxu0 %v4160_v54  ;;  %4255 = vmatpush.bf16.msrb.mxu1 %v4240_v24 }
0x1cf9   : > { %4179 = vmatpush.bf16.msrb.mxu0 %v4158_v33  ;;  %4256 = vmatpush.bf16.msrb.mxu1 %v4238_v45 }
0x1d0d   : > { %v4153_v44 = vpop.xlane.xlu1 %4152 }
0x1d42   : > { %v4071_v9 = vpop.xlane.xlu2 %4070 }
0x1d43   : > { %5422 = vrcp.f32 %v4071_v9 }
0x1d49   : > { %v5423_v25 = vpop.eup %5422 }
0x1d4a   : > { %v4073_v49 = vmul.f32 %v5423_v25, %v5419_v4  ;;  %v4236_v37 = vpop.permute.xlu2 %4235  ;;  %v4969_v4 = vld [vmem:[%s7580_s11 + $0x40] sm:$0xff]  ;;  %v5181_v25 = vld [vmem:[%s7575_s6 + $0x19] ss:$0 sm:$0xff] }
0x1d4b   : > { %4257 = vmatpush.bf16.msrb.mxu1 %v4236_v37  ;;  %v4348_v3 = vpack.c.bf16 %v4970_v40, %v4969_v4  ;;  %v5182_v37 = vld [vmem:[%s7575_s6 + $0x18] ss:$0 sm:$0xff] }
0x1d4c   : > { %v4074_v34 = vpack.c.bf16 %v4073_v49, %v4073_v49 }
0x1d4d   : > { %v4231_v18 = vpop.xlane.xlu0 %4230 }
0x1d4e   : > { %5424 = vrcp.f32 %v4231_v18  ;;  %4960 = vmatmul.msk.bf16.vlgmr.msra.gmra.mxu0 %vm953_vm4, %v4074_v34 }
0x1d4f   : > { %5426 = vrcp.f32 %v4153_v44  ;;  %4300 = vmatpush.bf16.msra.mxu0 %v4285_v13 }
0x1d53   : > { %4301 = vmatpush.bf16.msra.mxu0 %v4284_v62 }
0x1d54   : > { %v5425_v60 = vpop.eup %5424 }
0x1d55   : > { %v5427_v19 = vpop.eup %5426  ;;  %v4233_v1 = vmul.f32 %v5425_v60, %v5421_v57  ;;  %v4385_v57 = vpack.c.bf16 %v4380_v20, %v4379_v14 }
0x1d56   : > { %v4155_v48 = vmul.f32 %v5427_v19, %v5417_v52  ;;  %v4375_v19 = vld [vmem:[#allocation9 + $0x50] sm:$0xff] }
0x1d57   : > { %v4234_v30 = vpack.c.bf16 %v4233_v1, %v4233_v1  ;;  %4398 = vmatpush.bf16.msrb.mxu2 %v4385_v57  ;;  %v4376_v1 = vld [vmem:[#allocation9 + $0x58] sm:$0xff] }
0x1d58   : > { %v4156_v41 = vpack.c.bf16 %v4155_v48, %v4155_v48  ;;  %v4373_v48 = vld [vmem:[#allocation9 + $0x40] sm:$0xff]  ;;  %v4479_v57 = vld [vmem:[#allocation6 + $0x18] sm:$0xff] }
0x1d59   : > { %4964 = vmatmul.msk.bf16.vlgmr.msrb.gmra.mxu1 %vm953_vm4, %v4234_v30  ;;  %v4383_v30 = vpack.c.bf16 %v4376_v1, %v4375_v19 }
0x1d5b   : > { %4399 = vmatpush.bf16.msrb.mxu2 %v4384_v29  ;;  %v4597_v29 = vld [vmem:[#allocation4 + $0x18] sm:$0xff] }
0x1d5e   : > { %4962 = vmatmul.msk.bf16.vlgmr.msrb.gmra.mxu0 %vm953_vm4, %v4156_v41  ;;  %v4374_v41 = vld [vmem:[#allocation9 + $0x48] sm:$0xff] }
0x1d5f   : > { %4400 = vmatpush.bf16.msrb.mxu2 %v4383_v30  ;;  %v5187_v30 = vld [vmem:[%s7575_s6 + $0x3] ss:$0 sm:$0xff] }
0x1dcb   : > { %v4103_v8 = vpop.f32.mrf.mxu0 }
0x1dcc   : > { %4264 = vrot.lane.b32.xlu1 %v4103_v8, %s7615_s17  ;;  %v4382_v8 = vpack.c.bf16 %v4374_v41, %v4373_v48 }
0x1dce   : > { %4401 = vmatpush.bf16.msrb.mxu2 %v4382_v8 }
0x1dd3   : > { %v4105_v10 = vpop.f32.mrf.mxu0 }
0x1dd4   : > { %v5183_v10 = vld [vmem:[%s7579_s10 + $0x2] ss:$0 sm:$0xff] }
0x1dd6   : > { %v4259_v21 = vpop.f32.mrf.mxu1 }
0x1dd7   : > { %4272 = vrot.lane.b32.xlu2 %v4259_v21, %s7617_s24  ;;  %s658_s24 = scalar_lea.vmem %s7572_s3, %s7630_s25 }
0x1ddb   : > { %v4181_v35 = vpop.f32.mrf.mxu0 }
0x1ddc   : > { %4268 = vrot.lane.b32.xlu0 %v4181_v35, %s7616_s19 }
0x1dde   : > { %v4261_v51 = vpop.f32.mrf.mxu1 }
0x1de3   : > { %v4183_v31 = vpop.f32.mrf.mxu0 }
0x1e31   : > { %v4273_v39 = vpop.permute.xlu2 %4272 }
0x1e3e   : > { %v4265_v7 = vpop.permute.xlu1 %4264 }
0x1e3f   : > { %v4275_v5 = vsel %vm899_vm3, %v7439_v27, %v4265_v7 }
0x1e4e   : > { %v4269_v17 = vpop.permute.xlu0 %4268 }
0x1e4f   : > { %v4276_v16 = vsel %vm1845_vm5, %v4275_v5, %v4269_v17 }
0x1e50   : > { %v4277_v50 = vsel %vm1854_vm6, %v4276_v16, %v4273_v39 }
0x1e51   : > { %v4283_v42 = vpack.c.bf16 %v4277_v50, %v4277_v50 }
0x1e53   : > { %4966 = vmatmul.msk.bf16.vlgmr.msra.gmra.mxu0 %vm769_vm2, %v4283_v42 }
0x1ed0   : > { %v4303_v38 = vpop.f32.mrf.mxu0 }
0x1ed1   : > { %v4304_v0 = vadd.f32 %v5180_v28, %v4303_v38 }
0x1ed3   : > { %v4307_v2 = vadd.f32 %v4304_v0, %v7386_v32  ;;  %v4972_v32 = vld [vmem:[%s7580_s11 + $0x58] sm:$0xff] }
0x1ed4   : > { %v4349_v59 = vpack.c.bf16 %v4972_v32, %v4971_v61  ;;  %v5186_v61 = vld [vmem:[%s7575_s6 + $0x1a] ss:$0 sm:$0xff] }
0x1ed5   : > { %v4308_v12 = vsel %vm769_vm2, %v4307_v2, 0.0 }
0x1ed6   : > { %4309 = vadd.xlane.f32.xlu2 %v4308_v12  ;;  %4364 = vmatpush.bf16.msra.mxu1 %v4349_v59 }
0x1ed8   : > { %v4305_v27 = vpop.f32.mrf.mxu0 }
0x1eda   : > { %4365 = vmatpush.bf16.msra.mxu1 %v4348_v3 }
0x1f49   : > { %v4310_v15 = vpop.xlane.xlu2 %4309 }
0x1f4a   : > { %v4311_v52 = vmul.f32 %v4310_v15, %v6600_v56 }
0x1f4c   : > { %v4312_v46 = vsub.f32 %v4307_v2, %v4311_v52 }
0x1f4e   : > { %v4313_v55 = vmul.f32 %v4312_v46, %v4312_v46 }
0x1f50   : > { %v4314_v26 = vsel %vm769_vm2, %v4313_v55, 0.0 }
0x1f51   : > { %4315 = vadd.xlane.f32.xlu1 %v4314_v26 }
0x1fc4   : > { %v4316_v24 = vpop.xlane.xlu1 %4315 }
0x1fc5   : > { %v4317_v43 = vmul.f32 %v4316_v24, %v6600_v56  ;;  %v4478_v24 = vld [vmem:[#allocation6 + $0x10] sm:$0xff] }
0x1fc7   : > { %v4318_v54 = vadd.f32 1e-05, %v4317_v43  ;;  %v4482_v43 = vpack.c.bf16 %v4479_v57, %v4478_v24 }
0x1fc9   : > { %5428 = vrsqrt.f32 %v4318_v54  ;;  %vm4325_vm5 = vweird.f32 %v4318_v54  ;;  %4496 = vmatpush.bf16.msra.mxu3 %v4482_v43 }
0x1fcf   : > { %v5429_v58 = vpop.eup %5428 }
0x1fd0   : > { %v4320_v36 = vmul.f32 %v5429_v58, %v4318_v54  ;;  %vm4326_vm3 = vweird.f32 %v5429_v58  ;;  %v4599_v54 = vpack.c.bf16 %v4597_v29, %v4596_v47 }
0x1fd1   : > { %vm4327_vm6 = vmor %vm4325_vm5, %vm4326_vm3 }
0x1fd2   : > { %v4321_v45 = vmul.f32 %v5429_v58, %v4320_v36  ;;  %4610 = vmatpush.bf16.msra.mxu2 %v4599_v54  ;;  %v4477_v36 = vld [vmem:[#allocation6 + $0x8] sm:$0xff] }
0x1fd4   : > { %v4322_v22 = vmul.f32 0.5, %v4321_v45  ;;  %v4594_v45 = vld [vmem:[#allocation4] sm:$0xff] }
0x1fd6   : > { %v4323_v33 = vsub.f32 1.5, %v4322_v22 }
0x1fd8   : > { %v4324_v9 = vmul.f32 %v5429_v58, %v4323_v33  ;;  %v4595_v33 = vld [vmem:[#allocation4 + $0x8] sm:$0xff] }
0x1fda   : > { %v4328_v49 = vsel %vm4327_vm6, %v5429_v58, %v4324_v9  ;;  %v4476_v58 = vld [vmem:[#allocation6] sm:$0xff]  ;;  %v4598_v9 = vpack.c.bf16 %v4595_v33, %v4594_v45 }
0x1fdb   : > { %v4329_v44 = vmul.f32 %v4328_v49, %v4312_v46  ;;  %v5185_v46 = vld [vmem:[%s7575_s6 + $0x1b] ss:$0 sm:$0xff]  ;;  %v4481_v22 = vpack.c.bf16 %v4477_v36, %v4476_v58 }
0x1fdc   : > { %4611 = vmatpush.bf16.msra.mxu2 %v4598_v9 }
0x1fdd   : > { %v4335_v34 = vmul.f32 %v5181_v25, %v4329_v44  ;;  %4497 = vmatpush.bf16.msra.mxu3 %v4481_v22 }
0x1fdf   : > { %v4341_v18 = vadd.f32 %v5182_v37, %v4335_v34 }
0x1fe1   : > { %v4347_v60 = vpack.c.bf16 %v4341_v18, %v4341_v18 }
0x1fe3   : > { %4974 = vmatmul.msk.bf16.vlgmr.msra.gmra.mxu1 %vm769_vm2, %v4347_v60 }
0x2060   : > { %v4367_v21 = vpop.f32.mrf.mxu1 }
0x2061   : > { %v4368_v35 = vadd.f32 %v5183_v10, %v4367_v21 }
0x2063   : > { %v4371_v51 = vmax.f32 %v4368_v35, 0.0  ;;  %v4507_v35 = vld [vmem:[#allocation6 + $0x30] sm:$0xff] }
0x2065   : > { %v4381_v31 = vpack.c.bf16 %v4371_v51, %v4371_v51  ;;  %v4508_v51 = vld [vmem:[#allocation6 + $0x38] sm:$0xff] }
0x2067   : > { %4976 = vmatmul.msk.bf16.vlgmr.msrb.gmra.mxu2 %vm953_vm4, %v4381_v31  ;;  %v4511_v31 = vpack.c.bf16 %v4508_v51, %v4507_v35 }
0x2068   : > { %v4369_v11 = vpop.f32.mrf.mxu1 }
0x2069   : > { %4526 = vmatpush.bf16.msrb.mxu0 %v4511_v31  ;;  %v4505_v11 = vld [vmem:[#allocation6 + $0x20] sm:$0xff] }
0x20ea   : > { %v4403_v13 = vpop.f32.mrf.mxu2 }
0x20eb   : > { %v4404_v6 = vadd.f32 %v5184_v23, %v4403_v13  ;;  %v4506_v23 = vld [vmem:[#allocation6 + $0x28] sm:$0xff] }
0x20ec   : > { %v4510_v13 = vpack.c.bf16 %v4506_v23, %v4505_v11 }
0x20ed   : > { %v4407_v53 = vadd.f32 %v4404_v6, %v4341_v18  ;;  %v5189_v6 = vld [vmem:[%s7575_s6] ss:$0 sm:$0xff] }
0x20ee   : > { %4527 = vmatpush.bf16.msrb.mxu0 %v4510_v13 }
0x20ef   : > { %v4408_v62 = vsel %vm769_vm2, %v4407_v53, 0.0 }
0x20f0   : > { %4409 = vadd.xlane.f32.xlu0 %v4408_v62 }
0x20f2   : > { %v4405_v7 = vpop.f32.mrf.mxu2 }
0x2163   : > { %v4410_v5 = vpop.xlane.xlu0 %4409 }
0x2164   : > { %v4411_v17 = vmul.f32 %v4410_v5, %v6600_v56 }
0x2166   : > { %v4412_v39 = vsub.f32 %v4407_v53, %v4411_v17  ;;  %v5190_v53 = vld [vmem:[%s7573_s4] ss:$0 sm:$0xff] }
0x2168   : > { %v4413_v16 = vmul.f32 %v4412_v39, %v4412_v39 }
0x216a   : > { %v4414_v50 = vsel %vm769_vm2, %v4413_v16, 0.0 }
0x216b   : > { %4415 = vadd.xlane.f32.xlu2 %v4414_v50 }
0x21de   : > { %v4416_v42 = vpop.xlane.xlu2 %4415 }
0x21df   : > { %v4417_v28 = vmul.f32 %v4416_v42, %v6600_v56 }
0x21e1   : > { %v4418_v38 = vadd.f32 1e-05, %v4417_v28  ;;  %v4536_v28 = vld [vmem:[#allocation7 + $0x10] sm:$0xff] }
0x21e3   : > { %5430 = vrsqrt.f32 %v4418_v38  ;;  %vm4425_vm0 = vweird.f32 %v4418_v38 }
0x21e9   : > { %v5431_v0 = vpop.eup %5430 }
0x21ea   : > { %v4420_v2 = vmul.f32 %v5431_v0, %v4418_v38  ;;  %vm4426_vm4 = vweird.f32 %v5431_v0  ;;  %v4537_v38 = vld [vmem:[#allocation7 + $0x18] sm:$0xff] }
0x21eb   : > { %vm4427_vm1 = vmor %vm4425_vm0, %vm4426_vm4 }
0x21ec   : > { %v4421_v12 = vmul.f32 %v5431_v0, %v4420_v2  ;;  %v4534_v2 = vld [vmem:[#allocation7] sm:$0xff] }
0x21ee   : > { %v4422_v27 = vmul.f32 0.5, %v4421_v12  ;;  %v4535_v12 = vld [vmem:[#allocation7 + $0x8] sm:$0xff] }
0x21f0   : > { %v4423_v15 = vsub.f32 1.5, %v4422_v27  ;;  %v4539_v27 = vpack.c.bf16 %v4535_v12, %v4534_v2 }
0x21f2   : > { %v4424_v52 = vmul.f32 %v5431_v0, %v4423_v15  ;;  %v5192_v15 = vld [vmem:[%s658_s24] ss:$0 sm:$0xff] }
0x21f3   : > { %4584 = vrot.lane.b32.xlu0 %v5192_v15, %s5660_s0 }
0x21f4   : > { %v4428_v55 = vsel %vm4427_vm1, %v5431_v0, %v4424_v52  ;;  %v4540_v0 = vpack.c.bf16 %v4537_v38, %v4536_v28  ;;  %v5191_v52 = vld [vmem:[%s7575_s6 + $0x1] ss:$0 sm:$0xff] }
0x21f5   : > { %v4429_v26 = vmul.f32 %v4428_v55, %v4412_v39 }
0x21f6   : > { %4554 = vmatpush.bf16.msrb.mxu1 %v4540_v0 }
0x21f7   : > { %v4435_v32 = vmul.f32 %v5185_v46, %v4429_v26 }
0x21f9   : > { %v4441_v59 = vadd.f32 %v5186_v61, %v4435_v32 }
0x21fa   : > { %4555 = vmatpush.bf16.msrb.mxu1 %v4539_v27 }
0x21fb   : > { %v4442_v4 = vsel %vm769_vm2, %v4441_v59, 0.0 }
0x21fc   : > { %4443 = vadd.xlane.f32.xlu2 %v4442_v4 }
0x2265   : > { %v4585_v9 = vpop.permute.xlu0 %4584 }
0x226f   : > { %v4444_v40 = vpop.xlane.xlu2 %4443 }
0x2270   : > { %v4445_v3 = vmul.f32 %v4444_v40, %v6600_v56 }
0x2272   : > { %v4446_v14 = vsub.f32 %v4441_v59, %v4445_v3  ;;  %v5193_v59 = vld [vmem:[%s7622_s26] ss:$0 sm:$0xff] }
0x2274   : > { %v4447_v20 = vmul.f32 %v4446_v14, %v4446_v14 }
0x2276   : > { %v4448_v63 = vsel %vm769_vm2, %v4447_v20, 0.0 }
0x2277   : > { %4449 = vadd.xlane.f32.xlu1 %v4448_v63 }
0x22ea   : > { %v4450_v25 = vpop.xlane.xlu1 %4449 }
0x22eb   : > { %v4451_v49 = vmul.f32 %v4450_v25, %v6600_v56  ;;  %v5188_v56 = vld [vmem:[%s7575_s6 + $0x2] ss:$0 sm:$0xff] }
0x22ed   : > { %v4452_v37 = vadd.f32 1e-05, %v4451_v49 }
0x22ef   : > { %5432 = vrsqrt.f32 %v4452_v37  ;;  %vm4459_vm8 = vweird.f32 %v4452_v37 }
0x22f5   : > { %v5433_v44 = vpop.eup %5432 }
0x22f6   : > { %v4454_v34 = vmul.f32 %v5433_v44, %v4452_v37  ;;  %vm4460_vm7 = vweird.f32 %v5433_v44 }
0x22f7   : > { %vm4461_vm9 = vmor %vm4459_vm8, %vm4460_vm7 }
0x22f8   : > { %v4455_v18 = vmul.f32 %v5433_v44, %v4454_v34 }
0x22fa   : > { %v4456_v60 = vmul.f32 0.5, %v4455_v18 }
0x22fc   : > { %v4457_v19 = vsub.f32 1.5, %v4456_v60 }
0x22fe   : > { %v4458_v1 = vmul.f32 %v5433_v44, %v4457_v19 }
0x2300   : > { %v4462_v48 = vsel %vm4461_vm9, %v5433_v44, %v4458_v1 }
0x2301   : > { %v4463_v41 = vmul.f32 %v4462_v48, %v4446_v14 }
0x2303   : > { %v4469_v8 = vmul.f32 %v5187_v30, %v4463_v41 }
0x2305   : > { %v4475_v10 = vadd.f32 %v5188_v56, %v4469_v8 }
0x2307   : > { %v4480_v21 = vpack.c.bf16 %v4475_v10, %v4475_v10 }
0x2309   : > { %4981 = vmatmul.msk.bf16.vlgmr.msra.gmra.mxu3 %vm769_vm2, %v4480_v21  ;;  %4987 = vmatmul.msk.bf16.vlgmr.msra.gmra.mxu2 %vm769_vm2, %v4480_v21 }
0x238c   : > { %v4499_v62 = vpop.f32.mrf.mxu3  ;;  %v4613_v7 = vpop.f32.mrf.mxu2 }
0x238d   : > { %v4500_v5 = vadd.f32 %v5189_v6, %v4499_v62  ;;  %v4614_v17 = vadd.f32 %v5190_v53, %v4613_v7 }
0x238f   : > { %v4503_v39 = vmax.f32 %v4500_v5, 0.0  ;;  %4618 = vst.msk [vmem:[%s666_s5] sm:$0xff] %vm4617_vm11, %v4614_v17 }
0x2391   : > { %v4509_v16 = vpack.c.bf16 %v4503_v39, %v4503_v39 }
0x2393   : > { %4983 = vmatmul.msk.bf16.vlgmr.msrb.gmra.mxu0 %vm769_vm2, %v4509_v16 }
0x2394   : > { %v4501_v50 = vpop.f32.mrf.mxu3  ;;  %v4615_v42 = vpop.f32.mrf.mxu2 }
0x2410   : > { %v4529_v46 = vpop.f32.mrf.mxu0 }
0x2411   : > { %v4530_v55 = vadd.f32 %v5191_v52, %v4529_v46 }
0x2413   : > { %v4533_v26 = vmax.f32 %v4530_v55, 0.0 }
0x2415   : > { %v4538_v61 = vpack.c.bf16 %v4533_v26, %v4533_v26 }
0x2417   : > { %4984 = vmatmul.msk.bf16.vlgmr.msrb.gmra.mxu1 %vm769_vm2, %v4538_v61 }
0x2418   : > { %v4531_v32 = vpop.f32.mrf.mxu0 }
0x2494   : > { %v4557_v4 = vpop.f32.mrf.mxu1 }
0x2495   : > { %v4558_v40 = vadd.f32 %v5193_v59, %v4557_v4 }
0x2497   : > { %v4985_v3 = vmul.f32 -1.442695, %v4558_v40 }
0x2499   : > { %5434 = vpow2.f32 %v4985_v3 }
0x249c   : > { %v4559_v14 = vpop.f32.mrf.mxu1 }
0x249f   : > { %v5435_v20 = vpop.eup %5434 }
0x24a0   : > { %v4564_v63 = vadd.f32 1.0, %v5435_v20 }
0x24a2   : > { %5436 = vrcp.f32 %v4564_v63  ;;  %v4576_v43 = vand.u32 2147483648, %v4564_v63  ;;  %v4574_v54 = vand.u32 2147483647, %v4564_v63  ;;  %vm4570_vm12 = vweird.f32 %v4564_v63 }
0x24a4   : > { %v4577_v36 = vor.u32 1.1754944e-38, %v4576_v43  ;;  %vm4575_vm10 = vcmp.eq.f32.partialorder %v4574_v54, 8.507059e+37 }
0x24a8   : > { %v5437_v24 = vpop.eup %5436 }
0x24a9   : > { %v4566_v57 = vmul.f32 %v5437_v24, %v4564_v63  ;;  %vm4571_vm2 = vweird.f32 %v5437_v24 }
0x24aa   : > { %vm4572_vm13 = vmor %vm4570_vm12, %vm4571_vm2 }
0x24ab   : > { %v4567_v47 = vsub.f32 1.0, %v4566_v57 }
0x24ad   : > { %v4568_v29 = vmul.f32 %v5437_v24, %v4567_v47 }
0x24af   : > { %v4569_v58 = vadd.f32 %v5437_v24, %v4568_v29 }
0x24b1   : > { %v4573_v45 = vsel %vm4572_vm13, %v5437_v24, %v4569_v58 }
0x24b2   : > { %v4578_v22 = vsel %vm4575_vm10, %v4577_v36, %v4573_v45 }
0x24b3   : > { %v4580_v33 = vmul.f32 1.25, %v4578_v22 }
0x24b5   : > { %v4986_v25 = vadd.f32 -0.625, %v4580_v33 }
0x24b7   : > { %v4587_v49 = vmul.f32 %v4986_v25, %v4585_v9 }
0x24b9   : > { %v4589_v37 = vadd.f32 %v5192_v15, %v4587_v49 }
0x24bb   : > { %v4590_v44 = vmax.f32 %v4589_v37, 0.0 }
0x24bd   : > { %v4591_v34 = vmin.f32 %v4590_v44, 1.0 }
0x24bf   : > { %4593 = vst.msk [vmem:[%s662_s30] sm:$0xff] %vm4592_vm14, %v4591_v34 }
0x24c0 PF: > { %s7624_s29 = smov %s5822_s21  ;;  %p29_p1 = scmp.ge.s32.totalorder %s5822_s21, 4  }
0x24c1   : > { %s7625_s21 = smov %s5632_s22  ;;  %s7626_s22 = smov %s5636_s23 }
0x24c2   : > { %s7627_s23 = smov %s5832_s7  ;;  %s7628_s24 = smov %s7624_s29 }
0x24c3   :  { %31 = sbr.rel (!%p29_p1) target bundleno = 13 (0xd), region = 221 }
0x24c8   :  { %4652 = vsyncpa [#allocation3], 1 }
0x24c9   :  { %4654 = vsyncpa [#allocation3 + $0x1], 1 }
0x24ca   :  { %4655 = vsyncpa [#allocation5], 1 }
0x24cb   :  { %4656 = vsyncpa [#allocation8], 1 }

</bundles_post_ra>
